<compile_context>
chip_gen: v5e
topology: v5e:2x2
jax: 0.10.0
libtpu: 0.0.40
codegen_flags: <defaults>
</compile_context>

<pallas_src>
import jax
import jax.numpy as jnp
from jax import lax
from jax.experimental import pallas as pl
from jax.experimental.pallas import tpu as pltpu

EPS = 1e-5
CONV_DIM = 64


# ------------------------------ fused kernel -------------------------------

def _fused_kernel(p_ref, w1_ref, b1_ref,
                  w2_ref, b2_ref, g2_ref, t2_ref,
                  w3_ref, b3_ref, g3_ref, t3_ref,
                  w4_ref, b4_ref, g4_ref, t4_ref,
                  w5_ref, b5_ref,
                  o_ref,
                  a1_scr, z2_scr, a2_scr, z3_scr, a3_scr, z4_scr):
    f32 = jnp.float32
    bf16 = jnp.bfloat16
    bt = o_ref.shape[2]                       # samples handled by this step

    def inorm(z, g_ref, t_ref):
        # per-sample InstanceNorm: training-mode stats, biased var, two-pass.
        mu = jnp.mean(z, axis=0, keepdims=True)
        d = z - mu
        var = jnp.mean(d * d, axis=0, keepdims=True)
        return g_ref[...] * (d * lax.rsqrt(var + EPS)) + t_ref[...]

    # ---- conv1 (k=[1,12], s=[1,12]) as block-diag wide matmul + LeakyReLU --
    # p rows (per sample): r3*56 + h3*7 + w ; columns: r2*36 + kw*3 + cin
    # output columns: r2*64 + c1  == conv2's wide-K layout (no relayout).
    z1 = jnp.dot(p_ref[...], w1_ref[...], preferred_element_type=f32)
    z1 = z1 + b1_ref[...]
    a1_scr[...] = jnp.where(z1 >= 0, z1, 0.01 * z1).astype(bf16)

    # ---- conv2 (k=[4,1], s=[4,1]): one (Bt*112,256)@(256,128) matmul -------
    z2_scr[...] = (jnp.dot(a1_scr[...], w2_ref[...],
                           preferred_element_type=f32) + b2_ref[...])

    # per-sample IN + ReLU, then relayout rows -> lane blocks for conv3 K=256
    for s in range(bt):
        a = jnp.maximum(inorm(z2_scr[s * 112:(s + 1) * 112, :],
                              g2_ref, t2_ref), 0.0)          # (112,128) f32
        # z2 rows: r3*56 + (h3*7 + w)  ->  a2 row h3*7 + w, column block r3
        a2_scr[s * 56:(s + 1) * 56, 0:128] = a[0:56, :].astype(bf16)
        a2_scr[s * 56:(s + 1) * 56, 128:256] = a[56:112, :].astype(bf16)

    # ---- conv3 (k=[2,1], s=[2,1]): one (Bt*56,256)@(256,256) matmul --------
    z3_scr[...] = (jnp.dot(a2_scr[...], w3_ref[...],
                           preferred_element_type=f32) + b3_ref[...])

    # per-sample IN + ReLU, then relayout for conv4's wide K = 8*256 = 2048.
    a3_scr[...] = jnp.zeros_like(a3_scr)      # keep the 8th (pad) row benign
    for s in range(bt):
        a = jnp.maximum(inorm(z3_scr[s * 56:(s + 1) * 56, :],
                              g3_ref, t3_ref), 0.0)          # (56,256) f32
        # z3 rows: h3*7 + w  ->  a3 row (per sample) w, column block h3
        for h3 in range(8):
            a3_scr[s * 8:s * 8 + 7, h3 * 256:(h3 + 1) * 256] = (
                a[h3 * 7:(h3 + 1) * 7, :].astype(bf16))

    # ---- conv4 (k=[8,1], s=[8,1]): one (Bt*8,2048)@(2048,512) matmul -------
    z4_scr[...] = (jnp.dot(a3_scr[...], w4_ref[...],
                           preferred_element_type=f32) + b4_ref[...])

    # ---- per-sample IN + ReLU + conv5 head (k=[1,7]) -----------------------
    cols = []
    for s in range(bt):
        a4 = jnp.maximum(inorm(z4_scr[s * 8:s * 8 + 7, :],
                               g4_ref, t4_ref), 0.0)         # (7,512) f32
        prod = a4[None, :, :] * w5_ref[...]                  # (4,7,512) f32
        cols.append(jnp.sum(jnp.sum(prod, axis=-1), axis=-1, keepdims=True))
    y = jnp.concatenate(cols, axis=1) + b5_ref[...]          # (4, Bt)
    o_ref[0] = y.astype(o_ref.dtype)


# ------------------------------- JAX wrapper --------------------------------

def _pick_bt(batch):
    divs = [d for d in range(1, min(batch, 8) + 1) if batch % d == 0]
    two_step = [d for d in divs if batch // d >= 2]
    return max(two_step) if two_step else max(divs)


def domain_classifier_forward(x, params, bt=None):
    B, C, H, W = x.shape
    assert (C, H, W) == (3, 64, 84), "DomainClassifier expects (B, 3, 64, 84)"
    if bt is None:
        bt = _pick_bt(B)
    assert B % bt == 0
    nsteps = B // bt

    # host-side im2col for the block-diagonal conv1:
    #   per-sample row = r3*56 + h3*7 + w   (h = 8*h3 + 4*r3 + r2)
    #   column         = r2*36 + kw*3 + cin (wcol = 12*w + kw)
    xh = jnp.transpose(x, (0, 2, 3, 1))               # (B, 64, 84, 3)
    xh = xh.reshape(B, 8, 2, 4, 7, 12, 3)             # (b, h3, r3, r2, w, kw, ci)
    xh = jnp.transpose(xh, (0, 2, 1, 4, 3, 5, 6))     # (b, r3, h3, w, r2, kw, ci)
    p = xh.reshape(B * 112, 144).astype(jnp.bfloat16)

    c2 = lambda i: (0, 0)
    c3 = lambda i: (0, 0, 0)

    out = pl.pallas_call(
        _fused_kernel,
        out_shape=jax.ShapeDtypeStruct((nsteps, 4, bt), jnp.float32),
        grid=(nsteps,),
        in_specs=[
            pl.BlockSpec((bt * 112, 144), lambda i: (i, 0)),   # conv1 patches
            pl.BlockSpec((144, 256), c2),                      # w1 (block-diag x4)
            pl.BlockSpec((1, 256), c2),                        # b1 (tiled x4)
            pl.BlockSpec((256, 128), c2),                      # w2 (kh*cin, cout)
            pl.BlockSpec((1, 128), c2),                        # b2
            pl.BlockSpec((1, 128), c2),                        # gamma2
            pl.BlockSpec((1, 128), c2),                        # beta2
            pl.BlockSpec((256, 256), c2),                      # w3
            pl.BlockSpec((1, 256), c2),                        # b3
            pl.BlockSpec((1, 256), c2),                        # gamma3
            pl.BlockSpec((1, 256), c2),                        # beta3
            pl.BlockSpec((2048, 512), c2),                     # w4
            pl.BlockSpec((1, 512), c2),                        # b4
            pl.BlockSpec((1, 512), c2),                        # gamma4
            pl.BlockSpec((1, 512), c2),                        # beta4
            pl.BlockSpec((4, 7, 512), c3),                     # w5 (cout, kw, cin) f32
            pl.BlockSpec((4, 1), c2),                          # b5
        ],
        out_specs=pl.BlockSpec((1, 4, bt), lambda i: (i, 0, 0)),
        scratch_shapes=[
            pltpu.VMEM((bt * 112, 256), jnp.bfloat16),  # a1 (conv2-wide)
            pltpu.VMEM((bt * 112, 128), jnp.float32),   # z2 (pre-IN)
            pltpu.VMEM((bt * 56, 256), jnp.bfloat16),   # a2 (conv3-wide)
            pltpu.VMEM((bt * 56, 256), jnp.float32),    # z3 (pre-IN)
            pltpu.VMEM((bt * 8, 2048), jnp.bfloat16),   # a3 (conv4-wide, row-padded)
            pltpu.VMEM((bt * 8, 512), jnp.float32),     # z4 (pre-IN, row-padded)
        ],
        compiler_params=pltpu.CompilerParams(
            dimension_semantics=("parallel",)),
    )(p,
      params["w1"], params["b1"],
      params["w2"], params["b2"], params["g2"], params["beta2"],
      params["w3"], params["b3"], params["g3"], params["beta3"],
      params["w4"], params["b4"], params["g4"], params["beta4"],
      params["w5"], params["b5"])

    return jnp.transpose(out, (0, 2, 1)).reshape(B, 4)


def init_params(key, conv_dim=CONV_DIM):
    assert conv_dim == 64, "kernel layout constants assume conv_dim=64"
    cfgs = [
        ("1", 3, conv_dim, 1, 12),
        ("2", conv_dim, conv_dim * 2, 4, 1),
        ("3", conv_dim * 2, conv_dim * 4, 2, 1),
        ("4", conv_dim * 4, conv_dim * 8, 8, 1),
        ("5", conv_dim * 8, 4, 1, 7),
    ]
    params = {}
    for name, cin, cout, kh, kw in cfgs:
        key, k1, k2 = jax.random.split(key, 3)
        w_oihw = jax.random.normal(k1, (cout, cin, kh, kw), jnp.float32) * 0.05
        b = jax.random.normal(k2, (cout,), jnp.float32) * 0.01
        params["w" + name + "_oihw"] = w_oihw       # f32 copies for the reference
        params["b" + name + "_vec"] = b
        if name == "1":
            # (kw*cin, cout) with K ordered (kw, cin); block-diagonal over r2.
            w1m = jnp.transpose(w_oihw[:, :, 0, :], (2, 1, 0)).reshape(kw * cin, cout)
            params["w1"] = jnp.kron(jnp.eye(4, dtype=jnp.float32),
                                    w1m).astype(jnp.bfloat16)     # (144, 256)
            params["b1"] = jnp.tile(b, 4).reshape(1, 4 * cout)
        elif name == "5":
            # (cout, kw, cin) f32:  y[o] = sum_{w,c} a4[w,c] * w5[o,w,c]
            params["w5"] = jnp.transpose(w_oihw[:, :, 0, :], (0, 2, 1))
            params["b5"] = b.reshape(cout, 1)
        else:
            # wide-K layout (kh*cin, cout), K ordered (kh, cin)
            params["w" + name] = (jnp.transpose(w_oihw[:, :, :, 0], (2, 1, 0))
                                  .reshape(kh * cin, cout).astype(jnp.bfloat16))
            params["b" + name] = b.reshape(1, cout)
            # InstanceNorm2d affine params: PyTorch init weight=1, bias=0
            params["g" + name] = jnp.ones((1, cout), jnp.float32)
            params["beta" + name] = jnp.zeros((1, cout), jnp.float32)
    return params


# ------------------------- pure-JAX reference check -------------------------

def reference_forward(x, params):
    def conv(x, w, b, sh, sw):
        y = lax.conv_general_dilated(
            x, w, (sh, sw), "VALID",
            dimension_numbers=("NCHW", "OIHW", "NCHW"))
        return y + b.reshape(1, -1, 1, 1)

    def inorm(x, g, bt):
        m = jnp.mean(x, axis=(2, 3), keepdims=True)
        v = jnp.mean(jnp.square(x - m), axis=(2, 3), keepdims=True)
        return (g.reshape(1, -1, 1, 1) * (x - m) * lax.rsqrt(v + EPS)
                + bt.reshape(1, -1, 1, 1))

    y = conv(x, params["w1_oihw"], params["b1_vec"], 1, 12)
    y = jnp.where(y >= 0, y, 0.01 * y)
    for i, kh in zip((2, 3, 4), (4, 2, 8)):
        y = conv(y, params[f"w{i}_oihw"], params[f"b{i}_vec"], kh, 1)
        y = jnp.maximum(inorm(y, params[f"g{i}"], params[f"beta{i}"]), 0.0)
    y = conv(y, params["w5_oihw"], params["b5_vec"], 1, 7)
    return y.reshape(y.shape[0], y.shape[1])


if __name__ == "__main__":
    key = jax.random.PRNGKey(0)
    kx, kp = jax.random.split(key)
    # Smallest input the architecture supports for the final view(B, C):
    # H must be 4*2*8 = 64, W must be 12*7 = 84.  B=4 -> Bt=2, 2 grid steps.
    x = jax.random.normal(kx, (4, 3, 64, 84), jnp.float32)
    params = init_params(kp)

    fwd = jax.jit(domain_classifier_forward)
    out = jax.block_until_ready(fwd(x, params))

    ref = reference_forward(x, params)
    assert out.shape == (4, 4), out.shape
    # bf16 MXU operands / bf16 activation scratch -> loosened tolerance vs f32
    assert jnp.allclose(out, ref, atol=2e-1, rtol=5e-2), (out, ref)
    print("KERNEL_OK")
</pallas_src>

<mosaic_0001>
module attributes {stable_mosaic.version = 11 : i64} {
  func.func @_fused_kernel(%arg0: i32, %arg1: memref<224x144xbf16, #tpu.memory_space<vmem>>, %arg2: memref<144x256xbf16, #tpu.memory_space<vmem>>, %arg3: memref<1x256xf32, #tpu.memory_space<vmem>>, %arg4: memref<256x128xbf16, #tpu.memory_space<vmem>>, %arg5: memref<1x128xf32, #tpu.memory_space<vmem>>, %arg6: memref<1x128xf32, #tpu.memory_space<vmem>>, %arg7: memref<1x128xf32, #tpu.memory_space<vmem>>, %arg8: memref<256x256xbf16, #tpu.memory_space<vmem>>, %arg9: memref<1x256xf32, #tpu.memory_space<vmem>>, %arg10: memref<1x256xf32, #tpu.memory_space<vmem>>, %arg11: memref<1x256xf32, #tpu.memory_space<vmem>>, %arg12: memref<2048x512xbf16, #tpu.memory_space<vmem>>, %arg13: memref<1x512xf32, #tpu.memory_space<vmem>>, %arg14: memref<1x512xf32, #tpu.memory_space<vmem>>, %arg15: memref<1x512xf32, #tpu.memory_space<vmem>>, %arg16: memref<4x7x512xf32, #tpu.memory_space<vmem>>, %arg17: memref<4x1xf32, #tpu.memory_space<vmem>>, %arg18: memref<1x4x2xf32, #tpu.memory_space<vmem>>, %arg19: memref<224x256xbf16, #tpu.memory_space<vmem>>, %arg20: memref<224x128xf32, #tpu.memory_space<vmem>>, %arg21: memref<112x256xbf16, #tpu.memory_space<vmem>>, %arg22: memref<112x256xf32, #tpu.memory_space<vmem>>, %arg23: memref<16x2048xbf16, #tpu.memory_space<vmem>>, %arg24: memref<16x512xf32, #tpu.memory_space<vmem>>) attributes {dimension_semantics = [#tpu.dimension_semantics<parallel>], iteration_bounds = array<i64: 2>, scalar_prefetch = 0 : i64, scratch_operands = 6 : i64, tpu.core_type = #tpu.core_type<tc>, window_params = [{transform_indices = @transform_0, window_bounds = array<i64: 224, 144>}, {pipeline_mode = #tpu.pipeline_mode<synchronous>, transform_indices = @transform_1, window_bounds = array<i64: 144, 256>}, {pipeline_mode = #tpu.pipeline_mode<synchronous>, transform_indices = @transform_2, window_bounds = array<i64: 1, 256>}, {pipeline_mode = #tpu.pipeline_mode<synchronous>, transform_indices = @transform_3, window_bounds = array<i64: 256, 128>}, {pipeline_mode = #tpu.pipeline_mode<synchronous>, transform_indices = @transform_4, window_bounds = array<i64: 1, 128>}, {pipeline_mode = #tpu.pipeline_mode<synchronous>, transform_indices = @transform_5, window_bounds = array<i64: 1, 128>}, {pipeline_mode = #tpu.pipeline_mode<synchronous>, transform_indices = @transform_6, window_bounds = array<i64: 1, 128>}, {pipeline_mode = #tpu.pipeline_mode<synchronous>, transform_indices = @transform_7, window_bounds = array<i64: 256, 256>}, {pipeline_mode = #tpu.pipeline_mode<synchronous>, transform_indices = @transform_8, window_bounds = array<i64: 1, 256>}, {pipeline_mode = #tpu.pipeline_mode<synchronous>, transform_indices = @transform_9, window_bounds = array<i64: 1, 256>}, {pipeline_mode = #tpu.pipeline_mode<synchronous>, transform_indices = @transform_10, window_bounds = array<i64: 1, 256>}, {pipeline_mode = #tpu.pipeline_mode<synchronous>, transform_indices = @transform_11, window_bounds = array<i64: 2048, 512>}, {pipeline_mode = #tpu.pipeline_mode<synchronous>, transform_indices = @transform_12, window_bounds = array<i64: 1, 512>}, {pipeline_mode = #tpu.pipeline_mode<synchronous>, transform_indices = @transform_13, window_bounds = array<i64: 1, 512>}, {pipeline_mode = #tpu.pipeline_mode<synchronous>, transform_indices = @transform_14, window_bounds = array<i64: 1, 512>}, {pipeline_mode = #tpu.pipeline_mode<synchronous>, transform_indices = @transform_15, window_bounds = array<i64: 4, 7, 512>}, {pipeline_mode = #tpu.pipeline_mode<synchronous>, transform_indices = @transform_16, window_bounds = array<i64: 4, 1>}, {transform_indices = @transform_17, window_bounds = array<i64: 1, 4, 2>}]} {
    %c0 = arith.constant 0 : index
    %c0_0 = arith.constant 0 : index
    %0 = vector.load %arg1[%c0, %c0_0] : memref<224x144xbf16, #tpu.memory_space<vmem>>, vector<224x144xbf16>
    %c0_1 = arith.constant 0 : index
    %c0_2 = arith.constant 0 : index
    %1 = vector.load %arg2[%c0_1, %c0_2] : memref<144x256xbf16, #tpu.memory_space<vmem>>, vector<144x256xbf16>
    %cst = arith.constant dense<0.000000e+00> : vector<224x256xf32>
    %2 = tpu.matmul %0, %1, %cst {dimension_numbers = #tpu.dot_dimension_numbers<[1], [0], [0], [1], [0, 0, 1, 1], [], []>} : vector<224x144xbf16>, vector<144x256xbf16>, vector<224x256xf32> -> vector<224x256xf32>
    %c0_3 = arith.constant 0 : index
    %c0_4 = arith.constant 0 : index
    %3 = vector.load %arg3[%c0_3, %c0_4] : memref<1x256xf32, #tpu.memory_space<vmem>>, vector<1x256xf32>
    %4 = vector.broadcast %3 : vector<1x256xf32> to vector<224x256xf32>
    %5 = arith.addf %2, %4 : vector<224x256xf32>
    %cst_5 = arith.constant 0.000000e+00 : f32
    %6 = vector.broadcast %cst_5 : f32 to vector<224x256xf32>
    %7 = arith.cmpf oge, %5, %6 : vector<224x256xf32>
    %cst_6 = arith.constant 0.00999999977 : f32
    %8 = vector.broadcast %cst_6 : f32 to vector<224x256xf32>
    %9 = arith.mulf %8, %5 : vector<224x256xf32>
    %10 = arith.select %7, %5, %9 : vector<224x256xi1>, vector<224x256xf32>
    %11 = arith.truncf %10 : vector<224x256xf32> to vector<224x256xbf16>
    %c0_7 = arith.constant 0 : index
    %c0_8 = arith.constant 0 : index
    %12 = vector.load %arg19[%c0_7, %c0_8] : memref<224x256xbf16, #tpu.memory_space<vmem>>, vector<224x256xbf16>
    tpu.vector_store %arg19[%c0_7, %c0_8], %11 {strides = array<i32>} : memref<224x256xbf16, #tpu.memory_space<vmem>>, vector<224x256xbf16>,
    %c0_9 = arith.constant 0 : index
    %c0_10 = arith.constant 0 : index
    %13 = vector.load %arg19[%c0_9, %c0_10] : memref<224x256xbf16, #tpu.memory_space<vmem>>, vector<224x256xbf16>
    %c0_11 = arith.constant 0 : index
    %c0_12 = arith.constant 0 : index
    %14 = vector.load %arg4[%c0_11, %c0_12] : memref<256x128xbf16, #tpu.memory_space<vmem>>, vector<256x128xbf16>
    %cst_13 = arith.constant dense<0.000000e+00> : vector<224x128xf32>
    %15 = tpu.matmul %13, %14, %cst_13 {dimension_numbers = #tpu.dot_dimension_numbers<[1], [0], [0], [1], [0, 0, 1, 1], [], []>} : vector<224x256xbf16>, vector<256x128xbf16>, vector<224x128xf32> -> vector<224x128xf32>
    %c0_14 = arith.constant 0 : index
    %c0_15 = arith.constant 0 : index
    %16 = vector.load %arg5[%c0_14, %c0_15] : memref<1x128xf32, #tpu.memory_space<vmem>>, vector<1x128xf32>
    %17 = vector.broadcast %16 : vector<1x128xf32> to vector<224x128xf32>
    %18 = arith.addf %15, %17 : vector<224x128xf32>
    %c0_16 = arith.constant 0 : index
    %c0_17 = arith.constant 0 : index
    %19 = vector.load %arg20[%c0_16, %c0_17] : memref<224x128xf32, #tpu.memory_space<vmem>>, vector<224x128xf32>
    tpu.vector_store %arg20[%c0_16, %c0_17], %18 {strides = array<i32>} : memref<224x128xf32, #tpu.memory_space<vmem>>, vector<224x128xf32>,
    %c0_18 = arith.constant 0 : index
    %c0_19 = arith.constant 0 : index
    %20 = vector.load %arg20[%c0_18, %c0_19] : memref<224x128xf32, #tpu.memory_space<vmem>>, vector<112x128xf32>
    %cst_20 = arith.constant dense<0.000000e+00> : vector<128xf32>
    %21 = vector.multi_reduction <add>, %20, %cst_20 [0] : vector<112x128xf32> to vector<128xf32>
    %22 = vector.shape_cast %21 : vector<128xf32> to vector<1x128xf32>
    %cst_21 = arith.constant 1.120000e+02 : f32
    %23 = vector.broadcast %cst_21 : f32 to vector<1x128xf32>
    %24 = arith.divf %22, %23 : vector<1x128xf32>
    %25 = vector.broadcast %24 : vector<1x128xf32> to vector<112x128xf32>
    %26 = arith.subf %20, %25 : vector<112x128xf32>
    %27 = arith.mulf %26, %26 : vector<112x128xf32>
    %cst_22 = arith.constant dense<0.000000e+00> : vector<128xf32>
    %28 = vector.multi_reduction <add>, %27, %cst_22 [0] : vector<112x128xf32> to vector<128xf32>
    %29 = vector.shape_cast %28 : vector<128xf32> to vector<1x128xf32>
    %cst_23 = arith.constant 1.120000e+02 : f32
    %30 = vector.broadcast %cst_23 : f32 to vector<1x128xf32>
    %31 = arith.divf %29, %30 : vector<1x128xf32>
    %c0_24 = arith.constant 0 : index
    %c0_25 = arith.constant 0 : index
    %32 = vector.load %arg6[%c0_24, %c0_25] : memref<1x128xf32, #tpu.memory_space<vmem>>, vector<1x128xf32>
    %cst_26 = arith.constant 9.99999974E-6 : f32
    %33 = vector.broadcast %cst_26 : f32 to vector<1x128xf32>
    %34 = arith.addf %31, %33 : vector<1x128xf32>
    %35 = math.rsqrt %34 : vector<1x128xf32>
    %36 = vector.broadcast %35 : vector<1x128xf32> to vector<112x128xf32>
    %37 = arith.mulf %26, %36 : vector<112x128xf32>
    %38 = vector.broadcast %32 : vector<1x128xf32> to vector<112x128xf32>
    %39 = arith.mulf %38, %37 : vector<112x128xf32>
    %c0_27 = arith.constant 0 : index
    %c0_28 = arith.constant 0 : index
    %40 = vector.load %arg7[%c0_27, %c0_28] : memref<1x128xf32, #tpu.memory_space<vmem>>, vector<1x128xf32>
    %41 = vector.broadcast %40 : vector<1x128xf32> to vector<112x128xf32>
    %42 = arith.addf %39, %41 : vector<112x128xf32>
    %cst_29 = arith.constant 0.000000e+00 : f32
    %43 = vector.broadcast %cst_29 : f32 to vector<112x128xf32>
    %44 = arith.maximumf %42, %43 : vector<112x128xf32>
    %45 = vector.extract_strided_slice %44 {offsets = [0, 0], sizes = [56, 128], strides = [1, 1]} : vector<112x128xf32> to vector<56x128xf32>
    %46 = arith.truncf %45 : vector<56x128xf32> to vector<56x128xbf16>
    %c0_30 = arith.constant 0 : index
    %c0_31 = arith.constant 0 : index
    %47 = vector.load %arg21[%c0_30, %c0_31] : memref<112x256xbf16, #tpu.memory_space<vmem>>, vector<56x128xbf16>
    tpu.vector_store %arg21[%c0_30, %c0_31], %46 {strides = array<i32>} : memref<112x256xbf16, #tpu.memory_space<vmem>>, vector<56x128xbf16>,
    %48 = vector.extract_strided_slice %44 {offsets = [56, 0], sizes = [56, 128], strides = [1, 1]} : vector<112x128xf32> to vector<56x128xf32>
    %49 = arith.truncf %48 : vector<56x128xf32> to vector<56x128xbf16>
    %c0_32 = arith.constant 0 : index
    %c128 = arith.constant 128 : index
    %50 = vector.load %arg21[%c0_32, %c128] : memref<112x256xbf16, #tpu.memory_space<vmem>>, vector<56x128xbf16>
    tpu.vector_store %arg21[%c0_32, %c128], %49 {strides = array<i32>} : memref<112x256xbf16, #tpu.memory_space<vmem>>, vector<56x128xbf16>,
    %c112 = arith.constant 112 : index
    %c0_33 = arith.constant 0 : index
    %51 = vector.load %arg20[%c112, %c0_33] : memref<224x128xf32, #tpu.memory_space<vmem>>, vector<112x128xf32>
    %cst_34 = arith.constant dense<0.000000e+00> : vector<128xf32>
    %52 = vector.multi_reduction <add>, %51, %cst_34 [0] : vector<112x128xf32> to vector<128xf32>
    %53 = vector.shape_cast %52 : vector<128xf32> to vector<1x128xf32>
    %cst_35 = arith.constant 1.120000e+02 : f32
    %54 = vector.broadcast %cst_35 : f32 to vector<1x128xf32>
    %55 = arith.divf %53, %54 : vector<1x128xf32>
    %56 = vector.broadcast %55 : vector<1x128xf32> to vector<112x128xf32>
    %57 = arith.subf %51, %56 : vector<112x128xf32>
    %58 = arith.mulf %57, %57 : vector<112x128xf32>
    %cst_36 = arith.constant dense<0.000000e+00> : vector<128xf32>
    %59 = vector.multi_reduction <add>, %58, %cst_36 [0] : vector<112x128xf32> to vector<128xf32>
    %60 = vector.shape_cast %59 : vector<128xf32> to vector<1x128xf32>
    %cst_37 = arith.constant 1.120000e+02 : f32
    %61 = vector.broadcast %cst_37 : f32 to vector<1x128xf32>
    %62 = arith.divf %60, %61 : vector<1x128xf32>
    %c0_38 = arith.constant 0 : index
    %c0_39 = arith.constant 0 : index
    %63 = vector.load %arg6[%c0_38, %c0_39] : memref<1x128xf32, #tpu.memory_space<vmem>>, vector<1x128xf32>
    %cst_40 = arith.constant 9.99999974E-6 : f32
    %64 = vector.broadcast %cst_40 : f32 to vector<1x128xf32>
    %65 = arith.addf %62, %64 : vector<1x128xf32>
    %66 = math.rsqrt %65 : vector<1x128xf32>
    %67 = vector.broadcast %66 : vector<1x128xf32> to vector<112x128xf32>
    %68 = arith.mulf %57, %67 : vector<112x128xf32>
    %69 = vector.broadcast %63 : vector<1x128xf32> to vector<112x128xf32>
    %70 = arith.mulf %69, %68 : vector<112x128xf32>
    %c0_41 = arith.constant 0 : index
    %c0_42 = arith.constant 0 : index
    %71 = vector.load %arg7[%c0_41, %c0_42] : memref<1x128xf32, #tpu.memory_space<vmem>>, vector<1x128xf32>
    %72 = vector.broadcast %71 : vector<1x128xf32> to vector<112x128xf32>
    %73 = arith.addf %70, %72 : vector<112x128xf32>
    %cst_43 = arith.constant 0.000000e+00 : f32
    %74 = vector.broadcast %cst_43 : f32 to vector<112x128xf32>
    %75 = arith.maximumf %73, %74 : vector<112x128xf32>
    %76 = vector.extract_strided_slice %75 {offsets = [0, 0], sizes = [56, 128], strides = [1, 1]} : vector<112x128xf32> to vector<56x128xf32>
    %77 = arith.truncf %76 : vector<56x128xf32> to vector<56x128xbf16>
    %c56 = arith.constant 56 : index
    %c0_44 = arith.constant 0 : index
    %78 = vector.load %arg21[%c56, %c0_44] : memref<112x256xbf16, #tpu.memory_space<vmem>>, vector<56x128xbf16>
    tpu.vector_store %arg21[%c56, %c0_44], %77 {strides = array<i32>} : memref<112x256xbf16, #tpu.memory_space<vmem>>, vector<56x128xbf16>,
    %79 = vector.extract_strided_slice %75 {offsets = [56, 0], sizes = [56, 128], strides = [1, 1]} : vector<112x128xf32> to vector<56x128xf32>
    %80 = arith.truncf %79 : vector<56x128xf32> to vector<56x128xbf16>
    %c56_45 = arith.constant 56 : index
    %c128_46 = arith.constant 128 : index
    %81 = vector.load %arg21[%c56_45, %c128_46] : memref<112x256xbf16, #tpu.memory_space<vmem>>, vector<56x128xbf16>
    tpu.vector_store %arg21[%c56_45, %c128_46], %80 {strides = array<i32>} : memref<112x256xbf16, #tpu.memory_space<vmem>>, vector<56x128xbf16>,
    %c0_47 = arith.constant 0 : index
    %c0_48 = arith.constant 0 : index
    %82 = vector.load %arg21[%c0_47, %c0_48] : memref<112x256xbf16, #tpu.memory_space<vmem>>, vector<112x256xbf16>
    %c0_49 = arith.constant 0 : index
    %c0_50 = arith.constant 0 : index
    %83 = vector.load %arg8[%c0_49, %c0_50] : memref<256x256xbf16, #tpu.memory_space<vmem>>, vector<256x256xbf16>
    %cst_51 = arith.constant dense<0.000000e+00> : vector<112x256xf32>
    %84 = tpu.matmul %82, %83, %cst_51 {dimension_numbers = #tpu.dot_dimension_numbers<[1], [0], [0], [1], [0, 0, 1, 1], [], []>} : vector<112x256xbf16>, vector<256x256xbf16>, vector<112x256xf32> -> vector<112x256xf32>
    %c0_52 = arith.constant 0 : index
    %c0_53 = arith.constant 0 : index
    %85 = vector.load %arg9[%c0_52, %c0_53] : memref<1x256xf32, #tpu.memory_space<vmem>>, vector<1x256xf32>
    %86 = vector.broadcast %85 : vector<1x256xf32> to vector<112x256xf32>
    %87 = arith.addf %84, %86 : vector<112x256xf32>
    %c0_54 = arith.constant 0 : index
    %c0_55 = arith.constant 0 : index
    %88 = vector.load %arg22[%c0_54, %c0_55] : memref<112x256xf32, #tpu.memory_space<vmem>>, vector<112x256xf32>
    tpu.vector_store %arg22[%c0_54, %c0_55], %87 {strides = array<i32>} : memref<112x256xf32, #tpu.memory_space<vmem>>, vector<112x256xf32>,
    %cst_56 = arith.constant 0.000000e+00 : bf16
    %89 = vector.broadcast %cst_56 : bf16 to vector<16x2048xbf16>
    %c0_57 = arith.constant 0 : index
    %c0_58 = arith.constant 0 : index
    %90 = vector.load %arg23[%c0_57, %c0_58] : memref<16x2048xbf16, #tpu.memory_space<vmem>>, vector<16x2048xbf16>
    tpu.vector_store %arg23[%c0_57, %c0_58], %89 {strides = array<i32>} : memref<16x2048xbf16, #tpu.memory_space<vmem>>, vector<16x2048xbf16>,
    %c0_59 = arith.constant 0 : index
    %c0_60 = arith.constant 0 : index
    %91 = vector.load %arg22[%c0_59, %c0_60] : memref<112x256xf32, #tpu.memory_space<vmem>>, vector<56x256xf32>
    %cst_61 = arith.constant dense<0.000000e+00> : vector<256xf32>
    %92 = vector.multi_reduction <add>, %91, %cst_61 [0] : vector<56x256xf32> to vector<256xf32>
    %93 = vector.shape_cast %92 : vector<256xf32> to vector<1x256xf32>
    %cst_62 = arith.constant 5.600000e+01 : f32
    %94 = vector.broadcast %cst_62 : f32 to vector<1x256xf32>
    %95 = arith.divf %93, %94 : vector<1x256xf32>
    %96 = vector.broadcast %95 : vector<1x256xf32> to vector<56x256xf32>
    %97 = arith.subf %91, %96 : vector<56x256xf32>
    %98 = arith.mulf %97, %97 : vector<56x256xf32>
    %cst_63 = arith.constant dense<0.000000e+00> : vector<256xf32>
    %99 = vector.multi_reduction <add>, %98, %cst_63 [0] : vector<56x256xf32> to vector<256xf32>
    %100 = vector.shape_cast %99 : vector<256xf32> to vector<1x256xf32>
    %cst_64 = arith.constant 5.600000e+01 : f32
    %101 = vector.broadcast %cst_64 : f32 to vector<1x256xf32>
    %102 = arith.divf %100, %101 : vector<1x256xf32>
    %c0_65 = arith.constant 0 : index
    %c0_66 = arith.constant 0 : index
    %103 = vector.load %arg10[%c0_65, %c0_66] : memref<1x256xf32, #tpu.memory_space<vmem>>, vector<1x256xf32>
    %cst_67 = arith.constant 9.99999974E-6 : f32
    %104 = vector.broadcast %cst_67 : f32 to vector<1x256xf32>
    %105 = arith.addf %102, %104 : vector<1x256xf32>
    %106 = math.rsqrt %105 : vector<1x256xf32>
    %107 = vector.broadcast %106 : vector<1x256xf32> to vector<56x256xf32>
    %108 = arith.mulf %97, %107 : vector<56x256xf32>
    %109 = vector.broadcast %103 : vector<1x256xf32> to vector<56x256xf32>
    %110 = arith.mulf %109, %108 : vector<56x256xf32>
    %c0_68 = arith.constant 0 : index
    %c0_69 = arith.constant 0 : index
    %111 = vector.load %arg11[%c0_68, %c0_69] : memref<1x256xf32, #tpu.memory_space<vmem>>, vector<1x256xf32>
    %112 = vector.broadcast %111 : vector<1x256xf32> to vector<56x256xf32>
    %113 = arith.addf %110, %112 : vector<56x256xf32>
    %cst_70 = arith.constant 0.000000e+00 : f32
    %114 = vector.broadcast %cst_70 : f32 to vector<56x256xf32>
    %115 = arith.maximumf %113, %114 : vector<56x256xf32>
    %116 = vector.extract_strided_slice %115 {offsets = [0, 0], sizes = [7, 256], strides = [1, 1]} : vector<56x256xf32> to vector<7x256xf32>
    %117 = arith.truncf %116 : vector<7x256xf32> to vector<7x256xbf16>
    %c0_71 = arith.constant 0 : index
    %c0_72 = arith.constant 0 : index
    %118 = vector.load %arg23[%c0_71, %c0_72] : memref<16x2048xbf16, #tpu.memory_space<vmem>>, vector<7x256xbf16>
    tpu.vector_store %arg23[%c0_71, %c0_72], %117 {strides = array<i32>} : memref<16x2048xbf16, #tpu.memory_space<vmem>>, vector<7x256xbf16>,
    %119 = vector.extract_strided_slice %115 {offsets = [7, 0], sizes = [7, 256], strides = [1, 1]} : vector<56x256xf32> to vector<7x256xf32>
    %120 = arith.truncf %119 : vector<7x256xf32> to vector<7x256xbf16>
    %c0_73 = arith.constant 0 : index
    %c256 = arith.constant 256 : index
    %121 = vector.load %arg23[%c0_73, %c256] : memref<16x2048xbf16, #tpu.memory_space<vmem>>, vector<7x256xbf16>
    tpu.vector_store %arg23[%c0_73, %c256], %120 {strides = array<i32>} : memref<16x2048xbf16, #tpu.memory_space<vmem>>, vector<7x256xbf16>,
    %122 = vector.extract_strided_slice %115 {offsets = [14, 0], sizes = [7, 256], strides = [1, 1]} : vector<56x256xf32> to vector<7x256xf32>
    %123 = arith.truncf %122 : vector<7x256xf32> to vector<7x256xbf16>
    %c0_74 = arith.constant 0 : index
    %c512 = arith.constant 512 : index
    %124 = vector.load %arg23[%c0_74, %c512] : memref<16x2048xbf16, #tpu.memory_space<vmem>>, vector<7x256xbf16>
    tpu.vector_store %arg23[%c0_74, %c512], %123 {strides = array<i32>} : memref<16x2048xbf16, #tpu.memory_space<vmem>>, vector<7x256xbf16>,
    %125 = vector.extract_strided_slice %115 {offsets = [21, 0], sizes = [7, 256], strides = [1, 1]} : vector<56x256xf32> to vector<7x256xf32>
    %126 = arith.truncf %125 : vector<7x256xf32> to vector<7x256xbf16>
    %c0_75 = arith.constant 0 : index
    %c768 = arith.constant 768 : index
    %127 = vector.load %arg23[%c0_75, %c768] : memref<16x2048xbf16, #tpu.memory_space<vmem>>, vector<7x256xbf16>
    tpu.vector_store %arg23[%c0_75, %c768], %126 {strides = array<i32>} : memref<16x2048xbf16, #tpu.memory_space<vmem>>, vector<7x256xbf16>,
    %128 = vector.extract_strided_slice %115 {offsets = [28, 0], sizes = [7, 256], strides = [1, 1]} : vector<56x256xf32> to vector<7x256xf32>
    %129 = arith.truncf %128 : vector<7x256xf32> to vector<7x256xbf16>
    %c0_76 = arith.constant 0 : index
    %c1024 = arith.constant 1024 : index
    %130 = vector.load %arg23[%c0_76, %c1024] : memref<16x2048xbf16, #tpu.memory_space<vmem>>, vector<7x256xbf16>
    tpu.vector_store %arg23[%c0_76, %c1024], %129 {strides = array<i32>} : memref<16x2048xbf16, #tpu.memory_space<vmem>>, vector<7x256xbf16>,
    %131 = vector.extract_strided_slice %115 {offsets = [35, 0], sizes = [7, 256], strides = [1, 1]} : vector<56x256xf32> to vector<7x256xf32>
    %132 = arith.truncf %131 : vector<7x256xf32> to vector<7x256xbf16>
    %c0_77 = arith.constant 0 : index
    %c1280 = arith.constant 1280 : index
    %133 = vector.load %arg23[%c0_77, %c1280] : memref<16x2048xbf16, #tpu.memory_space<vmem>>, vector<7x256xbf16>
    tpu.vector_store %arg23[%c0_77, %c1280], %132 {strides = array<i32>} : memref<16x2048xbf16, #tpu.memory_space<vmem>>, vector<7x256xbf16>,
    %134 = vector.extract_strided_slice %115 {offsets = [42, 0], sizes = [7, 256], strides = [1, 1]} : vector<56x256xf32> to vector<7x256xf32>
    %135 = arith.truncf %134 : vector<7x256xf32> to vector<7x256xbf16>
    %c0_78 = arith.constant 0 : index
    %c1536 = arith.constant 1536 : index
    %136 = vector.load %arg23[%c0_78, %c1536] : memref<16x2048xbf16, #tpu.memory_space<vmem>>, vector<7x256xbf16>
    tpu.vector_store %arg23[%c0_78, %c1536], %135 {strides = array<i32>} : memref<16x2048xbf16, #tpu.memory_space<vmem>>, vector<7x256xbf16>,
    %137 = vector.extract_strided_slice %115 {offsets = [49, 0], sizes = [7, 256], strides = [1, 1]} : vector<56x256xf32> to vector<7x256xf32>
    %138 = arith.truncf %137 : vector<7x256xf32> to vector<7x256xbf16>
    %c0_79 = arith.constant 0 : index
    %c1792 = arith.constant 1792 : index
    %139 = vector.load %arg23[%c0_79, %c1792] : memref<16x2048xbf16, #tpu.memory_space<vmem>>, vector<7x256xbf16>
    tpu.vector_store %arg23[%c0_79, %c1792], %138 {strides = array<i32>} : memref<16x2048xbf16, #tpu.memory_space<vmem>>, vector<7x256xbf16>,
    %c56_80 = arith.constant 56 : index
    %c0_81 = arith.constant 0 : index
    %140 = vector.load %arg22[%c56_80, %c0_81] : memref<112x256xf32, #tpu.memory_space<vmem>>, vector<56x256xf32>
    %cst_82 = arith.constant dense<0.000000e+00> : vector<256xf32>
    %141 = vector.multi_reduction <add>, %140, %cst_82 [0] : vector<56x256xf32> to vector<256xf32>
    %142 = vector.shape_cast %141 : vector<256xf32> to vector<1x256xf32>
    %cst_83 = arith.constant 5.600000e+01 : f32
    %143 = vector.broadcast %cst_83 : f32 to vector<1x256xf32>
    %144 = arith.divf %142, %143 : vector<1x256xf32>
    %145 = vector.broadcast %144 : vector<1x256xf32> to vector<56x256xf32>
    %146 = arith.subf %140, %145 : vector<56x256xf32>
    %147 = arith.mulf %146, %146 : vector<56x256xf32>
    %cst_84 = arith.constant dense<0.000000e+00> : vector<256xf32>
    %148 = vector.multi_reduction <add>, %147, %cst_84 [0] : vector<56x256xf32> to vector<256xf32>
    %149 = vector.shape_cast %148 : vector<256xf32> to vector<1x256xf32>
    %cst_85 = arith.constant 5.600000e+01 : f32
    %150 = vector.broadcast %cst_85 : f32 to vector<1x256xf32>
    %151 = arith.divf %149, %150 : vector<1x256xf32>
    %c0_86 = arith.constant 0 : index
    %c0_87 = arith.constant 0 : index
    %152 = vector.load %arg10[%c0_86, %c0_87] : memref<1x256xf32, #tpu.memory_space<vmem>>, vector<1x256xf32>
    %cst_88 = arith.constant 9.99999974E-6 : f32
    %153 = vector.broadcast %cst_88 : f32 to vector<1x256xf32>
    %154 = arith.addf %151, %153 : vector<1x256xf32>
    %155 = math.rsqrt %154 : vector<1x256xf32>
    %156 = vector.broadcast %155 : vector<1x256xf32> to vector<56x256xf32>
    %157 = arith.mulf %146, %156 : vector<56x256xf32>
    %158 = vector.broadcast %152 : vector<1x256xf32> to vector<56x256xf32>
    %159 = arith.mulf %158, %157 : vector<56x256xf32>
    %c0_89 = arith.constant 0 : index
    %c0_90 = arith.constant 0 : index
    %160 = vector.load %arg11[%c0_89, %c0_90] : memref<1x256xf32, #tpu.memory_space<vmem>>, vector<1x256xf32>
    %161 = vector.broadcast %160 : vector<1x256xf32> to vector<56x256xf32>
    %162 = arith.addf %159, %161 : vector<56x256xf32>
    %cst_91 = arith.constant 0.000000e+00 : f32
    %163 = vector.broadcast %cst_91 : f32 to vector<56x256xf32>
    %164 = arith.maximumf %162, %163 : vector<56x256xf32>
    %165 = vector.extract_strided_slice %164 {offsets = [0, 0], sizes = [7, 256], strides = [1, 1]} : vector<56x256xf32> to vector<7x256xf32>
    %166 = arith.truncf %165 : vector<7x256xf32> to vector<7x256xbf16>
    %c8 = arith.constant 8 : index
    %c0_92 = arith.constant 0 : index
    %167 = vector.load %arg23[%c8, %c0_92] : memref<16x2048xbf16, #tpu.memory_space<vmem>>, vector<7x256xbf16>
    tpu.vector_store %arg23[%c8, %c0_92], %166 {strides = array<i32>} : memref<16x2048xbf16, #tpu.memory_space<vmem>>, vector<7x256xbf16>,
    %168 = vector.extract_strided_slice %164 {offsets = [7, 0], sizes = [7, 256], strides = [1, 1]} : vector<56x256xf32> to vector<7x256xf32>
    %169 = arith.truncf %168 : vector<7x256xf32> to vector<7x256xbf16>
    %c8_93 = arith.constant 8 : index
    %c256_94 = arith.constant 256 : index
    %170 = vector.load %arg23[%c8_93, %c256_94] : memref<16x2048xbf16, #tpu.memory_space<vmem>>, vector<7x256xbf16>
    tpu.vector_store %arg23[%c8_93, %c256_94], %169 {strides = array<i32>} : memref<16x2048xbf16, #tpu.memory_space<vmem>>, vector<7x256xbf16>,
    %171 = vector.extract_strided_slice %164 {offsets = [14, 0], sizes = [7, 256], strides = [1, 1]} : vector<56x256xf32> to vector<7x256xf32>
    %172 = arith.truncf %171 : vector<7x256xf32> to vector<7x256xbf16>
    %c8_95 = arith.constant 8 : index
    %c512_96 = arith.constant 512 : index
    %173 = vector.load %arg23[%c8_95, %c512_96] : memref<16x2048xbf16, #tpu.memory_space<vmem>>, vector<7x256xbf16>
    tpu.vector_store %arg23[%c8_95, %c512_96], %172 {strides = array<i32>} : memref<16x2048xbf16, #tpu.memory_space<vmem>>, vector<7x256xbf16>,
    %174 = vector.extract_strided_slice %164 {offsets = [21, 0], sizes = [7, 256], strides = [1, 1]} : vector<56x256xf32> to vector<7x256xf32>
    %175 = arith.truncf %174 : vector<7x256xf32> to vector<7x256xbf16>
    %c8_97 = arith.constant 8 : index
    %c768_98 = arith.constant 768 : index
    %176 = vector.load %arg23[%c8_97, %c768_98] : memref<16x2048xbf16, #tpu.memory_space<vmem>>, vector<7x256xbf16>
    tpu.vector_store %arg23[%c8_97, %c768_98], %175 {strides = array<i32>} : memref<16x2048xbf16, #tpu.memory_space<vmem>>, vector<7x256xbf16>,
    %177 = vector.extract_strided_slice %164 {offsets = [28, 0], sizes = [7, 256], strides = [1, 1]} : vector<56x256xf32> to vector<7x256xf32>
    %178 = arith.truncf %177 : vector<7x256xf32> to vector<7x256xbf16>
    %c8_99 = arith.constant 8 : index
    %c1024_100 = arith.constant 1024 : index
    %179 = vector.load %arg23[%c8_99, %c1024_100] : memref<16x2048xbf16, #tpu.memory_space<vmem>>, vector<7x256xbf16>
    tpu.vector_store %arg23[%c8_99, %c1024_100], %178 {strides = array<i32>} : memref<16x2048xbf16, #tpu.memory_space<vmem>>, vector<7x256xbf16>,
    %180 = vector.extract_strided_slice %164 {offsets = [35, 0], sizes = [7, 256], strides = [1, 1]} : vector<56x256xf32> to vector<7x256xf32>
    %181 = arith.truncf %180 : vector<7x256xf32> to vector<7x256xbf16>
    %c8_101 = arith.constant 8 : index
    %c1280_102 = arith.constant 1280 : index
    %182 = vector.load %arg23[%c8_101, %c1280_102] : memref<16x2048xbf16, #tpu.memory_space<vmem>>, vector<7x256xbf16>
    tpu.vector_store %arg23[%c8_101, %c1280_102], %181 {strides = array<i32>} : memref<16x2048xbf16, #tpu.memory_space<vmem>>, vector<7x256xbf16>,
    %183 = vector.extract_strided_slice %164 {offsets = [42, 0], sizes = [7, 256], strides = [1, 1]} : vector<56x256xf32> to vector<7x256xf32>
    %184 = arith.truncf %183 : vector<7x256xf32> to vector<7x256xbf16>
    %c8_103 = arith.constant 8 : index
    %c1536_104 = arith.constant 1536 : index
    %185 = vector.load %arg23[%c8_103, %c1536_104] : memref<16x2048xbf16, #tpu.memory_space<vmem>>, vector<7x256xbf16>
    tpu.vector_store %arg23[%c8_103, %c1536_104], %184 {strides = array<i32>} : memref<16x2048xbf16, #tpu.memory_space<vmem>>, vector<7x256xbf16>,
    %186 = vector.extract_strided_slice %164 {offsets = [49, 0], sizes = [7, 256], strides = [1, 1]} : vector<56x256xf32> to vector<7x256xf32>
    %187 = arith.truncf %186 : vector<7x256xf32> to vector<7x256xbf16>
    %c8_105 = arith.constant 8 : index
    %c1792_106 = arith.constant 1792 : index
    %188 = vector.load %arg23[%c8_105, %c1792_106] : memref<16x2048xbf16, #tpu.memory_space<vmem>>, vector<7x256xbf16>
    tpu.vector_store %arg23[%c8_105, %c1792_106], %187 {strides = array<i32>} : memref<16x2048xbf16, #tpu.memory_space<vmem>>, vector<7x256xbf16>,
    %c0_107 = arith.constant 0 : index
    %c0_108 = arith.constant 0 : index
    %189 = vector.load %arg23[%c0_107, %c0_108] : memref<16x2048xbf16, #tpu.memory_space<vmem>>, vector<16x2048xbf16>
    %c0_109 = arith.constant 0 : index
    %c0_110 = arith.constant 0 : index
    %190 = vector.load %arg12[%c0_109, %c0_110] : memref<2048x512xbf16, #tpu.memory_space<vmem>>, vector<2048x512xbf16>
    %cst_111 = arith.constant dense<0.000000e+00> : vector<16x512xf32>
    %191 = tpu.matmul %189, %190, %cst_111 {dimension_numbers = #tpu.dot_dimension_numbers<[1], [0], [0], [1], [0, 0, 1, 1], [], []>} : vector<16x2048xbf16>, vector<2048x512xbf16>, vector<16x512xf32> -> vector<16x512xf32>
    %c0_112 = arith.constant 0 : index
    %c0_113 = arith.constant 0 : index
    %192 = vector.load %arg13[%c0_112, %c0_113] : memref<1x512xf32, #tpu.memory_space<vmem>>, vector<1x512xf32>
    %193 = vector.broadcast %192 : vector<1x512xf32> to vector<16x512xf32>
    %194 = arith.addf %191, %193 : vector<16x512xf32>
    %c0_114 = arith.constant 0 : index
    %c0_115 = arith.constant 0 : index
    %195 = vector.load %arg24[%c0_114, %c0_115] : memref<16x512xf32, #tpu.memory_space<vmem>>, vector<16x512xf32>
    tpu.vector_store %arg24[%c0_114, %c0_115], %194 {strides = array<i32>} : memref<16x512xf32, #tpu.memory_space<vmem>>, vector<16x512xf32>,
    %c0_116 = arith.constant 0 : index
    %c0_117 = arith.constant 0 : index
    %196 = vector.load %arg24[%c0_116, %c0_117] : memref<16x512xf32, #tpu.memory_space<vmem>>, vector<7x512xf32>
    %cst_118 = arith.constant dense<0.000000e+00> : vector<512xf32>
    %197 = vector.multi_reduction <add>, %196, %cst_118 [0] : vector<7x512xf32> to vector<512xf32>
    %198 = vector.shape_cast %197 : vector<512xf32> to vector<1x512xf32>
    %cst_119 = arith.constant 7.000000e+00 : f32
    %199 = vector.broadcast %cst_119 : f32 to vector<1x512xf32>
    %200 = arith.divf %198, %199 : vector<1x512xf32>
    %201 = vector.broadcast %200 : vector<1x512xf32> to vector<7x512xf32>
    %202 = arith.subf %196, %201 : vector<7x512xf32>
    %203 = arith.mulf %202, %202 : vector<7x512xf32>
    %cst_120 = arith.constant dense<0.000000e+00> : vector<512xf32>
    %204 = vector.multi_reduction <add>, %203, %cst_120 [0] : vector<7x512xf32> to vector<512xf32>
    %205 = vector.shape_cast %204 : vector<512xf32> to vector<1x512xf32>
    %cst_121 = arith.constant 7.000000e+00 : f32
    %206 = vector.broadcast %cst_121 : f32 to vector<1x512xf32>
    %207 = arith.divf %205, %206 : vector<1x512xf32>
    %c0_122 = arith.constant 0 : index
    %c0_123 = arith.constant 0 : index
    %208 = vector.load %arg14[%c0_122, %c0_123] : memref<1x512xf32, #tpu.memory_space<vmem>>, vector<1x512xf32>
    %cst_124 = arith.constant 9.99999974E-6 : f32
    %209 = vector.broadcast %cst_124 : f32 to vector<1x512xf32>
    %210 = arith.addf %207, %209 : vector<1x512xf32>
    %211 = math.rsqrt %210 : vector<1x512xf32>
    %212 = vector.broadcast %211 : vector<1x512xf32> to vector<7x512xf32>
    %213 = arith.mulf %202, %212 : vector<7x512xf32>
    %214 = vector.broadcast %208 : vector<1x512xf32> to vector<7x512xf32>
    %215 = arith.mulf %214, %213 : vector<7x512xf32>
    %c0_125 = arith.constant 0 : index
    %c0_126 = arith.constant 0 : index
    %216 = vector.load %arg15[%c0_125, %c0_126] : memref<1x512xf32, #tpu.memory_space<vmem>>, vector<1x512xf32>
    %217 = vector.broadcast %216 : vector<1x512xf32> to vector<7x512xf32>
    %218 = arith.addf %215, %217 : vector<7x512xf32>
    %cst_127 = arith.constant 0.000000e+00 : f32
    %219 = vector.broadcast %cst_127 : f32 to vector<7x512xf32>
    %220 = arith.maximumf %218, %219 : vector<7x512xf32>
    %221 = vector.shape_cast %220 : vector<7x512xf32> to vector<1x7x512xf32>
    %c0_128 = arith.constant 0 : index
    %c0_129 = arith.constant 0 : index
    %c0_130 = arith.constant 0 : index
    %222 = vector.load %arg16[%c0_128, %c0_129, %c0_130] : memref<4x7x512xf32, #tpu.memory_space<vmem>>, vector<4x7x512xf32>
    %223 = vector.broadcast %221 : vector<1x7x512xf32> to vector<4x7x512xf32>
    %224 = arith.mulf %223, %222 : vector<4x7x512xf32>
    %cst_131 = arith.constant dense<0.000000e+00> : vector<4x7xf32>
    %225 = vector.multi_reduction <add>, %224, %cst_131 [2] : vector<4x7x512xf32> to vector<4x7xf32>
    %cst_132 = arith.constant dense<0.000000e+00> : vector<4xf32>
    %226 = vector.multi_reduction <add>, %225, %cst_132 [1] : vector<4x7xf32> to vector<4xf32>
    %227 = vector.shape_cast %226 : vector<4xf32> to vector<4x1xf32>
    %c8_133 = arith.constant 8 : index
    %c0_134 = arith.constant 0 : index
    %228 = vector.load %arg24[%c8_133, %c0_134] : memref<16x512xf32, #tpu.memory_space<vmem>>, vector<7x512xf32>
    %cst_135 = arith.constant dense<0.000000e+00> : vector<512xf32>
    %229 = vector.multi_reduction <add>, %228, %cst_135 [0] : vector<7x512xf32> to vector<512xf32>
    %230 = vector.shape_cast %229 : vector<512xf32> to vector<1x512xf32>
    %cst_136 = arith.constant 7.000000e+00 : f32
    %231 = vector.broadcast %cst_136 : f32 to vector<1x512xf32>
    %232 = arith.divf %230, %231 : vector<1x512xf32>
    %233 = vector.broadcast %232 : vector<1x512xf32> to vector<7x512xf32>
    %234 = arith.subf %228, %233 : vector<7x512xf32>
    %235 = arith.mulf %234, %234 : vector<7x512xf32>
    %cst_137 = arith.constant dense<0.000000e+00> : vector<512xf32>
    %236 = vector.multi_reduction <add>, %235, %cst_137 [0] : vector<7x512xf32> to vector<512xf32>
    %237 = vector.shape_cast %236 : vector<512xf32> to vector<1x512xf32>
    %cst_138 = arith.constant 7.000000e+00 : f32
    %238 = vector.broadcast %cst_138 : f32 to vector<1x512xf32>
    %239 = arith.divf %237, %238 : vector<1x512xf32>
    %c0_139 = arith.constant 0 : index
    %c0_140 = arith.constant 0 : index
    %240 = vector.load %arg14[%c0_139, %c0_140] : memref<1x512xf32, #tpu.memory_space<vmem>>, vector<1x512xf32>
    %cst_141 = arith.constant 9.99999974E-6 : f32
    %241 = vector.broadcast %cst_141 : f32 to vector<1x512xf32>
    %242 = arith.addf %239, %241 : vector<1x512xf32>
    %243 = math.rsqrt %242 : vector<1x512xf32>
    %244 = vector.broadcast %243 : vector<1x512xf32> to vector<7x512xf32>
    %245 = arith.mulf %234, %244 : vector<7x512xf32>
    %246 = vector.broadcast %240 : vector<1x512xf32> to vector<7x512xf32>
    %247 = arith.mulf %246, %245 : vector<7x512xf32>
    %c0_142 = arith.constant 0 : index
    %c0_143 = arith.constant 0 : index
    %248 = vector.load %arg15[%c0_142, %c0_143] : memref<1x512xf32, #tpu.memory_space<vmem>>, vector<1x512xf32>
    %249 = vector.broadcast %248 : vector<1x512xf32> to vector<7x512xf32>
    %250 = arith.addf %247, %249 : vector<7x512xf32>
    %cst_144 = arith.constant 0.000000e+00 : f32
    %251 = vector.broadcast %cst_144 : f32 to vector<7x512xf32>
    %252 = arith.maximumf %250, %251 : vector<7x512xf32>
    %253 = vector.shape_cast %252 : vector<7x512xf32> to vector<1x7x512xf32>
    %c0_145 = arith.constant 0 : index
    %c0_146 = arith.constant 0 : index
    %c0_147 = arith.constant 0 : index
    %254 = vector.load %arg16[%c0_145, %c0_146, %c0_147] : memref<4x7x512xf32, #tpu.memory_space<vmem>>, vector<4x7x512xf32>
    %255 = vector.broadcast %253 : vector<1x7x512xf32> to vector<4x7x512xf32>
    %256 = arith.mulf %255, %254 : vector<4x7x512xf32>
    %cst_148 = arith.constant dense<0.000000e+00> : vector<4x7xf32>
    %257 = vector.multi_reduction <add>, %256, %cst_148 [2] : vector<4x7x512xf32> to vector<4x7xf32>
    %cst_149 = arith.constant dense<0.000000e+00> : vector<4xf32>
    %258 = vector.multi_reduction <add>, %257, %cst_149 [1] : vector<4x7xf32> to vector<4xf32>
    %259 = vector.shape_cast %258 : vector<4xf32> to vector<4x1xf32>
    %260 = tpu.concatenate %227, %259 in 1 : vector<4x1xf32>, vector<4x1xf32> -> vector<4x2xf32>
    %c0_150 = arith.constant 0 : index
    %c0_151 = arith.constant 0 : index
    %261 = vector.load %arg17[%c0_150, %c0_151] : memref<4x1xf32, #tpu.memory_space<vmem>>, vector<4x1xf32>
    %262 = vector.broadcast %261 : vector<4x1xf32> to vector<4x2xf32>
    %263 = arith.addf %260, %262 : vector<4x2xf32>
    %c0_152 = arith.constant 0 : index
    %c0_153 = arith.constant 0 : index
    %c0_154 = arith.constant 0 : index
    %264 = vector.load %arg18[%c0_152, %c0_153, %c0_154] : memref<1x4x2xf32, #tpu.memory_space<vmem>>, vector<1x4x2xf32>
    %265 = vector.shape_cast %264 : vector<1x4x2xf32> to vector<4x2xf32>
    %266 = vector.shape_cast %263 : vector<4x2xf32> to vector<1x4x2xf32>
    tpu.vector_store %arg18[%c0_152, %c0_153, %c0_154], %266 {strides = array<i32>} : memref<1x4x2xf32, #tpu.memory_space<vmem>>, vector<1x4x2xf32>,
    return
  }
  func.func @transform_0(%arg0: i32) -> (i32, i32) {
    %c0_i32 = arith.constant 0 : i32
    %c0_i32_0 = arith.constant 0 : i32
    return %arg0, %c0_i32 : i32, i32
  }
  func.func @transform_1(%arg0: i32) -> (i32, i32) {
    %c0_i32 = arith.constant 0 : i32
    %c0_i32_0 = arith.constant 0 : i32
    %c0_i32_1 = arith.constant 0 : i32
    return %c0_i32, %c0_i32_0 : i32, i32
  }
  func.func @transform_2(%arg0: i32) -> (i32, i32) {
    %c0_i32 = arith.constant 0 : i32
    %c0_i32_0 = arith.constant 0 : i32
    %c0_i32_1 = arith.constant 0 : i32
    return %c0_i32, %c0_i32_0 : i32, i32
  }
  func.func @transform_3(%arg0: i32) -> (i32, i32) {
    %c0_i32 = arith.constant 0 : i32
    %c0_i32_0 = arith.constant 0 : i32
    %c0_i32_1 = arith.constant 0 : i32
    return %c0_i32, %c0_i32_0 : i32, i32
  }
  func.func @transform_4(%arg0: i32) -> (i32, i32) {
    %c0_i32 = arith.constant 0 : i32
    %c0_i32_0 = arith.constant 0 : i32
    %c0_i32_1 = arith.constant 0 : i32
    return %c0_i32, %c0_i32_0 : i32, i32
  }
  func.func @transform_5(%arg0: i32) -> (i32, i32) {
    %c0_i32 = arith.constant 0 : i32
    %c0_i32_0 = arith.constant 0 : i32
    %c0_i32_1 = arith.constant 0 : i32
    return %c0_i32, %c0_i32_0 : i32, i32
  }
  func.func @transform_6(%arg0: i32) -> (i32, i32) {
    %c0_i32 = arith.constant 0 : i32
    %c0_i32_0 = arith.constant 0 : i32
    %c0_i32_1 = arith.constant 0 : i32
    return %c0_i32, %c0_i32_0 : i32, i32
  }
  func.func @transform_7(%arg0: i32) -> (i32, i32) {
    %c0_i32 = arith.constant 0 : i32
    %c0_i32_0 = arith.constant 0 : i32
    %c0_i32_1 = arith.constant 0 : i32
    return %c0_i32, %c0_i32_0 : i32, i32
  }
  func.func @transform_8(%arg0: i32) -> (i32, i32) {
    %c0_i32 = arith.constant 0 : i32
    %c0_i32_0 = arith.constant 0 : i32
    %c0_i32_1 = arith.constant 0 : i32
    return %c0_i32, %c0_i32_0 : i32, i32
  }
  func.func @transform_9(%arg0: i32) -> (i32, i32) {
    %c0_i32 = arith.constant 0 : i32
    %c0_i32_0 = arith.constant 0 : i32
    %c0_i32_1 = arith.constant 0 : i32
    return %c0_i32, %c0_i32_0 : i32, i32
  }
  func.func @transform_10(%arg0: i32) -> (i32, i32) {
    %c0_i32 = arith.constant 0 : i32
    %c0_i32_0 = arith.constant 0 : i32
    %c0_i32_1 = arith.constant 0 : i32
    return %c0_i32, %c0_i32_0 : i32, i32
  }
  func.func @transform_11(%arg0: i32) -> (i32, i32) {
    %c0_i32 = arith.constant 0 : i32
    %c0_i32_0 = arith.constant 0 : i32
    %c0_i32_1 = arith.constant 0 : i32
    return %c0_i32, %c0_i32_0 : i32, i32
  }
  func.func @transform_12(%arg0: i32) -> (i32, i32) {
    %c0_i32 = arith.constant 0 : i32
    %c0_i32_0 = arith.constant 0 : i32
    %c0_i32_1 = arith.constant 0 : i32
    return %c0_i32, %c0_i32_0 : i32, i32
  }
  func.func @transform_13(%arg0: i32) -> (i32, i32) {
    %c0_i32 = arith.constant 0 : i32
    %c0_i32_0 = arith.constant 0 : i32
    %c0_i32_1 = arith.constant 0 : i32
    return %c0_i32, %c0_i32_0 : i32, i32
  }
  func.func @transform_14(%arg0: i32) -> (i32, i32) {
    %c0_i32 = arith.constant 0 : i32
    %c0_i32_0 = arith.constant 0 : i32
    %c0_i32_1 = arith.constant 0 : i32
    return %c0_i32, %c0_i32_0 : i32, i32
  }
  func.func @transform_15(%arg0: i32) -> (i32, i32, i32) {
    %c0_i32 = arith.constant 0 : i32
    %c0_i32_0 = arith.constant 0 : i32
    %c0_i32_1 = arith.constant 0 : i32
    %c0_i32_2 = arith.constant 0 : i32
    return %c0_i32, %c0_i32_0, %c0_i32_1 : i32, i32, i32
  }
  func.func @transform_16(%arg0: i32) -> (i32, i32) {
    %c0_i32 = arith.constant 0 : i32
    %c0_i32_0 = arith.constant 0 : i32
    %c0_i32_1 = arith.constant 0 : i32
    return %c0_i32, %c0_i32_0 : i32, i32
  }
  func.func @transform_17(%arg0: i32) -> (i32, i32, i32) {
    %c0_i32 = arith.constant 0 : i32
    %c0_i32_0 = arith.constant 0 : i32
    %c0_i32_1 = arith.constant 0 : i32
    return %arg0, %c0_i32, %c0_i32_0 : i32, i32, i32
  }
}

</mosaic_0001>

<bundles_post_ra>
// kernel: domain_classifier_forward.1
= control target key start
LH: loop header
LB: loop body
LE: loop exit
PB: predicated region body
PF: predicated region fallthrough
CT: control target
= control target key end

     0   :  { %s11523_s24 = smov 0   ;;  %s16936_s0 = inlined_call_operand.vmem [shape: bf16[448,144], index: 0, kind: input, shape index: {}]   ;;  %s16937_s1 = inlined_call_operand.vmem [shape: bf16[144,256], index: 1, kind: input, shape index: {}]   ;;  %s16938_s2 = inlined_call_operand.vmem [shape: f32[1,256], index: 2, kind: input, shape index: {}]   ;;  %s16939_s3 = inlined_call_operand.vmem [shape: bf16[256,128], index: 3, kind: input, shape index: {}]   ;;  %s16940_s4 = inlined_call_operand.vmem [shape: f32[1,128], index: 4, kind: input, shape index: {}]   ;;  %s16941_s5 = inlined_call_operand.vmem [shape: f32[1,128], index: 5, kind: input, shape index: {}]   ;;  %s16942_s6 = inlined_call_operand.vmem [shape: f32[1,128], index: 6, kind: input, shape index: {}]   ;;  %s16943_s7 = inlined_call_operand.vmem [shape: bf16[256,256], index: 7, kind: input, shape index: {}]   ;;  %s16944_s8 = inlined_call_operand.vmem [shape: f32[1,256], index: 8, kind: input, shape index: {}]   ;;  %s16945_s9 = inlined_call_operand.vmem [shape: f32[1,256], index: 9, kind: input, shape index: {}]   ;;  %s16946_s10 = inlined_call_operand.vmem [shape: f32[1,256], index: 10, kind: input, shape index: {}]   ;;  %s16947_s11 = inlined_call_operand.vmem [shape: bf16[2048,512], index: 11, kind: input, shape index: {}]   ;;  %s16948_s12 = inlined_call_operand.vmem [shape: f32[1,512], index: 12, kind: input, shape index: {}]   ;;  %s16949_s13 = inlined_call_operand.vmem [shape: f32[1,512], index: 13, kind: input, shape index: {}]   ;;  %s16950_s14 = inlined_call_operand.vmem [shape: f32[1,512], index: 14, kind: input, shape index: {}]   ;;  %s16951_s15 = inlined_call_operand.vmem [shape: f32[4,7,512], index: 15, kind: input, shape index: {}]   ;;  %s16952_s16 = inlined_call_operand.vmem [shape: f32[4,1], index: 16, kind: input, shape index: {}]   ;;  %s16953_s17 = inlined_call_operand.vmem [shape: f32[2,4,2], index: 17, kind: output, shape index: {}]  }
   0x1   :  { %16956 = sst [smem:[#allocation9_spill]] %s16936_s0 }
   0x2   :  { %16957 = sst [smem:[#allocation10_spill]] %s16937_s1 }
   0x3   :  { %16958 = sst [smem:[#allocation11_spill]] %s16953_s17 }
   0x4 LB: > { %16959 = sst [smem:[#allocation8_spill]] %s11427_s24  ;;  %s11529_s25 = sadd.s32 4294967295, %s11427_s24   ;;  %s11427_s24 = sphi %s11523_s24, %s27_s24  }
   0x5   : > { %p8003_p0 = scmp.ge.s32.totalorder %s11427_s24, 1  ;;  %p489_p1 = scmp.lt.s32.totalorder %s11427_s24, 3 }
   0x7   : > { %p490_p2 = pnand %p8003_p0, %p489_p1 }
   0x8   : > { %s16960_s28 = sld [smem:[#allocation10_spill]] (!%p490_p2)  ;;  %s541_s30 = smul.u32 (!%p490_p2), 28, %s11529_s25 }
   0x9   : > { %493 = sbr.rel (%p490_p2) target bundleno = 2061 (0x80d), region = 88  ;;  %s16961_s24 = sld [smem:[#allocation9_spill]] (!%p490_p2) }
   0xa   : > { %p542_p3 = scmp.lt.s32.totalorder (!%p490_p2), %s541_s30, 55  ;;  %p548_p4 = scmp.lt.s32.totalorder (!%p490_p2), %s11529_s25, 1 }
   0xb   : > { %s16985_s23 = sld [smem:[#allocation11_spill]] (!%p490_p2) }
   0xe   : > { %v8177_v0 = vld [vmem:[%s16960_s28 + $0x70] sm:$0xf]  ;;  %v10745_v1 = vld [vmem:[%s16960_s28 + $0x74] sm:$0xf0]  ;;  %v10744_v2 = vld [vmem:[%s16960_s28 + $0x74] sm:$0xf] }
   0xf   : > { %v8178_v3 = vor.u32 %v10745_v1, %v8177_v0  ;;  %v8179_v4 = vld [vmem:[%s16960_s28 + $0x78] sm:$0xf0]  ;;  %v8169_v5 = vld [vmem:[%s16960_s28 + $0x60] sm:$0xf]  ;;  %v10743_v6 = vld [vmem:[%s16960_s28 + $0x64] sm:$0xf0] }
  0x10   : > { %v8182_v7 = vor.u32 %v10744_v2, %v8179_v4  ;;  %v10742_v8 = vld [vmem:[%s16960_s28 + $0x64] sm:$0xf]  ;;  %v8171_v9 = vld [vmem:[%s16960_s28 + $0x68] sm:$0xf0]  ;;  %v8185_v10 = vld [vmem:[%s16960_s28 + $0x80] sm:$0xf]  ;;  %v8170_v11 = vor.u32 %v10743_v6, %v8169_v5 }
  0x11   : > { %864 = vmatpush.bf16.msra.mxu0 %v8178_v3  ;;  %v10747_v12 = vld [vmem:[%s16960_s28 + $0x84] sm:$0xf0]  ;;  %v10746_v13 = vld [vmem:[%s16960_s28 + $0x84] sm:$0xf]  ;;  %v8187_v14 = vld [vmem:[%s16960_s28 + $0x88] sm:$0xf0]  ;;  %v8174_v15 = vor.u32 %v10742_v8, %v8171_v9 }
  0x12   : > { %1022 = vmatpush.bf16.msra.mxu2 %v8182_v7  ;;  %v8186_v16 = vor.u32 %v10747_v12, %v8185_v10  ;;  %v8190_v17 = vor.u32 %v10746_v13, %v8187_v14  ;;  %v8161_v18 = vld [vmem:[%s16960_s28 + $0x50] sm:$0xf]  ;;  %v10741_v19 = vld [vmem:[%s16960_s28 + $0x54] sm:$0xf0]  ;;  %v10740_v20 = vld [vmem:[%s16960_s28 + $0x54] sm:$0xf] }
  0x13   : > { %v8163_v21 = vld [vmem:[%s16960_s28 + $0x58] sm:$0xf0]  ;;  %v8162_v22 = vor.u32 %v10741_v19, %v8161_v18  ;;  %s16988_s30 = smov (!%p542_p3, %s541_s30), 55  ;;  %v8153_v24 = vld [vmem:[%s16960_s28 + $0x40] sm:$0xf]  ;;  %vm821_vm0 = vcmask 130048  }
  0x14   : > { %950 = vmatpush.bf16.msra.mxu1 %v8186_v16  ;;  %1108 = vmatpush.bf16.msra.mxu3 %v8190_v17  ;;  %v8166_v23 = vor.u32 %v10740_v20, %v8163_v21  ;;  %v10739_v25 = vld [vmem:[%s16960_s28 + $0x44] sm:$0xf0]  ;;  %v10738_v26 = vld [vmem:[%s16960_s28 + $0x44] sm:$0xf]  ;;  %v8155_v27 = vld [vmem:[%s16960_s28 + $0x48] sm:$0xf0] }
  0x15   : > { %865 = vmatpush.bf16.msra.mxu0 %v8170_v11  ;;  %s10701_s19 = sshll.u32 %s16988_s30, 3  ;;  %v8154_v30 = vor.u32 %v10739_v25, %v8153_v24  ;;  %v8158_v31 = vor.u32 %v10738_v26, %v8155_v27  ;;  %v8145_v32 = vld [vmem:[%s16960_s28 + $0x30] sm:$0xf]  ;;  %v10737_v34 = vld [vmem:[%s16960_s28 + $0x34] sm:$0xf0]  ;;  %s16990_s25 = smov (!%p548_p4, %s11529_s25), 1 }
  0x16   : > { %1023 = vmatpush.bf16.msra.mxu2 %v8174_v15  ;;  %s11597_s17 = scalar_lea.vmem %s16961_s24, %s10701_s19  ;;  %v10736_v35 = vld [vmem:[%s16960_s28 + $0x34] sm:$0xf]  ;;  %v8147_v36 = vld [vmem:[%s16960_s28 + $0x38] sm:$0xf0]  ;;  %v8137_v37 = vld [vmem:[%s16960_s28 + $0x20] sm:$0xf]  ;;  %v8146_v39 = vor.u32 %v10737_v34, %v8145_v32 }
  0x17   : > { %v10702_v28 = vld [vmem:[%s11597_s17 + $0x4] sm:$0xf]  ;;  %v8011_v29 = vld [vmem:[%s11597_s17 + $0x8] sm:$0xf0]  ;;  %v10735_v38 = vld [vmem:[%s16960_s28 + $0x24] sm:$0xf0]  ;;  %v8150_v40 = vor.u32 %v10736_v35, %v8147_v36 }
  0x18   : > { %v8014_v33 = vor.u32 %v10702_v28, %v8011_v29  ;;  %v10734_v41 = vld [vmem:[%s16960_s28 + $0x24] sm:$0xf]  ;;  %v8139_v42 = vld [vmem:[%s16960_s28 + $0x28] sm:$0xf0]  ;;  %v8138_v43 = vor.u32 %v10735_v38, %v8137_v37  ;;  %v8129_v45 = vld [vmem:[%s16960_s28 + $0x10] sm:$0xf] }
  0x19   : > { %866 = vmatpush.bf16.msra.mxu0 %v8162_v22  ;;  %v8142_v44 = vor.u32 %v10734_v41, %v8139_v42  ;;  %v10733_v46 = vld [vmem:[%s16960_s28 + $0x14] sm:$0xf0]  ;;  %v10732_v47 = vld [vmem:[%s16960_s28 + $0x14] sm:$0xf]  ;;  %v8131_v48 = vld [vmem:[%s16960_s28 + $0x18] sm:$0xf0] }
  0x1a   : > { %1024 = vmatpush.bf16.msra.mxu2 %v8166_v23  ;;  %8191 = vmatmul.msk.bf16.vlgmr.msra.gmra.mxu1 %vm821_vm0, %v8014_v33  ;;  %v8130_v49 = vor.u32 %v10733_v46, %v8129_v45  ;;  %v10704_v50 = vld [vmem:[%s11597_s17 + $0x14] sm:$0xf]  ;;  %v8019_v51 = vld [vmem:[%s11597_s17 + $0x18] sm:$0xf0]  ;;  %v8134_v52 = vor.u32 %v10732_v47, %v8131_v48  ;;  %v8121_v53 = vld [vmem:[%s16960_s28] sm:$0xf] }
  0x1b   : > { %8205 = vmatmul.msk.bf16.vlgmr.msra.gmra.mxu3 %vm821_vm0, %v8014_v33  ;;  %v10731_v54 = vld [vmem:[%s16960_s28 + $0x4] sm:$0xf0]  ;;  %v10730_v55 = vld [vmem:[%s16960_s28 + $0x4] sm:$0xf]  ;;  %v8123_v56 = vld [vmem:[%s16960_s28 + $0x8] sm:$0xf0]  ;;  %v8022_v57 = vor.u32 %v10704_v50, %v8019_v51 }
  0x1c   : > { %v8122_v58 = vor.u32 %v10731_v54, %v8121_v53  ;;  %v8126_v59 = vor.u32 %v10730_v55, %v8123_v56  ;;  %v8009_v60 = vld [vmem:[%s11597_s17] sm:$0xf]  ;;  %v10703_v61 = vld [vmem:[%s11597_s17 + $0x4] sm:$0xf0]  ;;  %v10706_v63 = vld [vmem:[%s11597_s17 + $0x24] sm:$0xf] }
  0x1d   : > { %867 = vmatpush.bf16.msra.mxu0 %v8154_v30  ;;  %v8010_v62 = vor.u32 %v10703_v61, %v8009_v60  ;;  %v8027_v0 = vld [vmem:[%s11597_s17 + $0x28] sm:$0xf0]  ;;  %v8017_v2 = vld [vmem:[%s11597_s17 + $0x10] sm:$0xf]  ;;  %v10705_v3 = vld [vmem:[%s11597_s17 + $0x14] sm:$0xf0] }
  0x1e   : > { %1025 = vmatpush.bf16.msra.mxu2 %v8158_v31  ;;  %v8030_v1 = vor.u32 %v10706_v63, %v8027_v0  ;;  %v8018_v4 = vor.u32 %v10705_v3, %v8017_v2  ;;  %v10708_v5 = vld [vmem:[%s11597_s17 + $0x34] sm:$0xf]  ;;  %v8035_v6 = vld [vmem:[%s11597_s17 + $0x38] sm:$0xf0]  ;;  %v8025_v8 = vld [vmem:[%s11597_s17 + $0x20] sm:$0xf] }
  0x1f   : > { %v8038_v7 = vor.u32 %v10708_v5, %v8035_v6  ;;  %v10707_v9 = vld [vmem:[%s11597_s17 + $0x24] sm:$0xf0]  ;;  %v10710_v11 = vld [vmem:[%s11597_s17 + $0x44] sm:$0xf]  ;;  %v8043_v12 = vld [vmem:[%s11597_s17 + $0x48] sm:$0xf0] }
  0x20   : > { %v8026_v10 = vor.u32 %v10707_v9, %v8025_v8  ;;  %v8046_v13 = vor.u32 %v10710_v11, %v8043_v12  ;;  %v8033_v14 = vld [vmem:[%s11597_s17 + $0x30] sm:$0xf]  ;;  %v10709_v15 = vld [vmem:[%s11597_s17 + $0x34] sm:$0xf0]  ;;  %v10712_v17 = vld [vmem:[%s11597_s17 + $0x54] sm:$0xf] }
  0x21   : > { %868 = vmatpush.bf16.msra.mxu0 %v8146_v39  ;;  %v8034_v16 = vor.u32 %v10709_v15, %v8033_v14  ;;  %v8051_v18 = vld [vmem:[%s11597_s17 + $0x58] sm:$0xf0]  ;;  %v8041_v20 = vld [vmem:[%s11597_s17 + $0x40] sm:$0xf]  ;;  %v10711_v21 = vld [vmem:[%s11597_s17 + $0x44] sm:$0xf0] }
  0x22   : > { %1026 = vmatpush.bf16.msra.mxu2 %v8150_v40  ;;  %v8054_v19 = vor.u32 %v10712_v17, %v8051_v18  ;;  %v8042_v22 = vor.u32 %v10711_v21, %v8041_v20  ;;  %v10714_v23 = vld [vmem:[%s11597_s17 + $0x64] sm:$0xf]  ;;  %v8059_v24 = vld [vmem:[%s11597_s17 + $0x68] sm:$0xf0]  ;;  %v8049_v26 = vld [vmem:[%s11597_s17 + $0x50] sm:$0xf] }
  0x23   : > { %v8062_v25 = vor.u32 %v10714_v23, %v8059_v24  ;;  %v10713_v27 = vld [vmem:[%s11597_s17 + $0x54] sm:$0xf0]  ;;  %v10716_v29 = vld [vmem:[%s11597_s17 + $0x74] sm:$0xf]  ;;  %v8067_v30 = vld [vmem:[%s11597_s17 + $0x78] sm:$0xf0] }
  0x24   : > { %v8050_v28 = vor.u32 %v10713_v27, %v8049_v26  ;;  %v8070_v31 = vor.u32 %v10716_v29, %v8067_v30  ;;  %v8057_v32 = vld [vmem:[%s11597_s17 + $0x60] sm:$0xf]  ;;  %v10715_v33 = vld [vmem:[%s11597_s17 + $0x64] sm:$0xf0]  ;;  %v10718_v35 = vld [vmem:[%s11597_s17 + $0x84] sm:$0xf] }
  0x25   : > { %869 = vmatpush.bf16.msra.mxu0 %v8138_v43  ;;  %v8058_v34 = vor.u32 %v10715_v33, %v8057_v32  ;;  %v8075_v36 = vld [vmem:[%s11597_s17 + $0x88] sm:$0xf0]  ;;  %v8065_v39 = vld [vmem:[%s11597_s17 + $0x70] sm:$0xf]  ;;  %v10717_v40 = vld [vmem:[%s11597_s17 + $0x74] sm:$0xf0] }
  0x26   : > { %1027 = vmatpush.bf16.msra.mxu2 %v8142_v44  ;;  %v8078_v37 = vor.u32 %v10718_v35, %v8075_v36  ;;  %v8066_v41 = vor.u32 %v10717_v40, %v8065_v39  ;;  %v10720_v44 = vld [vmem:[%s11597_s17 + $0x94] sm:$0xf]  ;;  %v8083_v45 = vld [vmem:[%s11597_s17 + $0x98] sm:$0xf0]  ;;  %v599_v48 = vld [vmem:[%s16938_s2] sm:$0x3] }
  0x27   : > { %v10791_v46 = vld [vmem:[%s16939_s3 + $0x78] sm:$0xff]  ;;  %v8073_v51 = vld [vmem:[%s11597_s17 + $0x80] sm:$0xf]  ;;  %v11709_v53 = vperm.slane %v599_v48, 0  ;;  %v8091_v2 = vld [vmem:[%s11597_s17 + $0xa8] sm:$0xf0] }
  0x28   : > { %1783 = vmatpush.bf16.msrb.mxu3 %v10791_v46  ;;  %v10783_v56 = vld [vmem:[%s16939_s3 + $0x38] sm:$0xff]  ;;  %v10790_v24 = vld [vmem:[%s16939_s3 + $0x70] sm:$0xff]  ;;  %v10781_v33 = vld [vmem:[%s16939_s3 + $0x28] sm:$0xff] }
  0x29   : > { %870 = vmatpush.bf16.msra.mxu0 %v8130_v49  ;;  %v8086_v49 = vor.u32 %v10720_v44, %v8083_v45  ;;  %1704 = vmatpush.bf16.msrb.mxu1 %v10783_v56  ;;  %v10721_v11 = vld [vmem:[%s11597_s17 + $0x94] sm:$0xf0]  ;;  %v10788_v44 = vld [vmem:[%s16939_s3 + $0x60] sm:$0xff] }
  0x2a   : > { %1028 = vmatpush.bf16.msra.mxu2 %v8134_v52  ;;  %8192 = vmatmul.msk.bf16.gmra.mxu1 %vm821_vm0, %v8022_v57  ;;  %v10719_v52 = vld [vmem:[%s11597_s17 + $0x84] sm:$0xf0]  ;;  %v10779_v56 = vld [vmem:[%s16939_s3 + $0x18] sm:$0xff] }
  0x2b   : > { %8206 = vmatmul.msk.bf16.gmra.mxu3 %vm821_vm0, %v8022_v57  ;;  %v8074_v54 = vor.u32 %v10719_v52, %v8073_v51 }
  0x2c   : > { %1784 = vmatpush.bf16.msrb.mxu3 %v10790_v24 }
  0x2d   : > { %871 = vmatpush.bf16.msra.mxu0 %v8122_v58 }
  0x2e   : > { %1029 = vmatpush.bf16.msra.mxu2 %v8126_v59  ;;  %v11719_v59 = vperm.slane %v599_v48, 1  ;;  %v8089_v48 = vld [vmem:[%s11597_s17 + $0xa0] sm:$0xf] }
  0x30   : > { %872 = vmatmul.bf16.vlgmr.msra.gmra.mxu0 %v8010_v62 }
  0x31   : > { %1030 = vmatmul.bf16.vlgmr.msra.gmra.mxu2 %v8010_v62 }
  0x3a   : > { %8193 = vmatmul.msk.bf16.gmra.mxu1 %vm821_vm0, %v8030_v1 }
  0x3b   : > { %8207 = vmatmul.msk.bf16.gmra.mxu3 %vm821_vm0, %v8030_v1  ;;  %v10722_v1 = vld [vmem:[%s11597_s17 + $0xa4] sm:$0xf] }
  0x3c   : > { %v8094_v8 = vor.u32 %v10722_v1, %v8091_v2  ;;  %v10778_v2 = vld [vmem:[%s16939_s3 + $0x10] sm:$0xff] }
  0x40   : > { %877 = vmatmul.bf16.gmra.mxu0 %v8018_v4 }
  0x41   : > { %1035 = vmatmul.bf16.gmra.mxu2 %v8018_v4 }
  0x4a   : > { %8194 = vmatmul.msk.bf16.gmra.mxu1 %vm821_vm0, %v8038_v7 }
  0x4b   : > { %8208 = vmatmul.msk.bf16.gmra.mxu3 %vm821_vm0, %v8038_v7 }
  0x50   : > { %882 = vmatmul.bf16.gmra.mxu0 %v8026_v10 }
  0x51   : > { %1040 = vmatmul.bf16.gmra.mxu2 %v8026_v10  ;;  %v8081_v10 = vld [vmem:[%s11597_s17 + $0x90] sm:$0xf] }
  0x52   : > { %v8082_v18 = vor.u32 %v10721_v11, %v8081_v10 }
  0x5a   : > { %8195 = vmatmul.msk.bf16.gmra.mxu1 %vm821_vm0, %v8046_v13 }
  0x5b   : > { %8209 = vmatmul.msk.bf16.gmra.mxu3 %vm821_vm0, %v8046_v13 }
  0x60   : > { %887 = vmatmul.bf16.gmra.mxu0 %v8034_v16 }
  0x61   : > { %1045 = vmatmul.bf16.gmra.mxu2 %v8034_v16 }
  0x6a   : > { %8196 = vmatmul.msk.bf16.gmra.mxu1 %vm821_vm0, %v8054_v19 }
  0x6b   : > { %8210 = vmatmul.msk.bf16.gmra.mxu3 %vm821_vm0, %v8054_v19 }
  0x70   : > { %892 = vmatmul.bf16.gmra.mxu0 %v8042_v22 }
  0x71   : > { %1050 = vmatmul.bf16.gmra.mxu2 %v8042_v22 }
  0x7a   : > { %8197 = vmatmul.msk.bf16.gmra.mxu1 %vm821_vm0, %v8062_v25 }
  0x7b   : > { %8211 = vmatmul.msk.bf16.gmra.mxu3 %vm821_vm0, %v8062_v25  ;;  %v10782_v25 = vld [vmem:[%s16939_s3 + $0x30] sm:$0xff] }
  0x7c   : > { %1705 = vmatpush.bf16.msrb.mxu1 %v10782_v25 }
  0x80   : > { %897 = vmatmul.bf16.gmra.mxu0 %v8050_v28  ;;  %1706 = vmatpush.bf16.msrb.mxu1 %v10781_v33 }
  0x81   : > { %1055 = vmatmul.bf16.gmra.mxu2 %v8050_v28 }
  0x8a   : > { %8198 = vmatmul.msk.bf16.gmra.mxu1 %vm821_vm0, %v8070_v31 }
  0x8b   : > { %8212 = vmatmul.msk.bf16.gmra.mxu3 %vm821_vm0, %v8070_v31 }
  0x90   : > { %902 = vmatmul.bf16.gmra.mxu0 %v8058_v34 }
  0x91   : > { %1060 = vmatmul.bf16.gmra.mxu2 %v8058_v34  ;;  %v10789_v34 = vld [vmem:[%s16939_s3 + $0x68] sm:$0xff] }
  0x92   : > { %1785 = vmatpush.bf16.msrb.mxu3 %v10789_v34 }
  0x96   : > { %1786 = vmatpush.bf16.msrb.mxu3 %v10788_v44 }
  0x97   : > { %v952_v38 = vpop.f32.mrf.mxu1 }
  0x9a   : > { %8199 = vmatmul.msk.bf16.gmra.mxu1 %vm821_vm0, %v8078_v37 }
  0x9b   : > { %8213 = vmatmul.msk.bf16.gmra.mxu3 %vm821_vm0, %v8078_v37  ;;  %v10724_v37 = vld [vmem:[%s11597_s17 + $0xb4] sm:$0xf] }
  0x9e   : > { %v1110_v42 = vpop.f32.mrf.mxu3 }
  0x9f   : > { %v954_v43 = vpop.f32.mrf.mxu1 }
  0xa0   : > { %907 = vmatmul.bf16.gmra.mxu0 %v8066_v41 }
  0xa1   : > { %1065 = vmatmul.bf16.gmra.mxu2 %v8066_v41 }
  0xa6   : > { %v1112_v47 = vpop.f32.mrf.mxu3 }
  0xa7   : > { %v957_v50 = vpop.f32.mrf.mxu1 }
  0xaa   : > { %8200 = vmatmul.msk.bf16.gmra.mxu1 %vm821_vm0, %v8086_v49 }
  0xab   : > { %8214 = vmatmul.msk.bf16.gmra.mxu3 %vm821_vm0, %v8086_v49  ;;  %v10723_v49 = vld [vmem:[%s11597_s17 + $0xa4] sm:$0xf0] }
  0xad   : > { %v873_v55 = vpop.f32.mrf.mxu0 }
  0xae   : > { %v874_v57 = vadd.f32 %v873_v55, %v11709_v53  ;;  %v11717_v58 = vpop.f32.mrf.mxu3 }
  0xaf   : > { %v11721_v60 = vpop.f32.mrf.mxu1 }
  0xb0   : > { %912 = vmatmul.bf16.gmra.mxu0 %v8074_v54  ;;  %v953_v61 = vadd.f32 %v952_v38, %v874_v57  ;;  %v8099_v38 = vld [vmem:[%s11597_s17 + $0xb8] sm:$0xf0] }
  0xb1   : > { %1070 = vmatmul.bf16.gmra.mxu2 %v8074_v54  ;;  %v8102_v46 = vor.u32 %v10724_v37, %v8099_v38  ;;  %v10787_v57 = vld [vmem:[%s16939_s3 + $0x58] sm:$0xff] }
  0xb2   : > { %v1236_v3 = vmul.f32 0.01, %v953_v61  ;;  %vm1180_vm1 = vcmp.ge.f32.partialorder %v953_v61, 0.0  ;;  %1787 = vmatpush.bf16.msrb.mxu3 %v10787_v57 }
  0xb4   : > { %v1031_v62 = vpop.f32.mrf.mxu2  ;;  %v1292_v12 = vsel %vm1180_vm1, %v953_v61, %v1236_v3  ;;  %v8090_v61 = vor.u32 %v10723_v49, %v8089_v48  ;;  %v10786_v3 = vld [vmem:[%s16939_s3 + $0x50] sm:$0xff] }
  0xb5   : > { %v1032_v63 = vadd.f32 %v1031_v62, %v11719_v59  ;;  %v875_v0 = vpop.f32.mrf.mxu0 }
  0xb6   : > { %v876_v5 = vadd.f32 %v875_v0, %v11709_v53  ;;  %v11727_v6 = vpop.f32.mrf.mxu3  ;;  %1788 = vmatpush.bf16.msrb.mxu3 %v10786_v3 }
  0xb7   : > { %v1111_v4 = vadd.f32 %v1110_v42, %v1032_v63  ;;  %v11729_v9 = vpop.f32.mrf.mxu1 }
  0xb8   : > { %v955_v14 = vadd.f32 %v954_v43, %v876_v5  ;;  %v10780_v43 = vld [vmem:[%s16939_s3 + $0x20] sm:$0xff] }
  0xb9   : > { %vm1181_vm2 = vcmp.ge.f32.partialorder %v1111_v4, 0.0  ;;  %v1237_v7 = vmul.f32 0.01, %v1111_v4  ;;  %1707 = vmatpush.bf16.msrb.mxu1 %v10780_v43 }
  0xba   : > { %8201 = vmatmul.msk.bf16.gmra.mxu1 %vm821_vm0, %v8094_v8  ;;  %v1238_v20 = vmul.f32 0.01, %v955_v14  ;;  %vm1182_vm3 = vcmp.ge.f32.partialorder %v955_v14, 0.0 }
  0xbb   : > { %v1293_v13 = vsel %vm1181_vm2, %v1111_v4, %v1237_v7  ;;  %8215 = vmatmul.msk.bf16.gmra.mxu3 %vm821_vm0, %v8094_v8 }
  0xbc   : > { %v1348_v15 = vpack.c.bf16 %v1293_v13, %v1292_v12  ;;  %v1033_v16 = vpop.f32.mrf.mxu2  ;;  %v1294_v28 = vsel %vm1182_vm3, %v955_v14, %v1238_v20  ;;  %v10777_v12 = vld [vmem:[%s16939_s3 + $0x8] sm:$0xff] }
  0xbd   : > { %v1034_v17 = vadd.f32 %v1033_v16, %v11719_v59  ;;  %v878_v19 = vpop.f32.mrf.mxu0  ;;  %1708 = vmatpush.bf16.msrb.mxu1 %v10779_v56  ;;  %v10785_v13 = vld [vmem:[%s16939_s3 + $0x48] sm:$0xff]  ;;  %v10726_v16 = vld [vmem:[%s11597_s17 + $0xc4] sm:$0xf] }
  0xbe   : > { %1376 = vst [vmem:[#allocation2] sm:$0xff] %v1348_v15  ;;  %v879_v22 = vadd.f32 %v878_v19, %v11709_v53  ;;  %v11737_v23 = vpop.f32.mrf.mxu3  ;;  %1789 = vmatpush.bf16.msrb.mxu3 %v10785_v13 }
  0xbf   : > { %v1113_v21 = vadd.f32 %v1112_v47, %v1034_v17  ;;  %v11745_v27 = vpop.f32.mrf.mxu1  ;;  %v8107_v17 = vld [vmem:[%s11597_s17 + $0xc8] sm:$0xf0] }
  0xc0   : > { %917 = vmatmul.bf16.gmra.mxu0 %v8082_v18  ;;  %v958_v30 = vadd.f32 %v957_v50, %v879_v22  ;;  %v10784_v22 = vld [vmem:[%s16939_s3 + $0x40] sm:$0xff]  ;;  %v8110_v25 = vor.u32 %v10726_v16, %v8107_v17 }
  0xc1   : > { %vm1183_vm4 = vcmp.ge.f32.partialorder %v1113_v21, 0.0  ;;  %v1239_v26 = vmul.f32 0.01, %v1113_v21  ;;  %1075 = vmatmul.bf16.gmra.mxu2 %v8082_v18  ;;  %1709 = vmatpush.bf16.msrb.mxu1 %v10778_v2 }
  0xc2   : > { %v1240_v39 = vmul.f32 0.01, %v958_v30  ;;  %vm1184_vm5 = vcmp.ge.f32.partialorder %v958_v30, 0.0  ;;  %1790 = vmatpush.bf16.msrb.mxu3 %v10784_v22 }
  0xc3   : > { %v1295_v29 = vsel %vm1183_vm4, %v1113_v21, %v1239_v26  ;;  %v10776_v21 = vld [vmem:[%s16939_s3] sm:$0xff] }
  0xc4   : > { %v1349_v31 = vpack.c.bf16 %v1295_v29, %v1294_v28  ;;  %v1036_v32 = vpop.f32.mrf.mxu2  ;;  %v1296_v50 = vsel %vm1184_vm5, %v958_v30, %v1240_v39  ;;  %v8097_v28 = vld [vmem:[%s11597_s17 + $0xb0] sm:$0xf] }
  0xc5   : > { %v1037_v35 = vadd.f32 %v1036_v32, %v11719_v59  ;;  %v880_v36 = vpop.f32.mrf.mxu0  ;;  %1710 = vmatpush.bf16.msrb.mxu1 %v10777_v12 }
  0xc6   : > { %1377 = vst [vmem:[#allocation2 + $0x8] sm:$0xff] %v1349_v31  ;;  %v881_v41 = vadd.f32 %v880_v36, %v11709_v53  ;;  %v11758_v42 = vpop.f32.mrf.mxu3 }
  0xc7   : > { %v1116_v40 = vadd.f32 %v11717_v58, %v1037_v35  ;;  %v11766_v47 = vpop.f32.mrf.mxu1 }
  0xc8   : > { %v960_v52 = vadd.f32 %v11721_v60, %v881_v41 }
  0xc9   : > { %vm1185_vm6 = vcmp.ge.f32.partialorder %v1116_v40, 0.0  ;;  %v1241_v45 = vmul.f32 0.01, %v1116_v40  ;;  %1711 = vmatpush.bf16.msrb.mxu1 %v10776_v21 }
  0xca   : > { %8202 = vmatmul.msk.bf16.gmra.mxu1 %vm821_vm0, %v8102_v46  ;;  %v1242_v60 = vmul.f32 0.01, %v960_v52  ;;  %vm1186_vm7 = vcmp.ge.f32.partialorder %v960_v52, 0.0 }
  0xcb   : > { %v1297_v51 = vsel %vm1185_vm6, %v1116_v40, %v1241_v45  ;;  %8216 = vmatmul.msk.bf16.gmra.mxu3 %vm821_vm0, %v8102_v46 }
  0xcc   : > { %v1350_v54 = vpack.c.bf16 %v1297_v51, %v1296_v50  ;;  %v1038_v55 = vpop.f32.mrf.mxu2  ;;  %v10728_v50 = vld [vmem:[%s11597_s17 + $0xd4] sm:$0xf]  ;;  %v8115_v51 = vld [vmem:[%s11597_s17 + $0xd8] sm:$0xf0] }
  0xcd   : > { %v1039_v58 = vadd.f32 %v1038_v55, %v11719_v59  ;;  %v883_v62 = vpop.f32.mrf.mxu0  ;;  %v8118_v57 = vor.u32 %v10728_v50, %v8115_v51  ;;  %v10749_v22 = vld [vmem:[#allocation2 + $0x4] sm:$0xf0] }
  0xce   : > { %1378 = vst [vmem:[#allocation2 + $0x10] sm:$0xff] %v1350_v54  ;;  %v884_v0 = vadd.f32 %v883_v62, %v11709_v53  ;;  %v11782_v1 = vpop.f32.mrf.mxu3  ;;  %v10727_v62 = vld [vmem:[%s11597_s17 + $0xc4] sm:$0xf0] }
  0xcf   : > { %v1118_v63 = vadd.f32 %v11727_v6, %v1039_v58  ;;  %v11790_v5 = vpop.f32.mrf.mxu1  ;;  %v1298_v6 = vsel %vm1186_vm7, %v960_v52, %v1242_v60 }
  0xd0   : > { %922 = vmatmul.bf16.gmra.mxu0 %v8090_v61  ;;  %v963_v8 = vadd.f32 %v11729_v9, %v884_v0 }
  0xd1   : > { %vm1187_vm8 = vcmp.ge.f32.partialorder %v1118_v63, 0.0  ;;  %v1243_v4 = vmul.f32 0.01, %v1118_v63  ;;  %1080 = vmatmul.bf16.gmra.mxu2 %v8090_v61  ;;  %v8105_v61 = vld [vmem:[%s11597_s17 + $0xc0] sm:$0xf] }
  0xd2   : > { %v1244_v9 = vmul.f32 0.01, %v963_v8  ;;  %vm1188_vm9 = vcmp.ge.f32.partialorder %v963_v8, 0.0 }
  0xd3   : > { %v1299_v7 = vsel %vm1187_vm8, %v1118_v63, %v1243_v4  ;;  %v8106_v4 = vor.u32 %v10727_v62, %v8105_v61 }
  0xd4   : > { %v1351_v10 = vpack.c.bf16 %v1299_v7, %v1298_v6  ;;  %v1041_v11 = vpop.f32.mrf.mxu2  ;;  %v1300_v29 = vsel %vm1188_vm9, %v963_v8, %v1244_v9 }
  0xd5   : > { %v1042_v14 = vadd.f32 %v1041_v11, %v11719_v59  ;;  %v885_v15 = vpop.f32.mrf.mxu0 }
  0xd6   : > { %1379 = vst [vmem:[#allocation2 + $0x18] sm:$0xff] %v1351_v10  ;;  %v886_v19 = vadd.f32 %v885_v15, %v11709_v53  ;;  %v11804_v20 = vpop.f32.mrf.mxu3 }
  0xd7   : > { %v1121_v18 = vadd.f32 %v11737_v23, %v1042_v14  ;;  %v11812_v26 = vpop.f32.mrf.mxu1  ;;  %v10725_v23 = vld [vmem:[%s11597_s17 + $0xb4] sm:$0xf0] }
  0xd8   : > { %v965_v31 = vadd.f32 %v11745_v27, %v886_v19  ;;  %v8098_v35 = vor.u32 %v10725_v23, %v8097_v28 }
  0xd9   : > { %vm1189_vm10 = vcmp.ge.f32.partialorder %v1121_v18, 0.0  ;;  %v1245_v24 = vmul.f32 0.01, %v1121_v18 }
  0xda   : > { %8203 = vmatmul.msk.bf16.gmra.mxu1 %vm821_vm0, %v8110_v25  ;;  %v1246_v37 = vmul.f32 0.01, %v965_v31  ;;  %vm1190_vm11 = vcmp.ge.f32.partialorder %v965_v31, 0.0 }
  0xdb   : > { %v1301_v30 = vsel %vm1189_vm10, %v1121_v18, %v1245_v24  ;;  %8217 = vmatmul.msk.bf16.gmra.mxu3 %vm821_vm0, %v8110_v25  ;;  %v8223_v25 = vld [vmem:[#allocation2 + $0x8] sm:$0xf0] }
  0xdc   : > { %v1352_v32 = vpack.c.bf16 %v1301_v30, %v1300_v29  ;;  %v1043_v33 = vpop.f32.mrf.mxu2  ;;  %v1302_v43 = vsel %vm1190_vm11, %v965_v31, %v1246_v37  ;;  %v10748_v30 = vld [vmem:[#allocation2 + $0x4] sm:$0xf]  ;;  %v8113_v31 = vld [vmem:[%s11597_s17 + $0xd0] sm:$0xf] }
  0xdd   : > { %v1044_v34 = vadd.f32 %v1043_v33, %v11719_v59  ;;  %v888_v36 = vpop.f32.mrf.mxu0  ;;  %v10751_v61 = vld [vmem:[#allocation2 + $0x14] sm:$0xf0] }
  0xde   : > { %1380 = vst [vmem:[#allocation2 + $0x20] sm:$0xff] %v1352_v32  ;;  %v889_v39 = vadd.f32 %v888_v36, %v11709_v53  ;;  %v1130_v27 = vpop.f32.mrf.mxu3  ;;  %v10729_v32 = vld [vmem:[%s11597_s17 + $0xd4] sm:$0xf0]  ;;  %v8226_v36 = vor.u32 %v10748_v30, %v8223_v25  ;;  %s8006_s17 = sshll.u32 %s16990_s25, 2 }
  0xdf   : > { %v1123_v38 = vadd.f32 %v11758_v42, %v1044_v34  ;;  %v11822_v41 = vpop.f32.mrf.mxu1  ;;  %s551_s26 = scalar_lea.vmem %s16985_s23, %s8006_s17 }
  0xe0   : > { %927 = vmatmul.bf16.gmra.mxu0 %v8098_v35  ;;  %v968_v45 = vadd.f32 %v11766_v47, %v889_v39 }
  0xe1   : > { %vm1191_vm12 = vcmp.ge.f32.partialorder %v1123_v38, 0.0  ;;  %v1247_v40 = vmul.f32 0.01, %v1123_v38  ;;  %1085 = vmatmul.bf16.gmra.mxu2 %v8098_v35 }
  0xe2   : > { %v1248_v52 = vmul.f32 0.01, %v968_v45  ;;  %vm1192_vm13 = vcmp.ge.f32.partialorder %v968_v45, 0.0 }
  0xe3   : > { %v1303_v44 = vsel %vm1191_vm12, %v1123_v38, %v1247_v40 }
  0xe4   : > { %v1353_v46 = vpack.c.bf16 %v1303_v44, %v1302_v43  ;;  %v1046_v48 = vpop.f32.mrf.mxu2  ;;  %v1304_v60 = vsel %vm1192_vm13, %v968_v45, %v1248_v52 }
  0xe5   : > { %v1047_v42 = vadd.f32 %v1046_v48, %v11719_v59  ;;  %v890_v49 = vpop.f32.mrf.mxu0 }
  0xe6   : > { %1381 = vst [vmem:[#allocation2 + $0x28] sm:$0xff] %v1353_v46  ;;  %v891_v55 = vadd.f32 %v890_v49, %v11709_v53  ;;  %v11830_v56 = vpop.f32.mrf.mxu3 }
  0xe7   : > { %v1126_v54 = vadd.f32 %v11782_v1, %v1047_v42  ;;  %v11832_v58 = vpop.f32.mrf.mxu1 }
  0xe8   : > { %v970_v0 = vadd.f32 %v11790_v5, %v891_v55 }
  0xe9   : > { %vm1193_vm14 = vcmp.ge.f32.partialorder %v1126_v54, 0.0  ;;  %v1249_v47 = vmul.f32 0.01, %v1126_v54 }
  0xea   : > { %8204 = vmatmul.msk.bf16.gmra.mxu1 %vm821_vm0, %v8118_v57  ;;  %v1250_v7 = vmul.f32 0.01, %v970_v0  ;;  %vm1194_vm15 = vcmp.ge.f32.partialorder %v970_v0, 0.0 }
  0xeb   : > { %v1305_v63 = vsel %vm1193_vm14, %v1126_v54, %v1249_v47  ;;  %8218 = vmatmul.msk.bf16.gmra.mxu3 %vm821_vm0, %v8118_v57 }
  0xec   : > { %v1354_v2 = vpack.c.bf16 %v1305_v63, %v1304_v60  ;;  %v1048_v3 = vpop.f32.mrf.mxu2  ;;  %v1306_v13 = vsel %vm1194_vm15, %v970_v0, %v1250_v7  ;;  %v8231_v60 = vld [vmem:[#allocation2 + $0x18] sm:$0xf0]  ;;  %v8229_v0 = vld [vmem:[#allocation2 + $0x10] sm:$0xf] }
  0xed   : > { %v1049_v1 = vadd.f32 %v1048_v3, %v11719_v59  ;;  %v893_v6 = vpop.f32.mrf.mxu0  ;;  %v10750_v3 = vld [vmem:[#allocation2 + $0x14] sm:$0xf] }
  0xee   : > { %1382 = vst [vmem:[#allocation2 + $0x30] sm:$0xff] %v1354_v2  ;;  %v894_v10 = vadd.f32 %v893_v6, %v11709_v53  ;;  %v1135_v11 = vpop.f32.mrf.mxu3  ;;  %v8234_v7 = vor.u32 %v10750_v3, %v8231_v60 }
  0xef   : > { %v1128_v8 = vadd.f32 %v11804_v20, %v1049_v1  ;;  %v11842_v12 = vpop.f32.mrf.mxu1 }
  0xf0   : > { %932 = vmatmul.bf16.gmra.mxu0 %v8106_v4  ;;  %v973_v15 = vadd.f32 %v11812_v26, %v894_v10  ;;  %v8221_v26 = vld [vmem:[#allocation2] sm:$0xf] }
  0xf1   : > { %vm1195_vm1 = vcmp.ge.f32.partialorder %v1128_v8, 0.0  ;;  %v1251_v5 = vmul.f32 0.01, %v1128_v8  ;;  %1090 = vmatmul.bf16.gmra.mxu2 %v8106_v4  ;;  %v8222_v29 = vor.u32 %v10749_v22, %v8221_v26 }
  0xf2   : > { %v1252_v19 = vmul.f32 0.01, %v973_v15  ;;  %vm1196_vm0 = vcmp.ge.f32.partialorder %v973_v15, 0.0 }
  0xf3   : > { %v1307_v14 = vsel %vm1195_vm1, %v1128_v8, %v1251_v5 }
  0xf4   : > { %v1355_v16 = vpack.c.bf16 %v1307_v14, %v1306_v13  ;;  %v1051_v17 = vpop.f32.mrf.mxu2  ;;  %v1308_v33 = vsel %vm1196_vm0, %v973_v15, %v1252_v19 }
  0xf5   : > { %v1052_v9 = vadd.f32 %v1051_v17, %v11719_v59  ;;  %v895_v18 = vpop.f32.mrf.mxu0  ;;  %v8245_v3 = vld [vmem:[#allocation2 + $0x30] sm:$0xf] }
  0xf6   : > { %1383 = vst [vmem:[#allocation2 + $0x38] sm:$0xff] %v1355_v16  ;;  %v896_v21 = vadd.f32 %v895_v18, %v11709_v53  ;;  %v11847_v24 = vpop.f32.mrf.mxu3 }
  0xf7   : > { %v1131_v20 = vadd.f32 %v1130_v27, %v1052_v9  ;;  %v11849_v23 = vpop.f32.mrf.mxu1  ;;  %v8114_v27 = vor.u32 %v10729_v32, %v8113_v31  ;;  %v8239_v31 = vld [vmem:[#allocation2 + $0x28] sm:$0xf0] }
  0xf8   : > { %v975_v35 = vadd.f32 %v11822_v41, %v896_v21 }
  0xf9   : > { %vm1197_vm2 = vcmp.ge.f32.partialorder %v1131_v20, 0.0  ;;  %v1253_v28 = vmul.f32 0.01, %v1131_v20 }
  0xfa   : > { %1712 = vmatmul.bf16.vlgmr.msrb.gmra.mxu1 %v8222_v29  ;;  %v1254_v43 = vmul.f32 0.01, %v975_v35  ;;  %vm1198_vm3 = vcmp.ge.f32.partialorder %v975_v35, 0.0  ;;  %v10753_v29 = vld [vmem:[#allocation2 + $0x24] sm:$0xf0] }
  0xfb   : > { %v1309_v34 = vsel %vm1197_vm2, %v1131_v20, %v1253_v28  ;;  %1791 = vmatmul.bf16.vlgmr.msrb.gmra.mxu3 %v8226_v36 }
  0xfc   : > { %v1356_v37 = vpack.c.bf16 %v1309_v34, %v1308_v33  ;;  %v1053_v38 = vpop.f32.mrf.mxu2  ;;  %v1310_v42 = vsel %vm1198_vm3, %v975_v35, %v1254_v43  ;;  %v8237_v33 = vld [vmem:[#allocation2 + $0x20] sm:$0xf]  ;;  %v10752_v35 = vld [vmem:[#allocation2 + $0x24] sm:$0xf] }
  0xfd   : > { %v1054_v39 = vadd.f32 %v1053_v38, %v11719_v59  ;;  %v898_v40 = vpop.f32.mrf.mxu0  ;;  %v10755_v60 = vld [vmem:[#allocation2 + $0x34] sm:$0xf0] }
  0xfe   : > { %1384 = vst [vmem:[#allocation2 + $0x40] sm:$0xff] %v1356_v37  ;;  %v899_v45 = vadd.f32 %v898_v40, %v11709_v53  ;;  %v1140_v46 = vpop.f32.mrf.mxu3 }
  0xff   : > { %v1133_v44 = vadd.f32 %v11830_v56, %v1054_v39  ;;  %v11857_v41 = vpop.f32.mrf.mxu1  ;;  %v8242_v39 = vor.u32 %v10752_v35, %v8239_v31 }
 0x100   : > { %937 = vmatmul.bf16.gmra.mxu0 %v8114_v27  ;;  %v978_v50 = vadd.f32 %v11832_v58, %v899_v45  ;;  %v8230_v58 = vor.u32 %v10751_v61, %v8229_v0  ;;  %v8247_v0 = vld [vmem:[#allocation2 + $0x38] sm:$0xf0] }
 0x101   : > { %vm1199_vm4 = vcmp.ge.f32.partialorder %v1133_v44, 0.0  ;;  %v1255_v48 = vmul.f32 0.01, %v1133_v44  ;;  %1095 = vmatmul.bf16.gmra.mxu2 %v8114_v27 }
 0x102   : > { %v1256_v56 = vmul.f32 0.01, %v978_v50  ;;  %vm1200_vm5 = vcmp.ge.f32.partialorder %v978_v50, 0.0 }
 0x103   : > { %v1311_v49 = vsel %vm1199_vm4, %v1133_v44, %v1255_v48 }
 0x104   : > { %v1357_v51 = vpack.c.bf16 %v1311_v49, %v1310_v42  ;;  %v1056_v52 = vpop.f32.mrf.mxu2  ;;  %v1312_v1 = vsel %vm1200_vm5, %v978_v50, %v1256_v56 }
 0x105   : > { %v1057_v54 = vadd.f32 %v1056_v52, %v11719_v59  ;;  %v900_v55 = vpop.f32.mrf.mxu0  ;;  %v8253_v35 = vld [vmem:[#allocation2 + $0x40] sm:$0xf] }
 0x106   : > { %1385 = vst [vmem:[#allocation2 + $0x48] sm:$0xff] %v1357_v51  ;;  %v901_v57 = vadd.f32 %v900_v55, %v11709_v53  ;;  %v1142_v62 = vpop.f32.mrf.mxu3 }
 0x107   : > { %v1136_v47 = vadd.f32 %v1135_v11, %v1057_v54  ;;  %v11862_v2 = vpop.f32.mrf.mxu1 }
 0x108   : > { %v980_v6 = vadd.f32 %v11842_v12, %v901_v57 }
 0x109   : > { %vm1201_vm6 = vcmp.ge.f32.partialorder %v1136_v47, 0.0  ;;  %v1257_v63 = vmul.f32 0.01, %v1136_v47 }
 0x10a   : > { %1717 = vmatmul.bf16.gmra.mxu1 %v8230_v58  ;;  %v1258_v13 = vmul.f32 0.01, %v980_v6  ;;  %vm1202_vm7 = vcmp.ge.f32.partialorder %v980_v6, 0.0 }
 0x10b   : > { %v1313_v4 = vsel %vm1201_vm6, %v1136_v47, %v1257_v63  ;;  %1796 = vmatmul.bf16.gmra.mxu3 %v8234_v7 }
 0x10c   : > { %v1358_v8 = vpack.c.bf16 %v1313_v4, %v1312_v1  ;;  %v1058_v10 = vpop.f32.mrf.mxu2  ;;  %v1314_v12 = vsel %vm1202_vm7, %v980_v6, %v1258_v13  ;;  %v10754_v4 = vld [vmem:[#allocation2 + $0x34] sm:$0xf] }
 0x10d   : > { %v1059_v11 = vadd.f32 %v1058_v10, %v11719_v59  ;;  %v903_v5 = vpop.f32.mrf.mxu0  ;;  %v8250_v10 = vor.u32 %v10754_v4, %v8247_v0  ;;  %v10757_v31 = vld [vmem:[#allocation2 + $0x44] sm:$0xf0] }
 0x10e   : > { %1386 = vst [vmem:[#allocation2 + $0x50] sm:$0xff] %v1358_v8  ;;  %v904_v15 = vadd.f32 %v903_v5, %v11709_v53  ;;  %v1145_v16 = vpop.f32.mrf.mxu3 }
 0x10f   : > { %v1138_v14 = vadd.f32 %v11847_v24, %v1059_v11  ;;  %v11868_v9 = vpop.f32.mrf.mxu1 }
 0x110   : > { %v983_v19 = vadd.f32 %v11849_v23, %v904_v15  ;;  %v8238_v23 = vor.u32 %v10753_v29, %v8237_v33  ;;  %v8255_v33 = vld [vmem:[#allocation2 + $0x48] sm:$0xf0] }
 0x111   : > { %vm1203_vm8 = vcmp.ge.f32.partialorder %v1138_v14, 0.0  ;;  %v1259_v17 = vmul.f32 0.01, %v1138_v14 }
 0x112   : > { %v1260_v28 = vmul.f32 0.01, %v983_v19  ;;  %vm1204_vm9 = vcmp.ge.f32.partialorder %v983_v19, 0.0 }
 0x113   : > { %v1315_v18 = vsel %vm1203_vm8, %v1138_v14, %v1259_v17 }
 0x114   : > { %v1359_v20 = vpack.c.bf16 %v1315_v18, %v1314_v12  ;;  %v1061_v21 = vpop.f32.mrf.mxu2  ;;  %v1316_v36 = vsel %vm1204_vm9, %v983_v19, %v1260_v28 }
 0x115   : > { %v1062_v22 = vadd.f32 %v1061_v21, %v11719_v59  ;;  %v905_v25 = vpop.f32.mrf.mxu0  ;;  %v8261_v4 = vld [vmem:[#allocation2 + $0x50] sm:$0xf] }
 0x116   : > { %1387 = vst [vmem:[#allocation2 + $0x58] sm:$0xff] %v1359_v20  ;;  %v906_v26 = vadd.f32 %v905_v25, %v11709_v53  ;;  %v1147_v30 = vpop.f32.mrf.mxu3 }
 0x117   : > { %v1141_v24 = vadd.f32 %v1140_v46, %v1062_v22  ;;  %v11873_v34 = vpop.f32.mrf.mxu1 }
 0x118   : > { %v985_v38 = vadd.f32 %v11857_v41, %v906_v26 }
 0x119   : > { %vm1205_vm10 = vcmp.ge.f32.partialorder %v1141_v24, 0.0  ;;  %v1261_v32 = vmul.f32 0.01, %v1141_v24 }
 0x11a   : > { %1722 = vmatmul.bf16.gmra.mxu1 %v8238_v23  ;;  %v1262_v45 = vmul.f32 0.01, %v985_v38  ;;  %vm1206_vm11 = vcmp.ge.f32.partialorder %v985_v38, 0.0 }
 0x11b   : > { %v1317_v37 = vsel %vm1205_vm10, %v1141_v24, %v1261_v32  ;;  %1801 = vmatmul.bf16.gmra.mxu3 %v8242_v39 }
 0x11c   : > { %v1360_v27 = vpack.c.bf16 %v1317_v37, %v1316_v36  ;;  %v1063_v40 = vpop.f32.mrf.mxu2  ;;  %v1318_v41 = vsel %vm1206_vm11, %v985_v38, %v1262_v45  ;;  %v10756_v37 = vld [vmem:[#allocation2 + $0x44] sm:$0xf] }
 0x11d   : > { %v1064_v43 = vadd.f32 %v1063_v40, %v11719_v59  ;;  %v908_v44 = vpop.f32.mrf.mxu0  ;;  %v8258_v40 = vor.u32 %v10756_v37, %v8255_v33  ;;  %v10759_v0 = vld [vmem:[#allocation2 + $0x54] sm:$0xf0] }
 0x11e   : > { %1388 = vst [vmem:[#allocation2 + $0x60] sm:$0xff] %v1360_v27  ;;  %v909_v48 = vadd.f32 %v908_v44, %v11709_v53  ;;  %v1150_v42 = vpop.f32.mrf.mxu3 }
 0x11f   : > { %v1143_v46 = vadd.f32 %v1142_v62, %v1064_v43  ;;  %v11878_v50 = vpop.f32.mrf.mxu1 }
 0x120   : > { %v988_v52 = vadd.f32 %v11862_v2, %v909_v48  ;;  %v8246_v2 = vor.u32 %v10755_v60, %v8245_v3  ;;  %v8263_v3 = vld [vmem:[#allocation2 + $0x58] sm:$0xf0] }
 0x121   : > { %vm1207_vm12 = vcmp.ge.f32.partialorder %v1143_v46, 0.0  ;;  %v1263_v49 = vmul.f32 0.01, %v1143_v46 }
 0x122   : > { %v1264_v57 = vmul.f32 0.01, %v988_v52  ;;  %vm1208_vm13 = vcmp.ge.f32.partialorder %v988_v52, 0.0 }
 0x123   : > { %v1319_v51 = vsel %vm1207_vm12, %v1143_v46, %v1263_v49 }
 0x124   : > { %v1361_v54 = vpack.c.bf16 %v1319_v51, %v1318_v41  ;;  %v1066_v55 = vpop.f32.mrf.mxu2  ;;  %v1320_v6 = vsel %vm1208_vm13, %v988_v52, %v1264_v57 }
 0x125   : > { %v1067_v56 = vadd.f32 %v1066_v55, %v11719_v59  ;;  %v910_v47 = vpop.f32.mrf.mxu0  ;;  %v8269_v37 = vld [vmem:[#allocation2 + $0x60] sm:$0xf] }
 0x126   : > { %1389 = vst [vmem:[#allocation2 + $0x68] sm:$0xff] %v1361_v54  ;;  %v911_v62 = vadd.f32 %v910_v47, %v11709_v53  ;;  %v1152_v63 = vpop.f32.mrf.mxu3 }
 0x127   : > { %v1146_v61 = vadd.f32 %v1145_v16, %v1067_v56  ;;  %v11883_v1 = vpop.f32.mrf.mxu1 }
 0x128   : > { %v990_v8 = vadd.f32 %v11868_v9, %v911_v62 }
 0x129   : > { %vm1209_vm14 = vcmp.ge.f32.partialorder %v1146_v61, 0.0  ;;  %v1265_v58 = vmul.f32 0.01, %v1146_v61 }
 0x12a   : > { %1727 = vmatmul.bf16.gmra.mxu1 %v8246_v2  ;;  %v1266_v15 = vmul.f32 0.01, %v990_v8  ;;  %vm1210_vm15 = vcmp.ge.f32.partialorder %v990_v8, 0.0 }
 0x12b   : > { %v1321_v7 = vsel %vm1209_vm14, %v1146_v61, %v1265_v58  ;;  %1806 = vmatmul.bf16.gmra.mxu3 %v8250_v10 }
 0x12c   : > { %v1362_v11 = vpack.c.bf16 %v1321_v7, %v1320_v6  ;;  %v1068_v5 = vpop.f32.mrf.mxu2  ;;  %v1322_v9 = vsel %vm1210_vm15, %v990_v8, %v1266_v15  ;;  %v10758_v7 = vld [vmem:[#allocation2 + $0x54] sm:$0xf] }
 0x12d   : > { %v1069_v13 = vadd.f32 %v1068_v5, %v11719_v59  ;;  %v913_v14 = vpop.f32.mrf.mxu0  ;;  %v8266_v5 = vor.u32 %v10758_v7, %v8263_v3  ;;  %v10761_v33 = vld [vmem:[#allocation2 + $0x64] sm:$0xf0] }
 0x12e   : > { %1390 = vst [vmem:[#allocation2 + $0x70] sm:$0xff] %v1362_v11  ;;  %v914_v17 = vadd.f32 %v913_v14, %v11709_v53  ;;  %v1155_v12 = vpop.f32.mrf.mxu3 }
 0x12f   : > { %v1148_v16 = vadd.f32 %v1147_v30, %v1069_v13  ;;  %v11888_v19 = vpop.f32.mrf.mxu1 }
 0x130   : > { %v993_v21 = vadd.f32 %v11873_v34, %v914_v17  ;;  %v8254_v34 = vor.u32 %v10757_v31, %v8253_v35  ;;  %v8271_v35 = vld [vmem:[#allocation2 + $0x68] sm:$0xf0] }
 0x131   : > { %vm1211_vm1 = vcmp.ge.f32.partialorder %v1148_v16, 0.0  ;;  %v1267_v18 = vmul.f32 0.01, %v1148_v16 }
 0x132   : > { %v1268_v26 = vmul.f32 0.01, %v993_v21  ;;  %vm1212_vm0 = vcmp.ge.f32.partialorder %v993_v21, 0.0 }
 0x133   : > { %v1323_v20 = vsel %vm1211_vm1, %v1148_v16, %v1267_v18 }
 0x134   : > { %v1363_v22 = vpack.c.bf16 %v1323_v20, %v1322_v9  ;;  %v1071_v25 = vpop.f32.mrf.mxu2  ;;  %v1324_v38 = vsel %vm1212_vm0, %v993_v21, %v1268_v26 }
 0x135   : > { %v1072_v28 = vadd.f32 %v1071_v25, %v11719_v59  ;;  %v915_v24 = vpop.f32.mrf.mxu0  ;;  %v8277_v7 = vld [vmem:[#allocation2 + $0x70] sm:$0xf] }
 0x136   : > { %1391 = vst [vmem:[#allocation2 + $0x78] sm:$0xff] %v1363_v22  ;;  %v916_v30 = vadd.f32 %v915_v24, %v11709_v53  ;;  %v1157_v32 = vpop.f32.mrf.mxu3 }
 0x137   : > { %v1151_v29 = vadd.f32 %v1150_v42, %v1072_v28  ;;  %v11893_v36 = vpop.f32.mrf.mxu1 }
 0x138   : > { %v995_v27 = vadd.f32 %v11878_v50, %v916_v30 }
 0x139   : > { %vm1213_vm2 = vcmp.ge.f32.partialorder %v1151_v29, 0.0  ;;  %v1269_v23 = vmul.f32 0.01, %v1151_v29 }
 0x13a   : > { %1732 = vmatmul.bf16.gmra.mxu1 %v8254_v34  ;;  %v1270_v48 = vmul.f32 0.01, %v995_v27  ;;  %vm1214_vm3 = vcmp.ge.f32.partialorder %v995_v27, 0.0 }
 0x13b   : > { %v1325_v39 = vsel %vm1213_vm2, %v1151_v29, %v1269_v23  ;;  %1811 = vmatmul.bf16.gmra.mxu3 %v8258_v40 }
 0x13c   : > { %v1364_v43 = vpack.c.bf16 %v1325_v39, %v1324_v38  ;;  %v1073_v44 = vpop.f32.mrf.mxu2  ;;  %v1326_v50 = vsel %vm1214_vm3, %v995_v27, %v1270_v48  ;;  %v10760_v39 = vld [vmem:[#allocation2 + $0x64] sm:$0xf] }
 0x13d   : > { %v1074_v45 = vadd.f32 %v1073_v44, %v11719_v59  ;;  %v918_v46 = vpop.f32.mrf.mxu0  ;;  %v8274_v44 = vor.u32 %v10760_v39, %v8271_v35  ;;  %v10763_v3 = vld [vmem:[#allocation2 + $0x74] sm:$0xf0] }
 0x13e   : > { %1392 = vst [vmem:[#allocation2 + $0x80] sm:$0xff] %v1364_v43  ;;  %v919_v49 = vadd.f32 %v918_v46, %v11709_v53  ;;  %v1160_v41 = vpop.f32.mrf.mxu3 }
 0x13f   : > { %v1153_v42 = vadd.f32 %v1152_v63, %v1074_v45  ;;  %v11898_v52 = vpop.f32.mrf.mxu1 }
 0x140   : > { %v998_v55 = vadd.f32 %v11883_v1, %v919_v49  ;;  %v8262_v1 = vor.u32 %v10759_v0, %v8261_v4  ;;  %v8279_v4 = vld [vmem:[#allocation2 + $0x78] sm:$0xf0] }
 0x141   : > { %vm1215_vm4 = vcmp.ge.f32.partialorder %v1153_v42, 0.0  ;;  %v1271_v51 = vmul.f32 0.01, %v1153_v42 }
 0x142   : > { %v1272_v62 = vmul.f32 0.01, %v998_v55  ;;  %vm1216_vm5 = vcmp.ge.f32.partialorder %v998_v55, 0.0 }
 0x143   : > { %v1327_v54 = vsel %vm1215_vm4, %v1153_v42, %v1271_v51 }
 0x144   : > { %v1365_v56 = vpack.c.bf16 %v1327_v54, %v1326_v50  ;;  %v1076_v47 = vpop.f32.mrf.mxu2  ;;  %v1328_v8 = vsel %vm1216_vm5, %v998_v55, %v1272_v62 }
 0x145   : > { %v1077_v57 = vadd.f32 %v1076_v47, %v11719_v59  ;;  %v920_v61 = vpop.f32.mrf.mxu0  ;;  %v8285_v39 = vld [vmem:[#allocation2 + $0x80] sm:$0xf] }
 0x146   : > { %1393 = vst [vmem:[#allocation2 + $0x88] sm:$0xff] %v1365_v56  ;;  %v921_v63 = vadd.f32 %v920_v61, %v11709_v53  ;;  %v1162_v58 = vpop.f32.mrf.mxu3 }
 0x147   : > { %v1156_v60 = vadd.f32 %v1155_v12, %v1077_v57  ;;  %v11903_v6 = vpop.f32.mrf.mxu1 }
 0x148   : > { %v1000_v11 = vadd.f32 %v11888_v19, %v921_v63 }
 0x149   : > { %vm1217_vm6 = vcmp.ge.f32.partialorder %v1156_v60, 0.0  ;;  %v1273_v2 = vmul.f32 0.01, %v1156_v60 }
 0x14a   : > { %1737 = vmatmul.bf16.gmra.mxu1 %v8262_v1  ;;  %v1274_v17 = vmul.f32 0.01, %v1000_v11  ;;  %vm1218_vm7 = vcmp.ge.f32.partialorder %v1000_v11, 0.0 }
 0x14b   : > { %v1329_v10 = vsel %vm1217_vm6, %v1156_v60, %v1273_v2  ;;  %1816 = vmatmul.bf16.gmra.mxu3 %v8266_v5 }
 0x14c   : > { %v1366_v13 = vpack.c.bf16 %v1329_v10, %v1328_v8  ;;  %v1078_v14 = vpop.f32.mrf.mxu2  ;;  %v1330_v19 = vsel %vm1218_vm7, %v1000_v11, %v1274_v17  ;;  %v10762_v10 = vld [vmem:[#allocation2 + $0x74] sm:$0xf] }
 0x14d   : > { %v1079_v15 = vadd.f32 %v1078_v14, %v11719_v59  ;;  %v923_v16 = vpop.f32.mrf.mxu0  ;;  %v8282_v14 = vor.u32 %v10762_v10, %v8279_v4  ;;  %v10765_v35 = vld [vmem:[#allocation2 + $0x84] sm:$0xf0] }
 0x14e   : > { %1394 = vst [vmem:[#allocation2 + $0x90] sm:$0xff] %v1366_v13  ;;  %v924_v18 = vadd.f32 %v923_v16, %v11709_v53  ;;  %v1165_v9 = vpop.f32.mrf.mxu3 }
 0x14f   : > { %v1158_v12 = vadd.f32 %v1157_v32, %v1079_v15  ;;  %v11908_v21 = vpop.f32.mrf.mxu1 }
 0x150   : > { %v1003_v25 = vadd.f32 %v11893_v36, %v924_v18  ;;  %v8270_v36 = vor.u32 %v10761_v33, %v8269_v37  ;;  %v8287_v37 = vld [vmem:[#allocation2 + $0x88] sm:$0xf0] }
 0x151   : > { %vm1219_vm8 = vcmp.ge.f32.partialorder %v1158_v12, 0.0  ;;  %v1275_v20 = vmul.f32 0.01, %v1158_v12 }
 0x152   : > { %v1276_v30 = vmul.f32 0.01, %v1003_v25  ;;  %vm1220_vm9 = vcmp.ge.f32.partialorder %v1003_v25, 0.0 }
 0x153   : > { %v1331_v22 = vsel %vm1219_vm8, %v1158_v12, %v1275_v20 }
 0x154   : > { %v1367_v28 = vpack.c.bf16 %v1331_v22, %v1330_v19  ;;  %v1081_v24 = vpop.f32.mrf.mxu2  ;;  %v1332_v27 = vsel %vm1220_vm9, %v1003_v25, %v1276_v30 }
 0x155   : > { %v1082_v26 = vadd.f32 %v1081_v24, %v11719_v59  ;;  %v925_v29 = vpop.f32.mrf.mxu0 }
 0x156   : > { %1395 = vst [vmem:[#allocation2 + $0x98] sm:$0xff] %v1367_v28  ;;  %v926_v32 = vadd.f32 %v925_v29, %v11709_v53  ;;  %v1167_v23 = vpop.f32.mrf.mxu3 }
 0x157   : > { %v1161_v31 = vadd.f32 %v1160_v41, %v1082_v26  ;;  %v11913_v38 = vpop.f32.mrf.mxu1 }
 0x158   : > { %v1005_v43 = vadd.f32 %v11898_v52, %v926_v32 }
 0x159   : > { %vm1221_vm10 = vcmp.ge.f32.partialorder %v1161_v31, 0.0  ;;  %v1277_v34 = vmul.f32 0.01, %v1161_v31 }
 0x15a   : > { %1742 = vmatmul.bf16.gmra.mxu1 %v8270_v36  ;;  %v1278_v49 = vmul.f32 0.01, %v1005_v43  ;;  %vm1222_vm11 = vcmp.ge.f32.partialorder %v1005_v43, 0.0 }
 0x15b   : > { %v1333_v40 = vsel %vm1221_vm10, %v1161_v31, %v1277_v34  ;;  %1821 = vmatmul.bf16.gmra.mxu3 %v8274_v44 }
 0x15c   : > { %v1368_v45 = vpack.c.bf16 %v1333_v40, %v1332_v27  ;;  %v1083_v46 = vpop.f32.mrf.mxu2  ;;  %v1334_v52 = vsel %vm1222_vm11, %v1005_v43, %v1278_v49  ;;  %v10764_v40 = vld [vmem:[#allocation2 + $0x84] sm:$0xf] }
 0x15d   : > { %v1084_v48 = vadd.f32 %v1083_v46, %v11719_v59  ;;  %v928_v42 = vpop.f32.mrf.mxu0  ;;  %v11939_v46 = vld [vmem:[%s16940_s4] ss:$0 sm:$0xff]  ;;  %v10767_v10 = vld [vmem:[#allocation2 + $0x94] sm:$0xf0] }
 0x15e   : > { %1396 = vst [vmem:[#allocation2 + $0xa0] sm:$0xff] %v1368_v45  ;;  %v929_v51 = vadd.f32 %v928_v42, %v11709_v53  ;;  %v1170_v50 = vpop.f32.mrf.mxu3 }
 0x15f   : > { %v1163_v41 = vadd.f32 %v1162_v58, %v1084_v48  ;;  %v11918_v55 = vpop.f32.mrf.mxu1  ;;  %v8290_v48 = vor.u32 %v10764_v40, %v8287_v37 }
 0x160   : > { %v1008_v47 = vadd.f32 %v11903_v6, %v929_v51  ;;  %v8278_v6 = vor.u32 %v10763_v3, %v8277_v7 }
 0x161   : > { %vm1223_vm12 = vcmp.ge.f32.partialorder %v1163_v41, 0.0  ;;  %v1279_v54 = vmul.f32 0.01, %v1163_v41 }
 0x162   : > { %v1280_v63 = vmul.f32 0.01, %v1008_v47  ;;  %vm1224_vm13 = vcmp.ge.f32.partialorder %v1008_v47, 0.0 }
 0x163   : > { %v1335_v56 = vsel %vm1223_vm12, %v1163_v41, %v1279_v54 }
 0x164   : > { %v1369_v57 = vpack.c.bf16 %v1335_v56, %v1334_v52  ;;  %v1086_v61 = vpop.f32.mrf.mxu2  ;;  %v1336_v11 = vsel %vm1224_vm13, %v1008_v47, %v1280_v63 }
 0x165   : > { %v1087_v62 = vadd.f32 %v1086_v61, %v11719_v59  ;;  %v930_v60 = vpop.f32.mrf.mxu0 }
 0x166   : > { %1397 = vst [vmem:[#allocation2 + $0xa8] sm:$0xff] %v1369_v57  ;;  %v931_v58 = vadd.f32 %v930_v60, %v11709_v53  ;;  %v1172_v2 = vpop.f32.mrf.mxu3 }
 0x167   : > { %v1166_v0 = vadd.f32 %v1165_v9, %v1087_v62  ;;  %v11923_v8 = vpop.f32.mrf.mxu1 }
 0x168   : > { %v1010_v13 = vadd.f32 %v11908_v21, %v931_v58 }
 0x169   : > { %vm1225_vm14 = vcmp.ge.f32.partialorder %v1166_v0, 0.0  ;;  %v1281_v1 = vmul.f32 0.01, %v1166_v0 }
 0x16a   : > { %1747 = vmatmul.bf16.gmra.mxu1 %v8278_v6  ;;  %v1282_v18 = vmul.f32 0.01, %v1010_v13  ;;  %vm1226_vm15 = vcmp.ge.f32.partialorder %v1010_v13, 0.0 }
 0x16b   : > { %v1337_v5 = vsel %vm1225_vm14, %v1166_v0, %v1281_v1  ;;  %1826 = vmatmul.bf16.gmra.mxu3 %v8282_v14 }
 0x16c   : > { %v1370_v15 = vpack.c.bf16 %v1337_v5, %v1336_v11  ;;  %v1088_v16 = vpop.f32.mrf.mxu2  ;;  %v1338_v21 = vsel %vm1226_vm15, %v1010_v13, %v1282_v18  ;;  %v8295_v11 = vld [vmem:[#allocation2 + $0x98] sm:$0xf0]  ;;  %v8293_v13 = vld [vmem:[#allocation2 + $0x90] sm:$0xf] }
 0x16d   : > { %v1089_v17 = vadd.f32 %v1088_v16, %v11719_v59  ;;  %v933_v12 = vpop.f32.mrf.mxu0  ;;  %v10769_v37 = vld [vmem:[#allocation2 + $0xa4] sm:$0xf0] }
 0x16e   : > { %1398 = vst [vmem:[#allocation2 + $0xb0] sm:$0xff] %v1370_v15  ;;  %v934_v20 = vadd.f32 %v933_v12, %v11709_v53  ;;  %v1175_v19 = vpop.f32.mrf.mxu3  ;;  %v10766_v15 = vld [vmem:[#allocation2 + $0x94] sm:$0xf] }
 0x16f   : > { %v1168_v9 = vadd.f32 %v1167_v23, %v1089_v17  ;;  %v11928_v25 = vpop.f32.mrf.mxu1  ;;  %v8294_v17 = vor.u32 %v10767_v10, %v8293_v13  ;;  %v8298_v12 = vor.u32 %v10766_v15, %v8295_v11 }
 0x170   : > { %v1013_v24 = vadd.f32 %v11913_v38, %v934_v20  ;;  %v8286_v38 = vor.u32 %v10765_v35, %v8285_v39 }
 0x171   : > { %vm1227_vm1 = vcmp.ge.f32.partialorder %v1168_v9, 0.0  ;;  %v1283_v22 = vmul.f32 0.01, %v1168_v9 }
 0x172   : > { %v1284_v32 = vmul.f32 0.01, %v1013_v24  ;;  %vm1228_vm0 = vcmp.ge.f32.partialorder %v1013_v24, 0.0 }
 0x173   : > { %v1339_v28 = vsel %vm1227_vm1, %v1168_v9, %v1283_v22 }
 0x174   : > { %v1371_v26 = vpack.c.bf16 %v1339_v28, %v1338_v21  ;;  %v1091_v29 = vpop.f32.mrf.mxu2  ;;  %v1340_v43 = vsel %vm1228_vm0, %v1013_v24, %v1284_v32 }
 0x175   : > { %v1092_v30 = vadd.f32 %v1091_v29, %v11719_v59  ;;  %v935_v31 = vpop.f32.mrf.mxu0 }
 0x176   : > { %1399 = vst [vmem:[#allocation2 + $0xb8] sm:$0xff] %v1371_v26  ;;  %v936_v23 = vadd.f32 %v935_v31, %v11709_v53  ;;  %v11933_v34 = vpop.f32.mrf.mxu3 }
 0x177   : > { %v1171_v33 = vadd.f32 %v1170_v50, %v1092_v30  ;;  %v1713_v27 = vpop.f32.mrf.mxu1 }
 0x178   : > { %v1015_v45 = vadd.f32 %v11918_v55, %v936_v23  ;;  %v1714_v54 = vadd.f32 %v11939_v46, %v1713_v27  ;;  %v8301_v27 = vld [vmem:[#allocation2 + $0xa0] sm:$0xf] }
 0x179   : > { %vm1229_vm2 = vcmp.ge.f32.partialorder %v1171_v33, 0.0  ;;  %v1285_v36 = vmul.f32 0.01, %v1171_v33 }
 0x17a   : > { %1752 = vmatmul.bf16.gmra.mxu1 %v8286_v38  ;;  %v1286_v50 = vmul.f32 0.01, %v1015_v45  ;;  %vm1230_vm3 = vcmp.ge.f32.partialorder %v1015_v45, 0.0  ;;  %v10768_v38 = vld [vmem:[#allocation2 + $0xa4] sm:$0xf] }
 0x17b   : > { %v1341_v44 = vsel %vm1229_vm2, %v1171_v33, %v1285_v36  ;;  %1831 = vmatmul.bf16.gmra.mxu3 %v8290_v48  ;;  %v8303_v36 = vld [vmem:[#allocation2 + $0xa8] sm:$0xf0] }
 0x17c   : > { %v1372_v42 = vpack.c.bf16 %v1341_v44, %v1340_v43  ;;  %v1093_v49 = vpop.f32.mrf.mxu2  ;;  %v1342_v62 = vsel %vm1230_vm3, %v1015_v45, %v1286_v50  ;;  %v8306_v40 = vor.u32 %v10768_v38, %v8303_v36 }
 0x17d   : > { %v1094_v41 = vadd.f32 %v1093_v49, %v11719_v59  ;;  %v938_v51 = vpop.f32.mrf.mxu0  ;;  %v10771_v48 = vld [vmem:[#allocation2 + $0xb4] sm:$0xf0] }
 0x17e   : > { %1400 = vst [vmem:[#allocation2 + $0xc0] sm:$0xff] %v1372_v42  ;;  %v939_v55 = vadd.f32 %v938_v51, %v11709_v53  ;;  %v1792_v56 = vpop.f32.mrf.mxu3  ;;  %v8311_v42 = vld [vmem:[#allocation2 + $0xb8] sm:$0xf0]  ;;  %v10770_v51 = vld [vmem:[#allocation2 + $0xb4] sm:$0xf] }
 0x17f   : > { %v1173_v52 = vadd.f32 %v1172_v2, %v1094_v41  ;;  %v11944_v57 = vadd.f32 %v1792_v56, %v1714_v54  ;;  %v1715_v61 = vpop.f32.mrf.mxu1  ;;  %v8309_v41 = vld [vmem:[#allocation2 + $0xb0] sm:$0xf]  ;;  %v8314_v54 = vor.u32 %v10770_v51, %v8311_v42 }
 0x180   : > { %v1018_v63 = vadd.f32 %v11923_v8, %v939_v55  ;;  %v1716_v1 = vadd.f32 %v11939_v46, %v1715_v61  ;;  %v8310_v50 = vor.u32 %v10771_v48, %v8309_v41 }
 0x181   : > { %vm1231_vm4 = vcmp.ge.f32.partialorder %v1173_v52, 0.0  ;;  %v1287_v47 = vmul.f32 0.01, %v1173_v52 }
 0x182   : > { %v1288_v2 = vmul.f32 0.01, %v1018_v63  ;;  %vm1232_vm5 = vcmp.ge.f32.partialorder %v1018_v63, 0.0 }
 0x183   : > { %v1343_v60 = vsel %vm1231_vm4, %v1173_v52, %v1287_v47 }
 0x184   : > { %v1373_v0 = vpack.c.bf16 %v1343_v60, %v1342_v62  ;;  %v1096_v58 = vpop.f32.mrf.mxu2  ;;  %v1344_v18 = vsel %vm1232_vm5, %v1018_v63, %v1288_v2 }
 0x185   : > { %v1097_v3 = vadd.f32 %v1096_v58, %v11719_v59  ;;  %v940_v4 = vpop.f32.mrf.mxu0  ;;  %v8317_v60 = vld [vmem:[#allocation2 + $0xc0] sm:$0xf]  ;;  %v10772_v63 = vld [vmem:[#allocation2 + $0xc4] sm:$0xf] }
 0x186   : > { %1401 = vst [vmem:[#allocation2 + $0xc8] sm:$0xff] %v1373_v0  ;;  %v941_v6 = vadd.f32 %v940_v4, %v11709_v53  ;;  %v1794_v5 = vpop.f32.mrf.mxu3 }
 0x187   : > { %v1176_v7 = vadd.f32 %v1175_v19, %v1097_v3  ;;  %v11950_v8 = vadd.f32 %v1794_v5, %v1716_v1  ;;  %v1718_v16 = vpop.f32.mrf.mxu1 }
 0x188   : > { %v1020_v53 = vadd.f32 %v11928_v25, %v941_v6  ;;  %v1719_v24 = vadd.f32 %v11939_v46, %v1718_v16 }
 0x189   : > { %vm1233_vm6 = vcmp.ge.f32.partialorder %v1176_v7, 0.0  ;;  %v1289_v14 = vmul.f32 0.01, %v1176_v7  ;;  %v1904_v20 = vadd.f32 %v11950_v8, %v11944_v57 }
 0x18a   : > { %1757 = vmatmul.bf16.gmra.mxu1 %v8294_v17  ;;  %v1290_v28 = vmul.f32 0.01, %v1020_v53  ;;  %vm1234_vm7 = vcmp.ge.f32.partialorder %v1020_v53, 0.0 }
 0x18b   : > { %v1345_v9 = vsel %vm1233_vm6, %v1176_v7, %v1289_v14  ;;  %1836 = vmatmul.bf16.gmra.mxu3 %v8298_v12 }
 0x18c   : > { %v1374_v19 = vpack.c.bf16 %v1345_v9, %v1344_v18  ;;  %v1098_v22 = vpop.f32.mrf.mxu2  ;;  %v1346_v25 = vsel %vm1234_vm7, %v1020_v53, %v1290_v28 }
 0x18d   : > { %v1099_v21 = vadd.f32 %v1098_v22, %v11719_v59  ;;  %v10773_v47 = vld [vmem:[#allocation2 + $0xc4] sm:$0xf0]  ;;  %v8319_v61 = vld [vmem:[#allocation2 + $0xc8] sm:$0xf0] }
 0x18e   : > { %1402 = vst [vmem:[#allocation2 + $0xd0] sm:$0xff] %v1374_v19  ;;  %v1797_v29 = vpop.f32.mrf.mxu3  ;;  %v8318_v0 = vor.u32 %v10773_v47, %v8317_v60  ;;  %v8322_v58 = vor.u32 %v10772_v63, %v8319_v61 }
 0x18f   : > { %v1178_v26 = vadd.f32 %v11933_v34, %v1099_v21  ;;  %v11958_v31 = vadd.f32 %v1797_v29, %v1719_v24  ;;  %v1720_v32 = vpop.f32.mrf.mxu1  ;;  %v8302_v34 = vor.u32 %v10769_v37, %v8301_v27 }
 0x190   : > { %v1721_v15 = vadd.f32 %v11939_v46, %v1720_v32 }
 0x191   : > { %vm1235_vm8 = vcmp.ge.f32.partialorder %v1178_v26, 0.0  ;;  %v1291_v30 = vmul.f32 0.01, %v1178_v26  ;;  %v1905_v23 = vadd.f32 %v1904_v20, %v11958_v31 }
 0x193   : > { %v1347_v33 = vsel %vm1235_vm8, %v1178_v26, %v1291_v30 }
 0x194   : > { %v1375_v35 = vpack.c.bf16 %v1347_v33, %v1346_v25 }
 0x195   : > { %v8325_v10 = vld [vmem:[#allocation2 + $0xd0] sm:$0xf]  ;;  %v10774_v11 = vld [vmem:[#allocation2 + $0xd4] sm:$0xf] }
 0x196   : > { %1403 = vst [vmem:[#allocation2 + $0xd8] sm:$0xff] %v1375_v35  ;;  %v1799_v59 = vpop.f32.mrf.mxu3  ;;  %v11429_v35 = vmov 112.0  }
 0x197   : > { %v1723_v39 = vpop.f32.mrf.mxu1  ;;  %v11962_v17 = vadd.f32 %v1799_v59, %v1721_v15  ;;  %11385 = vrcp.f32 %v11429_v35 }
 0x198   : > { %v1724_v12 = vadd.f32 %v11939_v46, %v1723_v39 }
 0x199   : > { %v1906_v20 = vadd.f32 %v1905_v23, %v11962_v17 }
 0x19a   : > { %1762 = vmatmul.bf16.gmra.mxu1 %v8302_v34 }
 0x19b   : > { %1841 = vmatmul.bf16.gmra.mxu3 %v8306_v40 }
 0x19d   : > { %v10775_v1 = vld [vmem:[#allocation2 + $0xd4] sm:$0xf0]  ;;  %v8327_v7 = vld [vmem:[#allocation2 + $0xd8] sm:$0xf0] }
 0x19e   : > { %v1802_v43 = vpop.f32.mrf.mxu3  ;;  %v8326_v5 = vor.u32 %v10775_v1, %v8325_v10  ;;  %v8330_v13 = vor.u32 %v10774_v11, %v8327_v7 }
 0x19f   : > { %v1725_v44 = vpop.f32.mrf.mxu1  ;;  %v11965_v18 = vadd.f32 %v1802_v43, %v1724_v12  ;;  %v11386_v43 = vpop.eup %11385 }
 0x1a0   : > { %v1726_v9 = vadd.f32 %v11939_v46, %v1725_v44  ;;  %v1924_v41 = vmul.f32 112.0, %v11386_v43  ;;  %vm1928_vm9 = vweird.f32 %v11386_v43 }
 0x1a1   : > { %v1907_v21 = vadd.f32 %v1906_v20, %v11965_v18 }
 0x1a6   : > { %v1804_v45 = vpop.f32.mrf.mxu3 }
 0x1a7   : > { %v1728_v49 = vpop.f32.mrf.mxu1  ;;  %v11969_v53 = vadd.f32 %v1804_v45, %v1726_v9 }
 0x1a8   : > { %v1729_v19 = vadd.f32 %v11939_v46, %v1728_v49 }
 0x1a9   : > { %v1908_v29 = vadd.f32 %v1907_v21, %v11969_v53 }
 0x1aa   : > { %1767 = vmatmul.bf16.gmra.mxu1 %v8310_v50 }
 0x1ab   : > { %1846 = vmatmul.bf16.gmra.mxu3 %v8314_v54 }
 0x1ae   : > { %v1807_v52 = vpop.f32.mrf.mxu3 }
 0x1af   : > { %v1730_v55 = vpop.f32.mrf.mxu1  ;;  %v11973_v28 = vadd.f32 %v1807_v52, %v1729_v19 }
 0x1b0   : > { %v1731_v24 = vadd.f32 %v11939_v46, %v1730_v55 }
 0x1b1   : > { %v1909_v25 = vadd.f32 %v1908_v29, %v11973_v28 }
 0x1b6   : > { %v1809_v56 = vpop.f32.mrf.mxu3 }
 0x1b7   : > { %v1733_v62 = vpop.f32.mrf.mxu1  ;;  %v11977_v30 = vadd.f32 %v1809_v56, %v1731_v24  ;;  %v1925_v56 = vsub.f32 1.0, %v1924_v41 }
 0x1b8   : > { %v1734_v32 = vadd.f32 %v11939_v46, %v1733_v62 }
 0x1b9   : > { %v1910_v59 = vadd.f32 %v1909_v25, %v11977_v30  ;;  %v1926_v60 = vmul.f32 %v11386_v43, %v1925_v56 }
 0x1ba   : > { %1772 = vmatmul.bf16.gmra.mxu1 %v8318_v0 }
 0x1bb   : > { %1851 = vmatmul.bf16.gmra.mxu3 %v8322_v58 }
 0x1be   : > { %v1812_v3 = vpop.f32.mrf.mxu3 }
 0x1bf   : > { %v1735_v4 = vpop.f32.mrf.mxu1  ;;  %v11981_v33 = vadd.f32 %v1812_v3, %v1734_v32 }
 0x1c0   : > { %v1736_v23 = vadd.f32 %v11939_v46, %v1735_v4 }
 0x1c1   : > { %v1911_v27 = vadd.f32 %v1910_v59, %v11981_v33 }
 0x1c6   : > { %v1814_v2 = vpop.f32.mrf.mxu3 }
 0x1c7   : > { %v1738_v6 = vpop.f32.mrf.mxu1  ;;  %v11985_v37 = vadd.f32 %v1814_v2, %v1736_v23  ;;  %v1927_v2 = vadd.f32 %v11386_v43, %v1926_v60 }
 0x1c8   : > { %v1739_v36 = vadd.f32 %v11939_v46, %v1738_v6 }
 0x1c9   : > { %v1912_v44 = vadd.f32 %v1911_v27, %v11985_v37  ;;  %v12008_v10 = vsel %vm1928_vm9, %v11386_v43, %v1927_v2 }
 0x1ca   : > { %1777 = vmatmul.bf16.gmra.mxu1 %v8326_v5 }
 0x1cb   : > { %1856 = vmatmul.bf16.gmra.mxu3 %v8330_v13 }
 0x1ce   : > { %v1817_v14 = vpop.f32.mrf.mxu3 }
 0x1cf   : > { %v1740_v16 = vpop.f32.mrf.mxu1  ;;  %v11989_v38 = vadd.f32 %v1817_v14, %v1739_v36 }
 0x1d0   : > { %v1741_v34 = vadd.f32 %v11939_v46, %v1740_v16 }
 0x1d1   : > { %v1913_v42 = vadd.f32 %v1912_v44, %v11989_v38 }
 0x1d6   : > { %v1819_v22 = vpop.f32.mrf.mxu3 }
 0x1d7   : > { %v1743_v26 = vpop.f32.mrf.mxu1  ;;  %v11993_v45 = vadd.f32 %v1819_v22, %v1741_v34 }
 0x1d8   : > { %v1744_v48 = vadd.f32 %v11939_v46, %v1743_v26 }
 0x1d9   : > { %v1914_v51 = vadd.f32 %v1913_v42, %v11993_v45 }
 0x1de   : > { %v1822_v39 = vpop.f32.mrf.mxu3 }
 0x1df   : > { %v1745_v40 = vpop.f32.mrf.mxu1  ;;  %v11997_v49 = vadd.f32 %v1822_v39, %v1744_v48 }
 0x1e0   : > { %v1746_v50 = vadd.f32 %v11939_v46, %v1745_v40 }
 0x1e1   : > { %v1915_v52 = vadd.f32 %v1914_v51, %v11997_v49 }
 0x1e6   : > { %v1824_v54 = vpop.f32.mrf.mxu3 }
 0x1e7   : > { %v12002_v55 = vadd.f32 %v1824_v54, %v1746_v50  ;;  %v1748_v47 = vpop.f32.mrf.mxu1 }
 0x1e8   : > { %v1749_v0 = vadd.f32 %v11939_v46, %v1748_v47 }
 0x1e9   : > { %v1916_v61 = vadd.f32 %v1915_v52, %v12002_v55 }
 0x1eb   : > { %v1917_v62 = vrot.slane %v1916_v61, 4 }
 0x1ed   : > { %v1918_v63 = vadd.f32 %v1917_v62, %v1916_v61 }
 0x1ee   : > { %v1827_v58 = vpop.f32.mrf.mxu3 }
 0x1ef   : > { %v1919_v3 = vrot.slane %v1918_v63, 2  ;;  %v12006_v4 = vadd.f32 %v1827_v58, %v1749_v0  ;;  %v1750_v1 = vpop.f32.mrf.mxu1 }
 0x1f0   : > { %v1751_v19 = vadd.f32 %v11939_v46, %v1750_v1 }
 0x1f1   : > { %v1920_v7 = vadd.f32 %v1919_v3, %v1918_v63 }
 0x1f3   : > { %v1921_v6 = vrot.slane %v1920_v7, 1 }
 0x1f5   : > { %v1922_v11 = vadd.f32 %v1921_v6, %v1920_v7 }
 0x1f6   : > { %v1829_v5 = vpop.f32.mrf.mxu3 }
 0x1f7   : > { %v1930_v13 = vmul.f32 %v12008_v10, %v1922_v11  ;;  %v1753_v14 = vpop.f32.mrf.mxu1  ;;  %v12028_v21 = vadd.f32 %v1829_v5, %v1751_v19  ;;  %v10821_v11 = vld [vmem:[%s16943_s7 + $0x74] sm:$0xf0]  ;;  %v8573_v5 = vld [vmem:[%s16943_s7 + $0xf0] sm:$0xf] }
 0x1f8   : > { %v1754_v26 = vadd.f32 %v11939_v46, %v1753_v14 }
 0x1f9   : > { %v12012_v15 = vsub.f32 %v11944_v57, %v1930_v13  ;;  %v12015_v16 = vsub.f32 %v11950_v8, %v1930_v13  ;;  %v12018_v12 = vsub.f32 %v11958_v31, %v1930_v13  ;;  %v12026_v22 = vsub.f32 %v11962_v17, %v1930_v13 }
 0x1fa   : > { %v12031_v8 = vsub.f32 %v11965_v18, %v1930_v13  ;;  %v12039_v32 = vsub.f32 %v11969_v53, %v1930_v13  ;;  %v2096_v23 = vadd.f32 %v12028_v21, %v12006_v4  ;;  %v12048_v35 = vsub.f32 %v11973_v28, %v1930_v13 }
 0x1fb   : > { %v1945_v9 = vmul.f32 %v12012_v15, %v12012_v15  ;;  %v1946_v20 = vmul.f32 %v12015_v16, %v12015_v16  ;;  %v1947_v31 = vmul.f32 %v12018_v12, %v12018_v12  ;;  %v1948_v17 = vmul.f32 %v12026_v22, %v12026_v22 }
 0x1fc   : > { %v1949_v59 = vmul.f32 %v12031_v8, %v12031_v8  ;;  %v12056_v53 = vsub.f32 %v11977_v30, %v1930_v13  ;;  %v1950_v27 = vmul.f32 %v12039_v32, %v12039_v32  ;;  %v12063_v43 = vsub.f32 %v11981_v33, %v1930_v13 }
 0x1fd   : > { %v1959_v24 = vadd.f32 %v1946_v20, %v1945_v9  ;;  %v1951_v28 = vmul.f32 %v12048_v35, %v12048_v35  ;;  %v12070_v42 = vsub.f32 %v11985_v37, %v1930_v13  ;;  %v12075_v51 = vsub.f32 %v11989_v38, %v1930_v13  ;;  %v10837_v9 = vld [vmem:[%s16943_s7 + $0xf4] sm:$0xf0] }
 0x1fe   : > { %v1832_v57 = vpop.f32.mrf.mxu3  ;;  %v1952_v30 = vmul.f32 %v12056_v53, %v12056_v53  ;;  %v1953_v33 = vmul.f32 %v12063_v43, %v12063_v43  ;;  %v12080_v54 = vsub.f32 %v11993_v45, %v1930_v13  ;;  %v12087_v47 = vsub.f32 %v11997_v49, %v1930_v13 }
 0x1ff   : > { %v12036_v29 = vpop.f32.mrf.mxu1  ;;  %v1960_v25 = vadd.f32 %v1959_v24, %v1947_v31  ;;  %v12045_v18 = vadd.f32 %v1832_v57, %v1754_v26  ;;  %v1954_v52 = vmul.f32 %v12070_v42, %v12070_v42  ;;  %v1955_v38 = vmul.f32 %v12075_v51, %v12075_v51  ;;  %v8501_v31 = vld [vmem:[%s16943_s7 + $0x60] sm:$0xf]  ;;  %v10819_v24 = vld [vmem:[%s16943_s7 + $0x64] sm:$0xf0] }
 0x200   : > { %v12094_v60 = vsub.f32 %v12002_v55, %v1930_v13  ;;  %v1956_v45 = vmul.f32 %v12080_v54, %v12080_v54  ;;  %v1957_v0 = vmul.f32 %v12087_v47, %v12087_v47  ;;  %v8509_v55 = vld [vmem:[%s16943_s7 + $0x70] sm:$0xf]  ;;  %v8574_v20 = vor.u32 %v10837_v9, %v8573_v5  ;;  %v10829_v5 = vld [vmem:[%s16943_s7 + $0xb4] sm:$0xf0]  ;;  %v8469_v9 = vld [vmem:[%s16943_s7 + $0x20] sm:$0xf] }
 0x201   : > { %v1961_v36 = vadd.f32 %v1960_v25, %v1948_v17  ;;  %v12053_v39 = vadd.f32 %v2096_v23, %v12045_v18  ;;  %v8510_v14 = vor.u32 %v10821_v11, %v8509_v55  ;;  %v8502_v25 = vor.u32 %v10819_v24, %v8501_v31  ;;  %v8565_v23 = vld [vmem:[%s16943_s7 + $0xe0] sm:$0xf]  ;;  %v8541_v55 = vld [vmem:[%s16943_s7 + $0xb0] sm:$0xf] }
 0x202   : > { %v1958_v49 = vmul.f32 %v12094_v60, %v12094_v60  ;;  %2593 = vmatpush.bf16.msrb.mxu2 %v8574_v20  ;;  %v10811_v20 = vld [vmem:[%s16943_s7 + $0x24] sm:$0xf0] }
 0x203   : > { %v1962_v34 = vadd.f32 %v1961_v36, %v1949_v59  ;;  %2549 = vmatpush.bf16.msrb.mxu0 %v8510_v14  ;;  %v10835_v59 = vld [vmem:[%s16943_s7 + $0xe4] sm:$0xf0] }
 0x204   : > { %v8566_v36 = vor.u32 %v10835_v59, %v8565_v23  ;;  %v1756_v59 = vadd.f32 %v11939_v46, %v12036_v29 }
 0x205   : > { %v1963_v44 = vadd.f32 %v1962_v34, %v1950_v27  ;;  %v8493_v34 = vld [vmem:[%s16943_s7 + $0x50] sm:$0xf] }
 0x206   : > { %v12060_v40 = vpop.f32.mrf.mxu3  ;;  %2594 = vmatpush.bf16.msrb.mxu2 %v8566_v36 }
 0x207   : > { %v12067_v48 = vpop.f32.mrf.mxu1  ;;  %v1964_v41 = vadd.f32 %v1963_v44, %v1951_v28  ;;  %2550 = vmatpush.bf16.msrb.mxu0 %v8502_v25  ;;  %v10817_v28 = vld [vmem:[%s16943_s7 + $0x54] sm:$0xf0]  ;;  %v8557_v44 = vld [vmem:[%s16943_s7 + $0xd0] sm:$0xf]  ;;  %v10827_v25 = vld [vmem:[%s16943_s7 + $0xa4] sm:$0xf0] }
 0x208   : > { %v1759_v29 = vadd.f32 %v11939_v46, %v12067_v48  ;;  %v8517_v48 = vld [vmem:[%s16943_s7 + $0x80] sm:$0xf] }
 0x209   : > { %v1965_v50 = vadd.f32 %v1964_v41, %v1952_v30  ;;  %v8494_v41 = vor.u32 %v10817_v28, %v8493_v34  ;;  %v8461_v34 = vld [vmem:[%s16943_s7 + $0x10] sm:$0xf]  ;;  %v10809_v28 = vld [vmem:[%s16943_s7 + $0x14] sm:$0xf0] }
 0x20b   : > { %v1966_v56 = vadd.f32 %v1965_v50, %v1953_v33  ;;  %v10833_v33 = vld [vmem:[%s16943_s7 + $0xd4] sm:$0xf0]  ;;  %2551 = vmatpush.bf16.msrb.mxu0 %v8494_v41  ;;  %v8462_v41 = vor.u32 %v10809_v28, %v8461_v34 }
 0x20c   : > { %v8558_v50 = vor.u32 %v10833_v33, %v8557_v44  ;;  %v8525_v44 = vld [vmem:[%s16943_s7 + $0x90] sm:$0xf]  ;;  %v10825_v33 = vld [vmem:[%s16943_s7 + $0x94] sm:$0xf0] }
 0x20d   : > { %v1967_v61 = vadd.f32 %v1966_v56, %v1954_v52 }
 0x20e   : > { %v12084_v37 = vpop.f32.mrf.mxu3  ;;  %2595 = vmatpush.bf16.msrb.mxu2 %v8558_v50  ;;  %v8453_v50 = vld [vmem:[%s16943_s7] sm:$0xf] }
 0x20f   : > { %v12091_v62 = vpop.f32.mrf.mxu1  ;;  %v1968_v63 = vadd.f32 %v1967_v61, %v1955_v38  ;;  %v8485_v38 = vld [vmem:[%s16943_s7 + $0x40] sm:$0xf]  ;;  %v10815_v61 = vld [vmem:[%s16943_s7 + $0x44] sm:$0xf0] }
 0x211   : > { %v1969_v58 = vadd.f32 %v1968_v63, %v1956_v45  ;;  %v8549_v45 = vld [vmem:[%s16943_s7 + $0xc0] sm:$0xf] }
 0x213   : > { %v1970_v3 = vadd.f32 %v1969_v58, %v1957_v0  ;;  %v8486_v58 = vor.u32 %v10815_v61, %v8485_v38  ;;  %v10823_v61 = vld [vmem:[%s16943_s7 + $0x84] sm:$0xf0] }
 0x215   : > { %v1971_v1 = vadd.f32 %v1970_v3, %v1958_v49  ;;  %v10831_v49 = vld [vmem:[%s16943_s7 + $0xc4] sm:$0xf0]  ;;  %2552 = vmatpush.bf16.msrb.mxu0 %v8486_v58 }
 0x216   : > { %v12102_v2 = vpop.f32.mrf.mxu3  ;;  %v8550_v3 = vor.u32 %v10831_v49, %v8549_v45  ;;  %v12223_v45 = vadd.f32 %v12084_v37, %v1759_v29 }
 0x217   : > { %v12104_v7 = vpop.f32.mrf.mxu1  ;;  %v1972_v6 = vrot.slane %v1971_v1, 4 }
 0x218   : > { %2596 = vmatpush.bf16.msrb.mxu2 %v8550_v3 }
 0x219   : > { %v1973_v13 = vadd.f32 %v1972_v6, %v1971_v1  ;;  %v8477_v1 = vld [vmem:[%s16943_s7 + $0x30] sm:$0xf]  ;;  %v10813_v6 = vld [vmem:[%s16943_s7 + $0x34] sm:$0xf0] }
 0x21a   : > { %v8478_v11 = vor.u32 %v10813_v6, %v8477_v1 }
 0x21b   : > { %v1974_v19 = vrot.slane %v1973_v13, 2 }
 0x21c   : > { %2553 = vmatpush.bf16.msrb.mxu0 %v8478_v11 }
 0x21d   : > { %v1975_v26 = vadd.f32 %v1974_v19, %v1973_v13  ;;  %v8542_v13 = vor.u32 %v10829_v5, %v8541_v55  ;;  %v8533_v19 = vld [vmem:[%s16943_s7 + $0xa0] sm:$0xf]  ;;  %v8518_v55 = vor.u32 %v10823_v61, %v8517_v48  ;;  %v1761_v5 = vadd.f32 %v11939_v46, %v12091_v62 }
 0x21e   : > { %v12118_v57 = vpop.f32.mrf.mxu3  ;;  %v8534_v36 = vor.u32 %v10827_v25, %v8533_v19 }
 0x21f   : > { %v12126_v17 = vpop.f32.mrf.mxu1  ;;  %v1976_v27 = vrot.slane %v1975_v26, 1  ;;  %2597 = vmatpush.bf16.msrb.mxu2 %v8542_v13 }
 0x221   : > { %v1977_v30 = vadd.f32 %v1976_v27, %v1975_v26  ;;  %v8470_v26 = vor.u32 %v10811_v20, %v8469_v9  ;;  %v12235_v9 = vadd.f32 %v12102_v2, %v1761_v5  ;;  %v1766_v20 = vadd.f32 %v11939_v46, %v12126_v17 }
 0x223   : > { %v1978_v52 = vmul.f32 %v1977_v30, %v12008_v10  ;;  %2554 = vmatpush.bf16.msrb.mxu0 %v8470_v26  ;;  %v12203_v30 = vadd.f32 %v12060_v40, %v1756_v59  ;;  %2598 = vmatpush.bf16.msrb.mxu2 %v8534_v36  ;;  %v8526_v40 = vor.u32 %v10825_v33, %v8525_v44 }
 0x225   : > { %v1980_v63 = vadd.f32 1e-05, %v1978_v52  ;;  %v10807_v52 = vld [vmem:[%s16943_s7 + $0x4] sm:$0xf0]  ;;  %v2098_v1 = vadd.f32 %v12053_v39, %v12203_v30  ;;  %v1764_v39 = vadd.f32 %v11939_v46, %v12104_v7 }
 0x226   : > { %v12147_v56 = vpop.f32.mrf.mxu3  ;;  %v8454_v49 = vor.u32 %v10807_v52, %v8453_v50 }
 0x227   : > { %v12158_v0 = vpop.f32.mrf.mxu1  ;;  %11387 = vrsqrt.f32 %v1980_v63  ;;  %2555 = vmatpush.bf16.msrb.mxu0 %v8462_v41  ;;  %2599 = vmatpush.bf16.msrb.mxu2 %v8526_v40  ;;  %vm1987_vm11 = vweird.f32 %v1980_v63  ;;  %v2099_v37 = vadd.f32 %v2098_v1, %v12223_v45 }
 0x22b   : > { %2556 = vmatpush.bf16.msrb.mxu0 %v8454_v49  ;;  %2600 = vmatpush.bf16.msrb.mxu2 %v8518_v55 }
 0x22d   : > { %v11388_v31 = vpop.eup %11387 }
 0x22e   : > { %v12175_v14 = vpop.f32.mrf.mxu3  ;;  %v1982_v23 = vmul.f32 %v11388_v31, %v1980_v63  ;;  %vm1988_vm10 = vweird.f32 %v11388_v31 }
 0x22f   : > { %v12186_v24 = vpop.f32.mrf.mxu1  ;;  %vm1989_vm12 = vmor %vm1987_vm11, %vm1988_vm10  ;;  %vm2961_vm10 = vcmask 1043456   ;;  %vm2962_vm11 = vsmask.f32 3328 }
 0x230   : > { %v1983_v27 = vmul.f32 %v11388_v31, %v1982_v23 }
 0x232   : > { %v1984_v38 = vmul.f32 0.5, %v1983_v27 }
 0x234   : > { %v1985_v3 = vsub.f32 1.5, %v1984_v38 }
 0x236   : > { %v12225_v58 = vpop.f32.mrf.mxu3  ;;  %v1986_v11 = vmul.f32 %v11388_v31, %v1985_v3 }
 0x237   : > { %v12229_v6 = vpop.f32.mrf.mxu1 }
 0x238   : > { %v1990_v13 = vsel %vm1989_vm12, %v11388_v31, %v1986_v11  ;;  %v11381_v31 = vld [vmem:[%s16941_s5] ss:$0 sm:$0xff]  ;;  %vm2964_vm12 = vcmask 1047556  }
 0x239   : > { %v1991_v19 = vmul.f32 %v1990_v13, %v12012_v15  ;;  %v1992_v63 = vmul.f32 %v1990_v13, %v12015_v16  ;;  %v1993_v62 = vmul.f32 %v1990_v13, %v12018_v12  ;;  %v1994_v26 = vmul.f32 %v1990_v13, %v12026_v22 }
 0x23a   : > { %v1995_v2 = vmul.f32 %v1990_v13, %v12031_v8  ;;  %v1996_v7 = vmul.f32 %v1990_v13, %v12039_v32  ;;  %v1997_v25 = vmul.f32 %v1990_v13, %v12048_v35  ;;  %v1998_v17 = vmul.f32 %v1990_v13, %v12056_v53  ;;  %v11382_v32 = vld [vmem:[%s16942_s6] ss:$0 sm:$0xff] }
 0x23b   : > { %v1999_v15 = vmul.f32 %v1990_v13, %v12063_v43  ;;  %v2000_v16 = vmul.f32 %v1990_v13, %v12070_v42  ;;  %v2001_v12 = vmul.f32 %v1990_v13, %v12075_v51  ;;  %v2002_v22 = vmul.f32 %v1990_v13, %v12080_v54 }
 0x23c   : > { %v2003_v59 = vmul.f32 %v1990_v13, %v12087_v47  ;;  %v2004_v8 = vmul.f32 %v1990_v13, %v12094_v60  ;;  %v2100_v35 = vadd.f32 %v2099_v37, %v12235_v9  ;;  %v12265_v53 = vadd.f32 %v12118_v57, %v1764_v39 }
 0x23d   : > { %v2012_v43 = vmul.f32 %v11381_v31, %v1995_v2  ;;  %v2013_v42 = vmul.f32 %v11381_v31, %v1996_v7  ;;  %v12268_v51 = vadd.f32 %v12147_v56, %v1766_v20  ;;  %v1769_v54 = vadd.f32 %v11939_v46, %v12158_v0 }
 0x23e   : > { %v12256_v23 = vpop.f32.mrf.mxu3  ;;  %v2014_v60 = vmul.f32 %v11381_v31, %v1997_v25  ;;  %v2015_v36 = vmul.f32 %v11381_v31, %v1998_v17  ;;  %v2016_v27 = vmul.f32 %v11381_v31, %v1999_v15  ;;  %v2017_v34 = vmul.f32 %v11381_v31, %v2000_v16 }
 0x23f   : > { %v12272_v47 = vpop.f32.mrf.mxu1  ;;  %v2008_v28 = vmul.f32 %v11381_v31, %v1991_v19  ;;  %v2018_v44 = vmul.f32 %v11381_v31, %v2001_v12  ;;  %v2019_v29 = vmul.f32 %v11381_v31, %v2002_v22  ;;  %v2020_v41 = vmul.f32 %v11381_v31, %v2003_v59 }
 0x240   : > { %v2009_v57 = vmul.f32 %v11381_v31, %v1992_v63  ;;  %v2010_v33 = vmul.f32 %v11381_v31, %v1993_v62  ;;  %v2021_v50 = vmul.f32 %v11381_v31, %v2004_v8  ;;  %v2030_v52 = vadd.f32 %v11382_v32, %v2012_v43 }
 0x241   : > { %v2031_v38 = vadd.f32 %v11382_v32, %v2013_v42  ;;  %v2032_v56 = vadd.f32 %v11382_v32, %v2014_v60  ;;  %v2033_v40 = vadd.f32 %v11382_v32, %v2015_v36  ;;  %v2034_v48 = vadd.f32 %v11382_v32, %v2016_v27 }
 0x242   : > { %v2011_v61 = vmul.f32 %v11381_v31, %v1994_v26  ;;  %v2035_v0 = vadd.f32 %v11382_v32, %v2017_v34  ;;  %v2036_v49 = vadd.f32 %v11382_v32, %v2018_v44  ;;  %v2037_v3 = vadd.f32 %v11382_v32, %v2019_v29 }
 0x243   : > { %v2038_v1 = vadd.f32 %v11382_v32, %v2020_v41  ;;  %v2044_v55 = vmax.f32 %v2030_v52, 0.0  ;;  %v2045_v11 = vmax.f32 %v2031_v38, 0.0  ;;  %v2046_v5 = vmax.f32 %v2032_v56, 0.0 }
 0x244   : > { %v2039_v13 = vadd.f32 %v11382_v32, %v2021_v50  ;;  %v2047_v39 = vmax.f32 %v2033_v40, 0.0  ;;  %v2048_v20 = vmax.f32 %v2034_v48, 0.0  ;;  %v2049_v19 = vmax.f32 %v2035_v0, 0.0 }
 0x245   : > { %v2026_v63 = vadd.f32 %v11382_v32, %v2008_v28  ;;  %v2027_v62 = vadd.f32 %v11382_v32, %v2009_v57  ;;  %v2050_v2 = vmax.f32 %v2036_v49, 0.0  ;;  %v2058_v7 = vpack.c.bf16 %v2044_v55, %v2044_v55 }
 0x246   : > { %v1854_v37 = vpop.f32.mrf.mxu3  ;;  %v2051_v17 = vmax.f32 %v2037_v3, 0.0  ;;  %v2059_v15 = vpack.c.bf16 %v2045_v11, %v2045_v11  ;;  %v2060_v26 = vpack.c.bf16 %v2046_v5, %v2046_v5  ;;  %v2068_v31 = vpack.c.bf16 %v2047_v39, %v2047_v39 }
 0x247   : > { %v1778_v25 = vpop.f32.mrf.mxu1  ;;  %v2052_v16 = vmax.f32 %v2038_v1, 0.0  ;;  %v2069_v12 = vpack.c.bf16 %v2048_v20, %v2048_v20  ;;  %2065 = vst [vmem:[#allocation4 + $0x20] sm:$0xf] %v2058_v7  ;;  %v2101_v22 = vadd.f32 %v2100_v35, %v12265_v53  ;;  %v12276_v59 = vadd.f32 %v12175_v14, %v1769_v54 }
 0x248   : > { %v2029_v8 = vadd.f32 %v11382_v32, %v2011_v61  ;;  %v2053_v43 = vmax.f32 %v2039_v13, 0.0  ;;  %2066 = vst [vmem:[#allocation4 + $0x28] sm:$0xf] %v2059_v15  ;;  %v2070_v42 = vpack.c.bf16 %v2049_v19, %v2049_v19  ;;  %v1771_v60 = vadd.f32 %v11939_v46, %v12186_v24 }
 0x249   : > { %2067 = vst [vmem:[#allocation4 + $0x30] sm:$0xf] %v2060_v26  ;;  %v2071_v36 = vpack.c.bf16 %v2050_v2, %v2050_v2  ;;  %v2102_v27 = vadd.f32 %v2101_v22, %v12268_v51  ;;  %v2040_v34 = vmax.f32 %v2026_v63, 0.0  ;;  %v2028_v28 = vadd.f32 %v11382_v32, %v2010_v33 }
 0x24a   : > { %v2072_v44 = vpack.c.bf16 %v2051_v17, %v2051_v17  ;;  %2075 = vst [vmem:[#allocation4 + $0x4] sm:$0xf] %v2068_v31  ;;  %v12282_v35 = vadd.f32 %v12225_v58, %v1771_v60  ;;  %v1774_v14 = vadd.f32 %v11939_v46, %v12229_v6  ;;  %v2041_v54 = vmax.f32 %v2027_v62, 0.0 }
 0x24b   : > { %v2073_v29 = vpack.c.bf16 %v2052_v16, %v2052_v16  ;;  %2076 = vst [vmem:[#allocation4 + $0xc] sm:$0xf] %v2069_v12  ;;  %v2103_v41 = vadd.f32 %v2102_v27, %v12276_v59  ;;  %v2042_v57 = vmax.f32 %v2028_v28, 0.0  ;;  %v2074_v50 = vpack.c.bf16 %v2053_v43, %v2053_v43 }
 0x24c   : > { %2077 = vst [vmem:[#allocation4 + $0x14] sm:$0xf] %v2070_v42  ;;  %v12288_v52 = vadd.f32 %v12256_v23, %v1774_v14  ;;  %v1776_v32 = vadd.f32 %v11939_v46, %v12272_v47  ;;  %v2043_v58 = vmax.f32 %v2029_v8, 0.0  ;;  %v2054_v33 = vpack.c.bf16 %v2040_v34, %v2040_v34 }
 0x24d   : > { %2078 = vst [vmem:[#allocation4 + $0x1c] sm:$0xf] %v2071_v36  ;;  %v2104_v6 = vadd.f32 %v2103_v41, %v12282_v35  ;;  %v1779_v56 = vadd.f32 %v11939_v46, %v1778_v25  ;;  %v2055_v40 = vpack.c.bf16 %v2041_v54, %v2041_v54  ;;  %v2056_v61 = vpack.c.bf16 %v2042_v57, %v2042_v57 }
 0x24e   : > { %v1857_v24 = vpop.f32.mrf.mxu3  ;;  %2079 = vst [vmem:[#allocation4 + $0x24] sm:$0xf] %v2072_v44  ;;  %v12293_v38 = vadd.f32 %v1854_v37, %v1776_v32  ;;  %v2057_v47 = vpack.c.bf16 %v2043_v58, %v2043_v58 }
 0x24f   : > { %2080 = vst [vmem:[#allocation4 + $0x2c] sm:$0xf] %v2073_v29  ;;  %v1780_v48 = vpop.f32.mrf.mxu1  ;;  %v2105_v23 = vadd.f32 %v2104_v6, %v12288_v52  ;;  %v12297_v0 = vadd.f32 %v1857_v24, %v1779_v56 }
 0x250   : > { %2081 = vst [vmem:[#allocation4 + $0x34] sm:$0xf] %v2074_v50  ;;  %v1781_v55 = vadd.f32 %v11939_v46, %v1780_v48  ;;  %v10797_v48 = vld [vmem:[#allocation4 + $0x24] sm:$0xf0] }
 0x251   : > { %2061 = vst [vmem:[#allocation4] sm:$0xf] %v2054_v33  ;;  %v10792_v49 = vld [vmem:[#allocation4 + $0x4] sm:$0xf]  ;;  %v2106_v3 = vadd.f32 %v2105_v23, %v12293_v38 }
 0x252   : > { %2062 = vst [vmem:[#allocation4 + $0x8] sm:$0xf] %v2055_v40  ;;  %v8399_v1 = vld [vmem:[#allocation4 + $0x8] sm:$0xf0]  ;;  %v8413_v40 = vld [vmem:[#allocation4 + $0x20] sm:$0xf] }
 0x253   : > { %v12301_v11 = vor.u32 %v10792_v49, %v8399_v1  ;;  %2063 = vst [vmem:[#allocation4 + $0x10] sm:$0xf] %v2056_v61  ;;  %v2107_v37 = vadd.f32 %v2106_v3, %v12297_v0  ;;  %v10794_v17 = vld [vmem:[#allocation4 + $0x14] sm:$0xf] }
 0x254   : > { %2064 = vst [vmem:[#allocation4 + $0x18] sm:$0xf] %v2057_v47  ;;  %v8407_v15 = vld [vmem:[#allocation4 + $0x18] sm:$0xf0]  ;;  %v12356_v47 = vor.u32 %v10797_v48, %v8413_v40 }
 0x255   : > { %2601 = vmatmul.bf16.vlgmr.msrb.gmra.mxu2 %v12301_v11  ;;  %v12311_v31 = vor.u32 %v10794_v17, %v8407_v15  ;;  %v10796_v54 = vld [vmem:[#allocation4 + $0x24] sm:$0xf] }
 0x256   : > { %v1859_v5 = vpop.f32.mrf.mxu3  ;;  %v8415_v29 = vld [vmem:[#allocation4 + $0x28] sm:$0xf0] }
 0x257   : > { %v12304_v13 = vadd.f32 %v1859_v5, %v1781_v55 }
 0x258   : > { %v8397_v20 = vld [vmem:[#allocation4] sm:$0xf] }
 0x259   : > { %v2108_v39 = vadd.f32 %v2107_v37, %v12304_v13  ;;  %v10793_v63 = vld [vmem:[#allocation4 + $0x4] sm:$0xf0] }
 0x25a   : > { %v12308_v62 = vor.u32 %v10793_v63, %v8397_v20  ;;  %v8405_v43 = vld [vmem:[#allocation4 + $0x10] sm:$0xf] }
 0x25b   : > { %v2109_v19 = vrot.slane %v2108_v39, 4  ;;  %v10795_v42 = vld [vmem:[#allocation4 + $0x14] sm:$0xf0] }
 0x25c   : > { %2557 = vmatmul.bf16.vlgmr.msrb.gmra.mxu0 %v12308_v62  ;;  %v12328_v27 = vor.u32 %v10795_v42, %v8405_v43 }
 0x25d   : > { %v2110_v2 = vadd.f32 %v2109_v19, %v2108_v39 }
 0x25f   : > { %v2111_v46 = vrot.slane %v2110_v2, 2 }
 0x261   : > { %v2112_v7 = vadd.f32 %v2111_v46, %v2110_v2 }
 0x263   : > { %v2113_v25 = vrot.slane %v2112_v7, 1 }
 0x265   : > { %v2114_v26 = vadd.f32 %v2113_v25, %v2112_v7  ;;  %2606 = vmatmul.bf16.gmra.mxu2 %v12311_v31 }
 0x267   : > { %v2115_v16 = vmul.f32 %v2114_v26, %v12008_v10 }
 0x269   : > { %v12316_v12 = vsub.f32 %v12006_v4, %v2115_v16  ;;  %v12319_v22 = vsub.f32 %v12028_v21, %v2115_v16  ;;  %v12322_v8 = vsub.f32 %v12045_v18, %v2115_v16  ;;  %v12331_v34 = vsub.f32 %v12203_v30, %v2115_v16 }
 0x26a   : > { %v12335_v4 = vsub.f32 %v12223_v45, %v2115_v16  ;;  %v12340_v28 = vsub.f32 %v12235_v9, %v2115_v16  ;;  %v2122_v30 = vsub.f32 %v12265_v53, %v2115_v16  ;;  %v2123_v24 = vsub.f32 %v12268_v51, %v2115_v16 }
 0x26b   : > { %v2130_v60 = vmul.f32 %v12316_v12, %v12316_v12  ;;  %v2131_v36 = vmul.f32 %v12319_v22, %v12319_v22  ;;  %v2132_v21 = vmul.f32 %v12322_v8, %v12322_v8  ;;  %v2133_v44 = vmul.f32 %v12331_v34, %v12331_v34 }
 0x26c   : > { %2562 = vmatmul.bf16.gmra.mxu0 %v12328_v27  ;;  %v2134_v41 = vmul.f32 %v12335_v4, %v12335_v4  ;;  %v2135_v57 = vmul.f32 %v12340_v28, %v12340_v28  ;;  %v12350_v9 = vor.u32 %v10796_v54, %v8415_v29  ;;  %v2124_v32 = vsub.f32 %v12276_v59, %v2115_v16  ;;  %v11383_v54 = vld [vmem:[%s16941_s5] ss:$0 sm:$0xff] }
 0x26d   : > { %v2144_v18 = vadd.f32 %v2131_v36, %v2130_v60  ;;  %v2136_v58 = vmul.f32 %v2122_v30, %v2122_v30  ;;  %v2125_v53 = vsub.f32 %v12282_v35, %v2115_v16  ;;  %v2137_v6 = vmul.f32 %v2123_v24, %v2123_v24 }
 0x26e   : > { %v2126_v51 = vsub.f32 %v12288_v52, %v2115_v16  ;;  %v2138_v61 = vmul.f32 %v2124_v32, %v2124_v32  ;;  %v2127_v49 = vsub.f32 %v12293_v38, %v2115_v16  ;;  %v2128_v1 = vsub.f32 %v12297_v0, %v2115_v16 }
 0x26f   : > { %v2145_v14 = vadd.f32 %v2144_v18, %v2132_v21  ;;  %v2139_v3 = vmul.f32 %v2125_v53, %v2125_v53  ;;  %v2129_v5 = vsub.f32 %v12304_v13, %v2115_v16 }
 0x270   : > { %v2140_v55 = vmul.f32 %v2126_v51, %v2126_v51  ;;  %v2141_v37 = vmul.f32 %v2127_v49, %v2127_v49  ;;  %v2142_v20 = vmul.f32 %v2128_v1, %v2128_v1 }
 0x271   : > { %v2146_v45 = vadd.f32 %v2145_v14, %v2133_v44  ;;  %v2143_v19 = vmul.f32 %v2129_v5, %v2129_v5 }
 0x273   : > { %v2147_v50 = vadd.f32 %v2146_v45, %v2134_v41 }
 0x275   : > { %v2148_v33 = vadd.f32 %v2147_v50, %v2135_v57  ;;  %2611 = vmatmul.bf16.gmra.mxu2 %v12350_v9 }
 0x277   : > { %v2149_v56 = vadd.f32 %v2148_v33, %v2136_v58 }
 0x279   : > { %v2150_v23 = vadd.f32 %v2149_v56, %v2137_v6 }
 0x27b   : > { %v2151_v59 = vadd.f32 %v2150_v23, %v2138_v61 }
 0x27c   : > { %2567 = vmatmul.bf16.gmra.mxu0 %v12356_v47 }
 0x27d   : > { %v2152_v35 = vadd.f32 %v2151_v59, %v2139_v3 }
 0x27f   : > { %v2153_v39 = vadd.f32 %v2152_v35, %v2140_v55 }
 0x281   : > { %v2154_v52 = vadd.f32 %v2153_v39, %v2141_v37 }
 0x283   : > { %v2155_v63 = vadd.f32 %v2154_v52, %v2142_v20 }
 0x285   : > { %v2156_v2 = vadd.f32 %v2155_v63, %v2143_v19 }
 0x287   : > { %v2157_v46 = vrot.slane %v2156_v2, 4 }
 0x289   : > { %v2158_v7 = vadd.f32 %v2157_v46, %v2156_v2 }
 0x28b   : > { %v2159_v38 = vrot.slane %v2158_v7, 2 }
 0x28d   : > { %v2160_v25 = vadd.f32 %v2159_v38, %v2158_v7 }
 0x28f   : > { %v2161_v17 = vrot.slane %v2160_v25, 1 }
 0x291   : > { %v2162_v15 = vadd.f32 %v2161_v17, %v2160_v25 }
 0x293   : > { %v2163_v26 = vmul.f32 %v2162_v15, %v12008_v10 }
 0x295   : > { %v2165_v0 = vadd.f32 1e-05, %v2163_v26 }
 0x297   : > { %11389 = vrsqrt.f32 %v2165_v0  ;;  %vm2172_vm14 = vweird.f32 %v2165_v0 }
 0x29d   : > { %v11390_v43 = vpop.eup %11389 }
 0x29e   : > { %v2167_v42 = vmul.f32 %v11390_v43, %v2165_v0  ;;  %vm2173_vm13 = vweird.f32 %v11390_v43 }
 0x29f   : > { %vm2174_vm15 = vmor %vm2172_vm14, %vm2173_vm13  ;;  %vm2965_vm13 = vsmask.f32 7424  ;;  %vm2995_vm14 = vcmask 1040384  }
 0x2a0   : > { %v2168_v13 = vmul.f32 %v11390_v43, %v2167_v42 }
 0x2a2   : > { %v2169_v16 = vmul.f32 0.5, %v2168_v13 }
 0x2a4   : > { %v2170_v60 = vsub.f32 1.5, %v2169_v16 }
 0x2a6   : > { %v2171_v36 = vmul.f32 %v11390_v43, %v2170_v60 }
 0x2a8   : > { %v2175_v21 = vsel %vm2174_vm15, %v11390_v43, %v2171_v36  ;;  %vm2996_vm15 = vcmask 1044484  }
 0x2a9   : > { %v2176_v18 = vmul.f32 %v2175_v21, %v12316_v12  ;;  %v2177_v44 = vmul.f32 %v2175_v21, %v12319_v22  ;;  %v2178_v14 = vmul.f32 %v2175_v21, %v12322_v8  ;;  %v2179_v10 = vmul.f32 %v2175_v21, %v12331_v34  ;;  %v11384_v8 = vld [vmem:[%s16942_s6] ss:$0 sm:$0xff] }
 0x2aa   : > { %v2180_v29 = vmul.f32 %v2175_v21, %v12335_v4  ;;  %v2181_v41 = vmul.f32 %v2175_v21, %v12340_v28  ;;  %v2182_v45 = vmul.f32 %v2175_v21, %v2122_v30  ;;  %v2183_v57 = vmul.f32 %v2175_v21, %v2123_v24 }
 0x2ab   : > { %v2184_v50 = vmul.f32 %v2175_v21, %v2124_v32  ;;  %v2185_v58 = vmul.f32 %v2175_v21, %v2125_v53  ;;  %v2186_v33 = vmul.f32 %v2175_v21, %v2126_v51  ;;  %v2187_v12 = vmul.f32 %v2175_v21, %v2127_v49 }
 0x2ac   : > { %v2188_v6 = vmul.f32 %v2175_v21, %v2128_v1  ;;  %v2189_v22 = vmul.f32 %v2175_v21, %v2129_v5  ;;  %v2193_v34 = vmul.f32 %v11383_v54, %v2176_v18  ;;  %v2198_v56 = vmul.f32 %v11383_v54, %v2181_v41 }
 0x2ad   : > { %v2199_v40 = vmul.f32 %v11383_v54, %v2182_v45  ;;  %v2200_v48 = vmul.f32 %v11383_v54, %v2183_v57  ;;  %v2201_v61 = vmul.f32 %v11383_v54, %v2184_v50  ;;  %v2202_v4 = vmul.f32 %v11383_v54, %v2185_v58 }
 0x2ae   : > { %v2203_v23 = vmul.f32 %v11383_v54, %v2186_v33  ;;  %v2204_v28 = vmul.f32 %v11383_v54, %v2187_v12  ;;  %v2205_v30 = vmul.f32 %v11383_v54, %v2188_v6  ;;  %v2206_v24 = vmul.f32 %v11383_v54, %v2189_v22  ;;  %v10798_v6 = vld [vmem:[#allocation4 + $0x34] sm:$0xf] }
 0x2af   : > { %v2194_v32 = vmul.f32 %v11383_v54, %v2177_v44  ;;  %v2197_v53 = vmul.f32 %v11383_v54, %v2180_v29  ;;  %v2216_v51 = vadd.f32 %v11384_v8, %v2198_v56  ;;  %v2217_v49 = vadd.f32 %v11384_v8, %v2199_v40  ;;  %v8421_v56 = vld [vmem:[#allocation4 + $0x30] sm:$0xf] }
 0x2b0   : > { %v2218_v3 = vadd.f32 %v11384_v8, %v2200_v48  ;;  %v2219_v59 = vadd.f32 %v11384_v8, %v2201_v61  ;;  %v2220_v1 = vadd.f32 %v11384_v8, %v2202_v4  ;;  %v2221_v55 = vadd.f32 %v11384_v8, %v2203_v23  ;;  %v10820_v61 = vld [vmem:[%s16943_s7 + $0x74] sm:$0xf]  ;;  %v8511_v4 = vld [vmem:[%s16943_s7 + $0x78] sm:$0xf0] }
 0x2b1   : > { %v2196_v35 = vmul.f32 %v11383_v54, %v2179_v10  ;;  %v2222_v5 = vadd.f32 %v11384_v8, %v2204_v28  ;;  %v2223_v37 = vadd.f32 %v11384_v8, %v2205_v30  ;;  %v2224_v39 = vadd.f32 %v11384_v8, %v2206_v24  ;;  %v10836_v28 = vld [vmem:[%s16943_s7 + $0xf4] sm:$0xf]  ;;  %v8575_v30 = vld [vmem:[%s16943_s7 + $0xf8] sm:$0xf0] }
 0x2b2   : > { %v2230_v20 = vmax.f32 %v2216_v51, 0.0  ;;  %v2231_v52 = vmax.f32 %v2217_v49, 0.0  ;;  %v2232_v19 = vmax.f32 %v2218_v3, 0.0  ;;  %v2233_v63 = vmax.f32 %v2219_v59, 0.0  ;;  %v10818_v51 = vld [vmem:[%s16943_s7 + $0x64] sm:$0xf] }
 0x2b3   : > { %v2195_v2 = vmul.f32 %v11383_v54, %v2178_v14  ;;  %v2215_v46 = vadd.f32 %v11384_v8, %v2197_v53  ;;  %v2234_v7 = vmax.f32 %v2220_v1, 0.0  ;;  %v2235_v38 = vmax.f32 %v2221_v55, 0.0  ;;  %v8503_v49 = vld [vmem:[%s16943_s7 + $0x68] sm:$0xf0]  ;;  %v10834_v3 = vld [vmem:[%s16943_s7 + $0xe4] sm:$0xf] }
 0x2b4   : > { %v2236_v25 = vmax.f32 %v2222_v5, 0.0  ;;  %v2244_v17 = vpack.c.bf16 %v2230_v20, %v2230_v20  ;;  %v2245_v15 = vpack.c.bf16 %v2231_v52, %v2231_v52  ;;  %v2237_v26 = vmax.f32 %v2223_v37, 0.0  ;;  %v8567_v55 = vld [vmem:[%s16943_s7 + $0xe8] sm:$0xf0]  ;;  %v10816_v5 = vld [vmem:[%s16943_s7 + $0x54] sm:$0xf] }
 0x2b5   : > { %v2253_v0 = vpack.c.bf16 %v2232_v19, %v2232_v19  ;;  %v2254_v43 = vpack.c.bf16 %v2233_v63, %v2233_v63  ;;  %v2214_v42 = vadd.f32 %v11384_v8, %v2196_v35  ;;  %v2238_v13 = vmax.f32 %v2224_v39, 0.0  ;;  %v8495_v37 = vld [vmem:[%s16943_s7 + $0x58] sm:$0xf0]  ;;  %v10832_v39 = vld [vmem:[%s16943_s7 + $0xd4] sm:$0xf] }
 0x2b6   : > { %2251 = vst [vmem:[#allocation4 + $0x60] sm:$0xf] %v2244_v17  ;;  %v2255_v16 = vpack.c.bf16 %v2234_v7, %v2234_v7  ;;  %v2211_v60 = vadd.f32 %v11384_v8, %v2193_v34  ;;  %v2229_v36 = vmax.f32 %v2215_v46, 0.0  ;;  %v2256_v21 = vpack.c.bf16 %v2235_v38, %v2235_v38  ;;  %v12419_v20 = vld [vmem:[%s16944_s8] sm:$0x3] }
 0x2b7   : > { %2252 = vst [vmem:[#allocation4 + $0x68] sm:$0xf] %v2245_v15  ;;  %v2212_v18 = vadd.f32 %v11384_v8, %v2194_v32  ;;  %v2213_v44 = vadd.f32 %v11384_v8, %v2195_v2  ;;  %v2257_v14 = vpack.c.bf16 %v2236_v25, %v2236_v25  ;;  %v2258_v54 = vpack.c.bf16 %v2237_v26, %v2237_v26  ;;  %v8559_v19 = vld [vmem:[%s16943_s7 + $0xd8] sm:$0xf0]  ;;  %v10814_v25 = vld [vmem:[%s16943_s7 + $0x44] sm:$0xf] }
 0x2b8   : > { %2260 = vst [vmem:[#allocation4 + $0x3c] sm:$0xf] %v2253_v0  ;;  %v2225_v10 = vmax.f32 %v2211_v60, 0.0  ;;  %v2259_v41 = vpack.c.bf16 %v2238_v13, %v2238_v13  ;;  %v2243_v57 = vpack.c.bf16 %v2229_v36, %v2229_v36  ;;  %v2228_v50 = vmax.f32 %v2214_v42, 0.0  ;;  %v8487_v17 = vld [vmem:[%s16943_s7 + $0x48] sm:$0xf0] }
 0x2b9   : > { %2261 = vst [vmem:[#allocation4 + $0x44] sm:$0xf] %v2254_v43  ;;  %v2226_v29 = vmax.f32 %v2212_v18, 0.0  ;;  %v2227_v45 = vmax.f32 %v2213_v44, 0.0  ;;  %v8514_v23 = vor.u32 %v10820_v61, %v8511_v4  ;;  %v8578_v24 = vor.u32 %v10836_v28, %v8575_v30  ;;  %v10830_v15 = vld [vmem:[%s16943_s7 + $0xc4] sm:$0xf] }
 0x2ba   : > { %2262 = vst [vmem:[#allocation4 + $0x4c] sm:$0xf] %v2255_v16  ;;  %v2239_v58 = vpack.c.bf16 %v2225_v10, %v2225_v10  ;;  %v2242_v8 = vpack.c.bf16 %v2228_v50, %v2228_v50  ;;  %v8506_v1 = vor.u32 %v10818_v51, %v8503_v49  ;;  %v8570_v35 = vor.u32 %v10834_v3, %v8567_v55  ;;  %v8551_v42 = vld [vmem:[%s16943_s7 + $0xc8] sm:$0xf0]  ;;  %v10812_v60 = vld [vmem:[%s16943_s7 + $0x34] sm:$0xf] }
 0x2bb   : > { %2263 = vst [vmem:[#allocation4 + $0x54] sm:$0xf] %v2256_v21  ;;  %v2240_v33 = vpack.c.bf16 %v2226_v29, %v2226_v29  ;;  %v2241_v12 = vpack.c.bf16 %v2227_v45, %v2227_v45  ;;  %2637 = vmatpush.bf16.msra.mxu0 %v8514_v23  ;;  %2681 = vmatpush.bf16.msra.mxu2 %v8578_v24  ;;  %v12426_v2 = vperm.slane %v12419_v20, 0  ;;  %v8479_v36 = vld [vmem:[%s16943_s7 + $0x38] sm:$0xf0] }
 0x2bc   : > { %2264 = vst [vmem:[#allocation4 + $0x5c] sm:$0xf] %v2257_v14  ;;  %v8498_v52 = vor.u32 %v10816_v5, %v8495_v37  ;;  %v8562_v63 = vor.u32 %v10832_v39, %v8559_v19  ;;  %v8490_v43 = vor.u32 %v10814_v25, %v8487_v17  ;;  %v8554_v16 = vor.u32 %v10830_v15, %v8551_v42  ;;  %v10828_v21 = vld [vmem:[%s16943_s7 + $0xb4] sm:$0xf]  ;;  %v8543_v14 = vld [vmem:[%s16943_s7 + $0xb8] sm:$0xf0] }
 0x2bd   : > { %2265 = vst [vmem:[#allocation4 + $0x64] sm:$0xf] %v2258_v54  ;;  %v8482_v44 = vor.u32 %v10812_v60, %v8479_v36  ;;  %v8546_v10 = vor.u32 %v10828_v21, %v8543_v14  ;;  %v10810_v45 = vld [vmem:[%s16943_s7 + $0x24] sm:$0xf]  ;;  %v8527_v61 = vld [vmem:[%s16943_s7 + $0x98] sm:$0xf0] }
 0x2be   : > { %2266 = vst [vmem:[#allocation4 + $0x6c] sm:$0xf] %v2259_v41  ;;  %v10826_v50 = vld [vmem:[%s16943_s7 + $0xa4] sm:$0xf]  ;;  %v8519_v49 = vld [vmem:[%s16943_s7 + $0x88] sm:$0xf0] }
 0x2bf   : > { %2250 = vst [vmem:[#allocation4 + $0x58] sm:$0xf] %v2243_v57  ;;  %v8423_v22 = vld [vmem:[#allocation4 + $0x38] sm:$0xf0]  ;;  %2638 = vmatpush.bf16.msra.mxu0 %v8506_v1  ;;  %2682 = vmatpush.bf16.msra.mxu2 %v8570_v35  ;;  %v8471_v57 = vld [vmem:[%s16943_s7 + $0x28] sm:$0xf0] }
 0x2c0   : > { %2246 = vst [vmem:[#allocation4 + $0x38] sm:$0xf] %v2239_v58  ;;  %v12375_v34 = vor.u32 %v10798_v6, %v8423_v22  ;;  %v10800_v32 = vld [vmem:[#allocation4 + $0x44] sm:$0xf]  ;;  %v8535_v6 = vld [vmem:[%s16943_s7 + $0xa8] sm:$0xf0] }
 0x2c1   : > { %2247 = vst [vmem:[#allocation4 + $0x40] sm:$0xf] %v2240_v33  ;;  %v8431_v53 = vld [vmem:[#allocation4 + $0x48] sm:$0xf0]  ;;  %v8538_v22 = vor.u32 %v10826_v50, %v8535_v6  ;;  %v10822_v51 = vld [vmem:[%s16943_s7 + $0x84] sm:$0xf] }
 0x2c2   : > { %2616 = vmatmul.bf16.gmra.mxu2 %v12375_v34  ;;  %2248 = vst [vmem:[#allocation4 + $0x48] sm:$0xf] %v2241_v12  ;;  %v12402_v59 = vor.u32 %v10800_v32, %v8431_v53  ;;  %v10802_v54 = vld [vmem:[#allocation4 + $0x54] sm:$0xf]  ;;  %v8474_v12 = vor.u32 %v10810_v45, %v8471_v57  ;;  %v10806_v32 = vld [vmem:[%s16943_s7 + $0x4] sm:$0xf]  ;;  %v8522_v35 = vor.u32 %v10822_v51, %v8519_v49 }
 0x2c3   : > { %2249 = vst [vmem:[#allocation4 + $0x50] sm:$0xf] %v2242_v8  ;;  %2639 = vmatpush.bf16.msra.mxu0 %v8498_v52  ;;  %2683 = vmatpush.bf16.msra.mxu2 %v8562_v63  ;;  %v8439_v29 = vld [vmem:[#allocation4 + $0x58] sm:$0xf0]  ;;  %v10808_v8 = vld [vmem:[%s16943_s7 + $0x14] sm:$0xf] }
 0x2c4   : > { %v12467_v33 = vor.u32 %v10802_v54, %v8439_v29  ;;  %v8455_v53 = vld [vmem:[%s16943_s7 + $0x8] sm:$0xf0]  ;;  %v11430_v54 = vmov 56.0  }
 0x2c5   : > { %v8458_v55 = vor.u32 %v10806_v32, %v8455_v53  ;;  %11391 = vrcp.f32 %v11430_v54 }
 0x2c6   : > { %v10803_v30 = vld [vmem:[#allocation4 + $0x54] sm:$0xf0] }
 0x2c7   : > { %v10799_v40 = vld [vmem:[#allocation4 + $0x34] sm:$0xf0]  ;;  %2640 = vmatpush.bf16.msra.mxu0 %v8490_v43  ;;  %2684 = vmatpush.bf16.msra.mxu2 %v8554_v16  ;;  %v10805_v43 = vld [vmem:[#allocation4 + $0x64] sm:$0xf0] }
 0x2c8   : > { %v12378_v48 = vor.u32 %v10799_v40, %v8421_v56  ;;  %v8429_v46 = vld [vmem:[#allocation4 + $0x40] sm:$0xf]  ;;  %v8463_v56 = vld [vmem:[%s16943_s7 + $0x18] sm:$0xf0]  ;;  %v10824_v40 = vld [vmem:[%s16943_s7 + $0x94] sm:$0xf] }
 0x2c9   : > { %v10801_v7 = vld [vmem:[#allocation4 + $0x44] sm:$0xf0]  ;;  %v8466_v4 = vor.u32 %v10808_v8, %v8463_v56  ;;  %v8530_v23 = vor.u32 %v10824_v40, %v8527_v61 }
 0x2ca   : > { %2572 = vmatmul.bf16.gmra.mxu0 %v12378_v48  ;;  %v12437_v0 = vor.u32 %v10801_v7, %v8429_v46  ;;  %v8437_v28 = vld [vmem:[#allocation4 + $0x50] sm:$0xf]  ;;  %v10804_v46 = vld [vmem:[#allocation4 + $0x64] sm:$0xf]  ;;  %v8447_v7 = vld [vmem:[#allocation4 + $0x68] sm:$0xf0] }
 0x2cb   : > { %2641 = vmatpush.bf16.msra.mxu0 %v8482_v44  ;;  %2685 = vmatpush.bf16.msra.mxu2 %v8546_v10  ;;  %v12500_v37 = vor.u32 %v10803_v30, %v8437_v28  ;;  %v12509_v17 = vor.u32 %v10804_v46, %v8447_v7 }
 0x2cf   : > { %2642 = vmatpush.bf16.msra.mxu0 %v8474_v12  ;;  %2686 = vmatpush.bf16.msra.mxu2 %v8538_v22 }
 0x2d2   : > { %2621 = vmatmul.bf16.gmra.mxu2 %v12402_v59 }
 0x2d3   : > { %2643 = vmatpush.bf16.msra.mxu0 %v8466_v4  ;;  %2687 = vmatpush.bf16.msra.mxu2 %v8530_v23 }
 0x2d7   : > { %2644 = vmatpush.bf16.msra.mxu0 %v8458_v55  ;;  %2688 = vmatpush.bf16.msra.mxu2 %v8522_v35 }
 0x2d8   : > { %v2602_v38 = vpop.f32.mrf.mxu2 }
 0x2d9   : > { %v2558_v26 = vpop.f32.mrf.mxu0 }
 0x2da   : > { %v2559_v13 = vadd.f32 %v2558_v26, %v12426_v2  ;;  %2577 = vmatmul.bf16.gmra.mxu0 %v12437_v0  ;;  %v8445_v26 = vld [vmem:[#allocation4 + $0x60] sm:$0xf] }
 0x2db   : > { %v12513_v16 = vor.u32 %v10805_v43, %v8445_v26 }
 0x2dc   : > { %v12453_v18 = vadd.f32 %v2602_v38, %v2559_v13 }
 0x2e0   : > { %v2604_v41 = vpop.f32.mrf.mxu2 }
 0x2e1   : > { %v2560_v58 = vpop.f32.mrf.mxu0 }
 0x2e2   : > { %2626 = vmatmul.bf16.gmra.mxu2 %v12467_v33  ;;  %v2561_v24 = vadd.f32 %v2560_v58, %v12426_v2 }
 0x2e4   : > { %v12498_v3 = vadd.f32 %v2604_v41, %v2561_v24 }
 0x2e6   : > { %v2783_v52 = vadd.f32 %v12498_v3, %v12453_v18 }
 0x2e8   : > { %v2607_v1 = vpop.f32.mrf.mxu2 }
 0x2e9   : > { %v2563_v5 = vpop.f32.mrf.mxu0 }
 0x2ea   : > { %v2564_v39 = vadd.f32 %v2563_v5, %v12426_v2  ;;  %2582 = vmatmul.bf16.gmra.mxu0 %v12500_v37 }
 0x2ec   : > { %v12506_v19 = vadd.f32 %v2607_v1, %v2564_v39 }
 0x2ee   : > { %v2784_v63 = vadd.f32 %v2783_v52, %v12506_v19 }
 0x2f0   : > { %v2609_v38 = vpop.f32.mrf.mxu2 }
 0x2f1   : > { %v2565_v25 = vpop.f32.mrf.mxu0 }
 0x2f2   : > { %2631 = vmatmul.bf16.gmra.mxu2 %v12509_v17  ;;  %v2566_v15 = vadd.f32 %v2565_v25, %v12426_v2 }
 0x2f4   : > { %v2610_v42 = vadd.f32 %v2609_v38, %v2566_v15 }
 0x2f6   : > { %v2785_v21 = vadd.f32 %v2784_v63, %v2610_v42 }
 0x2f8   : > { %v2612_v60 = vpop.f32.mrf.mxu2 }
 0x2f9   : > { %v2568_v13 = vpop.f32.mrf.mxu0 }
 0x2fa   : > { %v2569_v36 = vadd.f32 %v2568_v13, %v12426_v2  ;;  %2587 = vmatmul.bf16.gmra.mxu0 %v12513_v16 }
 0x2fc   : > { %v2613_v44 = vadd.f32 %v2612_v60, %v2569_v36 }
 0x2fe   : > { %v2786_v14 = vadd.f32 %v2785_v21, %v2613_v44 }
 0x300   : > { %v2614_v10 = vpop.f32.mrf.mxu2 }
 0x301   : > { %v2570_v29 = vpop.f32.mrf.mxu0 }
 0x302   : > { %2689 = vmatmul.bf16.vlgmr.msra.gmra.mxu2 %v12301_v11  ;;  %v11392_v11 = vpop.eup %11391 }
 0x303   : > { %v2808_v45 = vmul.f32 56.0, %v11392_v11  ;;  %vm2812_vm1 = vweird.f32 %v11392_v11 }
 0x30a   : > { %2645 = vmatmul.bf16.vlgmr.msra.gmra.mxu0 %v12308_v62  ;;  %v2571_v62 = vadd.f32 %v2570_v29, %v12426_v2 }
 0x30c   : > { %v2615_v41 = vadd.f32 %v2614_v10, %v2571_v62 }
 0x312   : > { %2694 = vmatmul.bf16.gmra.mxu2 %v12311_v31 }
 0x31a   : > { %2650 = vmatmul.bf16.gmra.mxu0 %v12328_v27 }
 0x322   : > { %2699 = vmatmul.bf16.gmra.mxu2 %v12350_v9 }
 0x32a   : > { %2655 = vmatmul.bf16.gmra.mxu0 %v12356_v47  ;;  %v2787_v47 = vadd.f32 %v2786_v14, %v2615_v41 }
 0x332   : > { %2704 = vmatmul.bf16.gmra.mxu2 %v12375_v34 }
 0x33a   : > { %2660 = vmatmul.bf16.gmra.mxu0 %v12378_v48  ;;  %v2809_v48 = vsub.f32 1.0, %v2808_v45 }
 0x33c   : > { %v2810_v12 = vmul.f32 %v11392_v11, %v2809_v48 }
 0x33e   : > { %v2811_v8 = vadd.f32 %v11392_v11, %v2810_v12 }
 0x340   : > { %v12530_v4 = vsel %vm2812_vm1, %v11392_v11, %v2811_v8  ;;  %vm2972_vm1 = vsmask.f32 256 }
 0x342   : > { %2709 = vmatmul.bf16.gmra.mxu2 %v12402_v59 }
 0x345   : > { %v2617_v31 = vpop.f32.mrf.mxu2 }
 0x347   : > { %v2573_v27 = vpop.f32.mrf.mxu0 }
 0x348   : > { %v2574_v9 = vadd.f32 %v2573_v27, %v12426_v2 }
 0x34a   : > { %2665 = vmatmul.bf16.gmra.mxu0 %v12437_v0  ;;  %v2618_v34 = vadd.f32 %v2617_v31, %v2574_v9 }
 0x34c   : > { %v2788_v57 = vadd.f32 %v2787_v47, %v2618_v34 }
 0x34d   : > { %v2619_v50 = vpop.f32.mrf.mxu2 }
 0x34e   : > { %v2789_v58 = vrot.slane %v2788_v57, 4 }
 0x34f   : > { %v2575_v6 = vpop.f32.mrf.mxu0 }
 0x350   : > { %v2790_v59 = vadd.f32 %v2789_v58, %v2788_v57  ;;  %v2576_v7 = vadd.f32 %v2575_v6, %v12426_v2 }
 0x352   : > { %v2791_v22 = vrot.slane %v2790_v59, 2  ;;  %2714 = vmatmul.bf16.gmra.mxu2 %v12467_v33  ;;  %v12569_v43 = vadd.f32 %v2619_v50, %v2576_v7 }
 0x354   : > { %v2792_v56 = vadd.f32 %v2791_v22, %v2790_v59 }
 0x355   : > { %v2622_v40 = vpop.f32.mrf.mxu2 }
 0x356   : > { %v2793_v61 = vrot.slane %v2792_v56, 1 }
 0x357   : > { %v2578_v23 = vpop.f32.mrf.mxu0 }
 0x358   : > { %v2794_v0 = vadd.f32 %v2793_v61, %v2792_v56  ;;  %v2579_v28 = vadd.f32 %v2578_v23, %v12426_v2 }
 0x35a   : > { %v2814_v30 = vmul.f32 %v12530_v4, %v2794_v0  ;;  %2670 = vmatmul.bf16.gmra.mxu0 %v12500_v37  ;;  %v12535_v24 = vadd.f32 %v2622_v40, %v2579_v28 }
 0x35c   : > { %v12538_v32 = vsub.f32 %v12453_v18, %v2814_v30  ;;  %v12541_v33 = vsub.f32 %v12498_v3, %v2814_v30  ;;  %v12544_v53 = vsub.f32 %v12506_v19, %v2814_v30  ;;  %v12546_v51 = vsub.f32 %v2613_v44, %v2814_v30 }
 0x35d   : > { %v12548_v49 = vsub.f32 %v2618_v34, %v2814_v30  ;;  %v2624_v1 = vpop.f32.mrf.mxu2  ;;  %v12550_v55 = vsub.f32 %v2610_v42, %v2814_v30  ;;  %v12558_v39 = vsub.f32 %v2615_v41, %v2814_v30  ;;  %v3113_v36 = vadd.f32 %v12535_v24, %v12569_v43 }
 0x35e   : > { %v2830_v35 = vmul.f32 %v12538_v32, %v12538_v32  ;;  %v2832_v18 = vmul.f32 %v12541_v33, %v12541_v33  ;;  %v2834_v3 = vmul.f32 %v12544_v53, %v12544_v53  ;;  %v2838_v63 = vmul.f32 %v12546_v51, %v12546_v51 }
 0x35f   : > { %v2580_v5 = vpop.f32.mrf.mxu0  ;;  %v2836_v52 = vmul.f32 %v12550_v55, %v12550_v55  ;;  %v2840_v15 = vmul.f32 %v12558_v39, %v12558_v39 }
 0x360   : > { %v2844_v37 = vadd.f32 %v2832_v18, %v2830_v35  ;;  %v2581_v38 = vadd.f32 %v2580_v5, %v12426_v2 }
 0x362   : > { %v2845_v19 = vadd.f32 %v2844_v37, %v2834_v3  ;;  %2719 = vmatmul.bf16.gmra.mxu2 %v12509_v17  ;;  %v12571_v42 = vadd.f32 %v2624_v1, %v2581_v38  ;;  %v2842_v17 = vmul.f32 %v12548_v49, %v12548_v49 }
 0x364   : > { %v2846_v46 = vadd.f32 %v2845_v19, %v2836_v52  ;;  %v3114_v14 = vadd.f32 %v3113_v36, %v12571_v42 }
 0x365   : > { %v2627_v25 = vpop.f32.mrf.mxu2 }
 0x366   : > { %v2847_v26 = vadd.f32 %v2846_v46, %v2838_v63 }
 0x367   : > { %v2583_v13 = vpop.f32.mrf.mxu0 }
 0x368   : > { %v2848_v60 = vadd.f32 %v2847_v26, %v2840_v15  ;;  %v2584_v21 = vadd.f32 %v2583_v13, %v12426_v2 }
 0x36a   : > { %v2849_v44 = vadd.f32 %v2848_v60, %v2842_v17  ;;  %2675 = vmatmul.bf16.gmra.mxu0 %v12513_v16  ;;  %v2628_v10 = vadd.f32 %v2627_v25, %v2584_v21 }
 0x36c   : > { %v2850_v54 = vrot.slane %v2849_v44, 4  ;;  %v3115_v29 = vadd.f32 %v3114_v14, %v2628_v10 }
 0x36d   : > { %v2629_v11 = vpop.f32.mrf.mxu2 }
 0x36e   : > { %v2851_v62 = vadd.f32 %v2850_v54, %v2849_v44 }
 0x36f   : > { %v2585_v31 = vpop.f32.mrf.mxu0 }
 0x370   : > { %v2852_v41 = vrot.slane %v2851_v62, 2  ;;  %v2586_v9 = vadd.f32 %v2585_v31, %v12426_v2 }
 0x372   : > { %v2853_v27 = vadd.f32 %v2852_v41, %v2851_v62  ;;  %v2630_v48 = vadd.f32 %v2629_v11, %v2586_v9 }
 0x374   : > { %v2854_v45 = vrot.slane %v2853_v27, 1  ;;  %v3116_v12 = vadd.f32 %v3115_v29, %v2630_v48 }
 0x375   : > { %v2632_v47 = vpop.f32.mrf.mxu2 }
 0x376   : > { %v2855_v34 = vadd.f32 %v2854_v45, %v2853_v27 }
 0x377   : > { %v2588_v57 = vpop.f32.mrf.mxu0 }
 0x378   : > { %v2868_v50 = vmul.f32 %v2855_v34, %v12530_v4  ;;  %v2589_v58 = vadd.f32 %v2588_v57, %v12426_v2 }
 0x37a   : > { %v2871_v16 = vadd.f32 1e-05, %v2868_v50  ;;  %v2633_v6 = vadd.f32 %v2632_v47, %v2589_v58 }
 0x37c   : > { %11393 = vrsqrt.f32 %v2871_v16  ;;  %v3117_v59 = vadd.f32 %v3116_v12, %v2633_v6  ;;  %vm2879_vm2 = vweird.f32 %v2871_v16 }
 0x37d   : > { %v2634_v22 = vpop.f32.mrf.mxu2 }
 0x37f   : > { %v2590_v8 = vpop.f32.mrf.mxu0 }
 0x380   : > { %v2591_v56 = vadd.f32 %v2590_v8, %v12426_v2 }
 0x382   : > { %v11394_v40 = vpop.eup %11393  ;;  %v2635_v61 = vadd.f32 %v2634_v22, %v2591_v56 }
 0x383   : > { %v2874_v23 = vmul.f32 %v11394_v40, %v2871_v16  ;;  %vm2880_vm0 = vweird.f32 %v11394_v40  ;;  %v12638_v16 = vperm.slane %v12419_v20, 1 }
 0x384   : > { %v3118_v0 = vadd.f32 %v3117_v59, %v2635_v61  ;;  %vm2881_vm3 = vmor %vm2879_vm2, %vm2880_vm0  ;;  %vm2973_vm0 = vsmask.f32 4368 }
 0x385   : > { %v2875_v28 = vmul.f32 %v11394_v40, %v2874_v23  ;;  %v2690_v30 = vpop.f32.mrf.mxu2  ;;  %vm12773_vm2 = vmand %vm2961_vm10, %vm2962_vm11  ;;  %vm3076_vm10 = vcmask 1046532  }
 0x386   : > { %v3119_v1 = vrot.slane %v3118_v0, 4  ;;  %vm12816_vm11 = vmor %vm2995_vm14, %vm2996_vm15 }
 0x387   : > { %v2876_v35 = vmul.f32 0.5, %v2875_v28  ;;  %v2646_v18 = vpop.f32.mrf.mxu0 }
 0x388   : > { %v3120_v5 = vadd.f32 %v3119_v1, %v3118_v0  ;;  %v2647_v22 = vadd.f32 %v2646_v18, %v12638_v16 }
 0x389   : > { %v2877_v3 = vsub.f32 1.5, %v2876_v35 }
 0x38a   : > { %v3121_v37 = vrot.slane %v3120_v5, 2  ;;  %v2691_v23 = vadd.f32 %v2690_v30, %v2647_v22 }
 0x38b   : > { %v2878_v52 = vmul.f32 %v11394_v40, %v2877_v3 }
 0x38c   : > { %v3122_v19 = vadd.f32 %v3121_v37, %v3120_v5  ;;  %v11431_v5 = vmov 0  }
 0x38d   : > { %v2882_v63 = vsel %vm2881_vm3, %v11394_v40, %v2878_v52  ;;  %v2692_v46 = vpop.f32.mrf.mxu2  ;;  %11378 = vset.pattern.permute.xlu1 %v11431_v5  ;;  %11379 = vset.pattern.permute.xlu0 %v11431_v5  ;;  %vm3035_vm3 = vcmask 1041408  }
 0x38e   : > { %v12585_v2 = vmul.f32 %v2882_v63, %v12538_v32  ;;  %v12588_v7 = vmul.f32 %v2882_v63, %v12541_v33  ;;  %v12591_v38 = vmul.f32 %v2882_v63, %v12544_v53  ;;  %v12594_v25 = vmul.f32 %v2882_v63, %v12550_v55 }
 0x38f   : > { %v12597_v15 = vmul.f32 %v2882_v63, %v12546_v51  ;;  %v12600_v26 = vmul.f32 %v2882_v63, %v12558_v39  ;;  %v12603_v13 = vmul.f32 %v2882_v63, %v12548_v49  ;;  %v3123_v32 = vrot.slane %v3122_v19, 1  ;;  %v2648_v17 = vpop.f32.mrf.mxu0 }
 0x390   : > { %v2649_v59 = vadd.f32 %v2648_v17, %v12638_v16 }
 0x391   : > { %v3124_v60 = vadd.f32 %v3123_v32, %v3122_v19 }
 0x392   : > { %v2693_v40 = vadd.f32 %v2692_v46, %v2649_v59 }
 0x393   : > { %v3137_v33 = vmul.f32 %v3124_v60, %v12530_v4 }
 0x394   : > { %v2795_v3 = vadd.f32 %v2693_v40, %v2691_v23 }
 0x395   : > { %v12607_v53 = vsub.f32 %v12569_v43, %v3137_v33  ;;  %v2695_v36 = vpop.f32.mrf.mxu2  ;;  %v12610_v55 = vsub.f32 %v12535_v24, %v3137_v33  ;;  %v12613_v51 = vsub.f32 %v12571_v42, %v3137_v33  ;;  %v12615_v39 = vsub.f32 %v2628_v10, %v3137_v33 }
 0x396   : > { %v12617_v21 = vsub.f32 %v2633_v6, %v3137_v33  ;;  %v12623_v43 = vsub.f32 %v2630_v48, %v3137_v33  ;;  %v12629_v11 = vsub.f32 %v2635_v61, %v3137_v33 }
 0x397   : > { %v3153_v49 = vmul.f32 %v12607_v53, %v12607_v53  ;;  %v2651_v44 = vpop.f32.mrf.mxu0  ;;  %v3155_v14 = vmul.f32 %v12610_v55, %v12610_v55  ;;  %v3157_v24 = vmul.f32 %v12613_v51, %v12613_v51  ;;  %v3159_v42 = vmul.f32 %v12615_v39, %v12615_v39 }
 0x398   : > { %v3161_v62 = vmul.f32 %v12623_v43, %v12623_v43  ;;  %v3163_v27 = vmul.f32 %v12617_v21, %v12617_v21  ;;  %v3165_v9 = vmul.f32 %v12629_v11, %v12629_v11  ;;  %v2652_v61 = vadd.f32 %v2651_v44, %v12638_v16 }
 0x399   : > { %v3167_v54 = vadd.f32 %v3155_v14, %v3153_v49 }
 0x39a   : > { %v2696_v1 = vadd.f32 %v2695_v36, %v2652_v61 }
 0x39b   : > { %v3168_v10 = vadd.f32 %v3167_v54, %v3157_v24 }
 0x39c   : > { %v2796_v19 = vadd.f32 %v2795_v3, %v2696_v1 }
 0x39d   : > { %v2697_v29 = vpop.f32.mrf.mxu2  ;;  %v3169_v31 = vadd.f32 %v3168_v10, %v3159_v42 }
 0x39f   : > { %v2653_v41 = vpop.f32.mrf.mxu0  ;;  %v3170_v45 = vadd.f32 %v3169_v31, %v3161_v62 }
 0x3a0   : > { %v2654_v35 = vadd.f32 %v2653_v41, %v12638_v16 }
 0x3a1   : > { %v3171_v47 = vadd.f32 %v3170_v45, %v3163_v27 }
 0x3a2   : > { %v2698_v37 = vadd.f32 %v2697_v29, %v2654_v35 }
 0x3a3   : > { %v3172_v34 = vadd.f32 %v3171_v47, %v3165_v9 }
 0x3a4   : > { %v2797_v32 = vadd.f32 %v2796_v19, %v2698_v37 }
 0x3a5   : > { %v2700_v48 = vpop.f32.mrf.mxu2  ;;  %v3173_v57 = vrot.slane %v3172_v34, 4 }
 0x3a7   : > { %v2656_v50 = vpop.f32.mrf.mxu0  ;;  %v3174_v58 = vadd.f32 %v3173_v57, %v3172_v34 }
 0x3a8   : > { %v2657_v18 = vadd.f32 %v2656_v50, %v12638_v16 }
 0x3a9   : > { %v3175_v12 = vrot.slane %v3174_v58, 2 }
 0x3aa   : > { %v2701_v63 = vadd.f32 %v2700_v48, %v2657_v18 }
 0x3ab   : > { %v3176_v6 = vadd.f32 %v3175_v12, %v3174_v58 }
 0x3ac   : > { %v2798_v33 = vadd.f32 %v2797_v32, %v2701_v63 }
 0x3ad   : > { %v2702_v8 = vpop.f32.mrf.mxu2  ;;  %v3177_v56 = vrot.slane %v3176_v6, 1 }
 0x3af   : > { %v2658_v0 = vpop.f32.mrf.mxu0  ;;  %v3178_v28 = vadd.f32 %v3177_v56, %v3176_v6 }
 0x3b0   : > { %v2659_v46 = vadd.f32 %v2658_v0, %v12638_v16 }
 0x3b1   : > { %v3191_v20 = vmul.f32 %v3178_v28, %v12530_v4 }
 0x3b2   : > { %v2703_v17 = vadd.f32 %v2702_v8, %v2659_v46 }
 0x3b3   : > { %v3194_v52 = vadd.f32 1e-05, %v3191_v20 }
 0x3b4   : > { %v2799_v49 = vadd.f32 %v2798_v33, %v2703_v17 }
 0x3b5   : > { %v2705_v30 = vpop.f32.mrf.mxu2  ;;  %11395 = vrsqrt.f32 %v3194_v52  ;;  %vm3202_vm5 = vweird.f32 %v3194_v52 }
 0x3b7   : > { %v2661_v60 = vpop.f32.mrf.mxu0 }
 0x3b8   : > { %v2662_v36 = vadd.f32 %v2661_v60, %v12638_v16 }
 0x3ba   : > { %v2706_v44 = vadd.f32 %v2705_v30, %v2662_v36 }
 0x3bb   : > { %v11396_v14 = vpop.eup %11395 }
 0x3bc   : > { %v2800_v24 = vadd.f32 %v2799_v49, %v2706_v44  ;;  %v3197_v54 = vmul.f32 %v11396_v14, %v3194_v52  ;;  %vm3203_vm4 = vweird.f32 %v11396_v14 }
 0x3bd   : > { %v12648_v42 = vpop.f32.mrf.mxu2  ;;  %vm3204_vm6 = vmor %vm3202_vm5, %vm3203_vm4  ;;  %vm3007_vm5 = vsmask.f32 1280 }
 0x3be   : > { %v2801_v10 = vrot.slane %v2800_v24, 4  ;;  %v3198_v29 = vmul.f32 %v11396_v14, %v3197_v54  ;;  %vm2966_vm4 = vmand %vm2964_vm12, %vm2965_vm13  ;;  %vm3047_vm12 = vsmask.f32 2304  ;;  %vm3048_vm13 = vsmask.f32 6416 }
 0x3bf   : > { %v2663_v62 = vpop.f32.mrf.mxu0 }
 0x3c0   : > { %v2802_v31 = vadd.f32 %v2801_v10, %v2800_v24  ;;  %v3199_v41 = vmul.f32 0.5, %v3198_v29  ;;  %v2664_v29 = vadd.f32 %v2663_v62, %v12638_v16 }
 0x3c2   : > { %v2803_v27 = vrot.slane %v2802_v31, 2  ;;  %v3200_v45 = vsub.f32 1.5, %v3199_v41 }
 0x3c4   : > { %v2804_v9 = vadd.f32 %v2803_v27, %v2802_v31  ;;  %v3201_v47 = vmul.f32 %v11396_v14, %v3200_v45 }
 0x3c5   : > { %v2710_v34 = vpop.f32.mrf.mxu2 }
 0x3c6   : > { %v2805_v48 = vrot.slane %v2804_v9, 1  ;;  %v3205_v57 = vsel %vm3204_vm6, %v11396_v14, %v3201_v47  ;;  %vm3008_vm6 = vsmask.f32 5392 }
 0x3c7   : > { %v2666_v50 = vpop.f32.mrf.mxu0  ;;  %v12651_v58 = vmul.f32 %v3205_v57, %v12607_v53  ;;  %v12654_v12 = vmul.f32 %v3205_v57, %v12610_v55  ;;  %v12657_v6 = vmul.f32 %v3205_v57, %v12613_v51  ;;  %v12660_v59 = vmul.f32 %v3205_v57, %v12615_v39  ;;  %vm12840_vm15 = vmor %vm3007_vm5, %vm3008_vm6 }
 0x3c8   : > { %v12663_v22 = vmul.f32 %v3205_v57, %v12623_v43  ;;  %v12666_v8 = vmul.f32 %v3205_v57, %v12617_v21  ;;  %v12669_v56 = vmul.f32 %v3205_v57, %v12629_v11  ;;  %v2806_v53 = vadd.f32 %v2805_v48, %v2804_v9 }
 0x3c9   : > { %v2667_v24 = vadd.f32 %v2666_v50, %v12638_v16  ;;  %v12706_v9 = vadd.f32 %v12648_v42, %v2664_v29  ;;  %vm7483_vm6 = vcmask 1046528  }
 0x3ca   : > { %v2815_v61 = vmul.f32 %v12530_v4, %v2806_v53 }
 0x3cb   : > { %v12702_v31 = vadd.f32 %v2710_v34, %v2667_v24  ;;  %v2870_v34 = vld [vmem:[%s16945_s9] sm:$0x3] }
 0x3cc   : > { %v12672_v55 = vsub.f32 %v2691_v23, %v2815_v61  ;;  %v12674_v51 = vsub.f32 %v2693_v40, %v2815_v61  ;;  %v12676_v39 = vsub.f32 %v2696_v1, %v2815_v61  ;;  %v12678_v35 = vsub.f32 %v2698_v37, %v2815_v61 }
 0x3cd   : > { %v2712_v0 = vpop.f32.mrf.mxu2  ;;  %v12684_v11 = vsub.f32 %v2701_v63, %v2815_v61  ;;  %v12688_v20 = vsub.f32 %v2703_v17, %v2815_v61  ;;  %v12692_v37 = vsub.f32 %v2706_v44, %v2815_v61  ;;  %v3125_v50 = vadd.f32 %v12702_v31, %v12706_v9 }
 0x3ce   : > { %v2831_v21 = vmul.f32 %v12672_v55, %v12672_v55  ;;  %v2833_v43 = vmul.f32 %v12674_v51, %v12674_v51  ;;  %v2835_v23 = vmul.f32 %v12676_v39, %v12676_v39  ;;  %v2837_v40 = vmul.f32 %v12678_v35, %v12678_v35 }
 0x3cf   : > { %v2668_v28 = vpop.f32.mrf.mxu0  ;;  %v2839_v18 = vmul.f32 %v12684_v11, %v12684_v11  ;;  %v2841_v63 = vmul.f32 %v12688_v20, %v12688_v20  ;;  %v2843_v30 = vmul.f32 %v12692_v37, %v12692_v37 }
 0x3d0   : > { %v2856_v5 = vadd.f32 %v2833_v43, %v2831_v21  ;;  %v2669_v41 = vadd.f32 %v2668_v28, %v12638_v16  ;;  %v2908_v21 = vperm.slane %v2870_v34, 0 }
 0x3d2   : > { %v2857_v1 = vadd.f32 %v2856_v5, %v2835_v23  ;;  %v12708_v47 = vadd.f32 %v2712_v0, %v2669_v41 }
 0x3d4   : > { %v2858_v52 = vadd.f32 %v2857_v1, %v2837_v40  ;;  %v3126_v42 = vadd.f32 %v3125_v50, %v12708_v47  ;;  %v2926_v1 = vld [vmem:[%s16946_s10] sm:$0x3] }
 0x3d5   : > { %v2715_v3 = vpop.f32.mrf.mxu2 }
 0x3d6   : > { %v2859_v46 = vadd.f32 %v2858_v52, %v2839_v18 }
 0x3d7   : > { %v2671_v19 = vpop.f32.mrf.mxu0 }
 0x3d8   : > { %v2860_v32 = vadd.f32 %v2859_v46, %v2841_v63  ;;  %v2672_v48 = vadd.f32 %v2671_v19, %v12638_v16  ;;  %v2912_v19 = vmul.f32 %v2908_v21, %v12585_v2  ;;  %v2914_v63 = vmul.f32 %v2908_v21, %v12588_v7 }
 0x3d9   : > { %v2928_v46 = vperm.slane %v2926_v1, 0 }
 0x3da   : > { %v2861_v17 = vadd.f32 %v2860_v32, %v2843_v30  ;;  %v12714_v53 = vadd.f32 %v2715_v3, %v2672_v48  ;;  %v2916_v32 = vmul.f32 %v2908_v21, %v12591_v38 }
 0x3db   : > { %v12743_v2 = vadd.f32 %v2928_v46, %v2912_v19  ;;  %v12745_v7 = vadd.f32 %v2928_v46, %v2914_v63 }
 0x3dc   : > { %v2862_v33 = vrot.slane %v2861_v17, 4  ;;  %v3127_v43 = vadd.f32 %v3126_v42, %v12714_v53  ;;  %v12747_v24 = vadd.f32 %v2928_v46, %v2916_v32 }
 0x3dd   : > { %v2717_v60 = vpop.f32.mrf.mxu2  ;;  %v2946_v29 = vmax.f32 %v12743_v2, 0.0  ;;  %v2948_v41 = vmax.f32 %v12745_v7, 0.0 }
 0x3de   : > { %v2863_v49 = vadd.f32 %v2862_v33, %v2861_v17  ;;  %v2918_v17 = vmul.f32 %v2908_v21, %v12594_v25  ;;  %v2920_v33 = vmul.f32 %v2908_v21, %v12597_v15 }
 0x3df   : > { %v2673_v36 = vpop.f32.mrf.mxu0 }
 0x3e0   : > { %v2864_v44 = vrot.slane %v2863_v49, 2  ;;  %v2674_v62 = vadd.f32 %v2673_v36, %v12638_v16  ;;  %v2924_v36 = vmul.f32 %v2908_v21, %v12603_v13  ;;  %v12749_v38 = vadd.f32 %v2928_v46, %v2918_v17 }
 0x3e2   : > { %v2865_v14 = vadd.f32 %v2864_v44, %v2863_v49  ;;  %v12721_v0 = vadd.f32 %v2717_v60, %v2674_v62  ;;  %v2952_v48 = vmax.f32 %v12749_v38, 0.0 }
 0x3e4   : > { %v2866_v10 = vrot.slane %v2865_v14, 1  ;;  %v3128_v18 = vadd.f32 %v3127_v43, %v12721_v0  ;;  %v2909_v43 = vperm.slane %v2870_v34, 1 }
 0x3e5   : > { %v2720_v54 = vpop.f32.mrf.mxu2 }
 0x3e6   : > { %v2867_v45 = vadd.f32 %v2866_v10, %v2865_v14 }
 0x3e7   : > { %v2676_v27 = vpop.f32.mrf.mxu0 }
 0x3e8   : > { %v2869_v57 = vmul.f32 %v2867_v45, %v12530_v4  ;;  %v2677_v28 = vadd.f32 %v2676_v27, %v12638_v16  ;;  %v2950_v45 = vmax.f32 %v12747_v24, 0.0 }
 0x3ea   : > { %v2872_v61 = vadd.f32 1e-05, %v2869_v57  ;;  %v12725_v23 = vadd.f32 %v2720_v54, %v2677_v28  ;;  %v12751_v54 = vadd.f32 %v2928_v46, %v2920_v33 }
 0x3ec   : > { %11397 = vrsqrt.f32 %v2872_v61  ;;  %v3129_v30 = vadd.f32 %v3128_v18, %v12725_v23  ;;  %v2954_v50 = vmax.f32 %v12751_v54, 0.0  ;;  %vm2889_vm8 = vweird.f32 %v2872_v61 }
 0x3ed   : > { %v2722_v40 = vpop.f32.mrf.mxu2 }
 0x3ef   : > { %v2678_v5 = vpop.f32.mrf.mxu0 }
 0x3f0   : > { %v2679_v3 = vadd.f32 %v2678_v5, %v12638_v16  ;;  %v2922_v16 = vmul.f32 %v2908_v21, %v12600_v26  ;;  %v12755_v26 = vadd.f32 %v2928_v46, %v2924_v36  ;;  %v2929_v5 = vperm.slane %v2926_v1, 1 }
 0x3f2   : > { %v12732_v52 = vadd.f32 %v2722_v40, %v2679_v3  ;;  %v11398_v60 = vpop.eup %11397  ;;  %v12753_v15 = vadd.f32 %v2928_v46, %v2922_v16  ;;  %v2958_v42 = vmax.f32 %v12755_v26, 0.0 }
 0x3f3   : > { %v2884_v44 = vmul.f32 %v11398_v60, %v2872_v61  ;;  %vm2890_vm7 = vweird.f32 %v11398_v60 }
 0x3f4   : > { %v3130_v49 = vadd.f32 %v3129_v30, %v12732_v52  ;;  %v2956_v62 = vmax.f32 %v12753_v15, 0.0  ;;  %vm2891_vm9 = vmor %vm2889_vm8, %vm2890_vm7  ;;  %vm3036_vm7 = vcmask 1045508  }
 0x3f5   : > { %v2885_v25 = vmul.f32 %v11398_v60, %v2884_v44  ;;  %vm12784_vm8 = vmor %vm2966_vm4, %vm12773_vm2 }
 0x3f6   : > { %v3131_v14 = vrot.slane %v3130_v49, 4  ;;  %vm12822_vm2 = vmor %vm2972_vm1, %vm2973_vm0 }
 0x3f7   : > { %v2886_v10 = vmul.f32 0.5, %v2885_v25  ;;  %vm12832_vm14 = vmor %vm3035_vm3, %vm3036_vm7 }
 0x3f8   : > { %v3132_v13 = vadd.f32 %v3131_v14, %v3130_v49  ;;  %vm12865_vm0 = vmor %vm3047_vm12, %vm3048_vm13 }
 0x3f9   : > { %v2887_v57 = vsub.f32 1.5, %v2886_v10 }
 0x3fa   : > { %v3133_v27 = vrot.slane %v3132_v13, 2 }
 0x3fb   : > { %v2888_v21 = vmul.f32 %v11398_v60, %v2887_v57 }
 0x3fc   : > { %v3134_v28 = vadd.f32 %v3133_v27, %v3132_v13 }
 0x3fd   : > { %v2892_v3 = vsel %vm2891_vm9, %v11398_v60, %v2888_v21  ;;  %vm3075_vm9 = vcmask 1042432  }
 0x3fe   : > { %v3135_v40 = vrot.slane %v3134_v28, 1  ;;  %v2894_v18 = vmul.f32 %v2892_v3, %v12672_v55  ;;  %v2896_v19 = vmul.f32 %v2892_v3, %v12674_v51  ;;  %v2898_v63 = vmul.f32 %v2892_v3, %v12676_v39  ;;  %vm12852_vm1 = vmor %vm3075_vm9, %vm3076_vm10 }
 0x3ff   : > { %v2900_v46 = vmul.f32 %v2892_v3, %v12678_v35  ;;  %v2902_v34 = vmul.f32 %v2892_v3, %v12684_v11  ;;  %v2904_v61 = vmul.f32 %v2892_v3, %v12688_v20  ;;  %v2906_v1 = vmul.f32 %v2892_v3, %v12692_v37 }
 0x400   : > { %v3136_v30 = vadd.f32 %v3135_v40, %v3134_v28  ;;  %v2913_v32 = vmul.f32 %v2909_v43, %v2894_v18  ;;  %v2915_v17 = vmul.f32 %v2909_v43, %v2896_v19  ;;  %v2917_v60 = vmul.f32 %v2909_v43, %v2898_v63 }
 0x401   : > { %v2919_v33 = vmul.f32 %v2909_v43, %v2900_v46  ;;  %v2921_v55 = vmul.f32 %v2909_v43, %v2902_v34  ;;  %v2923_v16 = vmul.f32 %v2909_v43, %v2904_v61  ;;  %v2925_v51 = vmul.f32 %v2909_v43, %v2906_v1  ;;  %v9869_v43 = vld [vmem:[%s16947_s11 + $0x980] sm:$0xf] }
 0x402   : > { %v12778_v35 = vmul.f32 %v3136_v30, %v12530_v4  ;;  %v2933_v11 = vadd.f32 %v2929_v5, %v2913_v32  ;;  %v2935_v20 = vadd.f32 %v2929_v5, %v2915_v17  ;;  %v2937_v37 = vadd.f32 %v2929_v5, %v2917_v60 }
 0x403   : > { %v2939_v36 = vadd.f32 %v2929_v5, %v2919_v33  ;;  %v2941_v49 = vadd.f32 %v2929_v5, %v2921_v55  ;;  %v2943_v44 = vadd.f32 %v2929_v5, %v2923_v16  ;;  %v2945_v14 = vadd.f32 %v2929_v5, %v2925_v51 }
 0x404   : > { %v2947_v25 = vmax.f32 %v2933_v11, 0.0  ;;  %v2949_v13 = vmax.f32 %v2935_v20, 0.0  ;;  %v2951_v10 = vmax.f32 %v2937_v37, 0.0  ;;  %v12790_v5 = vsub.f32 %v12706_v9, %v12778_v35  ;;  %v9773_v37 = vld [vmem:[%s16947_s11 + $0x8c0] sm:$0xf] }
 0x405   : > { %v2953_v27 = vmax.f32 %v2939_v36, 0.0  ;;  %v2955_v57 = vmax.f32 %v2941_v49, 0.0  ;;  %v2957_v28 = vmax.f32 %v2943_v44, 0.0  ;;  %v2959_v21 = vmax.f32 %v2945_v14, 0.0 }
 0x406   : > { %v2960_v40 = vpack.c.bf16 %v2947_v25, %v2946_v29  ;;  %v2971_v3 = vpack.c.bf16 %v2949_v13, %v2948_v41  ;;  %v2992_v18 = vpack.c.bf16 %v2951_v10, %v2950_v45  ;;  %v12810_v2 = vsub.f32 %v12702_v31, %v12778_v35 }
 0x407   : > { %v3006_v19 = vpack.c.bf16 %v2953_v27, %v2952_v48  ;;  %v3032_v63 = vpack.c.bf16 %v2955_v57, %v2954_v50  ;;  %v3046_v46 = vpack.c.bf16 %v2957_v28, %v2956_v62  ;;  %v12806_v9 = vpack.c.bf16 %v2959_v21, %v2958_v42  ;;  %v11172_v42 = vld [vmem:[%s16947_s11 + $0x9ec] sm:$0xf0] }
 0x408   : > { %v2969_v7 = vsel %vm12784_vm8, %v2960_v40, 0  ;;  %v2976_v24 = vshrl.u32 %v2960_v40, 16  ;;  %v2981_v38 = vshrl.u32 %v2971_v3, 16  ;;  %v2984_v29 = vshll.u32 %v2971_v3, 16 }
 0x409   : > { %2970 = vst [vmem:[#allocation6] sm:$0xff] %v2969_v7  ;;  %v8580_v15 = vrot.slane %v2971_v3, 11  ;;  %v3000_v26 = vrot.slane %v2992_v18, 7  ;;  %v3011_v41 = vshrl.u32 %v2992_v18, 16  ;;  %v3014_v31 = vshll.u32 %v2992_v18, 16 }
 0x40a   : > { %v8579_v45 = vrot.slane %v2976_v24, 11  ;;  %v2983_v48 = vrot.slane %v2981_v38, 7  ;;  %v3020_v50 = vshrl.u32 %v3006_v19, 16  ;;  %v3023_v62 = vshll.u32 %v3006_v19, 16 }
 0x40b   : > { %v3001_v34 = vsel %vm12816_vm11, %v8580_v15, %v3000_v26  ;;  %v3013_v61 = vrot.slane %v3011_v41, 6  ;;  %v3016_v1 = vrot.slane %v3014_v31, 7  ;;  %v8581_v30 = vrot.slane %v3006_v19, 10  ;;  %v10884_v31 = vld [vmem:[%s16947_s11 + $0xec] sm:$0xf0] }
 0x40c   : > { %v2986_v32 = vor.u32 %v2984_v29, %v2983_v48  ;;  %v3004_v17 = vsel %vm12784_vm8, %v3001_v34, 0  ;;  %v3022_v60 = vrot.slane %v3020_v50, 6  ;;  %v3025_v33 = vrot.slane %v3023_v62, 7  ;;  %v10916_v34 = vld [vmem:[%s16947_s11 + $0x1ec] sm:$0xf0] }
 0x40d   : > { %3005 = vst [vmem:[#allocation6 + $0x10] sm:$0xff] %v3004_v17  ;;  %v3017_v16 = vor.u32 %v3016_v1, %v3013_v61  ;;  %v3040_v51 = vrot.slane %v3032_v63, 6  ;;  %v3051_v39 = vshrl.u32 %v3032_v63, 16  ;;  %v3054_v11 = vshll.u32 %v3032_v63, 16  ;;  %v8877_v17 = vld [vmem:[%s16947_s11 + $0x1c0] sm:$0xf] }
 0x40e   : > { %v2987_v20 = vsel %vm12822_vm2, %v8579_v45, %v2986_v32  ;;  %v3026_v36 = vor.u32 %v3025_v33, %v3022_v60  ;;  %v3060_v49 = vshrl.u32 %v3046_v46, 16  ;;  %v3063_v44 = vshll.u32 %v3046_v46, 16  ;;  %v10880_v32 = vld [vmem:[%s16947_s11 + $0xcc] sm:$0xf0]  ;;  %v9885_v29 = vld [vmem:[%s16947_s11 + $0x9a0] sm:$0xf] }
 0x40f   : > { %v2990_v14 = vsel %vm12784_vm8, %v2987_v20, 0  ;;  %v3018_v25 = vrot.slane %v3017_v16, 4  ;;  %v3041_v13 = vsel %vm12832_vm14, %v8581_v30, %v3040_v51  ;;  %v3053_v10 = vrot.slane %v3051_v39, 5  ;;  %v8749_v30 = vld [vmem:[%s16947_s11 + $0xc0] sm:$0xf] }
 0x410   : > { %2991 = vst [vmem:[#allocation6 + $0x8] sm:$0xff] %v2990_v14  ;;  %v3044_v27 = vsel %vm12784_vm8, %v3041_v13, 0  ;;  %v3056_v57 = vrot.slane %v3054_v11, 6  ;;  %v3062_v28 = vrot.slane %v3060_v49, 5  ;;  %v3065_v21 = vrot.slane %v3063_v44, 6 }
 0x411   : > { %v3027_v3 = vsel %vm12840_vm15, %v3018_v25, %v3026_v36  ;;  %3045 = vst [vmem:[#allocation6 + $0x20] sm:$0xff] %v3044_v27  ;;  %v8582_v18 = vrot.slane %v3046_v46, 9  ;;  %v3080_v19 = vrot.slane %v12806_v9, 5  ;;  %v3087_v63 = vshrl.u32 %v12806_v9, 16  ;;  %v10948_v51 = vld [vmem:[%s16947_s11 + $0x2ec] sm:$0xf0] }
 0x412   : > { %v3030_v7 = vsel %vm12784_vm8, %v3027_v3, 0  ;;  %v3057_v24 = vor.u32 %v3056_v57, %v3053_v10  ;;  %v3090_v38 = vshll.u32 %v12806_v9, 16  ;;  %v3066_v15 = vor.u32 %v3065_v21, %v3062_v28  ;;  %v8765_v9 = vld [vmem:[%s16947_s11 + $0xe0] sm:$0xf]  ;;  %v10980_v11 = vld [vmem:[%s16947_s11 + $0x3ec] sm:$0xf0] }
 0x413   : > { %3031 = vst [vmem:[#allocation6 + $0x18] sm:$0xff] %v3030_v7  ;;  %v3081_v46 = vsel %vm12852_vm1, %v8582_v18, %v3080_v19  ;;  %v3089_v26 = vrot.slane %v3087_v63, 4  ;;  %v12873_v41 = vsub.f32 %v12708_v47, %v12778_v35  ;;  %v12885_v62 = vsub.f32 %v12714_v53, %v12778_v35  ;;  %v8893_v47 = vld [vmem:[%s16947_s11 + $0x1e0] sm:$0xf]  ;;  %v10912_v44 = vld [vmem:[%s16947_s11 + $0x1cc] sm:$0xf0] }
 0x414   : > { %v3058_v45 = vrot.slane %v3057_v24, 4  ;;  %v3084_v48 = vsel %vm12784_vm8, %v3081_v46, 0  ;;  %v3092_v50 = vrot.slane %v3090_v38, 5  ;;  %v12895_v61 = vsub.f32 %v12721_v0, %v12778_v35  ;;  %v9021_v0 = vld [vmem:[%s16947_s11 + $0x2e0] sm:$0xf] }
 0x415   : > { %3085 = vst [vmem:[#allocation6 + $0x30] sm:$0xff] %v3084_v48  ;;  %v3154_v1 = vmul.f32 %v12790_v5, %v12790_v5  ;;  %v3156_v53 = vmul.f32 %v12810_v2, %v12810_v2  ;;  %v12917_v16 = vsub.f32 %v12725_v23, %v12778_v35  ;;  %v9149_v39 = vld [vmem:[%s16947_s11 + $0x3e0] sm:$0xf]  ;;  %v12932_v36 = vsub.f32 %v12732_v52, %v12778_v35  ;;  %v10944_v25 = vld [vmem:[%s16947_s11 + $0x2cc] sm:$0xf0] }
 0x416   : > { %v3067_v60 = vsel %vm12865_vm0, %v3058_v45, %v3066_v15  ;;  %v3093_v33 = vor.u32 %v3092_v50, %v3089_v26  ;;  %v3158_v23 = vmul.f32 %v12873_v41, %v12873_v41  ;;  %v9005_v14 = vld [vmem:[%s16947_s11 + $0x2c0] sm:$0xf]  ;;  %v3160_v52 = vmul.f32 %v12885_v62, %v12885_v62  ;;  %v10976_v57 = vld [vmem:[%s16947_s11 + $0x3cc] sm:$0xf0] }
 0x417   : > { %v3070_v20 = vsel %vm12784_vm8, %v3067_v60, 0  ;;  %v3179_v49 = vadd.f32 %v3156_v53, %v3154_v1  ;;  %v8766_v35 = vor.u32 %v10884_v31, %v8765_v9  ;;  %v8894_v10 = vor.u32 %v10916_v34, %v8893_v47  ;;  %v9133_v27 = vld [vmem:[%s16947_s11 + $0x3c0] sm:$0xf]  ;;  %v10876_v38 = vld [vmem:[%s16947_s11 + $0xac] sm:$0xf0] }
 0x418   : > { %3071 = vst [vmem:[#allocation6 + $0x28] sm:$0xff] %v3070_v20  ;;  %v3094_v13 = vrot.slane %v3093_v33, 4  ;;  %v3162_v28 = vmul.f32 %v12895_v61, %v12895_v61  ;;  %v9022_v3 = vor.u32 %v10948_v51, %v9021_v0  ;;  %v9150_v18 = vor.u32 %v10980_v11, %v9149_v39  ;;  %v8733_v24 = vld [vmem:[%s16947_s11 + $0xa0] sm:$0xf]  ;;  %v10908_v26 = vld [vmem:[%s16947_s11 + $0x1ac] sm:$0xf0] }
 0x419   : > { %v3180_v21 = vadd.f32 %v3179_v49, %v3158_v23  ;;  %6575 = vmatpush.bf16.msra.mxu1 %v8766_v35  ;;  %6589 = vmatpush.bf16.msra.mxu3 %v8894_v10  ;;  %v8750_v63 = vor.u32 %v10880_v32, %v8749_v30  ;;  %v8878_v7 = vor.u32 %v10912_v44, %v8877_v17  ;;  %v8861_v15 = vld [vmem:[%s16947_s11 + $0x1a0] sm:$0xf]  ;;  %v10940_v48 = vld [vmem:[%s16947_s11 + $0x2ac] sm:$0xf0] }
 0x41a   : > { %v3097_v19 = vsel %vm12784_vm8, %v3094_v13, 0  ;;  %6603 = vmatpush.bf16.msrb.mxu0 %v9022_v3  ;;  %6617 = vmatpush.bf16.msrb.mxu2 %v9150_v18  ;;  %v9006_v9 = vor.u32 %v10944_v25, %v9005_v14  ;;  %v9134_v31 = vor.u32 %v10976_v57, %v9133_v27  ;;  %v8989_v45 = vld [vmem:[%s16947_s11 + $0x2a0] sm:$0xf]  ;;  %v10972_v47 = vld [vmem:[%s16947_s11 + $0x3ac] sm:$0xf0]  ;;  %v3164_v34 = vmul.f32 %v12917_v16, %v12917_v16 }
 0x41b   : > { %3098 = vst [vmem:[#allocation6 + $0x38] sm:$0xff] %v3097_v19  ;;  %v3181_v46 = vadd.f32 %v3180_v21, %v3160_v52  ;;  %v9117_v50 = vld [vmem:[%s16947_s11 + $0x3a0] sm:$0xf]  ;;  %v3166_v53 = vmul.f32 %v12932_v36, %v12932_v36  ;;  %v8734_v30 = vor.u32 %v10876_v38, %v8733_v24  ;;  %v8862_v32 = vor.u32 %v10908_v26, %v8861_v15  ;;  %v10872_v0 = vld [vmem:[%s16947_s11 + $0x8c] sm:$0xf0] }
 0x41c   : > { %v8717_v17 = vld [vmem:[%s16947_s11 + $0x80] sm:$0xf]  ;;  %v10904_v51 = vld [vmem:[%s16947_s11 + $0x18c] sm:$0xf0]  ;;  %v8990_v39 = vor.u32 %v10940_v48, %v8989_v45  ;;  %v9118_v11 = vor.u32 %v10972_v47, %v9117_v50 }
 0x41d   : > { %v3182_v1 = vadd.f32 %v3181_v46, %v3162_v28  ;;  %6576 = vmatpush.bf16.msra.mxu1 %v8750_v63  ;;  %6590 = vmatpush.bf16.msra.mxu3 %v8878_v7  ;;  %v8845_v33 = vld [vmem:[%s16947_s11 + $0x180] sm:$0xf]  ;;  %v10936_v23 = vld [vmem:[%s16947_s11 + $0x28c] sm:$0xf0]  ;;  %v8718_v13 = vor.u32 %v10872_v0, %v8717_v17 }
 0x41e   : > { %6604 = vmatpush.bf16.msrb.mxu0 %v9006_v9  ;;  %6618 = vmatpush.bf16.msrb.mxu2 %v9134_v31  ;;  %v8973_v20 = vld [vmem:[%s16947_s11 + $0x280] sm:$0xf]  ;;  %v10968_v44 = vld [vmem:[%s16947_s11 + $0x38c] sm:$0xf0]  ;;  %v8846_v52 = vor.u32 %v10904_v51, %v8845_v33 }
 0x41f   : > { %v3183_v60 = vadd.f32 %v3182_v1, %v3164_v34  ;;  %v9101_v49 = vld [vmem:[%s16947_s11 + $0x380] sm:$0xf]  ;;  %v10868_v10 = vld [vmem:[%s16947_s11 + $0x6c] sm:$0xf0]  ;;  %v8974_v21 = vor.u32 %v10936_v23, %v8973_v20 }
 0x420   : > { %v13012_v14 = vld [vmem:[%s16945_s9] sm:$0x3]  ;;  %v10900_v28 = vld [vmem:[%s16947_s11 + $0x16c] sm:$0xf0]  ;;  %v9102_v3 = vor.u32 %v10968_v44, %v9101_v49 }
 0x421   : > { %v3184_v25 = vadd.f32 %v3183_v60, %v3166_v53  ;;  %6577 = vmatpush.bf16.msra.mxu1 %v8734_v30  ;;  %6591 = vmatpush.bf16.msra.mxu3 %v8862_v32  ;;  %v8701_v35 = vld [vmem:[%s16947_s11 + $0x60] sm:$0xf]  ;;  %v10932_v19 = vld [vmem:[%s16947_s11 + $0x26c] sm:$0xf0]  ;;  %v13039_v24 = vperm.slane %v13012_v14, 0 }
 0x422   : > { %v8829_v27 = vld [vmem:[%s16947_s11 + $0x160] sm:$0xf]  ;;  %6605 = vmatpush.bf16.msrb.mxu0 %v8990_v39  ;;  %6619 = vmatpush.bf16.msrb.mxu2 %v9118_v11  ;;  %v10964_v7 = vld [vmem:[%s16947_s11 + $0x36c] sm:$0xf0]  ;;  %v8702_v46 = vor.u32 %v10868_v10, %v8701_v35 }
 0x423   : > { %v3185_v57 = vrot.slane %v3184_v25, 4  ;;  %v8957_v18 = vld [vmem:[%s16947_s11 + $0x260] sm:$0xf]  ;;  %v8830_v26 = vor.u32 %v10900_v28, %v8829_v27  ;;  %v10864_v31 = vld [vmem:[%s16947_s11 + $0x4c] sm:$0xf0]  ;;  %v3235_v60 = vmul.f32 %v13039_v24, %v12651_v58  ;;  %v3239_v27 = vmul.f32 %v13039_v24, %v12657_v6 }
 0x424   : > { %v9085_v63 = vld [vmem:[%s16947_s11 + $0x360] sm:$0xf]  ;;  %v10896_v50 = vld [vmem:[%s16947_s11 + $0x14c] sm:$0xf0]  ;;  %v8958_v47 = vor.u32 %v10932_v19, %v8957_v18 }
 0x425   : > { %v13044_v38 = vld [vmem:[%s16946_s10] sm:$0x3]  ;;  %v3186_v15 = vadd.f32 %v3185_v57, %v3184_v25  ;;  %6578 = vmatpush.bf16.msra.mxu1 %v8718_v13  ;;  %6592 = vmatpush.bf16.msra.mxu3 %v8846_v52  ;;  %v9086_v34 = vor.u32 %v10964_v7, %v9085_v63  ;;  %v10928_v53 = vld [vmem:[%s16947_s11 + $0x24c] sm:$0xf0]  ;;  %v3237_v13 = vmul.f32 %v13039_v24, %v12654_v12 }
 0x426   : > { %v8685_v9 = vld [vmem:[%s16947_s11 + $0x40] sm:$0xf]  ;;  %6606 = vmatpush.bf16.msrb.mxu0 %v8974_v21  ;;  %6620 = vmatpush.bf16.msrb.mxu2 %v9102_v3  ;;  %v10960_v32 = vld [vmem:[%s16947_s11 + $0x34c] sm:$0xf0]  ;;  %v13071_v17 = vperm.slane %v13044_v38, 0  ;;  %v3241_v57 = vmul.f32 %v13039_v24, %v12660_v59  ;;  %v3243_v12 = vmul.f32 %v13039_v24, %v12663_v22 }
 0x427   : > { %v8813_v45 = vld [vmem:[%s16947_s11 + $0x140] sm:$0xf]  ;;  %v3187_v48 = vrot.slane %v3186_v15, 2  ;;  %v8686_v33 = vor.u32 %v10864_v31, %v8685_v9  ;;  %v10860_v11 = vld [vmem:[%s16947_s11 + $0x2c] sm:$0xf0] }
 0x428   : > { %v8941_v1 = vld [vmem:[%s16947_s11 + $0x240] sm:$0xf]  ;;  %v8814_v51 = vor.u32 %v10896_v50, %v8813_v45  ;;  %v10892_v58 = vld [vmem:[%s16947_s11 + $0x12c] sm:$0xf0]  ;;  %v13114_v18 = vadd.f32 %v13071_v17, %v3235_v60  ;;  %v3245_v45 = vmul.f32 %v13039_v24, %v12666_v8  ;;  %v13152_v8 = vadd.f32 %v13071_v17, %v3239_v27 }
 0x429   : > { %v9069_v30 = vld [vmem:[%s16947_s11 + $0x340] sm:$0xf]  ;;  %v3188_v0 = vadd.f32 %v3187_v48, %v3186_v15  ;;  %6579 = vmatpush.bf16.msra.mxu1 %v8702_v46  ;;  %6593 = vmatpush.bf16.msra.mxu3 %v8830_v26  ;;  %v8942_v49 = vor.u32 %v10928_v53, %v8941_v1  ;;  %v10924_v52 = vld [vmem:[%s16947_s11 + $0x22c] sm:$0xf0] }
 0x42a   : > { %v8669_v39 = vld [vmem:[%s16947_s11 + $0x20] sm:$0xf]  ;;  %6607 = vmatpush.bf16.msrb.mxu0 %v8958_v47  ;;  %6621 = vmatpush.bf16.msrb.mxu2 %v9086_v34  ;;  %v9070_v44 = vor.u32 %v10960_v32, %v9069_v30  ;;  %v10956_v10 = vld [vmem:[%s16947_s11 + $0x32c] sm:$0xf0]  ;;  %v13149_v34 = vadd.f32 %v13071_v17, %v3237_v13  ;;  %v13166_v30 = vadd.f32 %v13071_v17, %v3243_v12  ;;  %v3273_v27 = vmax.f32 %v13152_v8, 0.0 }
 0x42b   : > { %v8797_v20 = vld [vmem:[%s16947_s11 + $0x120] sm:$0xf]  ;;  %v3189_v23 = vrot.slane %v3188_v0, 1  ;;  %v10856_v3 = vld [vmem:[%s16947_s11 + $0xc] sm:$0xf0]  ;;  %v8670_v6 = vor.u32 %v10860_v11, %v8669_v39  ;;  %v3269_v39 = vmax.f32 %v13114_v18, 0.0 }
 0x42c   : > { %v8925_v25 = vld [vmem:[%s16947_s11 + $0x220] sm:$0xf]  ;;  %v8798_v19 = vor.u32 %v10892_v58, %v8797_v20  ;;  %v10888_v22 = vld [vmem:[%s16947_s11 + $0x10c] sm:$0xf0]  ;;  %v13183_v58 = vadd.f32 %v13071_v17, %v3245_v45 }
 0x42d   : > { %v9053_v35 = vld [vmem:[%s16947_s11 + $0x320] sm:$0xf]  ;;  %v3190_v28 = vadd.f32 %v3189_v23, %v3188_v0  ;;  %6580 = vmatpush.bf16.msra.mxu1 %v8686_v33  ;;  %6594 = vmatpush.bf16.msra.mxu3 %v8814_v51  ;;  %v11012_v15 = vld [vmem:[%s16947_s11 + $0x4ec] sm:$0xf0]  ;;  %v8926_v9 = vor.u32 %v10924_v52, %v8925_v25 }
 0x42e   : > { %v8653_v21 = vld [vmem:[%s16947_s11] sm:$0xf]  ;;  %6608 = vmatpush.bf16.msrb.mxu0 %v8942_v49  ;;  %6622 = vmatpush.bf16.msrb.mxu2 %v9070_v44  ;;  %v11044_v26 = vld [vmem:[%s16947_s11 + $0x5ec] sm:$0xf0]  ;;  %v9054_v31 = vor.u32 %v10956_v10, %v9053_v35  ;;  %v3271_v10 = vmax.f32 %v13149_v34, 0.0 }
 0x42f   : > { %v8781_v59 = vld [vmem:[%s16947_s11 + $0x100] sm:$0xf]  ;;  %v3192_v7 = vmul.f32 %v3190_v28, %v12530_v4  ;;  %v3247_v4 = vmul.f32 %v13039_v24, %v12669_v56  ;;  %v10920_v50 = vld [vmem:[%s16947_s11 + $0x20c] sm:$0xf0]  ;;  %v13155_v56 = vadd.f32 %v13071_v17, %v3241_v57  ;;  %v8654_v32 = vor.u32 %v10856_v3, %v8653_v21 }
 0x430   : > { %v9277_v63 = vld [vmem:[%s16947_s11 + $0x4e0] sm:$0xf]  ;;  %v10952_v1 = vld [vmem:[%s16947_s11 + $0x30c] sm:$0xf0]  ;;  %v8782_v0 = vor.u32 %v10888_v22, %v8781_v59 }
 0x431   : > { %v9405_v46 = vld [vmem:[%s16947_s11 + $0x5e0] sm:$0xf]  ;;  %v13157_v24 = vadd.f32 1e-05, %v3192_v7  ;;  %6581 = vmatpush.bf16.msra.mxu1 %v8670_v6  ;;  %6595 = vmatpush.bf16.msra.mxu3 %v8798_v19  ;;  %v11076_v60 = vld [vmem:[%s16947_s11 + $0x6ec] sm:$0xf0]  ;;  %v9278_v11 = vor.u32 %v11012_v15, %v9277_v63  ;;  %v13186_v49 = vadd.f32 %v13071_v17, %v3247_v4 }
 0x432   : > { %v8909_v48 = vld [vmem:[%s16947_s11 + $0x200] sm:$0xf]  ;;  %v11108_v51 = vld [vmem:[%s16947_s11 + $0x7ec] sm:$0xf0]  ;;  %v9406_v20 = vor.u32 %v11044_v26, %v9405_v46  ;;  %6609 = vmatpush.bf16.msrb.mxu0 %v8926_v9  ;;  %6623 = vmatpush.bf16.msrb.mxu2 %v9054_v31  ;;  %v3275_v6 = vmax.f32 %v13155_v56, 0.0  ;;  %v3277_v19 = vmax.f32 %v13166_v30, 0.0 }
 0x433   : > { %v9037_v47 = vld [vmem:[%s16947_s11 + $0x300] sm:$0xf]  ;;  %11399 = vrsqrt.f32 %v13157_v24  ;;  %v11008_v44 = vld [vmem:[%s16947_s11 + $0x4cc] sm:$0xf0]  ;;  %v8910_v52 = vor.u32 %v10920_v50, %v8909_v48  ;;  %v3279_v9 = vmax.f32 %v13183_v58, 0.0  ;;  %vm3212_vm4 = vweird.f32 %v13157_v24 }
 0x434   : > { %v9533_v53 = vld [vmem:[%s16947_s11 + $0x6e0] sm:$0xf]  ;;  %v11040_v13 = vld [vmem:[%s16947_s11 + $0x5cc] sm:$0xf0]  ;;  %v9038_v35 = vor.u32 %v10952_v1, %v9037_v47  ;;  %v16978_v18 = vmax.f32 %v13186_v49, 0.0 }
 0x435   : > { %v9661_v33 = vld [vmem:[%s16947_s11 + $0x7e0] sm:$0xf]  ;;  %v9534_v17 = vor.u32 %v11076_v60, %v9533_v53  ;;  %6582 = vmatpush.bf16.msra.mxu1 %v8654_v32  ;;  %6596 = vmatpush.bf16.msra.mxu3 %v8782_v0  ;;  %v11072_v28 = vld [vmem:[%s16947_s11 + $0x6cc] sm:$0xf0] }
 0x436   : > { %v9261_v23 = vld [vmem:[%s16947_s11 + $0x4c0] sm:$0xf]  ;;  %v9662_v57 = vor.u32 %v11108_v51, %v9661_v33  ;;  %v11104_v3 = vld [vmem:[%s16947_s11 + $0x7cc] sm:$0xf0]  ;;  %6610 = vmatpush.bf16.msrb.mxu0 %v8910_v52  ;;  %6624 = vmatpush.bf16.msrb.mxu2 %v9038_v35 }
 0x437   : > { %v9389_v25 = vld [vmem:[%s16947_s11 + $0x5c0] sm:$0xf]  ;;  %v9262_v59 = vor.u32 %v11008_v44, %v9261_v23  ;;  %v11004_v7 = vld [vmem:[%s16947_s11 + $0x4ac] sm:$0xf0] }
 0x438   : > { %v9517_v12 = vld [vmem:[%s16947_s11 + $0x6c0] sm:$0xf]  ;;  %v9390_v22 = vor.u32 %v11040_v13, %v9389_v25  ;;  %v11036_v46 = vld [vmem:[%s16947_s11 + $0x5ac] sm:$0xf0] }
 0x439   : > { %v9645_v21 = vld [vmem:[%s16947_s11 + $0x7c0] sm:$0xf]  ;;  %6631 = vmatpush.bf16.msrb.mxu1 %v9278_v11  ;;  %6645 = vmatpush.bf16.msrb.mxu3 %v9406_v20  ;;  %v13225_v26 = vpop.eup %11399  ;;  %v9518_v45 = vor.u32 %v11072_v28, %v9517_v12  ;;  %v13242_v1 = vld [vmem:[%s16947_s11 + $0x48c] sm:$0xf0] }
 0x43a   : > { %v9245_v63 = vld [vmem:[%s16947_s11 + $0x4a0] sm:$0xf]  ;;  %6659 = vmatpush.bf16.msra.mxu0 %v9534_v17  ;;  %6673 = vmatpush.bf16.msra.mxu2 %v9662_v57  ;;  %v9646_v4 = vor.u32 %v11104_v3, %v9645_v21  ;;  %v3207_v50 = vmul.f32 %v13225_v26, %v13157_v24  ;;  %v13252_v32 = vld [vmem:[%s16947_s11 + $0x58c] sm:$0xf0]  ;;  %vm3213_vm3 = vweird.f32 %v13225_v26 }
 0x43b   : > { %v9373_v15 = vld [vmem:[%s16947_s11 + $0x5a0] sm:$0xf]  ;;  %v11068_v0 = vld [vmem:[%s16947_s11 + $0x6ac] sm:$0xf0]  ;;  %v9246_v51 = vor.u32 %v11004_v7, %v9245_v63  ;;  %vm3214_vm5 = vmor %vm3212_vm4, %vm3213_vm3 }
 0x43c   : > { %v9501_v48 = vld [vmem:[%s16947_s11 + $0x6a0] sm:$0xf]  ;;  %v11100_v33 = vld [vmem:[%s16947_s11 + $0x7ac] sm:$0xf0]  ;;  %v9374_v11 = vor.u32 %v11036_v46, %v9373_v15  ;;  %v3208_v13 = vmul.f32 %v13225_v26, %v3207_v50 }
 0x43d   : > { %v13237_v47 = vld [vmem:[%s16947_s11 + $0x480] sm:$0xf]  ;;  %6632 = vmatpush.bf16.msrb.mxu1 %v9262_v59  ;;  %6646 = vmatpush.bf16.msrb.mxu3 %v9390_v22  ;;  %v13271_v23 = vld [vmem:[%s16947_s11 + $0x46c] sm:$0xf0]  ;;  %v9502_v21 = vor.u32 %v11068_v0, %v9501_v48 }
 0x43e   : > { %v13247_v53 = vld [vmem:[%s16947_s11 + $0x580] sm:$0xf]  ;;  %v13281_v25 = vld [vmem:[%s16947_s11 + $0x56c] sm:$0xf0]  ;;  %6660 = vmatpush.bf16.msra.mxu0 %v9518_v45  ;;  %6674 = vmatpush.bf16.msra.mxu2 %v9646_v4  ;;  %v3209_v45 = vmul.f32 0.5, %v3208_v13  ;;  %v13345_v4 = vperm.slane %v13012_v14, 1 }
 0x43f   : > { %v9629_v60 = vld [vmem:[%s16947_s11 + $0x7a0] sm:$0xf]  ;;  %v13292_v35 = vld [vmem:[%s16947_s11 + $0x68c] sm:$0xf0] }
 0x440   : > { %v13266_v20 = vld [vmem:[%s16947_s11 + $0x460] sm:$0xf]  ;;  %v13302_v57 = vld [vmem:[%s16947_s11 + $0x78c] sm:$0xf0]  ;;  %v9630_v3 = vor.u32 %v11100_v33, %v9629_v60  ;;  %v9230_v60 = vor.u32 %v13242_v1, %v13237_v47  ;;  %v9358_v33 = vor.u32 %v13252_v32, %v13247_v53 }
 0x441   : > { %v13276_v44 = vld [vmem:[%s16947_s11 + $0x560] sm:$0xf]  ;;  %v13312_v28 = vld [vmem:[%s16947_s11 + $0x44c] sm:$0xf0]  ;;  %6633 = vmatpush.bf16.msrb.mxu1 %v9246_v51  ;;  %6647 = vmatpush.bf16.msrb.mxu3 %v9374_v11  ;;  %v3210_v11 = vsub.f32 1.5, %v3209_v45  ;;  %v9214_v47 = vor.u32 %v13271_v23, %v13266_v20 }
 0x442   : > { %v13287_v52 = vld [vmem:[%s16947_s11 + $0x680] sm:$0xf]  ;;  %v13322_v22 = vld [vmem:[%s16947_s11 + $0x54c] sm:$0xf0]  ;;  %v9342_v1 = vor.u32 %v13281_v25, %v13276_v44  ;;  %6661 = vmatpush.bf16.msra.mxu0 %v9502_v21  ;;  %6675 = vmatpush.bf16.msra.mxu2 %v9630_v3 }
 0x443   : > { %v13297_v17 = vld [vmem:[%s16947_s11 + $0x780] sm:$0xf]  ;;  %v13332_v7 = vld [vmem:[%s16947_s11 + $0x66c] sm:$0xf0]  ;;  %v9486_v20 = vor.u32 %v13292_v35, %v13287_v52  ;;  %v3211_v35 = vmul.f32 %v13225_v26, %v3210_v11 }
 0x444   : > { %v13307_v12 = vld [vmem:[%s16947_s11 + $0x440] sm:$0xf]  ;;  %v13342_v46 = vld [vmem:[%s16947_s11 + $0x76c] sm:$0xf0]  ;;  %v9614_v23 = vor.u32 %v13302_v57, %v13297_v17 }
 0x445   : > { %v13317_v59 = vld [vmem:[%s16947_s11 + $0x540] sm:$0xf]  ;;  %v13355_v50 = vld [vmem:[%s16947_s11 + $0x42c] sm:$0xf0]  ;;  %v9198_v44 = vor.u32 %v13312_v28, %v13307_v12  ;;  %v3252_v28 = vperm.slane %v13044_v38, 1  ;;  %6634 = vmatpush.bf16.msrb.mxu1 %v9230_v60  ;;  %6648 = vmatpush.bf16.msrb.mxu3 %v9358_v33 }
 0x446   : > { %v13327_v63 = vld [vmem:[%s16947_s11 + $0x660] sm:$0xf]  ;;  %v13365_v14 = vld [vmem:[%s16947_s11 + $0x52c] sm:$0xf0]  ;;  %v9326_v17 = vor.u32 %v13322_v22, %v13317_v59  ;;  %6662 = vmatpush.bf16.msra.mxu0 %v9486_v20  ;;  %6676 = vmatpush.bf16.msra.mxu2 %v9614_v23 }
 0x447   : > { %v13337_v15 = vld [vmem:[%s16947_s11 + $0x760] sm:$0xf]  ;;  %v13379_v31 = vld [vmem:[%s16947_s11 + $0x64c] sm:$0xf0]  ;;  %v9470_v57 = vor.u32 %v13332_v7, %v13327_v63  ;;  %v3215_v63 = vsel %vm3214_vm5, %v13225_v26, %v3211_v35 }
 0x448   : > { %v13350_v48 = vld [vmem:[%s16947_s11 + $0x420] sm:$0xf]  ;;  %v13394_v53 = vld [vmem:[%s16947_s11 + $0x74c] sm:$0xf0]  ;;  %v9598_v12 = vor.u32 %v13342_v46, %v13337_v15  ;;  %v3217_v46 = vmul.f32 %v3215_v63, %v12790_v5  ;;  %v3219_v45 = vmul.f32 %v3215_v63, %v12810_v2  ;;  %v3221_v60 = vmul.f32 %v3215_v63, %v12873_v41 }
 0x449   : > { %v13360_v0 = vld [vmem:[%s16947_s11 + $0x520] sm:$0xf]  ;;  %v13411_v25 = vld [vmem:[%s16947_s11 + $0x40c] sm:$0xf0]  ;;  %v9182_v21 = vor.u32 %v13355_v50, %v13350_v48  ;;  %v3223_v33 = vmul.f32 %v3215_v63, %v12885_v62  ;;  %v3227_v5 = vmul.f32 %v3215_v63, %v12917_v16  ;;  %v3229_v2 = vmul.f32 %v3215_v63, %v12932_v36  ;;  %6635 = vmatpush.bf16.msrb.mxu1 %v9214_v47 }
 0x44a   : > { %v13374_v13 = vld [vmem:[%s16947_s11 + $0x640] sm:$0xf]  ;;  %v13421_v52 = vld [vmem:[%s16947_s11 + $0x50c] sm:$0xf0]  ;;  %v9310_v3 = vor.u32 %v13365_v14, %v13360_v0  ;;  %v3236_v62 = vmul.f32 %v13345_v4, %v3217_v46  ;;  %v3238_v11 = vmul.f32 %v13345_v4, %v3219_v45  ;;  %6649 = vmatpush.bf16.msrb.mxu3 %v9342_v1  ;;  %6663 = vmatpush.bf16.msra.mxu0 %v9470_v57 }
 0x44b   : > { %v13384_v51 = vld [vmem:[%s16947_s11 + $0x740] sm:$0xf]  ;;  %v9454_v59 = vor.u32 %v13379_v31, %v13374_v13  ;;  %v13447_v38 = vld [vmem:[%s16947_s11 + $0x8ec] sm:$0xf0]  ;;  %v3242_v20 = vmul.f32 %v13345_v4, %v3223_v33  ;;  %v3246_v23 = vmul.f32 %v13345_v4, %v3227_v5  ;;  %v3248_v35 = vmul.f32 %v13345_v4, %v3229_v2  ;;  %6677 = vmatpush.bf16.msra.mxu2 %v9598_v12 }
 0x44c   : > { %v13399_v32 = vld [vmem:[%s16947_s11 + $0x400] sm:$0xf]  ;;  %v9582_v7 = vor.u32 %v13394_v53, %v13384_v51  ;;  %v13468_v13 = vld [vmem:[%s16947_s11 + $0x62c] sm:$0xf0]  ;;  %v3225_v51 = vmul.f32 %v3215_v63, %v12895_v61  ;;  %v3240_v53 = vmul.f32 %v13345_v4, %v3221_v60  ;;  %v3256_v46 = vadd.f32 %v3252_v28, %v3236_v62 }
 0x44d   : > { %v13416_v24 = vld [vmem:[%s16947_s11 + $0x500] sm:$0xf]  ;;  %v9166_v15 = vor.u32 %v13411_v25, %v13399_v32  ;;  %v11084_v16 = vld [vmem:[%s16947_s11 + $0x72c] sm:$0xf0]  ;;  %v3258_v47 = vadd.f32 %v3252_v28, %v3238_v11  ;;  %v3262_v60 = vadd.f32 %v3252_v28, %v3242_v20  ;;  %v3266_v1 = vadd.f32 %v3252_v28, %v3246_v23  ;;  %6636 = vmatpush.bf16.msrb.mxu1 %v9198_v44 }
 0x44e   : > { %v13442_v22 = vld [vmem:[%s16947_s11 + $0x8e0] sm:$0xf]  ;;  %v9294_v31 = vor.u32 %v13421_v52, %v13416_v24  ;;  %v3244_v36 = vmul.f32 %v13345_v4, %v3225_v51  ;;  %v3260_v45 = vadd.f32 %v3252_v28, %v3240_v53  ;;  %v13498_v51 = vld [vmem:[%s16947_s11 + $0x60c] sm:$0xf0]  ;;  %v3268_v5 = vadd.f32 %v3252_v28, %v3248_v35  ;;  %6650 = vmatpush.bf16.msrb.mxu3 %v9326_v17 }
 0x44f   : > { %v13463_v26 = vld [vmem:[%s16947_s11 + $0x620] sm:$0xf]  ;;  %v9790_v41 = vor.u32 %v13447_v38, %v13442_v22  ;;  %v3270_v57 = vmax.f32 %v3256_v46, 0.0  ;;  %v3272_v2 = vmax.f32 %v3258_v47, 0.0  ;;  %v3276_v11 = vmax.f32 %v3262_v60, 0.0  ;;  %6664 = vmatpush.bf16.msra.mxu0 %v9454_v59  ;;  %6678 = vmatpush.bf16.msra.mxu2 %v9582_v7 }
 0x450   : > { %v9565_v61 = vld [vmem:[%s16947_s11 + $0x720] sm:$0xf]  ;;  %v9438_v63 = vor.u32 %v13468_v13, %v13463_v26  ;;  %v3264_v4 = vadd.f32 %v3252_v28, %v3244_v36  ;;  %v3274_v62 = vmax.f32 %v3260_v45, 0.0  ;;  %v11080_v53 = vld [vmem:[%s16947_s11 + $0x70c] sm:$0xf0]  ;;  %v3280_v36 = vmax.f32 %v3266_v1, 0.0 }
 0x451   : > { %v13493_v33 = vld [vmem:[%s16947_s11 + $0x600] sm:$0xf]  ;;  %v9566_v26 = vor.u32 %v11084_v16, %v9565_v61  ;;  %v3282_v23 = vmax.f32 %v3268_v5, 0.0  ;;  %v3283_v28 = vpack.c.bf16 %v3270_v57, %v3269_v39  ;;  %v3287_v61 = vpack.c.bf16 %v3272_v2, %v3271_v10  ;;  %6637 = vmatpush.bf16.msrb.mxu1 %v9182_v21  ;;  %v8589_v57 = vld [vmem:[#allocation6] sm:$0xf] }
 0x452   : > { %v13503_v13 = vld [vmem:[%s16947_s11 + $0x700] sm:$0xf]  ;;  %v3278_v20 = vmax.f32 %v3264_v4, 0.0  ;;  %v9422_v12 = vor.u32 %v13498_v51, %v13493_v33  ;;  %v3305_v44 = vpack.c.bf16 %v3274_v62, %v3273_v27  ;;  %v3316_v16 = vpack.c.bf16 %v3276_v11, %v3275_v6  ;;  %6651 = vmatpush.bf16.msrb.mxu3 %v9310_v3  ;;  %v10838_v2 = vld [vmem:[#allocation6 + $0x4] sm:$0xf] }
 0x453   : > { %v13522_v17 = vpack.c.bf16 %v3280_v36, %v3279_v9  ;;  %v13526_v39 = vpack.c.bf16 %v3282_v23, %v16978_v18  ;;  %v9550_v34 = vor.u32 %v11080_v53, %v13503_v13  ;;  %v3285_v8 = vsel %vm12784_vm8, %v3283_v28, 0  ;;  %6665 = vmatpush.bf16.msra.mxu0 %v9438_v63  ;;  %6679 = vmatpush.bf16.msra.mxu2 %v9566_v26  ;;  %v9917_v24 = vld [vmem:[%s16947_s11 + $0x9e0] sm:$0xf] }
 0x454   : > { %v3339_v35 = vpack.c.bf16 %v3278_v20, %v3277_v19  ;;  %v3289_v56 = vshrl.u32 %v3283_v28, 16  ;;  %v3294_v10 = vshrl.u32 %v3287_v61, 16  ;;  %v3297_v27 = vshll.u32 %v3287_v61, 16  ;;  %3286 = vst [vmem:[#allocation6 + $0x40] sm:$0xff] %v3285_v8 }
 0x455   : > { %v8584_v30 = vrot.slane %v3287_v61, 11  ;;  %v3310_v58 = vrot.slane %v3305_v44, 7  ;;  %v3318_v6 = vshrl.u32 %v3305_v44, 16  ;;  %v3321_v49 = vshll.u32 %v3305_v44, 16  ;;  %6638 = vmatpush.bf16.msrb.mxu1 %v9166_v15  ;;  %v11136_v44 = vld [vmem:[%s16947_s11 + $0x8cc] sm:$0xf0] }
 0x456   : > { %v8583_v19 = vrot.slane %v3289_v56, 11  ;;  %v3296_v9 = vrot.slane %v3294_v10, 7  ;;  %v3327_v59 = vshrl.u32 %v3316_v16, 16  ;;  %v3330_v7 = vshll.u32 %v3316_v16, 16  ;;  %6652 = vmatpush.bf16.msrb.mxu3 %v9294_v31 }
 0x457   : > { %v3311_v46 = vsel %vm12816_vm11, %v8584_v30, %v3310_v58  ;;  %v3320_v47 = vrot.slane %v3318_v6, 6  ;;  %v3323_v48 = vrot.slane %v3321_v49, 7  ;;  %v8585_v50 = vrot.slane %v3316_v16, 10  ;;  %6666 = vmatpush.bf16.msra.mxu0 %v9422_v12  ;;  %6680 = vmatpush.bf16.msra.mxu2 %v9550_v34  ;;  %v11168_v34 = vld [vmem:[%s16947_s11 + $0x9cc] sm:$0xf0] }
 0x458   : > { %v3299_v21 = vor.u32 %v3297_v27, %v3296_v9  ;;  %v3314_v45 = vsel %vm12784_vm8, %v3311_v46, 0  ;;  %v3329_v60 = vrot.slane %v3327_v59, 6  ;;  %v3332_v33 = vrot.slane %v3330_v7, 7  ;;  %v10045_v27 = vld [vmem:[%s16947_s11 + $0xae0] sm:$0xf] }
 0x459   : > { %3315 = vst [vmem:[#allocation6 + $0x50] sm:$0xff] %v3314_v45  ;;  %v3324_v0 = vor.u32 %v3323_v48, %v3320_v47  ;;  %v3344_v14 = vrot.slane %v3339_v35, 6  ;;  %v3352_v3 = vshrl.u32 %v3339_v35, 16  ;;  %v3355_v54 = vshll.u32 %v3339_v35, 16  ;;  %v11204_v30 = vld [vmem:[%s16947_s11 + $0xaec] sm:$0xf0] }
 0x45a   : > { %v3300_v63 = vsel %vm12822_vm2, %v8583_v19, %v3299_v21  ;;  %v3333_v51 = vor.u32 %v3332_v33, %v3329_v60  ;;  %v3361_v4 = vshrl.u32 %v13522_v17, 16  ;;  %v3364_v1 = vshll.u32 %v13522_v17, 16  ;;  %v8597_v6 = vld [vmem:[#allocation6 + $0x8] sm:$0xf]  ;;  %v10839_v49 = vld [vmem:[#allocation6 + $0xc] sm:$0xf] }
 0x45b   : > { %v3303_v32 = vsel %vm12784_vm8, %v3300_v63, 0  ;;  %v3325_v25 = vrot.slane %v3324_v0, 4  ;;  %v3345_v15 = vsel %vm12832_vm14, %v8585_v50, %v3344_v14  ;;  %v3354_v5 = vrot.slane %v3352_v3, 5  ;;  %v10846_v55 = vld [vmem:[#allocation6 + $0x3c] sm:$0xf0] }
 0x45c   : > { %3304 = vst [vmem:[#allocation6 + $0x48] sm:$0xff] %v3303_v32  ;;  %v3348_v52 = vsel %vm12784_vm8, %v3345_v15, 0  ;;  %v3357_v31 = vrot.slane %v3355_v54, 6  ;;  %v3363_v26 = vrot.slane %v3361_v4, 5  ;;  %v3366_v13 = vrot.slane %v3364_v1, 6 }
 0x45d   : > { %v3334_v62 = vsel %vm12840_vm15, %v3325_v25, %v3333_v51  ;;  %3349 = vst [vmem:[#allocation6 + $0x60] sm:$0xff] %v3348_v52  ;;  %v8586_v11 = vrot.slane %v13522_v17, 9  ;;  %v3378_v53 = vrot.slane %v13526_v39, 5  ;;  %v3385_v20 = vshrl.u32 %v13526_v39, 16  ;;  %v8591_v36 = vld [vmem:[#allocation6 + $0x40] sm:$0xf0] }
 0x45e   : > { %v3337_v23 = vsel %vm12784_vm8, %v3334_v62, 0  ;;  %v3358_v12 = vor.u32 %v3357_v31, %v3354_v5  ;;  %v3388_v28 = vshll.u32 %v13526_v39, 16  ;;  %v9918_v61 = vor.u32 %v11172_v42, %v9917_v24  ;;  %v9901_v39 = vld [vmem:[%s16947_s11 + $0x9c0] sm:$0xf]  ;;  %v11236_v9 = vld [vmem:[%s16947_s11 + $0xbec] sm:$0xf0] }
 0x45f   : > { %3338 = vst [vmem:[#allocation6 + $0x58] sm:$0xff] %v3337_v23  ;;  %v3379_v16 = vsel %vm12852_vm1, %v8586_v11, %v3378_v53  ;;  %v3387_v35 = vrot.slane %v3385_v20, 4  ;;  %v13579_v17 = vor.u32 %v10846_v55, %v8589_v57  ;;  %v13581_v18 = vor.u32 %v10838_v2, %v8591_v36  ;;  %v10173_v19 = vld [vmem:[%s16947_s11 + $0xbe0] sm:$0xf]  ;;  %v11132_v48 = vld [vmem:[%s16947_s11 + $0x8ac] sm:$0xf0] }
 0x460   : > { %v3359_v8 = vrot.slane %v3358_v12, 4  ;;  %v3367_v56 = vor.u32 %v3366_v13, %v3363_v26  ;;  %v3382_v10 = vsel %vm12784_vm8, %v3379_v16, 0  ;;  %v3390_v40 = vrot.slane %v3388_v28, 5  ;;  %v9757_v47 = vld [vmem:[%s16947_s11 + $0x8a0] sm:$0xf] }
 0x461   : > { %3383 = vst [vmem:[#allocation6 + $0x70] sm:$0xff] %v3382_v10  ;;  %6583 = vmatmul.bf16.vlgmr.msra.gmra.mxu1 %v13579_v17  ;;  %6597 = vmatmul.bf16.vlgmr.msra.gmra.mxu3 %v13581_v18  ;;  %v9774_v58 = vor.u32 %v11136_v44, %v9773_v37  ;;  %v9902_v46 = vor.u32 %v11168_v34, %v9901_v39  ;;  %v10029_v14 = vld [vmem:[%s16947_s11 + $0xac0] sm:$0xf]  ;;  %v11200_v3 = vld [vmem:[%s16947_s11 + $0xacc] sm:$0xf0] }
 0x462   : > { %v3368_v59 = vsel %vm12865_vm0, %v3359_v8, %v3367_v56  ;;  %v3391_v7 = vor.u32 %v3390_v40, %v3387_v35  ;;  %6687 = vmatpush.bf16.msra.mxu1 %v9790_v41  ;;  %6701 = vmatpush.bf16.msra.mxu3 %v9918_v61  ;;  %v10046_v38 = vor.u32 %v11204_v30, %v10045_v27  ;;  %v11164_v41 = vld [vmem:[%s16947_s11 + $0x9ac] sm:$0xf0]  ;;  %v10157_v54 = vld [vmem:[%s16947_s11 + $0xbc0] sm:$0xf]  ;;  %v8607_v23 = vld [vmem:[#allocation6 + $0x50] sm:$0xf0] }
 0x463   : > { %v3371_v50 = vsel %vm12784_vm8, %v3368_v59, 0  ;;  %v10847_v21 = vld [vmem:[#allocation6 + $0x44] sm:$0xf0]  ;;  %v8599_v22 = vld [vmem:[#allocation6 + $0x48] sm:$0xf0]  ;;  %v10174_v0 = vor.u32 %v11236_v9, %v10173_v19  ;;  %v9758_v4 = vor.u32 %v11132_v48, %v9757_v47  ;;  %v9886_v1 = vor.u32 %v11164_v41, %v9885_v29 }
 0x464   : > { %3372 = vst [vmem:[#allocation6 + $0x68] sm:$0xff] %v3371_v50  ;;  %v3392_v45 = vrot.slane %v3391_v7, 4  ;;  %v13624_v60 = vor.u32 %v10847_v21, %v8597_v6  ;;  %v13626_v33 = vor.u32 %v10839_v49, %v8599_v22  ;;  %v11232_v63 = vld [vmem:[%s16947_s11 + $0xbcc] sm:$0xf0]  ;;  %v9741_v32 = vld [vmem:[%s16947_s11 + $0x880] sm:$0xf]  ;;  %v10030_v5 = vor.u32 %v11200_v3, %v10029_v14 }
 0x465   : > { %v11128_v25 = vld [vmem:[%s16947_s11 + $0x88c] sm:$0xf0]  ;;  %v10158_v24 = vor.u32 %v11232_v63, %v10157_v54  ;;  %v10013_v42 = vld [vmem:[%s16947_s11 + $0xaa0] sm:$0xf]  ;;  %v10840_v16 = vld [vmem:[#allocation6 + $0x14] sm:$0xf] }
 0x466   : > { %v3395_v51 = vsel %vm12784_vm8, %v3392_v45, 0  ;;  %6688 = vmatpush.bf16.msra.mxu1 %v9774_v58  ;;  %6702 = vmatpush.bf16.msra.mxu3 %v9902_v46  ;;  %v11160_v15 = vld [vmem:[%s16947_s11 + $0x98c] sm:$0xf0]  ;;  %v10141_v31 = vld [vmem:[%s16947_s11 + $0xba0] sm:$0xf]  ;;  %v9742_v13 = vor.u32 %v11128_v25, %v9741_v32  ;;  %v13697_v56 = vor.u32 %v10840_v16, %v8607_v23 }
 0x467   : > { %3396 = vst [vmem:[#allocation6 + $0x78] sm:$0xff] %v3395_v51  ;;  %6611 = vmatmul.bf16.vlgmr.msrb.gmra.mxu0 %v13624_v60  ;;  %6625 = vmatmul.bf16.vlgmr.msrb.gmra.mxu2 %v13626_v33  ;;  %v11196_v52 = vld [vmem:[%s16947_s11 + $0xaac] sm:$0xf0]  ;;  %v9870_v57 = vor.u32 %v11160_v15, %v9869_v43  ;;  %v9725_v55 = vld [vmem:[%s16947_s11 + $0x860] sm:$0xf] }
 0x468   : > { %6715 = vmatpush.bf16.msrb.mxu0 %v10046_v38  ;;  %6729 = vmatpush.bf16.msrb.mxu2 %v10174_v0  ;;  %v11228_v26 = vld [vmem:[%s16947_s11 + $0xbac] sm:$0xf0]  ;;  %v9853_v62 = vld [vmem:[%s16947_s11 + $0x960] sm:$0xf]  ;;  %v10014_v53 = vor.u32 %v11196_v52, %v10013_v42  ;;  %v10849_v46 = vld [vmem:[#allocation6 + $0x54] sm:$0xf0] }
 0x469   : > { %v11124_v2 = vld [vmem:[%s16947_s11 + $0x86c] sm:$0xf0]  ;;  %v10142_v20 = vor.u32 %v11228_v26, %v10141_v31  ;;  %v10848_v36 = vld [vmem:[#allocation6 + $0x4c] sm:$0xf0]  ;;  %v8615_v47 = vld [vmem:[#allocation6 + $0x58] sm:$0xf0] }
 0x46a   : > { %6689 = vmatpush.bf16.msra.mxu1 %v9758_v4  ;;  %6703 = vmatpush.bf16.msra.mxu3 %v9886_v1  ;;  %v11156_v11 = vld [vmem:[%s16947_s11 + $0x96c] sm:$0xf0]  ;;  %v9997_v12 = vld [vmem:[%s16947_s11 + $0xa80] sm:$0xf]  ;;  %v9726_v35 = vor.u32 %v11124_v2, %v9725_v55  ;;  %v8613_v22 = vld [vmem:[#allocation6 + $0x18] sm:$0xf] }
 0x46b   : > { %v11192_v28 = vld [vmem:[%s16947_s11 + $0xa8c] sm:$0xf0]  ;;  %v10125_v61 = vld [vmem:[%s16947_s11 + $0xb80] sm:$0xf]  ;;  %v9854_v39 = vor.u32 %v11156_v11, %v9853_v62  ;;  %v10841_v38 = vld [vmem:[#allocation6 + $0x1c] sm:$0xf]  ;;  %v13737_v14 = vor.u32 %v10849_v46, %v8613_v22 }
 0x46c   : > { %6716 = vmatpush.bf16.msrb.mxu0 %v10030_v5  ;;  %6730 = vmatpush.bf16.msrb.mxu2 %v10158_v24  ;;  %v11224_v37 = vld [vmem:[%s16947_s11 + $0xb8c] sm:$0xf0]  ;;  %v8605_v44 = vld [vmem:[#allocation6 + $0x10] sm:$0xf]  ;;  %v9998_v30 = vor.u32 %v11192_v28, %v9997_v12  ;;  %v13739_v3 = vor.u32 %v10841_v38, %v8615_v47 }
 0x46d   : > { %v9709_v34 = vld [vmem:[%s16947_s11 + $0x840] sm:$0xf]  ;;  %v13695_v8 = vor.u32 %v10848_v36, %v8605_v44  ;;  %v11120_v10 = vld [vmem:[%s16947_s11 + $0x84c] sm:$0xf0]  ;;  %v10126_v58 = vor.u32 %v11224_v37, %v10125_v61 }
 0x46e   : > { %6690 = vmatpush.bf16.msra.mxu1 %v9742_v13  ;;  %6704 = vmatpush.bf16.msra.mxu3 %v9870_v57  ;;  %v9837_v40 = vld [vmem:[%s16947_s11 + $0x940] sm:$0xf]  ;;  %v11152_v27 = vld [vmem:[%s16947_s11 + $0x94c] sm:$0xf0]  ;;  %v9710_v59 = vor.u32 %v11120_v10, %v9709_v34 }
 0x46f   : > { %v9981_v6 = vld [vmem:[%s16947_s11 + $0xa60] sm:$0xf]  ;;  %v11188_v49 = vld [vmem:[%s16947_s11 + $0xa6c] sm:$0xf0]  ;;  %v9838_v7 = vor.u32 %v11152_v27, %v9837_v40 }
 0x470   : > { %6717 = vmatpush.bf16.msrb.mxu0 %v10014_v53  ;;  %6731 = vmatpush.bf16.msrb.mxu2 %v10142_v20  ;;  %v10109_v19 = vld [vmem:[%s16947_s11 + $0xb60] sm:$0xf]  ;;  %v11220_v9 = vld [vmem:[%s16947_s11 + $0xb6c] sm:$0xf0]  ;;  %v9982_v41 = vor.u32 %v11188_v49, %v9981_v6  ;;  %v8623_v20 = vld [vmem:[#allocation6 + $0x60] sm:$0xf0] }
 0x471   : > { %6639 = vmatmul.bf16.vlgmr.msrb.gmra.mxu1 %v13695_v8  ;;  %6653 = vmatmul.bf16.vlgmr.msrb.gmra.mxu3 %v13697_v56  ;;  %v9693_v48 = vld [vmem:[%s16947_s11 + $0x820] sm:$0xf]  ;;  %v11116_v29 = vld [vmem:[%s16947_s11 + $0x82c] sm:$0xf0]  ;;  %v10110_v45 = vor.u32 %v11220_v9, %v10109_v19 }
 0x472   : > { %6691 = vmatpush.bf16.msra.mxu1 %v9726_v35  ;;  %6705 = vmatpush.bf16.msra.mxu3 %v9854_v39  ;;  %v9821_v50 = vld [vmem:[%s16947_s11 + $0x920] sm:$0xf]  ;;  %v11148_v21 = vld [vmem:[%s16947_s11 + $0x92c] sm:$0xf0]  ;;  %v9694_v4 = vor.u32 %v11116_v29, %v9693_v48  ;;  %v10842_v35 = vld [vmem:[#allocation6 + $0x24] sm:$0xf] }
 0x473   : > { %v9965_v0 = vld [vmem:[%s16947_s11 + $0xa40] sm:$0xf]  ;;  %v11184_v54 = vld [vmem:[%s16947_s11 + $0xa4c] sm:$0xf0]  ;;  %v9822_v1 = vor.u32 %v11148_v21, %v9821_v50  ;;  %v13826_v9 = vor.u32 %v10842_v35, %v8623_v20 }
 0x474   : > { %6718 = vmatpush.bf16.msrb.mxu0 %v9998_v30  ;;  %6732 = vmatpush.bf16.msrb.mxu2 %v10126_v58  ;;  %v10093_v63 = vld [vmem:[%s16947_s11 + $0xb40] sm:$0xf]  ;;  %v11216_v51 = vld [vmem:[%s16947_s11 + $0xb4c] sm:$0xf0]  ;;  %v9966_v42 = vor.u32 %v11184_v54, %v9965_v0 }
 0x475   : > { %v9677_v32 = vld [vmem:[%s16947_s11 + $0x800] sm:$0xf]  ;;  %v11112_v25 = vld [vmem:[%s16947_s11 + $0x80c] sm:$0xf0]  ;;  %v10094_v52 = vor.u32 %v11216_v51, %v10093_v63 }
 0x476   : > { %6692 = vmatpush.bf16.msra.mxu1 %v9710_v59  ;;  %6706 = vmatpush.bf16.msra.mxu3 %v9838_v7  ;;  %v9805_v43 = vld [vmem:[%s16947_s11 + $0x900] sm:$0xf]  ;;  %v11144_v15 = vld [vmem:[%s16947_s11 + $0x90c] sm:$0xf0]  ;;  %v9678_v62 = vor.u32 %v11112_v25, %v9677_v32 }
 0x477   : > { %6667 = vmatmul.bf16.vlgmr.msra.gmra.mxu0 %v13737_v14  ;;  %6681 = vmatmul.bf16.vlgmr.msra.gmra.mxu2 %v13739_v3  ;;  %v10301_v5 = vld [vmem:[%s16947_s11 + $0xce0] sm:$0xf]  ;;  %v11268_v24 = vld [vmem:[%s16947_s11 + $0xcec] sm:$0xf0]  ;;  %v9806_v11 = vor.u32 %v11144_v15, %v9805_v43 }
 0x478   : > { %6719 = vmatpush.bf16.msrb.mxu0 %v9982_v41  ;;  %6733 = vmatpush.bf16.msrb.mxu2 %v10110_v45  ;;  %v10429_v31 = vld [vmem:[%s16947_s11 + $0xde0] sm:$0xf]  ;;  %v11300_v26 = vld [vmem:[%s16947_s11 + $0xdec] sm:$0xf0]  ;;  %v10302_v36 = vor.u32 %v11268_v24, %v10301_v5  ;;  %v8629_v5 = vld [vmem:[#allocation6 + $0x28] sm:$0xf] }
 0x479   : > { %v9949_v13 = vld [vmem:[%s16947_s11 + $0xa20] sm:$0xf]  ;;  %v11180_v57 = vld [vmem:[%s16947_s11 + $0xa2c] sm:$0xf0]  ;;  %v10430_v23 = vor.u32 %v11300_v26, %v10429_v31  ;;  %v10843_v24 = vld [vmem:[#allocation6 + $0x2c] sm:$0xf] }
 0x47a   : > { %v10077_v55 = vld [vmem:[%s16947_s11 + $0xb20] sm:$0xf]  ;;  %v11212_v2 = vld [vmem:[%s16947_s11 + $0xb2c] sm:$0xf0]  ;;  %6693 = vmatpush.bf16.msra.mxu1 %v9694_v4  ;;  %6707 = vmatpush.bf16.msra.mxu3 %v9822_v1  ;;  %v9950_v44 = vor.u32 %v11180_v57, %v9949_v13  ;;  %v10851_v4 = vld [vmem:[#allocation6 + $0x64] sm:$0xf0] }
 0x47b   : > { %v10850_v53 = vld [vmem:[#allocation6 + $0x5c] sm:$0xf0]  ;;  %v10285_v28 = vld [vmem:[%s16947_s11 + $0xcc0] sm:$0xf]  ;;  %v10078_v16 = vor.u32 %v11212_v2, %v10077_v55  ;;  %v8631_v1 = vld [vmem:[#allocation6 + $0x68] sm:$0xf0]  ;;  %v13869_v26 = vor.u32 %v10851_v4, %v8629_v5 }
 0x47c   : > { %v8621_v12 = vld [vmem:[#allocation6 + $0x20] sm:$0xf]  ;;  %v10413_v37 = vld [vmem:[%s16947_s11 + $0xdc0] sm:$0xf]  ;;  %6720 = vmatpush.bf16.msrb.mxu0 %v9966_v42  ;;  %6734 = vmatpush.bf16.msrb.mxu2 %v10094_v52  ;;  %v13871_v13 = vor.u32 %v10843_v24, %v8631_v1 }
 0x47d   : > { %v11264_v61 = vld [vmem:[%s16947_s11 + $0xccc] sm:$0xf0]  ;;  %v9933_v34 = vld [vmem:[%s16947_s11 + $0xa00] sm:$0xf]  ;;  %v13815_v58 = vor.u32 %v10850_v53, %v8621_v12 }
 0x47e   : > { %v11296_v39 = vld [vmem:[%s16947_s11 + $0xdcc] sm:$0xf0]  ;;  %v10061_v40 = vld [vmem:[%s16947_s11 + $0xb00] sm:$0xf]  ;;  %6694 = vmatpush.bf16.msra.mxu1 %v9678_v62  ;;  %6708 = vmatpush.bf16.msra.mxu3 %v9806_v11  ;;  %v10286_v59 = vor.u32 %v11264_v61, %v10285_v28 }
 0x47f   : > { %v11176_v10 = vld [vmem:[%s16947_s11 + $0xa0c] sm:$0xf0]  ;;  %v10557_v30 = vld [vmem:[%s16947_s11 + $0xee0] sm:$0xf]  ;;  %v10414_v7 = vor.u32 %v11296_v39, %v10413_v37 }
 0x480   : > { %v11208_v27 = vld [vmem:[%s16947_s11 + $0xb0c] sm:$0xf0]  ;;  %v10685_v49 = vld [vmem:[%s16947_s11 + $0xfe0] sm:$0xf]  ;;  %6721 = vmatpush.bf16.msrb.mxu0 %v9950_v44  ;;  %6735 = vmatpush.bf16.msrb.mxu2 %v10078_v16  ;;  %v9934_v47 = vor.u32 %v11176_v10, %v9933_v34 }
 0x481   : > { %v11332_v6 = vld [vmem:[%s16947_s11 + $0xeec] sm:$0xf0]  ;;  %v10269_v46 = vld [vmem:[%s16947_s11 + $0xca0] sm:$0xf]  ;;  %v10062_v48 = vor.u32 %v11208_v27, %v10061_v40  ;;  %6695 = vmatmul.bf16.vlgmr.msra.gmra.mxu1 %v13815_v58  ;;  %6709 = vmatmul.bf16.vlgmr.msra.gmra.mxu3 %v13826_v9 }
 0x482   : > { %v11364_v19 = vld [vmem:[%s16947_s11 + $0xfec] sm:$0xf0]  ;;  %6743 = vmatpush.bf16.msrb.mxu1 %v10302_v36  ;;  %6757 = vmatpush.bf16.msrb.mxu3 %v10430_v23  ;;  %v10397_v50 = vld [vmem:[%s16947_s11 + $0xda0] sm:$0xf]  ;;  %v10558_v22 = vor.u32 %v11332_v6, %v10557_v30 }
 0x483   : > { %v11260_v29 = vld [vmem:[%s16947_s11 + $0xcac] sm:$0xf0]  ;;  %v10686_v38 = vor.u32 %v11364_v19, %v10685_v49  ;;  %v10541_v41 = vld [vmem:[%s16947_s11 + $0xec0] sm:$0xf] }
 0x484   : > { %v11292_v21 = vld [vmem:[%s16947_s11 + $0xdac] sm:$0xf0]  ;;  %v10669_v0 = vld [vmem:[%s16947_s11 + $0xfc0] sm:$0xf]  ;;  %v10270_v63 = vor.u32 %v11260_v29, %v10269_v46  ;;  %6722 = vmatpush.bf16.msrb.mxu0 %v9934_v47  ;;  %6736 = vmatpush.bf16.msrb.mxu2 %v10062_v48 }
 0x485   : > { %v11328_v45 = vld [vmem:[%s16947_s11 + $0xecc] sm:$0xf0]  ;;  %v10398_v51 = vor.u32 %v11292_v21, %v10397_v50  ;;  %v10253_v32 = vld [vmem:[%s16947_s11 + $0xc80] sm:$0xf] }
 0x486   : > { %v11360_v54 = vld [vmem:[%s16947_s11 + $0xfcc] sm:$0xf0]  ;;  %6744 = vmatpush.bf16.msrb.mxu1 %v10286_v59  ;;  %6758 = vmatpush.bf16.msrb.mxu3 %v10414_v7  ;;  %v10381_v43 = vld [vmem:[%s16947_s11 + $0xd80] sm:$0xf]  ;;  %v10542_v42 = vor.u32 %v11328_v45, %v10541_v41 }
 0x487   : > { %v11256_v25 = vld [vmem:[%s16947_s11 + $0xc8c] sm:$0xf0]  ;;  %v10670_v52 = vor.u32 %v11360_v54, %v10669_v0  ;;  %v10525_v31 = vld [vmem:[%s16947_s11 + $0xea0] sm:$0xf]  ;;  %6723 = vmatmul.bf16.vlgmr.msrb.gmra.mxu0 %v13869_v26  ;;  %6737 = vmatmul.bf16.vlgmr.msrb.gmra.mxu2 %v13871_v13 }
 0x488   : > { %v11288_v15 = vld [vmem:[%s16947_s11 + $0xd8c] sm:$0xf0]  ;;  %6771 = vmatpush.bf16.msra.mxu0 %v10558_v22  ;;  %6785 = vmatpush.bf16.msra.mxu2 %v10686_v38  ;;  %v10653_v55 = vld [vmem:[%s16947_s11 + $0xfa0] sm:$0xf]  ;;  %v10254_v62 = vor.u32 %v11256_v25, %v10253_v32 }
 0x489   : > { %v11324_v57 = vld [vmem:[%s16947_s11 + $0xeac] sm:$0xf0]  ;;  %v10382_v11 = vor.u32 %v11288_v15, %v10381_v43  ;;  %v10237_v53 = vld [vmem:[%s16947_s11 + $0xc60] sm:$0xf]  ;;  %v10882_v43 = vld [vmem:[%s16947_s11 + $0xe4] sm:$0xf] }
 0x48a   : > { %v11356_v2 = vld [vmem:[%s16947_s11 + $0xfac] sm:$0xf0]  ;;  %6745 = vmatpush.bf16.msrb.mxu1 %v10270_v63  ;;  %6759 = vmatpush.bf16.msrb.mxu3 %v10398_v51  ;;  %v10365_v36 = vld [vmem:[%s16947_s11 + $0xd60] sm:$0xf]  ;;  %v10526_v12 = vor.u32 %v11324_v57, %v10525_v31  ;;  %v8767_v15 = vld [vmem:[%s16947_s11 + $0xf0] sm:$0xf0] }
 0x48b   : > { %v11252_v20 = vld [vmem:[%s16947_s11 + $0xc6c] sm:$0xf0]  ;;  %v10654_v28 = vor.u32 %v11356_v2, %v10653_v55  ;;  %v10509_v61 = vld [vmem:[%s16947_s11 + $0xe80] sm:$0xf] }
 0x48c   : > { %v11284_v23 = vld [vmem:[%s16947_s11 + $0xd6c] sm:$0xf0]  ;;  %6772 = vmatpush.bf16.msra.mxu0 %v10542_v42  ;;  %6786 = vmatpush.bf16.msra.mxu2 %v10670_v52  ;;  %v10637_v44 = vld [vmem:[%s16947_s11 + $0xf80] sm:$0xf]  ;;  %v10238_v35 = vor.u32 %v11252_v20, %v10237_v53  ;;  %v10914_v42 = vld [vmem:[%s16947_s11 + $0x1e4] sm:$0xf] }
 0x48d   : > { %v11320_v37 = vld [vmem:[%s16947_s11 + $0xe8c] sm:$0xf0]  ;;  %v10366_v39 = vor.u32 %v11284_v23, %v10365_v36  ;;  %v10221_v34 = vld [vmem:[%s16947_s11 + $0xc40] sm:$0xf]  ;;  %v8895_v52 = vld [vmem:[%s16947_s11 + $0x1f0] sm:$0xf0]  ;;  %v8770_v36 = vor.u32 %v10882_v43, %v8767_v15 }
 0x48e   : > { %v11352_v16 = vld [vmem:[%s16947_s11 + $0xf8c] sm:$0xf0]  ;;  %6746 = vmatpush.bf16.msrb.mxu1 %v10254_v62  ;;  %6760 = vmatpush.bf16.msrb.mxu3 %v10382_v11  ;;  %v10349_v40 = vld [vmem:[%s16947_s11 + $0xd40] sm:$0xf]  ;;  %v10510_v30 = vor.u32 %v11320_v37, %v10509_v61  ;;  %v8639_v20 = vld [vmem:[#allocation6 + $0x70] sm:$0xf0]  ;;  %v8898_v23 = vor.u32 %v10914_v42, %v8895_v52 }
 0x48f   : > { %v11248_v10 = vld [vmem:[%s16947_s11 + $0xc4c] sm:$0xf0]  ;;  %v10638_v6 = vor.u32 %v11352_v16, %v10637_v44  ;;  %v10493_v49 = vld [vmem:[%s16947_s11 + $0xe60] sm:$0xf]  ;;  %v8751_v61 = vld [vmem:[%s16947_s11 + $0xd0] sm:$0xf0] }
 0x490   : > { %v11280_v27 = vld [vmem:[%s16947_s11 + $0xd4c] sm:$0xf0]  ;;  %6773 = vmatpush.bf16.msra.mxu0 %v10526_v12  ;;  %6787 = vmatpush.bf16.msra.mxu2 %v10654_v28  ;;  %v10621_v59 = vld [vmem:[%s16947_s11 + $0xf60] sm:$0xf]  ;;  %v10222_v46 = vor.u32 %v11248_v10, %v10221_v34  ;;  %v10878_v28 = vld [vmem:[%s16947_s11 + $0xc4] sm:$0xf] }
 0x491   : > { %v11316_v19 = vld [vmem:[%s16947_s11 + $0xe6c] sm:$0xf0]  ;;  %v10350_v47 = vor.u32 %v11280_v27, %v10349_v40  ;;  %v10205_v48 = vld [vmem:[%s16947_s11 + $0xc20] sm:$0xf]  ;;  %v10910_v37 = vld [vmem:[%s16947_s11 + $0x1c4] sm:$0xf] }
 0x492   : > { %v11348_v7 = vld [vmem:[%s16947_s11 + $0xf6c] sm:$0xf0]  ;;  %6747 = vmatpush.bf16.msrb.mxu1 %v10238_v35  ;;  %6761 = vmatpush.bf16.msrb.mxu3 %v10366_v39  ;;  %v10333_v50 = vld [vmem:[%s16947_s11 + $0xd20] sm:$0xf]  ;;  %v10494_v22 = vor.u32 %v11316_v19, %v10493_v49  ;;  %v10844_v44 = vld [vmem:[#allocation6 + $0x34] sm:$0xf] }
 0x493   : > { %v11244_v29 = vld [vmem:[%s16947_s11 + $0xc2c] sm:$0xf0]  ;;  %v10622_v38 = vor.u32 %v11348_v7, %v10621_v59  ;;  %v10477_v41 = vld [vmem:[%s16947_s11 + $0xe40] sm:$0xf]  ;;  %v8879_v39 = vld [vmem:[%s16947_s11 + $0x1d0] sm:$0xf0]  ;;  %v14030_v7 = vor.u32 %v10844_v44, %v8639_v20 }
 0x494   : > { %v11276_v21 = vld [vmem:[%s16947_s11 + $0xd2c] sm:$0xf0]  ;;  %6774 = vmatpush.bf16.msra.mxu0 %v10510_v30  ;;  %6788 = vmatpush.bf16.msra.mxu2 %v10638_v6  ;;  %v10605_v0 = vld [vmem:[%s16947_s11 + $0xf40] sm:$0xf]  ;;  %v10206_v63 = vor.u32 %v11244_v29, %v10205_v48  ;;  %v10946_v30 = vld [vmem:[%s16947_s11 + $0x2e4] sm:$0xf] }
 0x495   : > { %v11312_v45 = vld [vmem:[%s16947_s11 + $0xe4c] sm:$0xf0]  ;;  %v10334_v51 = vor.u32 %v11276_v21, %v10333_v50  ;;  %v10189_v4 = vld [vmem:[%s16947_s11 + $0xc00] sm:$0xf]  ;;  %v9023_v49 = vld [vmem:[%s16947_s11 + $0x2f0] sm:$0xf0] }
 0x496   : > { %v11344_v54 = vld [vmem:[%s16947_s11 + $0xf4c] sm:$0xf0]  ;;  %6748 = vmatpush.bf16.msrb.mxu1 %v10222_v46  ;;  %6762 = vmatpush.bf16.msrb.mxu3 %v10350_v47  ;;  %v10317_v32 = vld [vmem:[%s16947_s11 + $0xd00] sm:$0xf]  ;;  %v10478_v5 = vor.u32 %v11312_v45, %v10477_v41  ;;  %v10978_v19 = vld [vmem:[%s16947_s11 + $0x3e4] sm:$0xf]  ;;  %v8754_v46 = vor.u32 %v10878_v28, %v8751_v61  ;;  %v8882_v47 = vor.u32 %v10910_v37, %v8879_v39 }
 0x497   : > { %v11240_v1 = vld [vmem:[%s16947_s11 + $0xc0c] sm:$0xf0]  ;;  %v10606_v24 = vor.u32 %v11344_v54, %v10605_v0  ;;  %v10461_v31 = vld [vmem:[%s16947_s11 + $0xe20] sm:$0xf]  ;;  %v9151_v59 = vld [vmem:[%s16947_s11 + $0x3f0] sm:$0xf0]  ;;  %v9026_v41 = vor.u32 %v10946_v30, %v9023_v49 }
 0x498   : > { %v11272_v25 = vld [vmem:[%s16947_s11 + $0xd0c] sm:$0xf0]  ;;  %6775 = vmatpush.bf16.msra.mxu0 %v10494_v22  ;;  %6789 = vmatpush.bf16.msra.mxu2 %v10622_v38  ;;  %v10589_v55 = vld [vmem:[%s16947_s11 + $0xf20] sm:$0xf]  ;;  %v10190_v62 = vor.u32 %v11240_v1, %v10189_v4  ;;  %v10874_v48 = vld [vmem:[%s16947_s11 + $0xa4] sm:$0xf]  ;;  %v9154_v45 = vor.u32 %v10978_v19, %v9151_v59 }
 0x499   : > { %v11308_v57 = vld [vmem:[%s16947_s11 + $0xe2c] sm:$0xf0]  ;;  %v10318_v11 = vor.u32 %v11272_v25, %v10317_v32  ;;  %v10852_v53 = vld [vmem:[#allocation6 + $0x6c] sm:$0xf0]  ;;  %v8735_v21 = vld [vmem:[%s16947_s11 + $0xb0] sm:$0xf0] }
 0x49a   : > { %v11340_v2 = vld [vmem:[%s16947_s11 + $0xf2c] sm:$0xf0]  ;;  %6749 = vmatpush.bf16.msrb.mxu1 %v10206_v63  ;;  %6763 = vmatpush.bf16.msrb.mxu3 %v10334_v51  ;;  %v8637_v12 = vld [vmem:[#allocation6 + $0x30] sm:$0xf]  ;;  %v10462_v16 = vor.u32 %v11308_v57, %v10461_v31  ;;  %v10906_v22 = vld [vmem:[%s16947_s11 + $0x1a4] sm:$0xf]  ;;  %v8738_v4 = vor.u32 %v10874_v48, %v8735_v21 }
 0x49b   : > { %v10590_v35 = vor.u32 %v11340_v2, %v10589_v55  ;;  %v10445_v34 = vld [vmem:[%s16947_s11 + $0xe00] sm:$0xf]  ;;  %v11304_v10 = vld [vmem:[%s16947_s11 + $0xe0c] sm:$0xf0]  ;;  %v14019_v6 = vor.u32 %v10852_v53, %v8637_v12  ;;  %v8863_v38 = vld [vmem:[%s16947_s11 + $0x1b0] sm:$0xf0] }
 0x49c   : > { %6776 = vmatpush.bf16.msra.mxu0 %v10478_v5  ;;  %6790 = vmatpush.bf16.msra.mxu2 %v10606_v24  ;;  %v10573_v40 = vld [vmem:[%s16947_s11 + $0xf00] sm:$0xf]  ;;  %v11336_v27 = vld [vmem:[%s16947_s11 + $0xf0c] sm:$0xf0]  ;;  %v10446_v29 = vor.u32 %v11304_v10, %v10445_v34  ;;  %v10942_v0 = vld [vmem:[%s16947_s11 + $0x2c4] sm:$0xf]  ;;  %v8866_v1 = vor.u32 %v10906_v22, %v8863_v38 }
 0x49d   : > { %v10574_v50 = vor.u32 %v11336_v27, %v10573_v40  ;;  %v9007_v54 = vld [vmem:[%s16947_s11 + $0x2d0] sm:$0xf0]  ;;  %v10974_v63 = vld [vmem:[%s16947_s11 + $0x3c4] sm:$0xf]  ;;  %v10853_v32 = vld [vmem:[#allocation6 + $0x74] sm:$0xf0] }
 0x49e   : > { %6750 = vmatpush.bf16.msrb.mxu1 %v10190_v62  ;;  %6764 = vmatpush.bf16.msrb.mxu3 %v10318_v11  ;;  %v9135_v51 = vld [vmem:[%s16947_s11 + $0x3d0] sm:$0xf0]  ;;  %v8647_v25 = vld [vmem:[#allocation6 + $0x78] sm:$0xf0]  ;;  %v10870_v43 = vld [vmem:[%s16947_s11 + $0x84] sm:$0xf]  ;;  %v9010_v31 = vor.u32 %v10942_v0, %v9007_v54 }
 0x49f   : > { %v8719_v15 = vld [vmem:[%s16947_s11 + $0x90] sm:$0xf0]  ;;  %v10902_v5 = vld [vmem:[%s16947_s11 + $0x184] sm:$0xf]  ;;  %v8645_v42 = vld [vmem:[#allocation6 + $0x38] sm:$0xf]  ;;  %v9138_v57 = vor.u32 %v10974_v63, %v9135_v51 }
 0x4a0   : > { %6777 = vmatpush.bf16.msra.mxu0 %v10462_v16  ;;  %6791 = vmatpush.bf16.msra.mxu2 %v10590_v35  ;;  %v8847_v24 = vld [vmem:[%s16947_s11 + $0x190] sm:$0xf0]  ;;  %v10845_v52 = vld [vmem:[#allocation6 + $0x3c] sm:$0xf]  ;;  %v10938_v55 = vld [vmem:[%s16947_s11 + $0x2a4] sm:$0xf]  ;;  %v14073_v2 = vor.u32 %v10853_v32, %v8645_v42 }
 0x4a1   : > { %6751 = vmatmul.bf16.vlgmr.msrb.gmra.mxu1 %v14019_v6  ;;  %6765 = vmatmul.bf16.vlgmr.msrb.gmra.mxu3 %v14030_v7  ;;  %v14075_v62 = vor.u32 %v10845_v52, %v8647_v25  ;;  %v8991_v11 = vld [vmem:[%s16947_s11 + $0x2b0] sm:$0xf0]  ;;  %v10970_v53 = vld [vmem:[%s16947_s11 + $0x3a4] sm:$0xf] }
 0x4a2   : > { %6799 = vmatpush.bf16.msra.mxu1 %v8770_v36  ;;  %6813 = vmatpush.bf16.msra.mxu3 %v8898_v23  ;;  %v9119_v20 = vld [vmem:[%s16947_s11 + $0x3b0] sm:$0xf0]  ;;  %v8722_v36 = vor.u32 %v10870_v43, %v8719_v15  ;;  %v8850_v23 = vor.u32 %v10902_v5, %v8847_v24  ;;  %v10866_v12 = vld [vmem:[%s16947_s11 + $0x64] sm:$0xf]  ;;  %v8994_v44 = vor.u32 %v10938_v55, %v8991_v11 }
 0x4a3   : > { %v8703_v28 = vld [vmem:[%s16947_s11 + $0x70] sm:$0xf0]  ;;  %v10898_v61 = vld [vmem:[%s16947_s11 + $0x164] sm:$0xf]  ;;  %v9122_v16 = vor.u32 %v10970_v53, %v9119_v20 }
 0x4a4   : > { %6778 = vmatpush.bf16.msra.mxu0 %v10446_v29  ;;  %6792 = vmatpush.bf16.msra.mxu2 %v10574_v50  ;;  %v8831_v37 = vld [vmem:[%s16947_s11 + $0x170] sm:$0xf0]  ;;  %v10934_v35 = vld [vmem:[%s16947_s11 + $0x284] sm:$0xf]  ;;  %v8706_v40 = vor.u32 %v10866_v12, %v8703_v28 }
 0x4a5   : > { %v8975_v39 = vld [vmem:[%s16947_s11 + $0x290] sm:$0xf0]  ;;  %v10966_v34 = vld [vmem:[%s16947_s11 + $0x384] sm:$0xf]  ;;  %v8834_v27 = vor.u32 %v10898_v61, %v8831_v37 }
 0x4a6   : > { %6800 = vmatpush.bf16.msra.mxu1 %v8754_v46  ;;  %6814 = vmatpush.bf16.msra.mxu3 %v8882_v47  ;;  %v9103_v10 = vld [vmem:[%s16947_s11 + $0x390] sm:$0xf0]  ;;  %v10862_v30 = vld [vmem:[%s16947_s11 + $0x44] sm:$0xf]  ;;  %v8978_v46 = vor.u32 %v10934_v35, %v8975_v39 }
 0x4a7   : > { %6779 = vmatmul.bf16.vlgmr.msra.gmra.mxu0 %v14073_v2  ;;  %6793 = vmatmul.bf16.vlgmr.msra.gmra.mxu2 %v14075_v62  ;;  %v8687_v49 = vld [vmem:[%s16947_s11 + $0x50] sm:$0xf0]  ;;  %v10894_v19 = vld [vmem:[%s16947_s11 + $0x144] sm:$0xf]  ;;  %v9106_v47 = vor.u32 %v10966_v34, %v9103_v10 }
 0x4a8   : > { %6827 = vmatpush.bf16.msrb.mxu0 %v9026_v41  ;;  %6841 = vmatpush.bf16.msrb.mxu2 %v9154_v45  ;;  %v8815_v59 = vld [vmem:[%s16947_s11 + $0x150] sm:$0xf0]  ;;  %v10930_v48 = vld [vmem:[%s16947_s11 + $0x264] sm:$0xf]  ;;  %v8690_v22 = vor.u32 %v10862_v30, %v8687_v49 }
 0x4a9   : > { %v8959_v29 = vld [vmem:[%s16947_s11 + $0x270] sm:$0xf0]  ;;  %v10962_v50 = vld [vmem:[%s16947_s11 + $0x364] sm:$0xf]  ;;  %v8818_v38 = vor.u32 %v10894_v19, %v8815_v59 }
 0x4aa   : > { %6801 = vmatpush.bf16.msra.mxu1 %v8738_v4  ;;  %6815 = vmatpush.bf16.msra.mxu3 %v8866_v1  ;;  %v9087_v21 = vld [vmem:[%s16947_s11 + $0x370] sm:$0xf0]  ;;  %v10858_v41 = vld [vmem:[%s16947_s11 + $0x24] sm:$0xf]  ;;  %v8962_v63 = vor.u32 %v10930_v48, %v8959_v29 }
 0x4ab   : > { %v8671_v45 = vld [vmem:[%s16947_s11 + $0x30] sm:$0xf0]  ;;  %v10890_v0 = vld [vmem:[%s16947_s11 + $0x124] sm:$0xf]  ;;  %v9090_v51 = vor.u32 %v10962_v50, %v9087_v21 }
 0x4ac   : > { %6828 = vmatpush.bf16.msrb.mxu0 %v9010_v31  ;;  %6842 = vmatpush.bf16.msrb.mxu2 %v9138_v57  ;;  %v8799_v54 = vld [vmem:[%s16947_s11 + $0x130] sm:$0xf0]  ;;  %v10926_v4 = vld [vmem:[%s16947_s11 + $0x244] sm:$0xf]  ;;  %v8674_v43 = vor.u32 %v10858_v41, %v8671_v45 }
 0x4ad   : > { %v8943_v1 = vld [vmem:[%s16947_s11 + $0x250] sm:$0xf0]  ;;  %v10958_v32 = vld [vmem:[%s16947_s11 + $0x344] sm:$0xf]  ;;  %v8802_v15 = vor.u32 %v10890_v0, %v8799_v54 }
 0x4ae   : > { %6802 = vmatpush.bf16.msra.mxu1 %v8722_v36  ;;  %6816 = vmatpush.bf16.msra.mxu3 %v8850_v23  ;;  %v9071_v25 = vld [vmem:[%s16947_s11 + $0x350] sm:$0xf0]  ;;  %v10854_v5 = vld [vmem:[%s16947_s11 + $0x4] sm:$0xf]  ;;  %v8946_v55 = vor.u32 %v10926_v4, %v8943_v1 }
 0x4af   : > { %v8655_v24 = vld [vmem:[%s16947_s11 + $0x10] sm:$0xf0]  ;;  %v10886_v42 = vld [vmem:[%s16947_s11 + $0x104] sm:$0xf]  ;;  %v9074_v11 = vor.u32 %v10958_v32, %v9071_v25 }
 0x4b0   : > { %6829 = vmatpush.bf16.msrb.mxu0 %v8994_v44  ;;  %6843 = vmatpush.bf16.msrb.mxu2 %v9122_v16  ;;  %v8783_v52 = vld [vmem:[%s16947_s11 + $0x110] sm:$0xf0]  ;;  %v11010_v31 = vld [vmem:[%s16947_s11 + $0x4e4] sm:$0xf]  ;;  %v8658_v61 = vor.u32 %v10854_v5, %v8655_v24 }
 0x4b1   : > { %v9279_v57 = vld [vmem:[%s16947_s11 + $0x4f0] sm:$0xf0]  ;;  %v11042_v53 = vld [vmem:[%s16947_s11 + $0x5e4] sm:$0xf]  ;;  %v8786_v37 = vor.u32 %v10886_v42, %v8783_v52 }
 0x4b2   : > { %6803 = vmatpush.bf16.msra.mxu1 %v8706_v40  ;;  %6817 = vmatpush.bf16.msra.mxu3 %v8834_v27  ;;  %v9407_v20 = vld [vmem:[%s16947_s11 + $0x5f0] sm:$0xf0]  ;;  %v10922_v36 = vld [vmem:[%s16947_s11 + $0x224] sm:$0xf]  ;;  %v9282_v44 = vor.u32 %v11010_v31, %v9279_v57 }
 0x4b3   : > { %v8927_v23 = vld [vmem:[%s16947_s11 + $0x230] sm:$0xf0]  ;;  %v10954_v12 = vld [vmem:[%s16947_s11 + $0x324] sm:$0xf]  ;;  %v9410_v16 = vor.u32 %v11042_v53, %v9407_v20 }
 0x4b4   : > { %6830 = vmatpush.bf16.msrb.mxu0 %v8978_v46  ;;  %6844 = vmatpush.bf16.msrb.mxu2 %v9106_v47  ;;  %v9055_v28 = vld [vmem:[%s16947_s11 + $0x330] sm:$0xf0]  ;;  %v11006_v35 = vld [vmem:[%s16947_s11 + $0x4c4] sm:$0xf]  ;;  %v8930_v10 = vor.u32 %v10922_v36, %v8927_v23 }
 0x4b5   : > { %v9263_v39 = vld [vmem:[%s16947_s11 + $0x4d0] sm:$0xf0]  ;;  %v11038_v34 = vld [vmem:[%s16947_s11 + $0x5c4] sm:$0xf]  ;;  %v9058_v40 = vor.u32 %v10954_v12, %v9055_v28 }
 0x4b6   : > { %6804 = vmatpush.bf16.msra.mxu1 %v8690_v22  ;;  %6818 = vmatpush.bf16.msra.mxu3 %v8818_v38  ;;  %v9391_v27 = vld [vmem:[%s16947_s11 + $0x5d0] sm:$0xf0]  ;;  %v10918_v30 = vld [vmem:[%s16947_s11 + $0x204] sm:$0xf]  ;;  %v9266_v50 = vor.u32 %v11006_v35, %v9263_v39 }
 0x4b7   : > { %v8911_v49 = vld [vmem:[%s16947_s11 + $0x210] sm:$0xf0]  ;;  %v10950_v19 = vld [vmem:[%s16947_s11 + $0x304] sm:$0xf]  ;;  %v9394_v21 = vor.u32 %v11038_v34, %v9391_v27 }
 0x4b8   : > { %6831 = vmatpush.bf16.msrb.mxu0 %v8962_v63  ;;  %6845 = vmatpush.bf16.msrb.mxu2 %v9090_v51  ;;  %v9039_v59 = vld [vmem:[%s16947_s11 + $0x310] sm:$0xf0]  ;;  %v11074_v46 = vld [vmem:[%s16947_s11 + $0x6e4] sm:$0xf]  ;;  %v8914_v38 = vor.u32 %v10918_v30, %v8911_v49 }
 0x4b9   : > { %v9535_v47 = vld [vmem:[%s16947_s11 + $0x6f0] sm:$0xf0]  ;;  %v11106_v48 = vld [vmem:[%s16947_s11 + $0x7e4] sm:$0xf]  ;;  %v9042_v41 = vor.u32 %v10950_v19, %v9039_v59 }
 0x4ba   : > { %6805 = vmatpush.bf16.msra.mxu1 %v8674_v43  ;;  %6819 = vmatpush.bf16.msra.mxu3 %v8802_v15  ;;  %v9663_v29 = vld [vmem:[%s16947_s11 + $0x7f0] sm:$0xf0]  ;;  %v11002_v22 = vld [vmem:[%s16947_s11 + $0x4a4] sm:$0xf]  ;;  %v9538_v63 = vor.u32 %v11074_v46, %v9535_v47 }
 0x4bb   : > { %v9247_v45 = vld [vmem:[%s16947_s11 + $0x4b0] sm:$0xf0]  ;;  %v11034_v0 = vld [vmem:[%s16947_s11 + $0x5a4] sm:$0xf]  ;;  %v9666_v51 = vor.u32 %v11106_v48, %v9663_v29 }
 0x4bc   : > { %6832 = vmatpush.bf16.msrb.mxu0 %v8946_v55  ;;  %6846 = vmatpush.bf16.msrb.mxu2 %v9074_v11  ;;  %v9375_v54 = vld [vmem:[%s16947_s11 + $0x5b0] sm:$0xf0]  ;;  %v11070_v4 = vld [vmem:[%s16947_s11 + $0x6c4] sm:$0xf]  ;;  %v9250_v43 = vor.u32 %v11002_v22, %v9247_v45 }
 0x4bd   : > { %v9519_v1 = vld [vmem:[%s16947_s11 + $0x6d0] sm:$0xf0]  ;;  %v11102_v32 = vld [vmem:[%s16947_s11 + $0x7c4] sm:$0xf]  ;;  %v9378_v15 = vor.u32 %v11034_v0, %v9375_v54 }
 0x4be   : > { %6806 = vmatpush.bf16.msra.mxu1 %v8658_v61  ;;  %6820 = vmatpush.bf16.msra.mxu3 %v8786_v37  ;;  %v9647_v25 = vld [vmem:[%s16947_s11 + $0x7d0] sm:$0xf0]  ;;  %v10998_v5 = vld [vmem:[%s16947_s11 + $0x484] sm:$0xf]  ;;  %v9522_v31 = vor.u32 %v11070_v4, %v9519_v1 }
 0x4bf   : > { %v9231_v24 = vld [vmem:[%s16947_s11 + $0x490] sm:$0xf0]  ;;  %v11030_v42 = vld [vmem:[%s16947_s11 + $0x584] sm:$0xf]  ;;  %v9650_v57 = vor.u32 %v11102_v32, %v9647_v25 }
 0x4c0   : > { %6833 = vmatpush.bf16.msrb.mxu0 %v8930_v10  ;;  %6847 = vmatpush.bf16.msrb.mxu2 %v9058_v40  ;;  %v9359_v52 = vld [vmem:[%s16947_s11 + $0x590] sm:$0xf0]  ;;  %v11066_v55 = vld [vmem:[%s16947_s11 + $0x6a4] sm:$0xf]  ;;  %v9234_v36 = vor.u32 %v10998_v5, %v9231_v24 }
 0x4c1   : > { %6807 = vmatmul.bf16.vlgmr.msra.gmra.mxu1 %v13579_v17  ;;  %6821 = vmatmul.bf16.vlgmr.msra.gmra.mxu3 %v13581_v18  ;;  %v9503_v11 = vld [vmem:[%s16947_s11 + $0x6b0] sm:$0xf0]  ;;  %v11098_v53 = vld [vmem:[%s16947_s11 + $0x7a4] sm:$0xf]  ;;  %v9362_v23 = vor.u32 %v11030_v42, %v9359_v52 }
 0x4c2   : > { %6855 = vmatpush.bf16.msrb.mxu1 %v9282_v44  ;;  %6869 = vmatpush.bf16.msrb.mxu3 %v9410_v16  ;;  %v9631_v20 = vld [vmem:[%s16947_s11 + $0x7b0] sm:$0xf0]  ;;  %v10994_v12 = vld [vmem:[%s16947_s11 + $0x464] sm:$0xf]  ;;  %v9506_v44 = vor.u32 %v11066_v55, %v9503_v11 }
 0x4c3   : > { %v9215_v28 = vld [vmem:[%s16947_s11 + $0x470] sm:$0xf0]  ;;  %v11026_v61 = vld [vmem:[%s16947_s11 + $0x564] sm:$0xf]  ;;  %v9634_v16 = vor.u32 %v11098_v53, %v9631_v20 }
 0x4c4   : > { %6834 = vmatpush.bf16.msrb.mxu0 %v8914_v38  ;;  %6848 = vmatpush.bf16.msrb.mxu2 %v9042_v41  ;;  %v9343_v37 = vld [vmem:[%s16947_s11 + $0x570] sm:$0xf0]  ;;  %v11062_v35 = vld [vmem:[%s16947_s11 + $0x684] sm:$0xf]  ;;  %v9218_v40 = vor.u32 %v10994_v12, %v9215_v28 }
 0x4c5   : > { %v9487_v39 = vld [vmem:[%s16947_s11 + $0x690] sm:$0xf0]  ;;  %v11094_v34 = vld [vmem:[%s16947_s11 + $0x784] sm:$0xf]  ;;  %v9346_v27 = vor.u32 %v11026_v61, %v9343_v37 }
 0x4c6   : > { %6856 = vmatpush.bf16.msrb.mxu1 %v9266_v50  ;;  %6870 = vmatpush.bf16.msrb.mxu3 %v9394_v21  ;;  %v9615_v10 = vld [vmem:[%s16947_s11 + $0x790] sm:$0xf0]  ;;  %v10990_v30 = vld [vmem:[%s16947_s11 + $0x444] sm:$0xf]  ;;  %v9490_v46 = vor.u32 %v11062_v35, %v9487_v39 }
 0x4c7   : > { %6835 = vmatmul.bf16.vlgmr.msrb.gmra.mxu0 %v13624_v60  ;;  %6849 = vmatmul.bf16.vlgmr.msrb.gmra.mxu2 %v13626_v33  ;;  %v9199_v49 = vld [vmem:[%s16947_s11 + $0x450] sm:$0xf0]  ;;  %v11022_v19 = vld [vmem:[%s16947_s11 + $0x544] sm:$0xf]  ;;  %v9618_v47 = vor.u32 %v11094_v34, %v9615_v10 }
 0x4c8   : > { %6883 = vmatpush.bf16.msra.mxu0 %v9538_v63  ;;  %6897 = vmatpush.bf16.msra.mxu2 %v9666_v51  ;;  %v9327_v59 = vld [vmem:[%s16947_s11 + $0x550] sm:$0xf0]  ;;  %v11058_v48 = vld [vmem:[%s16947_s11 + $0x664] sm:$0xf]  ;;  %v9202_v22 = vor.u32 %v10990_v30, %v9199_v49 }
 0x4c9   : > { %v9471_v29 = vld [vmem:[%s16947_s11 + $0x670] sm:$0xf0]  ;;  %v11090_v50 = vld [vmem:[%s16947_s11 + $0x764] sm:$0xf]  ;;  %v9330_v38 = vor.u32 %v11022_v19, %v9327_v59 }
 0x4ca   : > { %6857 = vmatpush.bf16.msrb.mxu1 %v9250_v43  ;;  %6871 = vmatpush.bf16.msrb.mxu3 %v9378_v15  ;;  %v9599_v21 = vld [vmem:[%s16947_s11 + $0x770] sm:$0xf0]  ;;  %v10986_v41 = vld [vmem:[%s16947_s11 + $0x424] sm:$0xf]  ;;  %v9474_v63 = vor.u32 %v11058_v48, %v9471_v29 }
 0x4cb   : > { %v9183_v45 = vld [vmem:[%s16947_s11 + $0x430] sm:$0xf0]  ;;  %v11018_v0 = vld [vmem:[%s16947_s11 + $0x524] sm:$0xf]  ;;  %v9602_v51 = vor.u32 %v11090_v50, %v9599_v21 }
 0x4cc   : > { %6884 = vmatpush.bf16.msra.mxu0 %v9522_v31  ;;  %6898 = vmatpush.bf16.msra.mxu2 %v9650_v57  ;;  %v9311_v54 = vld [vmem:[%s16947_s11 + $0x530] sm:$0xf0]  ;;  %v11054_v4 = vld [vmem:[%s16947_s11 + $0x644] sm:$0xf]  ;;  %v9186_v43 = vor.u32 %v10986_v41, %v9183_v45 }
 0x4cd   : > { %v9455_v1 = vld [vmem:[%s16947_s11 + $0x650] sm:$0xf0]  ;;  %v11086_v32 = vld [vmem:[%s16947_s11 + $0x744] sm:$0xf]  ;;  %v9314_v15 = vor.u32 %v11018_v0, %v9311_v54 }
 0x4ce   : > { %6858 = vmatpush.bf16.msrb.mxu1 %v9234_v36  ;;  %6872 = vmatpush.bf16.msrb.mxu3 %v9362_v23  ;;  %v9583_v25 = vld [vmem:[%s16947_s11 + $0x750] sm:$0xf0]  ;;  %v10982_v5 = vld [vmem:[%s16947_s11 + $0x404] sm:$0xf]  ;;  %v9458_v55 = vor.u32 %v11054_v4, %v9455_v1 }
 0x4cf   : > { %v9167_v24 = vld [vmem:[%s16947_s11 + $0x410] sm:$0xf0]  ;;  %v11014_v42 = vld [vmem:[%s16947_s11 + $0x504] sm:$0xf]  ;;  %v9586_v11 = vor.u32 %v11086_v32, %v9583_v25 }
 0x4d0   : > { %6885 = vmatpush.bf16.msra.mxu0 %v9506_v44  ;;  %6899 = vmatpush.bf16.msra.mxu2 %v9634_v16  ;;  %v9295_v52 = vld [vmem:[%s16947_s11 + $0x510] sm:$0xf0]  ;;  %v11138_v31 = vld [vmem:[%s16947_s11 + $0x8e4] sm:$0xf]  ;;  %v9170_v61 = vor.u32 %v10982_v5, %v9167_v24 }
 0x4d1   : > { %v9791_v57 = vld [vmem:[%s16947_s11 + $0x8f0] sm:$0xf0]  ;;  %v11170_v53 = vld [vmem:[%s16947_s11 + $0x9e4] sm:$0xf]  ;;  %v9298_v37 = vor.u32 %v11014_v42, %v9295_v52 }
 0x4d2   : > { %6859 = vmatpush.bf16.msrb.mxu1 %v9218_v40  ;;  %6873 = vmatpush.bf16.msrb.mxu3 %v9346_v27  ;;  %v9919_v20 = vld [vmem:[%s16947_s11 + $0x9f0] sm:$0xf0]  ;;  %v11050_v36 = vld [vmem:[%s16947_s11 + $0x624] sm:$0xf]  ;;  %v9794_v44 = vor.u32 %v11138_v31, %v9791_v57 }
 0x4d3   : > { %v9439_v23 = vld [vmem:[%s16947_s11 + $0x630] sm:$0xf0]  ;;  %v11082_v12 = vld [vmem:[%s16947_s11 + $0x724] sm:$0xf]  ;;  %v9922_v16 = vor.u32 %v11170_v53, %v9919_v20 }
 0x4d4   : > { %6886 = vmatpush.bf16.msra.mxu0 %v9490_v46  ;;  %6900 = vmatpush.bf16.msra.mxu2 %v9618_v47  ;;  %v9567_v28 = vld [vmem:[%s16947_s11 + $0x730] sm:$0xf0]  ;;  %v11134_v35 = vld [vmem:[%s16947_s11 + $0x8c4] sm:$0xf]  ;;  %v9442_v10 = vor.u32 %v11050_v36, %v9439_v23 }
 0x4d5   : > { %v9775_v39 = vld [vmem:[%s16947_s11 + $0x8d0] sm:$0xf0]  ;;  %v11166_v34 = vld [vmem:[%s16947_s11 + $0x9c4] sm:$0xf]  ;;  %v9570_v40 = vor.u32 %v11082_v12, %v9567_v28 }
 0x4d6   : > { %6860 = vmatpush.bf16.msrb.mxu1 %v9202_v22  ;;  %6874 = vmatpush.bf16.msrb.mxu3 %v9330_v38  ;;  %v9903_v27 = vld [vmem:[%s16947_s11 + $0x9d0] sm:$0xf0]  ;;  %v11046_v30 = vld [vmem:[%s16947_s11 + $0x604] sm:$0xf]  ;;  %v9778_v50 = vor.u32 %v11134_v35, %v9775_v39 }
 0x4d7   : > { %v9423_v49 = vld [vmem:[%s16947_s11 + $0x610] sm:$0xf0]  ;;  %v11078_v19 = vld [vmem:[%s16947_s11 + $0x704] sm:$0xf]  ;;  %v9906_v21 = vor.u32 %v11166_v34, %v9903_v27 }
 0x4d8   : > { %6887 = vmatpush.bf16.msra.mxu0 %v9474_v63  ;;  %6901 = vmatpush.bf16.msra.mxu2 %v9602_v51  ;;  %v9551_v59 = vld [vmem:[%s16947_s11 + $0x710] sm:$0xf0]  ;;  %v11202_v46 = vld [vmem:[%s16947_s11 + $0xae4] sm:$0xf]  ;;  %v9426_v38 = vor.u32 %v11046_v30, %v9423_v49 }
 0x4d9   : > { %v10047_v47 = vld [vmem:[%s16947_s11 + $0xaf0] sm:$0xf0]  ;;  %v11234_v48 = vld [vmem:[%s16947_s11 + $0xbe4] sm:$0xf]  ;;  %v9554_v41 = vor.u32 %v11078_v19, %v9551_v59 }
 0x4da   : > { %6861 = vmatpush.bf16.msrb.mxu1 %v9186_v43  ;;  %6875 = vmatpush.bf16.msrb.mxu3 %v9314_v15  ;;  %v10175_v29 = vld [vmem:[%s16947_s11 + $0xbf0] sm:$0xf0]  ;;  %v11130_v22 = vld [vmem:[%s16947_s11 + $0x8a4] sm:$0xf]  ;;  %v10050_v63 = vor.u32 %v11202_v46, %v10047_v47 }
 0x4db   : > { %v9759_v45 = vld [vmem:[%s16947_s11 + $0x8b0] sm:$0xf0]  ;;  %v11162_v0 = vld [vmem:[%s16947_s11 + $0x9a4] sm:$0xf]  ;;  %v10178_v51 = vor.u32 %v11234_v48, %v10175_v29 }
 0x4dc   : > { %6888 = vmatpush.bf16.msra.mxu0 %v9458_v55  ;;  %6902 = vmatpush.bf16.msra.mxu2 %v9586_v11  ;;  %v9887_v54 = vld [vmem:[%s16947_s11 + $0x9b0] sm:$0xf0]  ;;  %v11198_v4 = vld [vmem:[%s16947_s11 + $0xac4] sm:$0xf]  ;;  %v9762_v43 = vor.u32 %v11130_v22, %v9759_v45 }
 0x4dd   : > { %v10031_v1 = vld [vmem:[%s16947_s11 + $0xad0] sm:$0xf0]  ;;  %v11230_v32 = vld [vmem:[%s16947_s11 + $0xbc4] sm:$0xf]  ;;  %v9890_v15 = vor.u32 %v11162_v0, %v9887_v54 }
 0x4de   : > { %6862 = vmatpush.bf16.msrb.mxu1 %v9170_v61  ;;  %6876 = vmatpush.bf16.msrb.mxu3 %v9298_v37  ;;  %v10159_v25 = vld [vmem:[%s16947_s11 + $0xbd0] sm:$0xf0]  ;;  %v11126_v5 = vld [vmem:[%s16947_s11 + $0x884] sm:$0xf]  ;;  %v10034_v31 = vor.u32 %v11198_v4, %v10031_v1 }
 0x4df   : > { %v9743_v24 = vld [vmem:[%s16947_s11 + $0x890] sm:$0xf0]  ;;  %v11158_v42 = vld [vmem:[%s16947_s11 + $0x984] sm:$0xf]  ;;  %v10162_v57 = vor.u32 %v11230_v32, %v10159_v25 }
 0x4e0   : > { %6889 = vmatpush.bf16.msra.mxu0 %v9442_v10  ;;  %6903 = vmatpush.bf16.msra.mxu2 %v9570_v40  ;;  %v9871_v52 = vld [vmem:[%s16947_s11 + $0x990] sm:$0xf0]  ;;  %v11194_v55 = vld [vmem:[%s16947_s11 + $0xaa4] sm:$0xf]  ;;  %v9746_v36 = vor.u32 %v11126_v5, %v9743_v24  ;;  %v14504_v40 = vpop.f32.mrf.mxu1 }
 0x4e1   : > { %6863 = vmatmul.bf16.vlgmr.msrb.gmra.mxu1 %v13695_v8  ;;  %6877 = vmatmul.bf16.vlgmr.msrb.gmra.mxu3 %v13697_v56  ;;  %v10015_v11 = vld [vmem:[%s16947_s11 + $0xab0] sm:$0xf0]  ;;  %v11226_v53 = vld [vmem:[%s16947_s11 + $0xba4] sm:$0xf]  ;;  %v9874_v23 = vor.u32 %v11158_v42, %v9871_v52 }
 0x4e2   : > { %6911 = vmatpush.bf16.msra.mxu1 %v9794_v44  ;;  %6925 = vmatpush.bf16.msra.mxu3 %v9922_v16  ;;  %v10143_v20 = vld [vmem:[%s16947_s11 + $0xbb0] sm:$0xf0]  ;;  %v11122_v12 = vld [vmem:[%s16947_s11 + $0x864] sm:$0xf]  ;;  %v10018_v44 = vor.u32 %v11194_v55, %v10015_v11 }
 0x4e3   : > { %v9727_v28 = vld [vmem:[%s16947_s11 + $0x870] sm:$0xf0]  ;;  %v11154_v61 = vld [vmem:[%s16947_s11 + $0x964] sm:$0xf]  ;;  %v10146_v16 = vor.u32 %v11226_v53, %v10143_v20 }
 0x4e4   : > { %6890 = vmatpush.bf16.msra.mxu0 %v9426_v38  ;;  %6904 = vmatpush.bf16.msra.mxu2 %v9554_v41  ;;  %v9855_v37 = vld [vmem:[%s16947_s11 + $0x970] sm:$0xf0]  ;;  %v11190_v35 = vld [vmem:[%s16947_s11 + $0xa84] sm:$0xf]  ;;  %v9730_v27 = vor.u32 %v11122_v12, %v9727_v28  ;;  %v14533_v0 = vpop.f32.mrf.mxu3  ;;  %v14544_v4 = vpop.f32.mrf.mxu0 }
 0x4e5   : > { %v9999_v39 = vld [vmem:[%s16947_s11 + $0xa90] sm:$0xf0]  ;;  %v11222_v34 = vld [vmem:[%s16947_s11 + $0xb84] sm:$0xf]  ;;  %v9858_v30 = vor.u32 %v11154_v61, %v9855_v37 }
 0x4e6   : > { %6912 = vmatpush.bf16.msra.mxu1 %v9778_v50  ;;  %6926 = vmatpush.bf16.msra.mxu3 %v9906_v21  ;;  %v10127_v10 = vld [vmem:[%s16947_s11 + $0xb90] sm:$0xf0]  ;;  %v11118_v49 = vld [vmem:[%s16947_s11 + $0x844] sm:$0xf]  ;;  %v10002_v47 = vor.u32 %v11190_v35, %v9999_v39 }
 0x4e7   : > { %6891 = vmatmul.bf16.vlgmr.msra.gmra.mxu0 %v13737_v14  ;;  %6905 = vmatmul.bf16.vlgmr.msra.gmra.mxu2 %v13739_v3  ;;  %v9711_v19 = vld [vmem:[%s16947_s11 + $0x850] sm:$0xf0]  ;;  %v11150_v59 = vld [vmem:[%s16947_s11 + $0x944] sm:$0xf]  ;;  %v10130_v48 = vor.u32 %v11222_v34, %v10127_v10 }
 0x4e8   : > { %6939 = vmatpush.bf16.msrb.mxu0 %v10050_v63  ;;  %6953 = vmatpush.bf16.msrb.mxu2 %v10178_v51  ;;  %v9839_v46 = vld [vmem:[%s16947_s11 + $0x950] sm:$0xf0]  ;;  %v11186_v29 = vld [vmem:[%s16947_s11 + $0xa64] sm:$0xf]  ;;  %v9714_v38 = vor.u32 %v11118_v49, %v9711_v19  ;;  %v14576_v20 = vpop.f32.mrf.mxu1 }
 0x4e9   : > { %v9983_v50 = vld [vmem:[%s16947_s11 + $0xa70] sm:$0xf0]  ;;  %v11218_v21 = vld [vmem:[%s16947_s11 + $0xb64] sm:$0xf]  ;;  %v9842_v41 = vor.u32 %v11150_v59, %v9839_v46 }
 0x4ea   : > { %6913 = vmatpush.bf16.msra.mxu1 %v9762_v43  ;;  %6927 = vmatpush.bf16.msra.mxu3 %v9890_v15  ;;  %v10111_v22 = vld [vmem:[%s16947_s11 + $0xb70] sm:$0xf0]  ;;  %v11114_v45 = vld [vmem:[%s16947_s11 + $0x824] sm:$0xf]  ;;  %v9986_v1 = vor.u32 %v11186_v29, %v9983_v50  ;;  %v14596_v35 = vpop.f32.mrf.mxu2 }
 0x4eb   : > { %v9695_v54 = vld [vmem:[%s16947_s11 + $0x830] sm:$0xf0]  ;;  %v11146_v63 = vld [vmem:[%s16947_s11 + $0x924] sm:$0xf]  ;;  %v10114_v32 = vor.u32 %v11218_v21, %v10111_v22 }
 0x4ec   : > { %6940 = vmatpush.bf16.msrb.mxu0 %v10034_v31  ;;  %6954 = vmatpush.bf16.msrb.mxu2 %v10162_v57  ;;  %v9823_v51 = vld [vmem:[%s16947_s11 + $0x930] sm:$0xf0]  ;;  %v11182_v25 = vld [vmem:[%s16947_s11 + $0xa44] sm:$0xf]  ;;  %v9698_v24 = vor.u32 %v11114_v45, %v9695_v54  ;;  %v14616_v50 = vpop.f32.mrf.mxu3 }
 0x4ed   : > { %v9967_v43 = vld [vmem:[%s16947_s11 + $0xa50] sm:$0xf0]  ;;  %v11214_v15 = vld [vmem:[%s16947_s11 + $0xb44] sm:$0xf]  ;;  %v9826_v42 = vor.u32 %v11146_v63, %v9823_v51 }
 0x4ee   : > { %6914 = vmatpush.bf16.msra.mxu1 %v9746_v36  ;;  %6928 = vmatpush.bf16.msra.mxu3 %v9874_v23  ;;  %v10095_v5 = vld [vmem:[%s16947_s11 + $0xb50] sm:$0xf0]  ;;  %v11110_v52 = vld [vmem:[%s16947_s11 + $0x804] sm:$0xf]  ;;  %v9970_v36 = vor.u32 %v11182_v25, %v9967_v43 }
 0x4ef   : > { %v9679_v31 = vld [vmem:[%s16947_s11 + $0x810] sm:$0xf0]  ;;  %v11142_v57 = vld [vmem:[%s16947_s11 + $0x904] sm:$0xf]  ;;  %v10098_v23 = vor.u32 %v11214_v15, %v10095_v5 }
 0x4f0   : > { %6941 = vmatpush.bf16.msrb.mxu0 %v10018_v44  ;;  %6955 = vmatpush.bf16.msrb.mxu2 %v10146_v16  ;;  %v9807_v55 = vld [vmem:[%s16947_s11 + $0x910] sm:$0xf0]  ;;  %v11266_v11 = vld [vmem:[%s16947_s11 + $0xce4] sm:$0xf]  ;;  %v9682_v39 = vor.u32 %v11110_v52, %v9679_v31 }
 0x4f1   : > { %v10303_v53 = vld [vmem:[%s16947_s11 + $0xcf0] sm:$0xf0]  ;;  %v11298_v12 = vld [vmem:[%s16947_s11 + $0xde4] sm:$0xf]  ;;  %v9810_v34 = vor.u32 %v11142_v57, %v9807_v55  ;;  %v14655_v57 = vpop.f32.mrf.mxu1 }
 0x4f2   : > { %6915 = vmatpush.bf16.msra.mxu1 %v9730_v27  ;;  %6929 = vmatpush.bf16.msra.mxu3 %v9858_v30  ;;  %v10431_v28 = vld [vmem:[%s16947_s11 + $0xdf0] sm:$0xf0]  ;;  %v11178_v61 = vld [vmem:[%s16947_s11 + $0xa24] sm:$0xf]  ;;  %v10306_v10 = vor.u32 %v11266_v11, %v10303_v53 }
 0x4f3   : > { %v9951_v37 = vld [vmem:[%s16947_s11 + $0xa30] sm:$0xf0]  ;;  %v11210_v44 = vld [vmem:[%s16947_s11 + $0xb24] sm:$0xf]  ;;  %v10434_v27 = vor.u32 %v11298_v12, %v10431_v28 }
 0x4f4   : > { %6942 = vmatpush.bf16.msrb.mxu0 %v10002_v47  ;;  %6956 = vmatpush.bf16.msrb.mxu2 %v10130_v48  ;;  %v10079_v16 = vld [vmem:[%s16947_s11 + $0xb30] sm:$0xf0]  ;;  %v11262_v30 = vld [vmem:[%s16947_s11 + $0xcc4] sm:$0xf]  ;;  %v9954_v59 = vor.u32 %v11178_v61, %v9951_v37  ;;  %v14674_v61 = vpop.f32.mrf.mxu2 }
 0x4f5   : > { %v10287_v49 = vld [vmem:[%s16947_s11 + $0xcd0] sm:$0xf0]  ;;  %v11294_v19 = vld [vmem:[%s16947_s11 + $0xdc4] sm:$0xf]  ;;  %v10082_v46 = vor.u32 %v11210_v44, %v10079_v16 }
 0x4f6   : > { %6916 = vmatpush.bf16.msra.mxu1 %v9714_v38  ;;  %6930 = vmatpush.bf16.msra.mxu3 %v9842_v41  ;;  %v10415_v47 = vld [vmem:[%s16947_s11 + $0xdd0] sm:$0xf0]  ;;  %v11174_v48 = vld [vmem:[%s16947_s11 + $0xa04] sm:$0xf]  ;;  %v14627_v41 = vpop.f32.mrf.mxu0  ;;  %v10290_v51 = vor.u32 %v11262_v30, %v10287_v49 }
 0x4f7   : > { %v9935_v29 = vld [vmem:[%s16947_s11 + $0xa10] sm:$0xf0]  ;;  %v11206_v21 = vld [vmem:[%s16947_s11 + $0xb04] sm:$0xf] }
 0x4f8   : > { %6943 = vmatpush.bf16.msrb.mxu0 %v9986_v1  ;;  %6957 = vmatpush.bf16.msrb.mxu2 %v10114_v32  ;;  %v10063_v22 = vld [vmem:[%s16947_s11 + $0xb10] sm:$0xf0]  ;;  %v11330_v38 = vld [vmem:[%s16947_s11 + $0xee4] sm:$0xf]  ;;  %v10418_v1 = vor.u32 %v11294_v19, %v10415_v47  ;;  %v9938_v25 = vor.u32 %v11174_v48, %v9935_v29 }
 0x4f9   : > { %v10559_v45 = vld [vmem:[%s16947_s11 + $0xef0] sm:$0xf0]  ;;  %v11362_v54 = vld [vmem:[%s16947_s11 + $0xfe4] sm:$0xf]  ;;  %v10066_v43 = vor.u32 %v11206_v21, %v10063_v22 }
 0x4fa   : > { %6917 = vmatpush.bf16.msra.mxu1 %v9698_v24  ;;  %6931 = vmatpush.bf16.msra.mxu3 %v9826_v42  ;;  %v10687_v63 = vld [vmem:[%s16947_s11 + $0xff0] sm:$0xf0]  ;;  %v11258_v32 = vld [vmem:[%s16947_s11 + $0xca4] sm:$0xf]  ;;  %v10562_v42 = vor.u32 %v11330_v38, %v10559_v45 }
 0x4fb   : > { %v10271_v15 = vld [vmem:[%s16947_s11 + $0xcb0] sm:$0xf0]  ;;  %v11290_v5 = vld [vmem:[%s16947_s11 + $0xda4] sm:$0xf]  ;;  %v10690_v52 = vor.u32 %v11362_v54, %v10687_v63 }
 0x4fc   : > { %6944 = vmatpush.bf16.msrb.mxu0 %v9970_v36  ;;  %6958 = vmatpush.bf16.msrb.mxu2 %v10098_v23  ;;  %v10399_v24 = vld [vmem:[%s16947_s11 + $0xdb0] sm:$0xf0]  ;;  %v11326_v31 = vld [vmem:[%s16947_s11 + $0xec4] sm:$0xf]  ;;  %v14669_v36 = vld [vmem:[%s16948_s12] sm:$0xf]  ;;  %v10274_v23 = vor.u32 %v11258_v32, %v10271_v15 }
 0x4fd   : > { %v10543_v55 = vld [vmem:[%s16947_s11 + $0xed0] sm:$0xf0]  ;;  %v11358_v11 = vld [vmem:[%s16947_s11 + $0xfc4] sm:$0xf]  ;;  %v10402_v12 = vor.u32 %v11290_v5, %v10399_v24  ;;  %v3927_v19 = vperm.slane %v14669_v36, 0  ;;  %v14732_v24 = vpop.f32.mrf.mxu1  ;;  %v14747_v36 = vpop.f32.mrf.mxu2 }
 0x4fe   : > { %6918 = vmatpush.bf16.msra.mxu1 %v9682_v39  ;;  %6932 = vmatpush.bf16.msra.mxu3 %v9810_v34  ;;  %v10671_v53 = vld [vmem:[%s16947_s11 + $0xfd0] sm:$0xf0]  ;;  %v11254_v28 = vld [vmem:[%s16947_s11 + $0xc84] sm:$0xf]  ;;  %v10546_v39 = vor.u32 %v11326_v31, %v10543_v55  ;;  %v14703_v29 = vpop.f32.mrf.mxu0 }
 0x4ff   : > { %v10255_v37 = vld [vmem:[%s16947_s11 + $0xc90] sm:$0xf0]  ;;  %v11286_v44 = vld [vmem:[%s16947_s11 + $0xd84] sm:$0xf]  ;;  %v10674_v34 = vor.u32 %v11358_v11, %v10671_v53 }
 0x500   : > { %6945 = vmatpush.bf16.msrb.mxu0 %v9954_v59  ;;  %6959 = vmatpush.bf16.msrb.mxu2 %v10082_v46  ;;  %v10383_v16 = vld [vmem:[%s16947_s11 + $0xd90] sm:$0xf0]  ;;  %v11354_v30 = vld [vmem:[%s16947_s11 + $0xfa4] sm:$0xf]  ;;  %v14698_v59 = vpop.f32.mrf.mxu3  ;;  %v10258_v46 = vor.u32 %v11254_v28, %v10255_v37 }
 0x501   : > { %6919 = vmatmul.bf16.vlgmr.msra.gmra.mxu1 %v13815_v58  ;;  %6933 = vmatmul.bf16.vlgmr.msra.gmra.mxu3 %v13826_v9  ;;  %v10655_v49 = vld [vmem:[%s16947_s11 + $0xfb0] sm:$0xf0]  ;;  %v10386_v47 = vor.u32 %v11286_v44, %v10383_v16  ;;  %v11250_v48 = vld [vmem:[%s16947_s11 + $0xc64] sm:$0xf] }
 0x502   : > { %6967 = vmatpush.bf16.msrb.mxu1 %v10306_v10  ;;  %6981 = vmatpush.bf16.msrb.mxu3 %v10434_v27  ;;  %v11322_v10 = vld [vmem:[%s16947_s11 + $0xea4] sm:$0xf]  ;;  %v10527_v27 = vld [vmem:[%s16947_s11 + $0xeb0] sm:$0xf0]  ;;  %v10658_v54 = vor.u32 %v11354_v30, %v10655_v49 }
 0x503   : > { %v10239_v21 = vld [vmem:[%s16947_s11 + $0xc70] sm:$0xf0]  ;;  %v11282_v22 = vld [vmem:[%s16947_s11 + $0xd64] sm:$0xf]  ;;  %v10530_v45 = vor.u32 %v11322_v10, %v10527_v27 }
 0x504   : > { %6946 = vmatpush.bf16.msrb.mxu0 %v9938_v25  ;;  %6960 = vmatpush.bf16.msrb.mxu2 %v10066_v43  ;;  %v10367_v38 = vld [vmem:[%s16947_s11 + $0xd70] sm:$0xf0]  ;;  %v11318_v63 = vld [vmem:[%s16947_s11 + $0xe84] sm:$0xf]  ;;  %v6585_v25 = vadd.f32 %v14504_v40, %v3927_v19  ;;  %v10242_v43 = vor.u32 %v11250_v48, %v10239_v21 }
 0x505   : > { %v10639_v32 = vld [vmem:[%s16947_s11 + $0xf90] sm:$0xf0]  ;;  %v10370_v15 = vor.u32 %v11282_v22, %v10367_v38  ;;  %v11246_v5 = vld [vmem:[%s16947_s11 + $0xc44] sm:$0xf] }
 0x506   : > { %6968 = vmatpush.bf16.msrb.mxu1 %v10290_v51  ;;  %6982 = vmatpush.bf16.msrb.mxu3 %v10418_v1  ;;  %v10511_v51 = vld [vmem:[%s16947_s11 + $0xe90] sm:$0xf0]  ;;  %v11350_v1 = vld [vmem:[%s16947_s11 + $0xf84] sm:$0xf]  ;;  %v6599_v31 = vadd.f32 %v14533_v0, %v6585_v25  ;;  %v14777_v48 = vpop.f32.mrf.mxu0 }
 0x507   : > { %6947 = vmatmul.bf16.vlgmr.msrb.gmra.mxu0 %v13869_v26  ;;  %6961 = vmatmul.bf16.vlgmr.msrb.gmra.mxu2 %v13871_v13  ;;  %v10351_v40 = vld [vmem:[%s16947_s11 + $0xd50] sm:$0xf0]  ;;  %v10514_v55 = vor.u32 %v11318_v63, %v10511_v51  ;;  %v10642_v11 = vor.u32 %v11350_v1, %v10639_v32  ;;  %v11314_v53 = vld [vmem:[%s16947_s11 + $0xe64] sm:$0xf]  ;;  %v8773_v1 = vld [vmem:[%s16947_s11 + $0xe8] sm:$0xf] }
 0x508   : > { %6995 = vmatpush.bf16.msra.mxu0 %v10562_v42  ;;  %7009 = vmatpush.bf16.msra.mxu2 %v10690_v52  ;;  %v10223_v42 = vld [vmem:[%s16947_s11 + $0xc50] sm:$0xf0]  ;;  %v11278_v52 = vld [vmem:[%s16947_s11 + $0xd44] sm:$0xf]  ;;  %v6613_v10 = vadd.f32 %v14544_v4, %v6599_v31  ;;  %v14771_v27 = vpop.f32.mrf.mxu3  ;;  %v10885_v32 = vld [vmem:[%s16947_s11 + $0xf4] sm:$0xf0] }
 0x509   : > { %v10623_v0 = vld [vmem:[%s16947_s11 + $0xf70] sm:$0xf0]  ;;  %v10226_v28 = vor.u32 %v11246_v5, %v10223_v42  ;;  %v10354_v37 = vor.u32 %v11278_v52, %v10351_v40  ;;  %v11242_v44 = vld [vmem:[%s16947_s11 + $0xc24] sm:$0xf]  ;;  %v14817_v42 = vpop.f32.mrf.mxu1 }
 0x50a   : > { %6969 = vmatpush.bf16.msrb.mxu1 %v10274_v23  ;;  %6983 = vmatpush.bf16.msrb.mxu3 %v10402_v12  ;;  %v10495_v23 = vld [vmem:[%s16947_s11 + $0xe70] sm:$0xf0]  ;;  %v11346_v12 = vld [vmem:[%s16947_s11 + $0xf64] sm:$0xf]  ;;  %v6627_v38 = vadd.f32 %v14596_v35, %v6613_v10 }
 0x50b   : > { %v10207_v16 = vld [vmem:[%s16947_s11 + $0xc30] sm:$0xf0]  ;;  %v10498_v30 = vor.u32 %v11314_v53, %v10495_v23  ;;  %v10626_v49 = vor.u32 %v11346_v12, %v10623_v0  ;;  %v11342_v4 = vld [vmem:[%s16947_s11 + $0xf44] sm:$0xf]  ;;  %v14830_v12 = vpop.f32.mrf.mxu2  ;;  %v8774_v0 = vor.u32 %v10885_v32, %v8773_v1  ;;  %v8869_v1 = vld [vmem:[%s16947_s11 + $0x1a8] sm:$0xf] }
 0x50c   : > { %6996 = vmatpush.bf16.msra.mxu0 %v10546_v39  ;;  %7010 = vmatpush.bf16.msra.mxu2 %v10674_v34  ;;  %v11274_v39 = vld [vmem:[%s16947_s11 + $0xd24] sm:$0xf]  ;;  %v10335_v34 = vld [vmem:[%s16947_s11 + $0xd30] sm:$0xf0]  ;;  %v10909_v32 = vld [vmem:[%s16947_s11 + $0x1b4] sm:$0xf0] }
 0x50d   : > { %v10479_v21 = vld [vmem:[%s16947_s11 + $0xe50] sm:$0xf0]  ;;  %v11270_v63 = vld [vmem:[%s16947_s11 + $0xd04] sm:$0xf] }
 0x50e   : > { %6970 = vmatpush.bf16.msrb.mxu1 %v10258_v46  ;;  %6984 = vmatpush.bf16.msrb.mxu3 %v10386_v47  ;;  %v11310_v46 = vld [vmem:[%s16947_s11 + $0xe44] sm:$0xf]  ;;  %v6587_v47 = vadd.f32 %v14576_v20, %v3927_v19  ;;  %v10607_v22 = vld [vmem:[%s16947_s11 + $0xf50] sm:$0xf0]  ;;  %v10338_v20 = vor.u32 %v11274_v39, %v10335_v34  ;;  %v10913_v34 = vld [vmem:[%s16947_s11 + $0x1d4] sm:$0xf0] }
 0x50f   : > { %v11238_v19 = vld [vmem:[%s16947_s11 + $0xc04] sm:$0xf]  ;;  %v10319_v35 = vld [vmem:[%s16947_s11 + $0xd10] sm:$0xf0]  ;;  %v10482_v25 = vor.u32 %v11310_v46, %v10479_v21  ;;  %v9029_v46 = vld [vmem:[%s16947_s11 + $0x2e8] sm:$0xf] }
 0x510   : > { %6997 = vmatpush.bf16.msra.mxu0 %v10530_v45  ;;  %7011 = vmatpush.bf16.msra.mxu2 %v10658_v54  ;;  %v10210_v45 = vor.u32 %v11242_v44, %v10207_v16  ;;  %v10191_v54 = vld [vmem:[%s16947_s11 + $0xc10] sm:$0xf0]  ;;  %v6601_v51 = vadd.f32 %v14616_v50, %v6587_v47  ;;  %v8901_v50 = vld [vmem:[%s16947_s11 + $0x1e8] sm:$0xf]  ;;  %v11306_v5 = vld [vmem:[%s16947_s11 + $0xe24] sm:$0xf]  ;;  %v10322_v53 = vor.u32 %v11270_v63, %v10319_v35  ;;  %v6710_v21 = vpop.f32.mrf.mxu3 }
 0x511   : > { %v10463_v52 = vld [vmem:[%s16947_s11 + $0xe30] sm:$0xf0]  ;;  %v11338_v40 = vld [vmem:[%s16947_s11 + $0xf24] sm:$0xf]  ;;  %v10881_v44 = vld [vmem:[%s16947_s11 + $0xd4] sm:$0xf0] }
 0x512   : > { %6971 = vmatpush.bf16.msrb.mxu1 %v10242_v43  ;;  %6985 = vmatpush.bf16.msrb.mxu3 %v10370_v15  ;;  %v10610_v43 = vor.u32 %v11342_v4, %v10607_v22  ;;  %v10917_v15 = vld [vmem:[%s16947_s11 + $0x1f4] sm:$0xf0]  ;;  %v10591_v31 = vld [vmem:[%s16947_s11 + $0xf30] sm:$0xf0]  ;;  %v6615_v23 = vadd.f32 %v14627_v41, %v6601_v51  ;;  %v10466_v41 = vor.u32 %v11306_v5, %v10463_v52  ;;  %v11302_v10 = vld [vmem:[%s16947_s11 + $0xe04] sm:$0xf] }
 0x513   : > { %v10594_v39 = vor.u32 %v11338_v40, %v10591_v31  ;;  %v10949_v4 = vld [vmem:[%s16947_s11 + $0x2f4] sm:$0xf0]  ;;  %v9157_v22 = vld [vmem:[%s16947_s11 + $0x3e8] sm:$0xf]  ;;  %v6698_v31 = vpop.f32.mrf.mxu1 }
 0x514   : > { %6998 = vmatpush.bf16.msra.mxu0 %v10514_v55  ;;  %7012 = vmatpush.bf16.msra.mxu2 %v10642_v11  ;;  %v6641_v55 = vadd.f32 %v14655_v57, %v6627_v38  ;;  %v10194_v11 = vor.u32 %v11238_v19, %v10191_v54  ;;  %v8885_v57 = vld [vmem:[%s16947_s11 + $0x1c8] sm:$0xf]  ;;  %v6629_v47 = vadd.f32 %v14674_v61, %v6615_v23  ;;  %v10981_v38 = vld [vmem:[%s16947_s11 + $0x3f4] sm:$0xf0] }
 0x515   : > { %v8741_v19 = vld [vmem:[%s16947_s11 + $0xa8] sm:$0xf]  ;;  %v10877_v35 = vld [vmem:[%s16947_s11 + $0xb4] sm:$0xf0] }
 0x516   : > { %6972 = vmatpush.bf16.msrb.mxu1 %v10226_v28  ;;  %6986 = vmatpush.bf16.msrb.mxu3 %v10354_v37  ;;  %v8902_v28 = vor.u32 %v10917_v15, %v8901_v50  ;;  %v8757_v37 = vld [vmem:[%s16947_s11 + $0xc8] sm:$0xf]  ;;  %v6655_v16 = vadd.f32 %v14698_v59, %v6641_v55  ;;  %v11334_v59 = vld [vmem:[%s16947_s11 + $0xf04] sm:$0xf]  ;;  %v6643_v50 = vadd.f32 %v14732_v24, %v6629_v47  ;;  %v10945_v5 = vld [vmem:[%s16947_s11 + $0x2d4] sm:$0xf0] }
 0x517   : > { %v8758_v61 = vor.u32 %v10881_v44, %v8757_v37  ;;  %v9141_v52 = vld [vmem:[%s16947_s11 + $0x3c8] sm:$0xf]  ;;  %v10977_v40 = vld [vmem:[%s16947_s11 + $0x3d4] sm:$0xf0]  ;;  %v8742_v55 = vor.u32 %v10877_v35, %v8741_v19 }
 0x518   : > { %6999 = vmatpush.bf16.msra.mxu0 %v10498_v30  ;;  %7013 = vmatpush.bf16.msra.mxu2 %v10626_v49  ;;  %v10447_v30 = vld [vmem:[%s16947_s11 + $0xe10] sm:$0xf0]  ;;  %v6669_v54 = vadd.f32 %v14703_v29, %v6655_v16  ;;  %v9030_v29 = vor.u32 %v10949_v4, %v9029_v46  ;;  %v8725_v24 = vld [vmem:[%s16947_s11 + $0x88] sm:$0xf]  ;;  %v9142_v44 = vor.u32 %v10977_v40, %v9141_v52  ;;  %v10941_v16 = vld [vmem:[%s16947_s11 + $0x2b4] sm:$0xf0] }
 0x519   : > { %v10575_v49 = vld [vmem:[%s16947_s11 + $0xf10] sm:$0xf0]  ;;  %v10450_v63 = vor.u32 %v11302_v10, %v10447_v30  ;;  %v8853_v23 = vld [vmem:[%s16947_s11 + $0x188] sm:$0xf]  ;;  %v10869_v46 = vld [vmem:[%s16947_s11 + $0x74] sm:$0xf0] }
 0x51a   : > { %6973 = vmatpush.bf16.msrb.mxu1 %v10210_v45  ;;  %6987 = vmatpush.bf16.msrb.mxu3 %v10338_v20  ;;  %v14870_v45 = vpop.f32.mrf.mxu0  ;;  %v8886_v20 = vor.u32 %v10913_v34, %v8885_v57  ;;  %v10578_v51 = vor.u32 %v11334_v59, %v10575_v49  ;;  %v6683_v15 = vadd.f32 %v14747_v36, %v6669_v54  ;;  %v6712_v49 = vpop.f32.mrf.mxu3  ;;  %v8837_v47 = vld [vmem:[%s16947_s11 + $0x168] sm:$0xf]  ;;  %v10901_v4 = vld [vmem:[%s16947_s11 + $0x174] sm:$0xf0] }
 0x51b   : > { %v6657_v36 = vadd.f32 %v14771_v27, %v6643_v50  ;;  %v8997_v27 = vld [vmem:[%s16947_s11 + $0x2a8] sm:$0xf]  ;;  %v10969_v54 = vld [vmem:[%s16947_s11 + $0x394] sm:$0xf0]  ;;  %v8838_v35 = vor.u32 %v10901_v4, %v8837_v47 }
 0x51c   : > { %7000 = vmatpush.bf16.msra.mxu0 %v10482_v25  ;;  %7014 = vmatpush.bf16.msra.mxu2 %v10610_v43  ;;  %v9158_v25 = vor.u32 %v10981_v38, %v9157_v22  ;;  %v9013_v43 = vld [vmem:[%s16947_s11 + $0x2c8] sm:$0xf]  ;;  %v6697_v57 = vadd.f32 %v14817_v42, %v6683_v15  ;;  %v10933_v52 = vld [vmem:[%s16947_s11 + $0x274] sm:$0xf0] }
 0x51d   : > { %v9014_v37 = vor.u32 %v10945_v5, %v9013_v43  ;;  %v8709_v42 = vld [vmem:[%s16947_s11 + $0x68] sm:$0xf]  ;;  %v6671_v30 = vadd.f32 %v14777_v48, %v6657_v36  ;;  %v8998_v48 = vor.u32 %v10941_v16, %v8997_v27 }
 0x51e   : > { %6974 = vmatpush.bf16.msrb.mxu1 %v10194_v11  ;;  %6988 = vmatpush.bf16.msrb.mxu3 %v10322_v53  ;;  %v8870_v11 = vor.u32 %v10909_v32, %v8869_v1  ;;  %v10873_v53 = vld [vmem:[%s16947_s11 + $0x94] sm:$0xf0]  ;;  %v6711_v59 = vadd.f32 %v6710_v21, %v6697_v57  ;;  %v8981_v38 = vld [vmem:[%s16947_s11 + $0x288] sm:$0xf] }
 0x51f   : > { %v8726_v34 = vor.u32 %v10873_v53, %v8725_v24  ;;  %v9109_v19 = vld [vmem:[%s16947_s11 + $0x388] sm:$0xf]  ;;  %v10865_v32 = vld [vmem:[%s16947_s11 + $0x54] sm:$0xf0] }
 0x520   : > { %7001 = vmatpush.bf16.msra.mxu0 %v10466_v41  ;;  %7015 = vmatpush.bf16.msra.mxu2 %v10594_v39  ;;  %v9125_v41 = vld [vmem:[%s16947_s11 + $0x3a8] sm:$0xf]  ;;  %v10973_v39 = vld [vmem:[%s16947_s11 + $0x3b4] sm:$0xf0]  ;;  %v6725_v1 = vadd.f32 %v14870_v45, %v6711_v59  ;;  %v9110_v50 = vor.u32 %v10969_v54, %v9109_v19 }
 0x521   : > { %6975 = vmatmul.bf16.vlgmr.msrb.gmra.mxu1 %v14019_v6  ;;  %6989 = vmatmul.bf16.vlgmr.msrb.gmra.mxu3 %v14030_v7  ;;  %v9126_v21 = vor.u32 %v10973_v39, %v9125_v41  ;;  %v8965_v45 = vld [vmem:[%s16947_s11 + $0x268] sm:$0xf]  ;;  %v11045_v54 = vld [vmem:[%s16947_s11 + $0x5f4] sm:$0xf0] }
 0x522   : > { %7023 = vmatpush.bf16.msra.mxu1 %v8774_v0  ;;  %7037 = vmatpush.bf16.msra.mxu3 %v8902_v28  ;;  %v10905_v0 = vld [vmem:[%s16947_s11 + $0x194] sm:$0xf0]  ;;  %v6738_v28 = vpop.f32.mrf.mxu2  ;;  %v6726_v22 = vpop.f32.mrf.mxu0  ;;  %v9093_v40 = vld [vmem:[%s16947_s11 + $0x368] sm:$0xf]  ;;  %v8966_v57 = vor.u32 %v10933_v52, %v8965_v45 }
 0x523   : > { %v8854_v10 = vor.u32 %v10905_v0, %v8853_v23  ;;  %v6739_v5 = vadd.f32 %v6738_v28, %v6725_v1  ;;  %v10861_v28 = vld [vmem:[%s16947_s11 + $0x34] sm:$0xf0]  ;;  %v8949_v41 = vld [vmem:[%s16947_s11 + $0x248] sm:$0xf] }
 0x524   : > { %7002 = vmatpush.bf16.msra.mxu0 %v10450_v63  ;;  %7016 = vmatpush.bf16.msra.mxu2 %v10578_v51  ;;  %v6752_v63 = vpop.f32.mrf.mxu1  ;;  %v8710_v51 = vor.u32 %v10869_v46, %v8709_v42  ;;  %v6766_v0 = vpop.f32.mrf.mxu3  ;;  %v10961_v42 = vld [vmem:[%s16947_s11 + $0x354] sm:$0xf0]  ;;  %v8789_v47 = vld [vmem:[%s16947_s11 + $0x108] sm:$0xf] }
 0x525   : > { %v6753_v23 = vadd.f32 %v6752_v63, %v6739_v5  ;;  %v10857_v46 = vld [vmem:[%s16947_s11 + $0x14] sm:$0xf0]  ;;  %v8933_v63 = vld [vmem:[%s16947_s11 + $0x228] sm:$0xf] }
 0x526   : > { %7024 = vmatpush.bf16.msra.mxu1 %v8758_v61  ;;  %7038 = vmatpush.bf16.msra.mxu3 %v8886_v20  ;;  %v6685_v61 = vadd.f32 %v14830_v12, %v6671_v30  ;;  %v10937_v20 = vld [vmem:[%s16947_s11 + $0x294] sm:$0xf0]  ;;  %v8693_v12 = vld [vmem:[%s16947_s11 + $0x48] sm:$0xf] }
 0x527   : > { %7003 = vmatmul.bf16.vlgmr.msra.gmra.mxu0 %v14073_v2  ;;  %7017 = vmatmul.bf16.vlgmr.msra.gmra.mxu2 %v14075_v62  ;;  %v8982_v43 = vor.u32 %v10937_v20, %v8981_v38  ;;  %v8694_v24 = vor.u32 %v10865_v32, %v8693_v12  ;;  %v6767_v39 = vadd.f32 %v6766_v0, %v6753_v23  ;;  %v11013_v38 = vld [vmem:[%s16947_s11 + $0x4f4] sm:$0xf0]  ;;  %v9061_v1 = vld [vmem:[%s16947_s11 + $0x328] sm:$0xf] }
 0x528   : > { %7051 = vmatpush.bf16.msrb.mxu0 %v9030_v29  ;;  %7065 = vmatpush.bf16.msrb.mxu2 %v9158_v25  ;;  %v8821_v29 = vld [vmem:[%s16947_s11 + $0x148] sm:$0xf]  ;;  %v10897_v25 = vld [vmem:[%s16947_s11 + $0x154] sm:$0xf0]  ;;  %v6699_v15 = vadd.f32 %v6698_v31, %v6685_v61 }
 0x529   : > { %v8822_v36 = vor.u32 %v10897_v25, %v8821_v29  ;;  %v8677_v31 = vld [vmem:[%s16947_s11 + $0x28] sm:$0xf]  ;;  %v10925_v12 = vld [vmem:[%s16947_s11 + $0x234] sm:$0xf0] }
 0x52a   : > { %7025 = vmatpush.bf16.msra.mxu1 %v8742_v55  ;;  %7039 = vmatpush.bf16.msra.mxu3 %v8870_v11  ;;  %v10965_v55 = vld [vmem:[%s16947_s11 + $0x374] sm:$0xf0]  ;;  %v6740_v11 = vpop.f32.mrf.mxu2  ;;  %v6713_v53 = vadd.f32 %v6712_v49, %v6699_v15  ;;  %v6780_v27 = vpop.f32.mrf.mxu0  ;;  %v8678_v30 = vor.u32 %v10861_v28, %v8677_v31  ;;  %v8661_v49 = vld [vmem:[%s16947_s11 + $0x8] sm:$0xf] }
 0x52b   : > { %v9094_v16 = vor.u32 %v10965_v55, %v9093_v40  ;;  %v10957_v32 = vld [vmem:[%s16947_s11 + $0x334] sm:$0xf0]  ;;  %v8662_v25 = vor.u32 %v10857_v46, %v8661_v49  ;;  %v9045_v0 = vld [vmem:[%s16947_s11 + $0x308] sm:$0xf] }
 0x52c   : > { %7052 = vmatpush.bf16.msrb.mxu0 %v9014_v37  ;;  %7066 = vmatpush.bf16.msrb.mxu2 %v9142_v44  ;;  %v8805_v37 = vld [vmem:[%s16947_s11 + $0x128] sm:$0xf]  ;;  %v10893_v44 = vld [vmem:[%s16947_s11 + $0x134] sm:$0xf0]  ;;  %v6727_v4 = vadd.f32 %v6726_v22, %v6713_v53  ;;  %v6754_v61 = vpop.f32.mrf.mxu1  ;;  %v6768_v5 = vpop.f32.mrf.mxu3  ;;  %v9062_v31 = vor.u32 %v10957_v32, %v9061_v1 }
 0x52d   : > { %v8806_v59 = vor.u32 %v10893_v44, %v8805_v37  ;;  %v9413_v22 = vld [vmem:[%s16947_s11 + $0x5e8] sm:$0xf]  ;;  %v11009_v55 = vld [vmem:[%s16947_s11 + $0x4d4] sm:$0xf0] }
 0x52e   : > { %7026 = vmatpush.bf16.msra.mxu1 %v8726_v34  ;;  %7040 = vmatpush.bf16.msra.mxu3 %v8854_v10  ;;  %v10929_v34 = vld [vmem:[%s16947_s11 + $0x254] sm:$0xf0]  ;;  %v9077_v10 = vld [vmem:[%s16947_s11 + $0x348] sm:$0xf]  ;;  %v9414_v40 = vor.u32 %v11045_v54, %v9413_v22 }
 0x52f   : > { %v8950_v20 = vor.u32 %v10929_v34, %v8949_v41  ;;  %v9078_v19 = vor.u32 %v10961_v42, %v9077_v10  ;;  %v8917_v53 = vld [vmem:[%s16947_s11 + $0x208] sm:$0xf]  ;;  %v10921_v23 = vld [vmem:[%s16947_s11 + $0x214] sm:$0xf0] }
 0x530   : > { %7053 = vmatpush.bf16.msrb.mxu0 %v8998_v48  ;;  %7067 = vmatpush.bf16.msrb.mxu2 %v9126_v21  ;;  %v10889_v48 = vld [vmem:[%s16947_s11 + $0x114] sm:$0xf0]  ;;  %v9285_v21 = vld [vmem:[%s16947_s11 + $0x4e8] sm:$0xf]  ;;  %v8918_v42 = vor.u32 %v10921_v23, %v8917_v53 }
 0x531   : > { %v9286_v52 = vor.u32 %v11013_v38, %v9285_v21  ;;  %v10953_v37 = vld [vmem:[%s16947_s11 + $0x314] sm:$0xf0]  ;;  %v9541_v44 = vld [vmem:[%s16947_s11 + $0x6e8] sm:$0xf] }
 0x532   : > { %7027 = vmatpush.bf16.msra.mxu1 %v8710_v51  ;;  %7041 = vmatpush.bf16.msra.mxu3 %v8838_v35  ;;  %v6741_v51 = vadd.f32 %v6740_v11, %v6727_v4  ;;  %v6781_v35 = vadd.f32 %v6780_v27, %v6767_v39  ;;  %v6794_v29 = vpop.f32.mrf.mxu2  ;;  %v9397_v11 = vld [vmem:[%s16947_s11 + $0x5c8] sm:$0xf]  ;;  %v6782_v27 = vpop.f32.mrf.mxu0  ;;  %v11109_v41 = vld [vmem:[%s16947_s11 + $0x7f4] sm:$0xf0] }
 0x533   : > { %v9253_v10 = vld [vmem:[%s16947_s11 + $0x4a8] sm:$0xf]  ;;  %v11037_v46 = vld [vmem:[%s16947_s11 + $0x5b4] sm:$0xf0] }
 0x534   : > { %7054 = vmatpush.bf16.msrb.mxu0 %v8982_v43  ;;  %7068 = vmatpush.bf16.msrb.mxu2 %v9110_v50  ;;  %v8790_v43 = vor.u32 %v10889_v48, %v8789_v47  ;;  %v9269_v50 = vld [vmem:[%s16947_s11 + $0x4c8] sm:$0xf]  ;;  %v6755_v45 = vadd.f32 %v6754_v61, %v6741_v51  ;;  %v6795_v15 = vadd.f32 %v6794_v29, %v6781_v35  ;;  %v11073_v61 = vld [vmem:[%s16947_s11 + $0x6d4] sm:$0xf0] }
 0x535   : > { %v9270_v39 = vor.u32 %v11009_v55, %v9269_v50  ;;  %v9381_v49 = vld [vmem:[%s16947_s11 + $0x5a8] sm:$0xf]  ;;  %v11001_v35 = vld [vmem:[%s16947_s11 + $0x494] sm:$0xf0] }
 0x536   : > { %7028 = vmatpush.bf16.msra.mxu1 %v8694_v24  ;;  %7042 = vmatpush.bf16.msra.mxu3 %v8822_v36  ;;  %v11041_v24 = vld [vmem:[%s16947_s11 + $0x5d4] sm:$0xf0]  ;;  %v8934_v36 = vor.u32 %v10925_v12, %v8933_v63  ;;  %7471 = vst [vmem:[#allocation7 + $0x30] sm:$0xff] %v6795_v15  ;;  %v6769_v28 = vadd.f32 %v6768_v5, %v6755_v45  ;;  %v9525_v21 = vld [vmem:[%s16947_s11 + $0x6c8] sm:$0xf] }
 0x537   : > { %v9398_v34 = vor.u32 %v11041_v24, %v9397_v11  ;;  %v9382_v63 = vor.u32 %v11037_v46, %v9381_v49  ;;  %v9237_v51 = vld [vmem:[%s16947_s11 + $0x488] sm:$0xf]  ;;  %v11033_v1 = vld [vmem:[%s16947_s11 + $0x594] sm:$0xf0]  ;;  %v9526_v32 = vor.u32 %v11073_v61, %v9525_v21 }
 0x538   : > { %7055 = vmatpush.bf16.msrb.mxu0 %v8966_v57  ;;  %7069 = vmatpush.bf16.msrb.mxu2 %v9094_v16  ;;  %v11077_v57 = vld [vmem:[%s16947_s11 + $0x6f4] sm:$0xf0]  ;;  %v9669_v16 = vld [vmem:[%s16947_s11 + $0x7e8] sm:$0xf]  ;;  %v6783_v47 = vadd.f32 %v6782_v27, %v6769_v28  ;;  %v9238_v15 = vor.u32 %v11001_v35, %v9237_v51 }
 0x539   : > { %v9542_v4 = vor.u32 %v11077_v57, %v9541_v44  ;;  %v9670_v48 = vor.u32 %v11109_v41, %v9669_v16  ;;  %v9365_v12 = vld [vmem:[%s16947_s11 + $0x588] sm:$0xf]  ;;  %v11101_v45 = vld [vmem:[%s16947_s11 + $0x7b4] sm:$0xf0] }
 0x53a   : > { %7029 = vmatpush.bf16.msra.mxu1 %v8678_v30  ;;  %7043 = vmatpush.bf16.msra.mxu3 %v8806_v59  ;;  %v9046_v30 = vor.u32 %v10953_v37, %v9045_v0  ;;  %v11005_v59 = vld [vmem:[%s16947_s11 + $0x4b4] sm:$0xf0]  ;;  %v6796_v38 = vpop.f32.mrf.mxu2  ;;  %v9637_v50 = vld [vmem:[%s16947_s11 + $0x7a8] sm:$0xf]  ;;  %v9366_v5 = vor.u32 %v11033_v1, %v9365_v12 }
 0x53b   : > { %v6797_v22 = vadd.f32 %v6796_v38, %v6783_v47  ;;  %v9254_v54 = vor.u32 %v11005_v59, %v9253_v10  ;;  %v9349_v55 = vld [vmem:[%s16947_s11 + $0x568] sm:$0xf]  ;;  %v11029_v11 = vld [vmem:[%s16947_s11 + $0x574] sm:$0xf0] }
 0x53c   : > { %7056 = vmatpush.bf16.msrb.mxu0 %v8950_v20  ;;  %7070 = vmatpush.bf16.msrb.mxu2 %v9078_v19  ;;  %v9653_v20 = vld [vmem:[%s16947_s11 + $0x7c8] sm:$0xf]  ;;  %v11105_v19 = vld [vmem:[%s16947_s11 + $0x7d4] sm:$0xf0]  ;;  %v9350_v37 = vor.u32 %v11029_v11, %v9349_v55 }
 0x53d   : > { %7475 = vst [vmem:[#allocation7 + $0x8] sm:$0xff] %v6797_v22  ;;  %v9654_v29 = vor.u32 %v11105_v19, %v9653_v20  ;;  %v11065_v53 = vld [vmem:[%s16947_s11 + $0x694] sm:$0xf0]  ;;  %v9621_v23 = vld [vmem:[%s16947_s11 + $0x788] sm:$0xf] }
 0x53e   : > { %7030 = vmatpush.bf16.msra.mxu1 %v8662_v25  ;;  %7044 = vmatpush.bf16.msra.mxu3 %v8790_v43  ;;  %v9509_v25 = vld [vmem:[%s16947_s11 + $0x6a8] sm:$0xf]  ;;  %v11069_v43 = vld [vmem:[%s16947_s11 + $0x6b4] sm:$0xf0] }
 0x53f   : > { %v9510_v24 = vor.u32 %v11069_v43, %v9509_v25  ;;  %v11097_v0 = vld [vmem:[%s16947_s11 + $0x794] sm:$0xf0]  ;;  %v9205_v44 = vld [vmem:[%s16947_s11 + $0x448] sm:$0xf] }
 0x540   : > { %7057 = vmatpush.bf16.msrb.mxu0 %v8934_v36  ;;  %7071 = vmatpush.bf16.msrb.mxu2 %v9062_v31  ;;  %v9638_v36 = vor.u32 %v11101_v45, %v9637_v50  ;;  %v9493_v31 = vld [vmem:[%s16947_s11 + $0x688] sm:$0xf]  ;;  %v10993_v27 = vld [vmem:[%s16947_s11 + $0x454] sm:$0xf0] }
 0x541   : > { %7031 = vmatmul.bf16.vlgmr.msra.gmra.mxu1 %v13579_v17  ;;  %7045 = vmatmul.bf16.vlgmr.msra.gmra.mxu3 %v13581_v18  ;;  %v9333_v57 = vld [vmem:[%s16947_s11 + $0x548] sm:$0xf]  ;;  %v11025_v16 = vld [vmem:[%s16947_s11 + $0x554] sm:$0xf0]  ;;  %v9494_v41 = vor.u32 %v11065_v53, %v9493_v31  ;;  %v9206_v59 = vor.u32 %v10993_v27, %v9205_v44 }
 0x542   : > { %7079 = vmatpush.bf16.msrb.mxu1 %v9286_v52  ;;  %7093 = vmatpush.bf16.msrb.mxu3 %v9414_v40  ;;  %v9221_v52 = vld [vmem:[%s16947_s11 + $0x468] sm:$0xf]  ;;  %v10997_v40 = vld [vmem:[%s16947_s11 + $0x474] sm:$0xf0]  ;;  %v9334_v49 = vor.u32 %v11025_v16, %v9333_v57 }
 0x543   : > { %v9222_v28 = vor.u32 %v10997_v40, %v9221_v52  ;;  %v11061_v10 = vld [vmem:[%s16947_s11 + $0x674] sm:$0xf0]  ;;  %v9189_v46 = vld [vmem:[%s16947_s11 + $0x428] sm:$0xf] }
 0x544   : > { %7058 = vmatpush.bf16.msrb.mxu0 %v8918_v42  ;;  %7072 = vmatpush.bf16.msrb.mxu2 %v9046_v30  ;;  %v9605_v42 = vld [vmem:[%s16947_s11 + $0x768] sm:$0xf]  ;;  %v11093_v30 = vld [vmem:[%s16947_s11 + $0x774] sm:$0xf0] }
 0x545   : > { %v10989_v47 = vld [vmem:[%s16947_s11 + $0x434] sm:$0xf0]  ;;  %v9606_v38 = vor.u32 %v11093_v30, %v9605_v42  ;;  %v9461_v61 = vld [vmem:[%s16947_s11 + $0x648] sm:$0xf] }
 0x546   : > { %7080 = vmatpush.bf16.msrb.mxu1 %v9270_v39  ;;  %7094 = vmatpush.bf16.msrb.mxu3 %v9398_v34  ;;  %v9622_v39 = vor.u32 %v11097_v0, %v9621_v23  ;;  %v9477_v34 = vld [vmem:[%s16947_s11 + $0x668] sm:$0xf]  ;;  %v11057_v20 = vld [vmem:[%s16947_s11 + $0x654] sm:$0xf0] }
 0x547   : > { %7059 = vmatmul.bf16.vlgmr.msrb.gmra.mxu0 %v13624_v60  ;;  %7073 = vmatmul.bf16.vlgmr.msrb.gmra.mxu2 %v13626_v33  ;;  %v9478_v21 = vor.u32 %v11061_v10, %v9477_v34  ;;  %v9589_v19 = vld [vmem:[%s16947_s11 + $0x748] sm:$0xf]  ;;  %v11089_v22 = vld [vmem:[%s16947_s11 + $0x754] sm:$0xf0]  ;;  %v9462_v25 = vor.u32 %v11057_v20, %v9461_v61 }
 0x548   : > { %7107 = vmatpush.bf16.msra.mxu0 %v9542_v4  ;;  %7121 = vmatpush.bf16.msra.mxu2 %v9670_v48  ;;  %v9317_v4 = vld [vmem:[%s16947_s11 + $0x528] sm:$0xf]  ;;  %v11021_v48 = vld [vmem:[%s16947_s11 + $0x534] sm:$0xf0]  ;;  %v9590_v43 = vor.u32 %v11089_v22, %v9589_v19 }
 0x549   : > { %v9173_v51 = vld [vmem:[%s16947_s11 + $0x408] sm:$0xf]  ;;  %v10985_v35 = vld [vmem:[%s16947_s11 + $0x414] sm:$0xf0] }
 0x54a   : > { %7081 = vmatpush.bf16.msrb.mxu1 %v9254_v54  ;;  %7095 = vmatpush.bf16.msrb.mxu3 %v9382_v63  ;;  %v9190_v54 = vor.u32 %v10989_v47, %v9189_v46  ;;  %v9318_v63 = vor.u32 %v11021_v48, %v9317_v4  ;;  %v9301_v12 = vld [vmem:[%s16947_s11 + $0x508] sm:$0xf]  ;;  %v11017_v1 = vld [vmem:[%s16947_s11 + $0x514] sm:$0xf0]  ;;  %v9174_v55 = vor.u32 %v10985_v35, %v9173_v51 }
 0x54b   : > { %v9925_v50 = vld [vmem:[%s16947_s11 + $0x9e8] sm:$0xf]  ;;  %v11173_v45 = vld [vmem:[%s16947_s11 + $0x9f4] sm:$0xf0]  ;;  %v9302_v11 = vor.u32 %v11017_v1, %v9301_v12 }
 0x54c   : > { %7108 = vmatpush.bf16.msra.mxu0 %v9526_v32  ;;  %7122 = vmatpush.bf16.msra.mxu2 %v9654_v29  ;;  %v9797_v32 = vld [vmem:[%s16947_s11 + $0x8e8] sm:$0xf]  ;;  %v11141_v29 = vld [vmem:[%s16947_s11 + $0x8f4] sm:$0xf0] }
 0x54d   : > { %v9573_v52 = vld [vmem:[%s16947_s11 + $0x728] sm:$0xf]  ;;  %v11085_v40 = vld [vmem:[%s16947_s11 + $0x734] sm:$0xf0] }
 0x54e   : > { %7082 = vmatpush.bf16.msrb.mxu1 %v9238_v15  ;;  %7096 = vmatpush.bf16.msrb.mxu3 %v9366_v5  ;;  %v9445_v15 = vld [vmem:[%s16947_s11 + $0x628] sm:$0xf]  ;;  %v11053_v5 = vld [vmem:[%s16947_s11 + $0x634] sm:$0xf0] }
 0x54f   : > { %v9781_v31 = vld [vmem:[%s16947_s11 + $0x8c8] sm:$0xf]  ;;  %v11137_v53 = vld [vmem:[%s16947_s11 + $0x8d4] sm:$0xf0]  ;;  %v9446_v0 = vor.u32 %v11053_v5, %v9445_v15 }
 0x550   : > { %7109 = vmatpush.bf16.msra.mxu0 %v9510_v24  ;;  %7123 = vmatpush.bf16.msra.mxu2 %v9638_v36  ;;  %v9798_v24 = vor.u32 %v11141_v29, %v9797_v32  ;;  %v9926_v36 = vor.u32 %v11173_v45, %v9925_v50  ;;  %v9909_v23 = vld [vmem:[%s16947_s11 + $0x9c8] sm:$0xf]  ;;  %v11049_v27 = vld [vmem:[%s16947_s11 + $0x614] sm:$0xf0]  ;;  %v9782_v42 = vor.u32 %v11137_v53, %v9781_v31 }
 0x551   : > { %v9429_v44 = vld [vmem:[%s16947_s11 + $0x608] sm:$0xf]  ;;  %v11081_v16 = vld [vmem:[%s16947_s11 + $0x714] sm:$0xf0] }
 0x552   : > { %7083 = vmatpush.bf16.msrb.mxu1 %v9222_v28  ;;  %7097 = vmatpush.bf16.msrb.mxu3 %v9350_v37  ;;  %v9574_v28 = vor.u32 %v11085_v40, %v9573_v52  ;;  %v11169_v37 = vld [vmem:[%s16947_s11 + $0x9d4] sm:$0xf0]  ;;  %v9557_v57 = vld [vmem:[%s16947_s11 + $0x708] sm:$0xf] }
 0x553   : > { %v10181_v34 = vld [vmem:[%s16947_s11 + $0xbe8] sm:$0xf]  ;;  %v11237_v10 = vld [vmem:[%s16947_s11 + $0xbf4] sm:$0xf0]  ;;  %v9910_v30 = vor.u32 %v11169_v37, %v9909_v23  ;;  %v9558_v46 = vor.u32 %v11081_v16, %v9557_v57 }
 0x554   : > { %7110 = vmatpush.bf16.msra.mxu0 %v9494_v41  ;;  %7124 = vmatpush.bf16.msra.mxu2 %v9622_v39  ;;  %v10053_v41 = vld [vmem:[%s16947_s11 + $0xae8] sm:$0xf]  ;;  %v11205_v39 = vld [vmem:[%s16947_s11 + $0xaf4] sm:$0xf0] }
 0x555   : > { %v11133_v47 = vld [vmem:[%s16947_s11 + $0x8b4] sm:$0xf0]  ;;  %v9893_v4 = vld [vmem:[%s16947_s11 + $0x9a8] sm:$0xf] }
 0x556   : > { %7084 = vmatpush.bf16.msrb.mxu1 %v9206_v59  ;;  %7098 = vmatpush.bf16.msrb.mxu3 %v9334_v49  ;;  %v9765_v59 = vld [vmem:[%s16947_s11 + $0x8a8] sm:$0xf]  ;;  %v9430_v49 = vor.u32 %v11049_v27, %v9429_v44  ;;  %v11165_v48 = vld [vmem:[%s16947_s11 + $0x9b4] sm:$0xf0] }
 0x557   : > { %v10037_v61 = vld [vmem:[%s16947_s11 + $0xac8] sm:$0xf]  ;;  %v11201_v20 = vld [vmem:[%s16947_s11 + $0xad4] sm:$0xf0] }
 0x558   : > { %7111 = vmatpush.bf16.msra.mxu0 %v9478_v21  ;;  %7125 = vmatpush.bf16.msra.mxu2 %v9606_v38  ;;  %v10054_v21 = vor.u32 %v11205_v39, %v10053_v41  ;;  %v10182_v38 = vor.u32 %v11237_v10, %v10181_v34  ;;  %v10165_v19 = vld [vmem:[%s16947_s11 + $0xbc8] sm:$0xf]  ;;  %v11233_v22 = vld [vmem:[%s16947_s11 + $0xbd4] sm:$0xf0]  ;;  %v10038_v32 = vor.u32 %v11201_v20, %v10037_v61 }
 0x559   : > { %v9749_v51 = vld [vmem:[%s16947_s11 + $0x888] sm:$0xf]  ;;  %v11129_v35 = vld [vmem:[%s16947_s11 + $0x894] sm:$0xf0]  ;;  %v10166_v29 = vor.u32 %v11233_v22, %v10165_v19 }
 0x55a   : > { %7085 = vmatpush.bf16.msrb.mxu1 %v9190_v54  ;;  %7099 = vmatpush.bf16.msrb.mxu3 %v9318_v63  ;;  %v9766_v54 = vor.u32 %v11133_v47, %v9765_v59  ;;  %v9894_v63 = vor.u32 %v11165_v48, %v9893_v4  ;;  %v9877_v12 = vld [vmem:[%s16947_s11 + $0x988] sm:$0xf]  ;;  %v11161_v1 = vld [vmem:[%s16947_s11 + $0x994] sm:$0xf0]  ;;  %v9750_v15 = vor.u32 %v11129_v35, %v9749_v51  ;;  %v15372_v59 = vpop.f32.mrf.mxu1 }
 0x55b   : > { %v10149_v50 = vld [vmem:[%s16947_s11 + $0xba8] sm:$0xf]  ;;  %v11229_v45 = vld [vmem:[%s16947_s11 + $0xbb4] sm:$0xf0]  ;;  %v9878_v5 = vor.u32 %v11161_v1, %v9877_v12 }
 0x55c   : > { %7112 = vmatpush.bf16.msra.mxu0 %v9462_v25  ;;  %7126 = vmatpush.bf16.msra.mxu2 %v9590_v43  ;;  %v10021_v25 = vld [vmem:[%s16947_s11 + $0xaa8] sm:$0xf]  ;;  %v11197_v43 = vld [vmem:[%s16947_s11 + $0xab4] sm:$0xf0] }
 0x55d   : > { %v9733_v52 = vld [vmem:[%s16947_s11 + $0x868] sm:$0xf]  ;;  %v11125_v40 = vld [vmem:[%s16947_s11 + $0x874] sm:$0xf0] }
 0x55e   : > { %7086 = vmatpush.bf16.msrb.mxu1 %v9174_v55  ;;  %7100 = vmatpush.bf16.msrb.mxu3 %v9302_v11  ;;  %v9861_v55 = vld [vmem:[%s16947_s11 + $0x968] sm:$0xf]  ;;  %v11157_v11 = vld [vmem:[%s16947_s11 + $0x974] sm:$0xf0] }
 0x55f   : > { %v10005_v31 = vld [vmem:[%s16947_s11 + $0xa88] sm:$0xf]  ;;  %v11193_v53 = vld [vmem:[%s16947_s11 + $0xa94] sm:$0xf0]  ;;  %v9862_v37 = vor.u32 %v11157_v11, %v9861_v55 }
 0x560   : > { %7113 = vmatpush.bf16.msra.mxu0 %v9446_v0  ;;  %7127 = vmatpush.bf16.msra.mxu2 %v9574_v28  ;;  %v10133_v23 = vld [vmem:[%s16947_s11 + $0xb88] sm:$0xf]  ;;  %v11225_v0 = vld [vmem:[%s16947_s11 + $0xb94] sm:$0xf0]  ;;  %v9734_v28 = vor.u32 %v11125_v40, %v9733_v52  ;;  %v10006_v41 = vor.u32 %v11193_v53, %v10005_v31 }
 0x561   : > { %7087 = vmatmul.bf16.vlgmr.msrb.gmra.mxu1 %v13695_v8  ;;  %7101 = vmatmul.bf16.vlgmr.msrb.gmra.mxu3 %v13697_v56  ;;  %v9717_v44 = vld [vmem:[%s16947_s11 + $0x848] sm:$0xf]  ;;  %v11121_v27 = vld [vmem:[%s16947_s11 + $0x854] sm:$0xf0]  ;;  %v10134_v39 = vor.u32 %v11225_v0, %v10133_v23 }
 0x562   : > { %7135 = vmatpush.bf16.msra.mxu1 %v9798_v24  ;;  %7149 = vmatpush.bf16.msra.mxu3 %v9926_v36  ;;  %v10022_v24 = vor.u32 %v11197_v43, %v10021_v25  ;;  %v10150_v36 = vor.u32 %v11229_v45, %v10149_v50  ;;  %v9845_v57 = vld [vmem:[%s16947_s11 + $0x948] sm:$0xf]  ;;  %v11153_v16 = vld [vmem:[%s16947_s11 + $0x954] sm:$0xf0]  ;;  %v15418_v50 = vpop.f32.mrf.mxu0 }
 0x563   : > { %v9989_v34 = vld [vmem:[%s16947_s11 + $0xa68] sm:$0xf]  ;;  %v11189_v10 = vld [vmem:[%s16947_s11 + $0xa74] sm:$0xf0] }
 0x564   : > { %7114 = vmatpush.bf16.msra.mxu0 %v9430_v49  ;;  %7128 = vmatpush.bf16.msra.mxu2 %v9558_v46  ;;  %v9718_v49 = vor.u32 %v11121_v27, %v9717_v44  ;;  %v9846_v46 = vor.u32 %v11153_v16, %v9845_v57  ;;  %v9701_v47 = vld [vmem:[%s16947_s11 + $0x828] sm:$0xf]  ;;  %v11117_v4 = vld [vmem:[%s16947_s11 + $0x834] sm:$0xf0]  ;;  %v15447_v44 = vpop.f32.mrf.mxu1 }
 0x565   : > { %v9829_v48 = vld [vmem:[%s16947_s11 + $0x928] sm:$0xf]  ;;  %v11185_v19 = vld [vmem:[%s16947_s11 + $0xa54] sm:$0xf0] }
 0x566   : > { %7136 = vmatpush.bf16.msra.mxu1 %v9782_v42  ;;  %7150 = vmatpush.bf16.msra.mxu3 %v9910_v30  ;;  %v10117_v42 = vld [vmem:[%s16947_s11 + $0xb68] sm:$0xf]  ;;  %v11221_v30 = vld [vmem:[%s16947_s11 + $0xb74] sm:$0xf0] }
 0x567   : > { %7115 = vmatmul.bf16.vlgmr.msra.gmra.mxu0 %v13737_v14  ;;  %7129 = vmatmul.bf16.vlgmr.msra.gmra.mxu2 %v13739_v3  ;;  %v10118_v61 = vor.u32 %v11221_v30, %v10117_v42  ;;  %v9973_v20 = vld [vmem:[%s16947_s11 + $0xa48] sm:$0xf]  ;;  %v11113_v12 = vld [vmem:[%s16947_s11 + $0x814] sm:$0xf0]  ;;  %v15467_v30 = vpop.f32.mrf.mxu2 }
 0x568   : > { %7163 = vmatpush.bf16.msrb.mxu0 %v10054_v21  ;;  %7177 = vmatpush.bf16.msrb.mxu2 %v10182_v38  ;;  %v11149_v21 = vld [vmem:[%s16947_s11 + $0x934] sm:$0xf0]  ;;  %v9990_v38 = vor.u32 %v11189_v10, %v9989_v34  ;;  %v10101_v22 = vld [vmem:[%s16947_s11 + $0xb48] sm:$0xf]  ;;  %v9974_v45 = vor.u32 %v11185_v19, %v9973_v20 }
 0x569   : > { %v9830_v51 = vor.u32 %v11149_v21, %v9829_v48  ;;  %v9685_v35 = vld [vmem:[%s16947_s11 + $0x808] sm:$0xf]  ;;  %v11269_v43 = vld [vmem:[%s16947_s11 + $0xcf4] sm:$0xf0] }
 0x56a   : > { %7137 = vmatpush.bf16.msra.mxu1 %v9766_v54  ;;  %7151 = vmatpush.bf16.msra.mxu3 %v9894_v63  ;;  %v11217_v54 = vld [vmem:[%s16947_s11 + $0xb54] sm:$0xf0]  ;;  %v9702_v63 = vor.u32 %v11117_v4, %v9701_v47  ;;  %v9813_v1 = vld [vmem:[%s16947_s11 + $0x908] sm:$0xf] }
 0x56b   : > { %v10309_v25 = vld [vmem:[%s16947_s11 + $0xce8] sm:$0xf]  ;;  %v11301_v52 = vld [vmem:[%s16947_s11 + $0xdf4] sm:$0xf0] }
 0x56c   : > { %7164 = vmatpush.bf16.msrb.mxu0 %v10038_v32  ;;  %7178 = vmatpush.bf16.msrb.mxu2 %v10166_v29  ;;  %v15407_v32 = vpop.f32.mrf.mxu3  ;;  %v11145_v29 = vld [vmem:[%s16947_s11 + $0x914] sm:$0xf0]  ;;  %v9957_v40 = vld [vmem:[%s16947_s11 + $0xa28] sm:$0xf]  ;;  %v10310_v53 = vor.u32 %v11269_v43, %v10309_v25 }
 0x56d   : > { %v11181_v55 = vld [vmem:[%s16947_s11 + $0xa34] sm:$0xf0]  ;;  %v10085_v11 = vld [vmem:[%s16947_s11 + $0xb28] sm:$0xf]  ;;  %v9814_v31 = vor.u32 %v11145_v29, %v9813_v1 }
 0x56e   : > { %7138 = vmatpush.bf16.msra.mxu1 %v9750_v15  ;;  %7152 = vmatpush.bf16.msra.mxu3 %v9878_v5  ;;  %v10102_v15 = vor.u32 %v11217_v54, %v10101_v22  ;;  %v10437_v5 = vld [vmem:[%s16947_s11 + $0xde8] sm:$0xf]  ;;  %v9958_v27 = vor.u32 %v11181_v55, %v9957_v40  ;;  %v11297_v16 = vld [vmem:[%s16947_s11 + $0xdd4] sm:$0xf0] }
 0x56f   : > { %v10438_v23 = vor.u32 %v11301_v52, %v10437_v5  ;;  %v10293_v0 = vld [vmem:[%s16947_s11 + $0xcc8] sm:$0xf]  ;;  %v11209_v10 = vld [vmem:[%s16947_s11 + $0xb14] sm:$0xf0]  ;;  %v15511_v5 = vpop.f32.mrf.mxu1 }
 0x570   : > { %7165 = vmatpush.bf16.msrb.mxu0 %v10022_v24  ;;  %7179 = vmatpush.bf16.msrb.mxu2 %v10150_v36  ;;  %v11213_v24 = vld [vmem:[%s16947_s11 + $0xb34] sm:$0xf0]  ;;  %v9686_v36 = vor.u32 %v11113_v12, %v9685_v35  ;;  %v10069_v34 = vld [vmem:[%s16947_s11 + $0xb08] sm:$0xf]  ;;  %v15497_v12 = vpop.f32.mrf.mxu0 }
 0x571   : > { %v10086_v57 = vor.u32 %v11213_v24, %v10085_v11  ;;  %v10565_v42 = vld [vmem:[%s16947_s11 + $0xee8] sm:$0xf]  ;;  %v11365_v47 = vld [vmem:[%s16947_s11 + $0xff4] sm:$0xf0] }
 0x572   : > { %7139 = vmatpush.bf16.msra.mxu1 %v9734_v28  ;;  %7153 = vmatpush.bf16.msra.mxu3 %v9862_v37  ;;  %v11265_v28 = vld [vmem:[%s16947_s11 + $0xcd4] sm:$0xf0]  ;;  %v10421_v37 = vld [vmem:[%s16947_s11 + $0xdc8] sm:$0xf] }
 0x573   : > { %v10294_v4 = vor.u32 %v11265_v28, %v10293_v0  ;;  %v10422_v48 = vor.u32 %v11297_v16, %v10421_v37  ;;  %v10277_v21 = vld [vmem:[%s16947_s11 + $0xca8] sm:$0xf]  ;;  %v11261_v20 = vld [vmem:[%s16947_s11 + $0xcb4] sm:$0xf0] }
 0x574   : > { %7166 = vmatpush.bf16.msrb.mxu0 %v10006_v41  ;;  %7180 = vmatpush.bf16.msrb.mxu2 %v10134_v39  ;;  %v9941_v41 = vld [vmem:[%s16947_s11 + $0xa08] sm:$0xf]  ;;  %v11177_v39 = vld [vmem:[%s16947_s11 + $0xa14] sm:$0xf0]  ;;  %v15490_v54 = vpop.f32.mrf.mxu3  ;;  %v10278_v43 = vor.u32 %v11261_v20, %v10277_v21 }
 0x575   : > { %v10405_v19 = vld [vmem:[%s16947_s11 + $0xda8] sm:$0xf]  ;;  %v11293_v22 = vld [vmem:[%s16947_s11 + $0xdb4] sm:$0xf0] }
 0x576   : > { %7140 = vmatpush.bf16.msra.mxu1 %v9718_v49  ;;  %7154 = vmatpush.bf16.msra.mxu3 %v9846_v46  ;;  %v11333_v49 = vld [vmem:[%s16947_s11 + $0xef4] sm:$0xf0]  ;;  %v10693_v46 = vld [vmem:[%s16947_s11 + $0xfe8] sm:$0xf] }
 0x577   : > { %v10549_v35 = vld [vmem:[%s16947_s11 + $0xec8] sm:$0xf]  ;;  %v11329_v1 = vld [vmem:[%s16947_s11 + $0xed4] sm:$0xf0] }
 0x578   : > { %7167 = vmatpush.bf16.msrb.mxu0 %v9990_v38  ;;  %7181 = vmatpush.bf16.msrb.mxu2 %v10118_v61  ;;  %v9942_v38 = vor.u32 %v11177_v39, %v9941_v41  ;;  %v10070_v61 = vor.u32 %v11209_v10, %v10069_v34  ;;  %v10677_v29 = vld [vmem:[%s16947_s11 + $0xfc8] sm:$0xf]  ;;  %v11361_v25 = vld [vmem:[%s16947_s11 + $0xfd4] sm:$0xf0]  ;;  %v10550_v11 = vor.u32 %v11329_v1, %v10549_v35 }
 0x579   : > { %v11257_v52 = vld [vmem:[%s16947_s11 + $0xc94] sm:$0xf0]  ;;  %v10389_v40 = vld [vmem:[%s16947_s11 + $0xd88] sm:$0xf]  ;;  %v10678_v24 = vor.u32 %v11361_v25, %v10677_v29  ;;  %v15584_v29 = vpop.f32.mrf.mxu1 }
 0x57a   : > { %7141 = vmatpush.bf16.msra.mxu1 %v9702_v63  ;;  %7155 = vmatpush.bf16.msra.mxu3 %v9830_v51  ;;  %v10566_v63 = vor.u32 %v11333_v49, %v10565_v42  ;;  %v10694_v51 = vor.u32 %v11365_v47, %v10693_v46  ;;  %v11289_v55 = vld [vmem:[%s16947_s11 + $0xd94] sm:$0xf0]  ;;  %v10245_v37 = vld [vmem:[%s16947_s11 + $0xc68] sm:$0xf]  ;;  %v15555_v49 = vpop.f32.mrf.mxu0 }
 0x57b   : > { %v10390_v28 = vor.u32 %v11289_v55, %v10389_v40  ;;  %v10373_v16 = vld [vmem:[%s16947_s11 + $0xd68] sm:$0xf]  ;;  %v11285_v41 = vld [vmem:[%s16947_s11 + $0xd74] sm:$0xf0] }
 0x57c   : > { %7168 = vmatpush.bf16.msrb.mxu0 %v9974_v45  ;;  %7182 = vmatpush.bf16.msrb.mxu2 %v10102_v15  ;;  %v10406_v45 = vor.u32 %v11293_v22, %v10405_v19  ;;  %v10261_v15 = vld [vmem:[%s16947_s11 + $0xc88] sm:$0xf]  ;;  %v15550_v39 = vpop.f32.mrf.mxu3  ;;  %v11321_v46 = vld [vmem:[%s16947_s11 + $0xe94] sm:$0xf0] }
 0x57d   : > { %v10262_v0 = vor.u32 %v11257_v52, %v10261_v15  ;;  %v10517_v42 = vld [vmem:[%s16947_s11 + $0xe88] sm:$0xf]  ;;  %v11249_v19 = vld [vmem:[%s16947_s11 + $0xc54] sm:$0xf0] }
 0x57e   : > { %7142 = vmatpush.bf16.msra.mxu1 %v9686_v36  ;;  %7156 = vmatpush.bf16.msra.mxu3 %v9814_v31  ;;  %v10533_v36 = vld [vmem:[%s16947_s11 + $0xea8] sm:$0xf]  ;;  %v11325_v31 = vld [vmem:[%s16947_s11 + $0xeb4] sm:$0xf0] }
 0x57f   : > { %v10534_v34 = vor.u32 %v11325_v31, %v10533_v36  ;;  %v10645_v47 = vld [vmem:[%s16947_s11 + $0xf88] sm:$0xf]  ;;  %v11317_v25 = vld [vmem:[%s16947_s11 + $0xe74] sm:$0xf0] }
 0x580   : > { %7169 = vmatpush.bf16.msrb.mxu0 %v9958_v27  ;;  %7183 = vmatpush.bf16.msrb.mxu2 %v10086_v57  ;;  %v15537_v27 = vpop.f32.mrf.mxu2  ;;  %v11253_v57 = vld [vmem:[%s16947_s11 + $0xc74] sm:$0xf0]  ;;  %v10229_v20 = vld [vmem:[%s16947_s11 + $0xc48] sm:$0xf] }
 0x581   : > { %7143 = vmatmul.bf16.vlgmr.msra.gmra.mxu1 %v13815_v58  ;;  %7157 = vmatmul.bf16.vlgmr.msra.gmra.mxu3 %v13826_v9  ;;  %v10357_v22 = vld [vmem:[%s16947_s11 + $0xd48] sm:$0xf]  ;;  %v10230_v52 = vor.u32 %v11249_v19, %v10229_v20  ;;  %v10915_v19 = vld [vmem:[%s16947_s11 + $0x1ec] sm:$0xf] }
 0x582   : > { %7191 = vmatpush.bf16.msrb.mxu1 %v10310_v53  ;;  %7205 = vmatpush.bf16.msrb.mxu3 %v10438_v23  ;;  %v10661_v53 = vld [vmem:[%s16947_s11 + $0xfa8] sm:$0xf]  ;;  %v11357_v23 = vld [vmem:[%s16947_s11 + $0xfb4] sm:$0xf0] }
 0x583   : > { %v10662_v10 = vor.u32 %v11357_v23, %v10661_v53  ;;  %v10501_v1 = vld [vmem:[%s16947_s11 + $0xe68] sm:$0xf] }
 0x584   : > { %7170 = vmatpush.bf16.msrb.mxu0 %v9942_v38  ;;  %7184 = vmatpush.bf16.msrb.mxu2 %v10070_v61  ;;  %v10246_v38 = vor.u32 %v11253_v57, %v10245_v37  ;;  %v10374_v61 = vor.u32 %v11285_v41, %v10373_v16  ;;  %v10213_v55 = vld [vmem:[%s16947_s11 + $0xc28] sm:$0xf]  ;;  %v10502_v53 = vor.u32 %v11317_v25, %v10501_v1  ;;  %v15623_v57 = vpop.f32.mrf.mxu3  ;;  %v11341_v25 = vld [vmem:[%s16947_s11 + $0xf34] sm:$0xf0] }
 0x585   : > { %v10341_v36 = vld [vmem:[%s16947_s11 + $0xd28] sm:$0xf] }
 0x586   : > { %7192 = vmatpush.bf16.msrb.mxu1 %v10294_v4  ;;  %7206 = vmatpush.bf16.msrb.mxu3 %v10422_v48  ;;  %v11353_v4 = vld [vmem:[%s16947_s11 + $0xf94] sm:$0xf0]  ;;  %v11419_v48 = vld [vmem:[%s16948_s12] sm:$0xf]  ;;  %v10613_v37 = vld [vmem:[%s16947_s11 + $0xf48] sm:$0xf] }
 0x587   : > { %7171 = vmatmul.bf16.vlgmr.msrb.gmra.mxu0 %v13869_v26  ;;  %7185 = vmatmul.bf16.vlgmr.msrb.gmra.mxu2 %v13871_v13  ;;  %v3928_v21 = vperm.slane %v11419_v48, 1  ;;  %v10646_v35 = vor.u32 %v11353_v4, %v10645_v47  ;;  %v11273_v47 = vld [vmem:[%s16947_s11 + $0xd14] sm:$0xf0]  ;;  %v10883_v4 = vld [vmem:[%s16947_s11 + $0xec] sm:$0xf] }
 0x588   : > { %7219 = vmatpush.bf16.msra.mxu0 %v10566_v63  ;;  %7233 = vmatpush.bf16.msra.mxu2 %v10694_v51  ;;  %v11281_v63 = vld [vmem:[%s16947_s11 + $0xd54] sm:$0xf0]  ;;  %v10518_v51 = vor.u32 %v11321_v46, %v10517_v42  ;;  %v10325_v42 = vld [vmem:[%s16947_s11 + $0xd08] sm:$0xf]  ;;  %v15634_v46 = vpop.f32.mrf.mxu0  ;;  %v8775_v48 = vld [vmem:[%s16947_s11 + $0xf8] sm:$0xf0] }
 0x589   : > { %v6809_v15 = vadd.f32 %v15372_v59, %v3928_v21  ;;  %v10358_v40 = vor.u32 %v11281_v63, %v10357_v22  ;;  %v11277_v59 = vld [vmem:[%s16947_s11 + $0xd34] sm:$0xf0]  ;;  %v8903_v22 = vld [vmem:[%s16947_s11 + $0x1f8] sm:$0xf0]  ;;  %v10469_v63 = vld [vmem:[%s16947_s11 + $0xe28] sm:$0xf] }
 0x58a   : > { %7193 = vmatpush.bf16.msrb.mxu1 %v10278_v43  ;;  %7207 = vmatpush.bf16.msrb.mxu3 %v10406_v45  ;;  %v10629_v43 = vld [vmem:[%s16947_s11 + $0xf68] sm:$0xf]  ;;  %v11349_v45 = vld [vmem:[%s16947_s11 + $0xf74] sm:$0xf0]  ;;  %v10342_v41 = vor.u32 %v11277_v59, %v10341_v36  ;;  %v8887_v59 = vld [vmem:[%s16947_s11 + $0x1d8] sm:$0xf0] }
 0x58b   : > { %v6823_v31 = vadd.f32 %v15407_v32, %v6809_v15  ;;  %v10630_v23 = vor.u32 %v11349_v45, %v10629_v43  ;;  %v11345_v32 = vld [vmem:[%s16947_s11 + $0xf54] sm:$0xf0]  ;;  %v10597_v1 = vld [vmem:[%s16947_s11 + $0xf28] sm:$0xf]  ;;  %v8778_v15 = vor.u32 %v10883_v4, %v8775_v48 }
 0x58c   : > { %7220 = vmatpush.bf16.msra.mxu0 %v10550_v11  ;;  %7234 = vmatpush.bf16.msra.mxu2 %v10678_v24  ;;  %v15599_v11 = vpop.f32.mrf.mxu2  ;;  %v11245_v24 = vld [vmem:[%s16947_s11 + $0xc34] sm:$0xf0]  ;;  %v10614_v20 = vor.u32 %v11345_v32, %v10613_v37  ;;  %v6934_v32 = vpop.f32.mrf.mxu3 }
 0x58d   : > { %v10214_v16 = vor.u32 %v11245_v24, %v10213_v55  ;;  %v8759_v55 = vld [vmem:[%s16947_s11 + $0xd8] sm:$0xf0] }
 0x58e   : > { %7194 = vmatpush.bf16.msrb.mxu1 %v10262_v0  ;;  %7208 = vmatpush.bf16.msrb.mxu3 %v10390_v28  ;;  %v10485_v0 = vld [vmem:[%s16947_s11 + $0xe48] sm:$0xf]  ;;  %v11313_v28 = vld [vmem:[%s16947_s11 + $0xe54] sm:$0xf0] }
 0x590   : > { %7221 = vmatpush.bf16.msra.mxu0 %v10534_v34  ;;  %7235 = vmatpush.bf16.msra.mxu2 %v10662_v10  ;;  %v10197_v34 = vld [vmem:[%s16947_s11 + $0xc08] sm:$0xf]  ;;  %v11241_v10 = vld [vmem:[%s16947_s11 + $0xc14] sm:$0xf0] }
 0x591   : > { %v10198_v45 = vor.u32 %v11241_v10, %v10197_v34  ;;  %v9159_v34 = vld [vmem:[%s16947_s11 + $0x3f8] sm:$0xf0]  ;;  %v15709_v10 = vpop.f32.mrf.mxu0 }
 0x592   : > { %7195 = vmatpush.bf16.msrb.mxu1 %v10246_v38  ;;  %7209 = vmatpush.bf16.msrb.mxu3 %v10374_v61  ;;  %v6837_v38 = vadd.f32 %v15418_v50, %v6823_v31  ;;  %v10486_v61 = vor.u32 %v11313_v28, %v10485_v0  ;;  %v11309_v50 = vld [vmem:[%s16947_s11 + $0xe34] sm:$0xf0]  ;;  %v10453_v31 = vld [vmem:[%s16947_s11 + $0xe08] sm:$0xf]  ;;  %v10947_v28 = vld [vmem:[%s16947_s11 + $0x2ec] sm:$0xf] }
 0x593   : > { %v10470_v36 = vor.u32 %v11309_v50, %v10469_v63  ;;  %v11337_v0 = vld [vmem:[%s16947_s11 + $0xf14] sm:$0xf0]  ;;  %v10943_v63 = vld [vmem:[%s16947_s11 + $0x2cc] sm:$0xf] }
 0x594   : > { %7222 = vmatpush.bf16.msra.mxu0 %v10518_v51  ;;  %7236 = vmatpush.bf16.msra.mxu2 %v10646_v35  ;;  %v6811_v51 = vadd.f32 %v15447_v44, %v3928_v21  ;;  %v15656_v35 = vpop.f32.mrf.mxu1  ;;  %v6851_v43 = vadd.f32 %v15467_v30, %v6837_v38  ;;  %v10326_v44 = vor.u32 %v11273_v47, %v10325_v42  ;;  %v10911_v30 = vld [vmem:[%s16947_s11 + $0x1cc] sm:$0xf] }
 0x595   : > { %v8890_v42 = vor.u32 %v10911_v30, %v8887_v59  ;;  %v10875_v47 = vld [vmem:[%s16947_s11 + $0xac] sm:$0xf]  ;;  %v8999_v59 = vld [vmem:[%s16947_s11 + $0x2b8] sm:$0xf0] }
 0x596   : > { %7196 = vmatpush.bf16.msrb.mxu1 %v10230_v52  ;;  %7210 = vmatpush.bf16.msrb.mxu3 %v10358_v40  ;;  %v6825_v21 = vadd.f32 %v15490_v54, %v6811_v51  ;;  %v8906_v52 = vor.u32 %v10915_v19, %v8903_v22  ;;  %v10879_v40 = vld [vmem:[%s16947_s11 + $0xcc] sm:$0xf]  ;;  %v6865_v24 = vadd.f32 %v15511_v5, %v6851_v43  ;;  %v10581_v5 = vld [vmem:[%s16947_s11 + $0xf08] sm:$0xf]  ;;  %v8871_v19 = vld [vmem:[%s16947_s11 + $0x1b8] sm:$0xf0] }
 0x597   : > { %v10598_v54 = vor.u32 %v11341_v25, %v10597_v1  ;;  %v10582_v38 = vor.u32 %v11337_v0, %v10581_v5  ;;  %v9015_v1 = vld [vmem:[%s16947_s11 + $0x2d8] sm:$0xf0]  ;;  %v10975_v25 = vld [vmem:[%s16947_s11 + $0x3cc] sm:$0xf] }
 0x598   : > { %7223 = vmatpush.bf16.msra.mxu0 %v10502_v53  ;;  %7237 = vmatpush.bf16.msra.mxu2 %v10630_v23  ;;  %v11305_v53 = vld [vmem:[%s16947_s11 + $0xe14] sm:$0xf0]  ;;  %v15688_v23 = vpop.f32.mrf.mxu2  ;;  %v6879_v37 = vadd.f32 %v15550_v39, %v6865_v24  ;;  %v8762_v39 = vor.u32 %v10879_v40, %v8759_v55  ;;  %v6839_v4 = vadd.f32 %v15497_v12, %v6825_v21  ;;  %v9143_v43 = vld [vmem:[%s16947_s11 + $0x3d8] sm:$0xf0]  ;;  %v10903_v40 = vld [vmem:[%s16947_s11 + $0x18c] sm:$0xf] }
 0x599   : > { %v10454_v48 = vor.u32 %v11305_v53, %v10453_v31  ;;  %v8855_v55 = vld [vmem:[%s16947_s11 + $0x198] sm:$0xf0]  ;;  %v9146_v24 = vor.u32 %v10975_v25, %v9143_v43  ;;  %v10971_v31 = vld [vmem:[%s16947_s11 + $0x3ac] sm:$0xf] }
 0x59a   : > { %7197 = vmatpush.bf16.msrb.mxu1 %v10214_v16  ;;  %7211 = vmatpush.bf16.msrb.mxu3 %v10342_v41  ;;  %v9031_v16 = vld [vmem:[%s16947_s11 + $0x2f8] sm:$0xf0]  ;;  %v10979_v41 = vld [vmem:[%s16947_s11 + $0x3ec] sm:$0xf]  ;;  %v6853_v51 = vadd.f32 %v15537_v27, %v6839_v4  ;;  %v6893_v50 = vadd.f32 %v15555_v49, %v6879_v37  ;;  %v8858_v0 = vor.u32 %v10903_v40, %v8855_v55 }
 0x59b   : > { %v9034_v12 = vor.u32 %v10947_v28, %v9031_v16  ;;  %v9162_v22 = vor.u32 %v10979_v41, %v9159_v34  ;;  %v10871_v27 = vld [vmem:[%s16947_s11 + $0x8c] sm:$0xf]  ;;  %v9127_v53 = vld [vmem:[%s16947_s11 + $0x3b8] sm:$0xf0]  ;;  %v6936_v28 = vpop.f32.mrf.mxu3  ;;  %v6950_v34 = vpop.f32.mrf.mxu0 }
 0x59c   : > { %7224 = vmatpush.bf16.msra.mxu0 %v10486_v61  ;;  %7238 = vmatpush.bf16.msra.mxu2 %v10614_v20  ;;  %v8743_v61 = vld [vmem:[%s16947_s11 + $0xb8] sm:$0xf0]  ;;  %v10907_v20 = vld [vmem:[%s16947_s11 + $0x1ac] sm:$0xf]  ;;  %v6867_v49 = vadd.f32 %v15584_v29, %v6853_v51  ;;  %v9018_v29 = vor.u32 %v10943_v63, %v9015_v1 }
 0x59d   : > { %v8874_v21 = vor.u32 %v10907_v20, %v8871_v19  ;;  %v8711_v37 = vld [vmem:[%s16947_s11 + $0x78] sm:$0xf0]  ;;  %v10899_v16 = vld [vmem:[%s16947_s11 + $0x16c] sm:$0xf] }
 0x59e   : > { %7198 = vmatpush.bf16.msrb.mxu1 %v10198_v45  ;;  %7212 = vmatpush.bf16.msrb.mxu3 %v10326_v44  ;;  %v6922_v45 = vpop.f32.mrf.mxu1  ;;  %v8746_v44 = vor.u32 %v10875_v47, %v8743_v61  ;;  %v8839_v41 = vld [vmem:[%s16947_s11 + $0x178] sm:$0xf0]  ;;  %v10895_v51 = vld [vmem:[%s16947_s11 + $0x14c] sm:$0xf] }
 0x59f   : > { %v8983_v4 = vld [vmem:[%s16947_s11 + $0x298] sm:$0xf0]  ;;  %v8842_v19 = vor.u32 %v10899_v16, %v8839_v41  ;;  %v10887_v41 = vld [vmem:[%s16947_s11 + $0x10c] sm:$0xf] }
 0x5a0   : > { %7225 = vmatpush.bf16.msra.mxu0 %v10470_v36  ;;  %7239 = vmatpush.bf16.msra.mxu2 %v10598_v54  ;;  %v6962_v30 = vpop.f32.mrf.mxu2  ;;  %v6881_v36 = vadd.f32 %v15623_v57, %v6867_v49  ;;  %v10867_v57 = vld [vmem:[%s16947_s11 + $0x6c] sm:$0xf]  ;;  %v8695_v63 = vld [vmem:[%s16947_s11 + $0x58] sm:$0xf0] }
 0x5a1   : > { %7199 = vmatmul.bf16.vlgmr.msrb.gmra.mxu1 %v14019_v6  ;;  %7213 = vmatmul.bf16.vlgmr.msrb.gmra.mxu3 %v14030_v7  ;;  %v8714_v20 = vor.u32 %v10867_v57, %v8711_v37  ;;  %v9079_v57 = vld [vmem:[%s16947_s11 + $0x358] sm:$0xf0]  ;;  %v10855_v37 = vld [vmem:[%s16947_s11 + $0xc] sm:$0xf] }
 0x5a2   : > { %7247 = vmatpush.bf16.msra.mxu1 %v8778_v15  ;;  %7261 = vmatpush.bf16.msra.mxu3 %v8906_v52  ;;  %v6907_v15 = vadd.f32 %v15599_v11, %v6893_v50  ;;  %v8727_v52 = vld [vmem:[%s16947_s11 + $0x98] sm:$0xf0]  ;;  %v10939_v11 = vld [vmem:[%s16947_s11 + $0x2ac] sm:$0xf]  ;;  %v6895_v47 = vadd.f32 %v15634_v46, %v6881_v36 }
 0x5a3   : > { %v8730_v5 = vor.u32 %v10871_v27, %v8727_v52  ;;  %v10863_v46 = vld [vmem:[%s16947_s11 + $0x4c] sm:$0xf]  ;;  %v8823_v50 = vld [vmem:[%s16947_s11 + $0x158] sm:$0xf0] }
 0x5a4   : > { %7226 = vmatpush.bf16.msra.mxu0 %v10454_v48  ;;  %7240 = vmatpush.bf16.msra.mxu2 %v10582_v38  ;;  %v6921_v54 = vadd.f32 %v15656_v35, %v6907_v15  ;;  %v10967_v48 = vld [vmem:[%s16947_s11 + $0x38c] sm:$0xf]  ;;  %v9111_v38 = vld [vmem:[%s16947_s11 + $0x398] sm:$0xf0]  ;;  %v8698_v15 = vor.u32 %v10863_v46, %v8695_v63  ;;  %v8826_v52 = vor.u32 %v10895_v51, %v8823_v50  ;;  %v7004_v36 = vpop.f32.mrf.mxu0 }
 0x5a5   : > { %v9114_v25 = vor.u32 %v10967_v48, %v9111_v38  ;;  %v9095_v27 = vld [vmem:[%s16947_s11 + $0x378] sm:$0xf0] }
 0x5a6   : > { %7248 = vmatpush.bf16.msra.mxu1 %v8762_v39  ;;  %7262 = vmatpush.bf16.msra.mxu3 %v8890_v42  ;;  %v6935_v35 = vadd.f32 %v6934_v32, %v6921_v54  ;;  %v9002_v32 = vor.u32 %v10939_v11, %v8999_v59  ;;  %v9130_v39 = vor.u32 %v10971_v31, %v9127_v53  ;;  %v10935_v42 = vld [vmem:[%s16947_s11 + $0x28c] sm:$0xf]  ;;  %v6976_v61 = vpop.f32.mrf.mxu1  ;;  %v8807_v11 = vld [vmem:[%s16947_s11 + $0x138] sm:$0xf0] }
 0x5a7   : > { %7227 = vmatmul.bf16.vlgmr.msra.gmra.mxu0 %v14073_v2  ;;  %7241 = vmatmul.bf16.vlgmr.msra.gmra.mxu2 %v14075_v62  ;;  %v8986_v1 = vor.u32 %v10935_v42, %v8983_v4  ;;  %v10927_v31 = vld [vmem:[%s16947_s11 + $0x24c] sm:$0xf]  ;;  %v8663_v16 = vld [vmem:[%s16947_s11 + $0x18] sm:$0xf0] }
 0x5a8   : > { %7275 = vmatpush.bf16.msrb.mxu0 %v9034_v12  ;;  %7289 = vmatpush.bf16.msrb.mxu2 %v9162_v22  ;;  %v6909_v12 = vadd.f32 %v15688_v23, %v6895_v47  ;;  %v6949_v22 = vadd.f32 %v15709_v10, %v6935_v35  ;;  %v10931_v23 = vld [vmem:[%s16947_s11 + $0x26c] sm:$0xf]  ;;  %v6964_v49 = vpop.f32.mrf.mxu2  ;;  %v9287_v47 = vld [vmem:[%s16947_s11 + $0x4f8] sm:$0xf0]  ;;  %v8666_v50 = vor.u32 %v10855_v37, %v8663_v16 }
 0x5a9   : > { %v11011_v42 = vld [vmem:[%s16947_s11 + $0x4ec] sm:$0xf]  ;;  %v9063_v63 = vld [vmem:[%s16947_s11 + $0x338] sm:$0xf0] }
 0x5aa   : > { %7249 = vmatpush.bf16.msra.mxu1 %v8746_v44  ;;  %7263 = vmatpush.bf16.msra.mxu3 %v8874_v21  ;;  %v6923_v10 = vadd.f32 %v6922_v45, %v6909_v12  ;;  %v6963_v43 = vadd.f32 %v6962_v30, %v6949_v22  ;;  %v8967_v44 = vld [vmem:[%s16947_s11 + $0x278] sm:$0xf0]  ;;  %v10963_v21 = vld [vmem:[%s16947_s11 + $0x36c] sm:$0xf]  ;;  %v6990_v30 = vpop.f32.mrf.mxu3 }
 0x5ab   : > { %v10859_v45 = vld [vmem:[%s16947_s11 + $0x2c] sm:$0xf]  ;;  %v8970_v54 = vor.u32 %v10931_v23, %v8967_v44  ;;  %v9098_v59 = vor.u32 %v10963_v21, %v9095_v27  ;;  %v8935_v12 = vld [vmem:[%s16947_s11 + $0x238] sm:$0xf0]  ;;  %v9290_v44 = vor.u32 %v11011_v42, %v9287_v47 }
 0x5ac   : > { %7276 = vmatpush.bf16.msrb.mxu0 %v9018_v29  ;;  %7290 = vmatpush.bf16.msrb.mxu2 %v9146_v24  ;;  %v6937_v40 = vadd.f32 %v6936_v28, %v6923_v10  ;;  %v6977_v55 = vadd.f32 %v6976_v61, %v6963_v43  ;;  %v8679_v29 = vld [vmem:[%s16947_s11 + $0x38] sm:$0xf0]  ;;  %v10891_v24 = vld [vmem:[%s16947_s11 + $0x12c] sm:$0xf] }
 0x5ad   : > { %v8682_v35 = vor.u32 %v10859_v45, %v8679_v29  ;;  %v8810_v28 = vor.u32 %v10891_v24, %v8807_v11  ;;  %v9415_v61 = vld [vmem:[%s16947_s11 + $0x5f8] sm:$0xf0]  ;;  %v10955_v22 = vld [vmem:[%s16947_s11 + $0x32c] sm:$0xf] }
 0x5ae   : > { %7250 = vmatpush.bf16.msra.mxu1 %v8730_v5  ;;  %7264 = vmatpush.bf16.msra.mxu3 %v8858_v0  ;;  %v6991_v53 = vadd.f32 %v6990_v30, %v6977_v55  ;;  %v8951_v5 = vld [vmem:[%s16947_s11 + $0x258] sm:$0xf0]  ;;  %v10959_v0 = vld [vmem:[%s16947_s11 + $0x34c] sm:$0xf]  ;;  %v6978_v4 = vpop.f32.mrf.mxu1  ;;  %v9066_v45 = vor.u32 %v10955_v22, %v9063_v63 }
 0x5af   : > { %v8954_v48 = vor.u32 %v10927_v31, %v8951_v5  ;;  %v9082_v38 = vor.u32 %v10959_v0, %v9079_v57  ;;  %v9271_v27 = vld [vmem:[%s16947_s11 + $0x4d8] sm:$0xf0]  ;;  %v10951_v30 = vld [vmem:[%s16947_s11 + $0x30c] sm:$0xf] }
 0x5b0   : > { %7277 = vmatpush.bf16.msrb.mxu0 %v9002_v32  ;;  %7291 = vmatpush.bf16.msrb.mxu2 %v9130_v39  ;;  %v6951_v32 = vadd.f32 %v6950_v34, %v6937_v40  ;;  %v8791_v39 = vld [vmem:[%s16947_s11 + $0x118] sm:$0xf0]  ;;  %v11043_v34 = vld [vmem:[%s16947_s11 + $0x5ec] sm:$0xf]  ;;  %v7005_v46 = vadd.f32 %v7004_v36, %v6991_v53  ;;  %v7018_v51 = vpop.f32.mrf.mxu2  ;;  %v7006_v36 = vpop.f32.mrf.mxu0 }
 0x5b1   : > { %v9418_v21 = vor.u32 %v11043_v34, %v9415_v61  ;;  %v10919_v40 = vld [vmem:[%s16947_s11 + $0x20c] sm:$0xf]  ;;  %v8919_v55 = vld [vmem:[%s16947_s11 + $0x218] sm:$0xf0] }
 0x5b2   : > { %7251 = vmatpush.bf16.msra.mxu1 %v8714_v20  ;;  %7265 = vmatpush.bf16.msra.mxu3 %v8842_v19  ;;  %v10923_v20 = vld [vmem:[%s16947_s11 + $0x22c] sm:$0xf]  ;;  %v6965_v19 = vadd.f32 %v6964_v49, %v6951_v32  ;;  %v7019_v10 = vadd.f32 %v7018_v51, %v7005_v46  ;;  %v6992_v43 = vpop.f32.mrf.mxu3  ;;  %v9047_v24 = vld [vmem:[%s16947_s11 + $0x318] sm:$0xf0]  ;;  %v8922_v57 = vor.u32 %v10919_v40, %v8919_v55 }
 0x5b3   : > { %v11039_v49 = vld [vmem:[%s16947_s11 + $0x5cc] sm:$0xf]  ;;  %v9671_v31 = vld [vmem:[%s16947_s11 + $0x7f8] sm:$0xf0] }
 0x5b4   : > { %7278 = vmatpush.bf16.msrb.mxu0 %v8986_v1  ;;  %7292 = vmatpush.bf16.msrb.mxu2 %v9114_v25  ;;  %v8794_v1 = vor.u32 %v10887_v41, %v8791_v39  ;;  %v11007_v25 = vld [vmem:[%s16947_s11 + $0x4cc] sm:$0xf]  ;;  %v6979_v23 = vadd.f32 %v6978_v4, %v6965_v19  ;;  %7472 = vst [vmem:[#allocation7] sm:$0xff] %v7019_v10  ;;  %v9383_v16 = vld [vmem:[%s16947_s11 + $0x5b8] sm:$0xf0] }
 0x5b5   : > { %v11075_v11 = vld [vmem:[%s16947_s11 + $0x6ec] sm:$0xf]  ;;  %v9274_v53 = vor.u32 %v11007_v25, %v9271_v27  ;;  %v9527_v4 = vld [vmem:[%s16947_s11 + $0x6d8] sm:$0xf0] }
 0x5b6   : > { %7252 = vmatpush.bf16.msra.mxu1 %v8698_v15  ;;  %7266 = vmatpush.bf16.msra.mxu3 %v8826_v52  ;;  %v9399_v15 = vld [vmem:[%s16947_s11 + $0x5d8] sm:$0xf0]  ;;  %v8938_v52 = vor.u32 %v10923_v20, %v8935_v12  ;;  %v6993_v29 = vadd.f32 %v6992_v43, %v6979_v23  ;;  %v11003_v0 = vld [vmem:[%s16947_s11 + $0x4ac] sm:$0xf] }
 0x5b7   : > { %v9402_v5 = vor.u32 %v11039_v49, %v9399_v15  ;;  %v11035_v37 = vld [vmem:[%s16947_s11 + $0x5ac] sm:$0xf]  ;;  %v9239_v20 = vld [vmem:[%s16947_s11 + $0x498] sm:$0xf0] }
 0x5b8   : > { %7279 = vmatpush.bf16.msrb.mxu0 %v8970_v54  ;;  %7293 = vmatpush.bf16.msrb.mxu2 %v9098_v59  ;;  %v9543_v54 = vld [vmem:[%s16947_s11 + $0x6f8] sm:$0xf0]  ;;  %v11107_v59 = vld [vmem:[%s16947_s11 + $0x7ec] sm:$0xf]  ;;  %v7007_v41 = vadd.f32 %v7006_v36, %v6993_v29  ;;  %v7020_v47 = vpop.f32.mrf.mxu2  ;;  %v9386_v34 = vor.u32 %v11035_v37, %v9383_v16 }
 0x5b9   : > { %v9546_v32 = vor.u32 %v11075_v11, %v9543_v54  ;;  %v9674_v39 = vor.u32 %v11107_v59, %v9671_v31  ;;  %v11071_v42 = vld [vmem:[%s16947_s11 + $0x6cc] sm:$0xf]  ;;  %v9367_v46 = vld [vmem:[%s16947_s11 + $0x598] sm:$0xf0] }
 0x5ba   : > { %7253 = vmatpush.bf16.msra.mxu1 %v8682_v35  ;;  %7267 = vmatpush.bf16.msra.mxu3 %v8810_v28  ;;  %v9050_v35 = vor.u32 %v10951_v30, %v9047_v24  ;;  %v9255_v28 = vld [vmem:[%s16947_s11 + $0x4b8] sm:$0xf0]  ;;  %v10999_v61 = vld [vmem:[%s16947_s11 + $0x48c] sm:$0xf]  ;;  %v9530_v12 = vor.u32 %v11071_v42, %v9527_v4 }
 0x5bb   : > { %v11031_v19 = vld [vmem:[%s16947_s11 + $0x58c] sm:$0xf]  ;;  %v9511_v51 = vld [vmem:[%s16947_s11 + $0x6b8] sm:$0xf0]  ;;  %v9242_v25 = vor.u32 %v10999_v61, %v9239_v20 }
 0x5bc   : > { %7280 = vmatpush.bf16.msrb.mxu0 %v8954_v48  ;;  %7294 = vmatpush.bf16.msrb.mxu2 %v9082_v38  ;;  %v11103_v48 = vld [vmem:[%s16947_s11 + $0x7cc] sm:$0xf]  ;;  %v9258_v38 = vor.u32 %v11003_v0, %v9255_v28  ;;  %v9370_v23 = vor.u32 %v11031_v19, %v9367_v46  ;;  %v9223_v43 = vld [vmem:[%s16947_s11 + $0x478] sm:$0xf0] }
 0x5bd   : > { %v11067_v63 = vld [vmem:[%s16947_s11 + $0x6ac] sm:$0xf]  ;;  %v9207_v30 = vld [vmem:[%s16947_s11 + $0x458] sm:$0xf0] }
 0x5be   : > { %7254 = vmatpush.bf16.msra.mxu1 %v8666_v50  ;;  %7268 = vmatpush.bf16.msra.mxu3 %v8794_v1  ;;  %v11099_v50 = vld [vmem:[%s16947_s11 + $0x7ac] sm:$0xf]  ;;  %v9639_v1 = vld [vmem:[%s16947_s11 + $0x7b8] sm:$0xf0]  ;;  %v9514_v27 = vor.u32 %v11067_v63, %v9511_v51 }
 0x5bf   : > { %v10995_v10 = vld [vmem:[%s16947_s11 + $0x46c] sm:$0xf]  ;;  %v9642_v49 = vor.u32 %v11099_v50, %v9639_v1  ;;  %v9335_v24 = vld [vmem:[%s16947_s11 + $0x558] sm:$0xf0] }
 0x5c0   : > { %7281 = vmatpush.bf16.msrb.mxu0 %v8938_v52  ;;  %7295 = vmatpush.bf16.msrb.mxu2 %v9066_v45  ;;  %v11095_v15 = vld [vmem:[%s16947_s11 + $0x78c] sm:$0xf]  ;;  %v9623_v52 = vld [vmem:[%s16947_s11 + $0x798] sm:$0xf0]  ;;  %v9226_v45 = vor.u32 %v10995_v10, %v9223_v43 }
 0x5c1   : > { %7255 = vmatmul.bf16.vlgmr.msra.gmra.mxu1 %v13579_v17  ;;  %7269 = vmatmul.bf16.vlgmr.msra.gmra.mxu3 %v13581_v18  ;;  %v9655_v17 = vld [vmem:[%s16947_s11 + $0x7d8] sm:$0xf0]  ;;  %v7021_v18 = vadd.f32 %v7020_v47, %v7007_v41  ;;  %v10991_v55 = vld [vmem:[%s16947_s11 + $0x44c] sm:$0xf]  ;;  %v9626_v36 = vor.u32 %v11095_v15, %v9623_v52 }
 0x5c2   : > { %7303 = vmatpush.bf16.msrb.mxu1 %v9290_v44  ;;  %7317 = vmatpush.bf16.msrb.mxu3 %v9418_v21  ;;  %v9658_v22 = vor.u32 %v11103_v48, %v9655_v17  ;;  %v11027_v44 = vld [vmem:[%s16947_s11 + $0x56c] sm:$0xf]  ;;  %v9351_v21 = vld [vmem:[%s16947_s11 + $0x578] sm:$0xf0] }
 0x5c3   : > { %7476 = vst [vmem:[#allocation7 + $0x20] sm:$0xff] %v7021_v18  ;;  %v9354_v40 = vor.u32 %v11027_v44, %v9351_v21  ;;  %v11023_v29 = vld [vmem:[%s16947_s11 + $0x54c] sm:$0xf]  ;;  %v9479_v59 = vld [vmem:[%s16947_s11 + $0x678] sm:$0xf0] }
 0x5c4   : > { %7282 = vmatpush.bf16.msrb.mxu0 %v8922_v57  ;;  %7296 = vmatpush.bf16.msrb.mxu2 %v9050_v35  ;;  %v11059_v54 = vld [vmem:[%s16947_s11 + $0x66c] sm:$0xf]  ;;  %v9338_v0 = vor.u32 %v11023_v29, %v9335_v24  ;;  %v9191_v35 = vld [vmem:[%s16947_s11 + $0x438] sm:$0xf0] }
 0x5c5   : > { %v11091_v31 = vld [vmem:[%s16947_s11 + $0x76c] sm:$0xf]  ;;  %v9319_v37 = vld [vmem:[%s16947_s11 + $0x538] sm:$0xf0]  ;;  %v9482_v16 = vor.u32 %v11059_v54, %v9479_v59 }
 0x5c6   : > { %7304 = vmatpush.bf16.msrb.mxu1 %v9274_v53  ;;  %7318 = vmatpush.bf16.msrb.mxu3 %v9402_v5  ;;  %v9607_v53 = vld [vmem:[%s16947_s11 + $0x778] sm:$0xf0]  ;;  %v9210_v5 = vor.u32 %v10991_v55, %v9207_v30  ;;  %v10987_v57 = vld [vmem:[%s16947_s11 + $0x42c] sm:$0xf] }
 0x5c7   : > { %7283 = vmatmul.bf16.vlgmr.msrb.gmra.mxu0 %v13624_v60  ;;  %7297 = vmatmul.bf16.vlgmr.msrb.gmra.mxu2 %v13626_v33  ;;  %v11063_v60 = vld [vmem:[%s16947_s11 + $0x68c] sm:$0xf]  ;;  %v9495_v33 = vld [vmem:[%s16947_s11 + $0x698] sm:$0xf0]  ;;  %v9610_v41 = vor.u32 %v11091_v31, %v9607_v53  ;;  %v9194_v4 = vor.u32 %v10987_v57, %v9191_v35 }
 0x5c8   : > { %7331 = vmatpush.bf16.msra.mxu0 %v9546_v32  ;;  %7345 = vmatpush.bf16.msra.mxu2 %v9674_v39  ;;  %v9498_v11 = vor.u32 %v11063_v60, %v9495_v33  ;;  %v11019_v28 = vld [vmem:[%s16947_s11 + $0x52c] sm:$0xf]  ;;  %v9463_v39 = vld [vmem:[%s16947_s11 + $0x658] sm:$0xf0] }
 0x5c9   : > { %v11055_v32 = vld [vmem:[%s16947_s11 + $0x64c] sm:$0xf]  ;;  %v9591_v47 = vld [vmem:[%s16947_s11 + $0x758] sm:$0xf0]  ;;  %v9322_v48 = vor.u32 %v11019_v28, %v9319_v37 }
 0x5ca   : > { %7305 = vmatpush.bf16.msrb.mxu1 %v9258_v38  ;;  %7319 = vmatpush.bf16.msrb.mxu3 %v9386_v34  ;;  %v11087_v42 = vld [vmem:[%s16947_s11 + $0x74c] sm:$0xf]  ;;  %v9175_v18 = vld [vmem:[%s16947_s11 + $0x418] sm:$0xf0]  ;;  %v9466_v19 = vor.u32 %v11055_v32, %v9463_v39 }
 0x5cb   : > { %v10983_v17 = vld [vmem:[%s16947_s11 + $0x40c] sm:$0xf]  ;;  %v9303_v34 = vld [vmem:[%s16947_s11 + $0x518] sm:$0xf0]  ;;  %v9594_v46 = vor.u32 %v11087_v42, %v9591_v47 }
 0x5cc   : > { %7332 = vmatpush.bf16.msra.mxu0 %v9530_v12  ;;  %7346 = vmatpush.bf16.msra.mxu2 %v9658_v22  ;;  %v11015_v38 = vld [vmem:[%s16947_s11 + $0x50c] sm:$0xf]  ;;  %v9799_v20 = vld [vmem:[%s16947_s11 + $0x8f8] sm:$0xf0] }
 0x5cd   : > { %v11139_v61 = vld [vmem:[%s16947_s11 + $0x8ec] sm:$0xf]  ;;  %v9927_v22 = vld [vmem:[%s16947_s11 + $0x9f8] sm:$0xf0] }
 0x5ce   : > { %7306 = vmatpush.bf16.msrb.mxu1 %v9242_v25  ;;  %7320 = vmatpush.bf16.msrb.mxu3 %v9370_v23  ;;  %v11171_v12 = vld [vmem:[%s16947_s11 + $0x9ec] sm:$0xf]  ;;  %v9447_v51 = vld [vmem:[%s16947_s11 + $0x638] sm:$0xf0]  ;;  %v9178_v25 = vor.u32 %v10983_v17, %v9175_v18  ;;  %v9306_v23 = vor.u32 %v11015_v38, %v9303_v34  ;;  %v9802_v10 = vor.u32 %v11139_v61, %v9799_v20 }
 0x5cf   : > { %v11051_v63 = vld [vmem:[%s16947_s11 + $0x62c] sm:$0xf]  ;;  %v9575_v1 = vld [vmem:[%s16947_s11 + $0x738] sm:$0xf0]  ;;  %v9930_v43 = vor.u32 %v11171_v12, %v9927_v22 }
 0x5d0   : > { %7333 = vmatpush.bf16.msra.mxu0 %v9514_v27  ;;  %7347 = vmatpush.bf16.msra.mxu2 %v9642_v49  ;;  %v11083_v50 = vld [vmem:[%s16947_s11 + $0x72c] sm:$0xf]  ;;  %v9783_v21 = vld [vmem:[%s16947_s11 + $0x8d8] sm:$0xf0]  ;;  %v9450_v49 = vor.u32 %v11051_v63, %v9447_v51 }
 0x5d1   : > { %v11135_v44 = vld [vmem:[%s16947_s11 + $0x8cc] sm:$0xf]  ;;  %v9578_v60 = vor.u32 %v11083_v50, %v9575_v1  ;;  %v9911_v33 = vld [vmem:[%s16947_s11 + $0x9d8] sm:$0xf0] }
 0x5d2   : > { %7307 = vmatpush.bf16.msrb.mxu1 %v9226_v45  ;;  %7321 = vmatpush.bf16.msrb.mxu3 %v9354_v40  ;;  %v11167_v27 = vld [vmem:[%s16947_s11 + $0x9cc] sm:$0xf]  ;;  %v9431_v52 = vld [vmem:[%s16947_s11 + $0x618] sm:$0xf0] }
 0x5d3   : > { %v11047_v15 = vld [vmem:[%s16947_s11 + $0x60c] sm:$0xf]  ;;  %v9559_v40 = vld [vmem:[%s16947_s11 + $0x718] sm:$0xf0] }
 0x5d4   : > { %7334 = vmatpush.bf16.msra.mxu0 %v9498_v11  ;;  %7348 = vmatpush.bf16.msra.mxu2 %v9626_v36  ;;  %v11079_v45 = vld [vmem:[%s16947_s11 + $0x70c] sm:$0xf]  ;;  %v10055_v30 = vld [vmem:[%s16947_s11 + $0xaf8] sm:$0xf0]  ;;  %v9786_v11 = vor.u32 %v11135_v44, %v9783_v21  ;;  %v9914_v36 = vor.u32 %v11167_v27, %v9911_v33  ;;  %v9434_v59 = vor.u32 %v11047_v15, %v9431_v52 }
 0x5d5   : > { %v11203_v55 = vld [vmem:[%s16947_s11 + $0xaec] sm:$0xf]  ;;  %v10183_v24 = vld [vmem:[%s16947_s11 + $0xbf8] sm:$0xf0]  ;;  %v9562_v31 = vor.u32 %v11079_v45, %v9559_v40  ;;  %v16213_v45 = vpop.f32.mrf.mxu1 }
 0x5d6   : > { %7308 = vmatpush.bf16.msrb.mxu1 %v9210_v5  ;;  %7322 = vmatpush.bf16.msrb.mxu3 %v9338_v0  ;;  %v11235_v29 = vld [vmem:[%s16947_s11 + $0xbec] sm:$0xf]  ;;  %v9767_v53 = vld [vmem:[%s16947_s11 + $0x8b8] sm:$0xf0]  ;;  %v10058_v57 = vor.u32 %v11203_v55, %v10055_v30 }
 0x5d7   : > { %v11131_v54 = vld [vmem:[%s16947_s11 + $0x8ac] sm:$0xf]  ;;  %v9895_v0 = vld [vmem:[%s16947_s11 + $0x9b8] sm:$0xf0]  ;;  %v10186_v35 = vor.u32 %v11235_v29, %v10183_v24 }
 0x5d8   : > { %7335 = vmatpush.bf16.msra.mxu0 %v9482_v16  ;;  %7349 = vmatpush.bf16.msra.mxu2 %v9610_v41  ;;  %v11163_v5 = vld [vmem:[%s16947_s11 + $0x9ac] sm:$0xf]  ;;  %v10039_v37 = vld [vmem:[%s16947_s11 + $0xad8] sm:$0xf0] }
 0x5d9   : > { %v11199_v28 = vld [vmem:[%s16947_s11 + $0xacc] sm:$0xf]  ;;  %v9898_v41 = vor.u32 %v11163_v5, %v9895_v0  ;;  %v9751_v39 = vld [vmem:[%s16947_s11 + $0x898] sm:$0xf0] }
 0x5da   : > { %7309 = vmatpush.bf16.msrb.mxu1 %v9194_v4  ;;  %7323 = vmatpush.bf16.msrb.mxu3 %v9322_v48  ;;  %v11231_v16 = vld [vmem:[%s16947_s11 + $0xbcc] sm:$0xf]  ;;  %v9879_v47 = vld [vmem:[%s16947_s11 + $0x998] sm:$0xf0]  ;;  %v10042_v4 = vor.u32 %v11199_v28, %v10039_v37 }
 0x5db   : > { %v11127_v32 = vld [vmem:[%s16947_s11 + $0x88c] sm:$0xf]  ;;  %v10023_v18 = vld [vmem:[%s16947_s11 + $0xab8] sm:$0xf0] }
 0x5dc   : > { %7336 = vmatpush.bf16.msra.mxu0 %v9466_v19  ;;  %7350 = vmatpush.bf16.msra.mxu2 %v9594_v46  ;;  %v11159_v42 = vld [vmem:[%s16947_s11 + $0x98c] sm:$0xf]  ;;  %v10151_v34 = vld [vmem:[%s16947_s11 + $0xbb8] sm:$0xf0]  ;;  %v9754_v61 = vor.u32 %v11127_v32, %v9751_v39  ;;  %v16259_v32 = vpop.f32.mrf.mxu0 }
 0x5dd   : > { %v11195_v17 = vld [vmem:[%s16947_s11 + $0xaac] sm:$0xf]  ;;  %v9882_v20 = vor.u32 %v11159_v42, %v9879_v47  ;;  %v9735_v46 = vld [vmem:[%s16947_s11 + $0x878] sm:$0xf0] }
 0x5de   : > { %7310 = vmatpush.bf16.msrb.mxu1 %v9178_v25  ;;  %7324 = vmatpush.bf16.msrb.mxu3 %v9306_v23  ;;  %v11227_v38 = vld [vmem:[%s16947_s11 + $0xbac] sm:$0xf]  ;;  %v9863_v22 = vld [vmem:[%s16947_s11 + $0x978] sm:$0xf0]  ;;  %v10026_v63 = vor.u32 %v11195_v17, %v10023_v18 }
 0x5df   : > { %v11123_v19 = vld [vmem:[%s16947_s11 + $0x86c] sm:$0xf]  ;;  %v10154_v51 = vor.u32 %v11227_v38, %v10151_v34  ;;  %v10135_v1 = vld [vmem:[%s16947_s11 + $0xb98] sm:$0xf0] }
 0x5e0   : > { %7337 = vmatpush.bf16.msra.mxu0 %v9450_v49  ;;  %7351 = vmatpush.bf16.msra.mxu2 %v9578_v60  ;;  %v11155_v12 = vld [vmem:[%s16947_s11 + $0x96c] sm:$0xf]  ;;  %v9738_v25 = vor.u32 %v11123_v19, %v9735_v46  ;;  %v9847_v21 = vld [vmem:[%s16947_s11 + $0x958] sm:$0xf0] }
 0x5e1   : > { %7311 = vmatmul.bf16.vlgmr.msrb.gmra.mxu1 %v13695_v8  ;;  %7325 = vmatmul.bf16.vlgmr.msrb.gmra.mxu3 %v13697_v56  ;;  %v10167_v8 = vld [vmem:[%s16947_s11 + $0xbd8] sm:$0xf0]  ;;  %v9770_v56 = vor.u32 %v11131_v54, %v9767_v53  ;;  %v11223_v50 = vld [vmem:[%s16947_s11 + $0xb8c] sm:$0xf]  ;;  %v9866_v23 = vor.u32 %v11155_v12, %v9863_v22 }
 0x5e2   : > { %7359 = vmatpush.bf16.msra.mxu1 %v9802_v10  ;;  %7373 = vmatpush.bf16.msra.mxu3 %v9930_v43  ;;  %v10170_v48 = vor.u32 %v11231_v16, %v10167_v8  ;;  %v11119_v10 = vld [vmem:[%s16947_s11 + $0x84c] sm:$0xf]  ;;  %v9719_v43 = vld [vmem:[%s16947_s11 + $0x858] sm:$0xf0]  ;;  %v10138_v49 = vor.u32 %v11223_v50, %v10135_v1  ;;  %v16248_v16 = vpop.f32.mrf.mxu3 }
 0x5e3   : > { %v11151_v44 = vld [vmem:[%s16947_s11 + $0x94c] sm:$0xf]  ;;  %v9991_v33 = vld [vmem:[%s16947_s11 + $0xa78] sm:$0xf0]  ;;  %v9722_v40 = vor.u32 %v11119_v10, %v9719_v43  ;;  %v16308_v43 = vpop.f32.mrf.mxu2 }
 0x5e4   : > { %7338 = vmatpush.bf16.msra.mxu0 %v9434_v59  ;;  %7352 = vmatpush.bf16.msra.mxu2 %v9562_v31  ;;  %v11187_v60 = vld [vmem:[%s16947_s11 + $0xa6c] sm:$0xf]  ;;  %v10119_v52 = vld [vmem:[%s16947_s11 + $0xb78] sm:$0xf0]  ;;  %v9850_v55 = vor.u32 %v11151_v44, %v9847_v21 }
 0x5e5   : > { %v11219_v15 = vld [vmem:[%s16947_s11 + $0xb6c] sm:$0xf]  ;;  %v9703_v29 = vld [vmem:[%s16947_s11 + $0x838] sm:$0xf0] }
 0x5e6   : > { %7360 = vmatpush.bf16.msra.mxu1 %v9786_v11  ;;  %7374 = vmatpush.bf16.msra.mxu3 %v9914_v36  ;;  %v11115_v30 = vld [vmem:[%s16947_s11 + $0x82c] sm:$0xf]  ;;  %v9831_v11 = vld [vmem:[%s16947_s11 + $0x938] sm:$0xf0]  ;;  %v9994_v36 = vor.u32 %v11187_v60, %v9991_v33  ;;  %v10122_v54 = vor.u32 %v11219_v15, %v10119_v52 }
 0x5e7   : > { %7339 = vmatmul.bf16.vlgmr.msra.gmra.mxu0 %v13737_v14  ;;  %7353 = vmatmul.bf16.vlgmr.msra.gmra.mxu2 %v13739_v3  ;;  %v11191_v14 = vld [vmem:[%s16947_s11 + $0xa8c] sm:$0xf]  ;;  %v10007_v3 = vld [vmem:[%s16947_s11 + $0xa98] sm:$0xf0]  ;;  %v9706_v0 = vor.u32 %v11115_v30, %v9703_v29 }
 0x5e8   : > { %7387 = vmatpush.bf16.msrb.mxu0 %v10058_v57  ;;  %7401 = vmatpush.bf16.msrb.mxu2 %v10186_v35  ;;  %v10010_v27 = vor.u32 %v11191_v14, %v10007_v3  ;;  %v11147_v24 = vld [vmem:[%s16947_s11 + $0x92c] sm:$0xf]  ;;  %v9975_v31 = vld [vmem:[%s16947_s11 + $0xa58] sm:$0xf0] }
 0x5e9   : > { %v11183_v59 = vld [vmem:[%s16947_s11 + $0xa4c] sm:$0xf]  ;;  %v10103_v5 = vld [vmem:[%s16947_s11 + $0xb58] sm:$0xf0]  ;;  %v9834_v57 = vor.u32 %v11147_v24, %v9831_v11 }
 0x5ea   : > { %7361 = vmatpush.bf16.msra.mxu1 %v9770_v56  ;;  %7375 = vmatpush.bf16.msra.mxu3 %v9898_v41  ;;  %v11215_v53 = vld [vmem:[%s16947_s11 + $0xb4c] sm:$0xf]  ;;  %v9687_v28 = vld [vmem:[%s16947_s11 + $0x818] sm:$0xf0]  ;;  %v9978_v39 = vor.u32 %v11183_v59, %v9975_v31  ;;  %v16331_v29 = vpop.f32.mrf.mxu3 }
 0x5eb   : > { %v11111_v35 = vld [vmem:[%s16947_s11 + $0x80c] sm:$0xf]  ;;  %v9815_v8 = vld [vmem:[%s16947_s11 + $0x918] sm:$0xf0]  ;;  %v10106_v42 = vor.u32 %v11215_v53, %v10103_v5 }
 0x5ec   : > { %7388 = vmatpush.bf16.msrb.mxu0 %v10042_v4  ;;  %7402 = vmatpush.bf16.msrb.mxu2 %v10170_v48  ;;  %v11143_v37 = vld [vmem:[%s16947_s11 + $0x90c] sm:$0xf]  ;;  %v10311_v41 = vld [vmem:[%s16947_s11 + $0xcf8] sm:$0xf0]  ;;  %v9690_v34 = vor.u32 %v11111_v35, %v9687_v28 }
 0x5ed   : > { %v11267_v56 = vld [vmem:[%s16947_s11 + $0xcec] sm:$0xf]  ;;  %v10439_v4 = vld [vmem:[%s16947_s11 + $0xdf8] sm:$0xf0] }
 0x5ee   : > { %7362 = vmatpush.bf16.msra.mxu1 %v9754_v61  ;;  %7376 = vmatpush.bf16.msra.mxu3 %v9882_v20  ;;  %v11299_v47 = vld [vmem:[%s16947_s11 + $0xdec] sm:$0xf]  ;;  %v9959_v17 = vld [vmem:[%s16947_s11 + $0xa38] sm:$0xf0]  ;;  %v9818_v61 = vor.u32 %v11143_v37, %v9815_v8  ;;  %v10314_v20 = vor.u32 %v11267_v56, %v10311_v41 }
 0x5ef   : > { %v11179_v48 = vld [vmem:[%s16947_s11 + $0xa2c] sm:$0xf]  ;;  %v10087_v38 = vld [vmem:[%s16947_s11 + $0xb38] sm:$0xf0]  ;;  %v10442_v19 = vor.u32 %v11299_v47, %v10439_v4 }
 0x5f0   : > { %7389 = vmatpush.bf16.msrb.mxu0 %v10026_v63  ;;  %7403 = vmatpush.bf16.msrb.mxu2 %v10154_v51  ;;  %v11211_v18 = vld [vmem:[%s16947_s11 + $0xb2c] sm:$0xf]  ;;  %v10295_v12 = vld [vmem:[%s16947_s11 + $0xcd8] sm:$0xf0]  ;;  %v16288_v63 = vpop.f32.mrf.mxu1  ;;  %v9962_v51 = vor.u32 %v11179_v48, %v9959_v17  ;;  %v16378_v17 = vpop.f32.mrf.mxu2 }
 0x5f1   : > { %v11263_v46 = vld [vmem:[%s16947_s11 + $0xccc] sm:$0xf]  ;;  %v10090_v14 = vor.u32 %v11211_v18, %v10087_v38  ;;  %v10423_v3 = vld [vmem:[%s16947_s11 + $0xdd8] sm:$0xf0] }
 0x5f2   : > { %7363 = vmatpush.bf16.msra.mxu1 %v9738_v25  ;;  %7377 = vmatpush.bf16.msra.mxu3 %v9866_v23  ;;  %v11295_v22 = vld [vmem:[%s16947_s11 + $0xdcc] sm:$0xf]  ;;  %v9943_v1 = vld [vmem:[%s16947_s11 + $0xa18] sm:$0xf0] }
 0x5f3   : > { %v11175_v50 = vld [vmem:[%s16947_s11 + $0xa0c] sm:$0xf]  ;;  %v10071_v23 = vld [vmem:[%s16947_s11 + $0xb18] sm:$0xf0]  ;;  %v10426_v60 = vor.u32 %v11295_v22, %v10423_v3 }
 0x5f4   : > { %7390 = vmatpush.bf16.msrb.mxu0 %v10010_v27  ;;  %7404 = vmatpush.bf16.msrb.mxu2 %v10138_v49  ;;  %v11207_v25 = vld [vmem:[%s16947_s11 + $0xb0c] sm:$0xf]  ;;  %v10567_v44 = vld [vmem:[%s16947_s11 + $0xef8] sm:$0xf0]  ;;  %v10298_v49 = vor.u32 %v11263_v46, %v10295_v12  ;;  %v9946_v15 = vor.u32 %v11175_v50, %v9943_v1 }
 0x5f5   : > { %v11331_v10 = vld [vmem:[%s16947_s11 + $0xeec] sm:$0xf]  ;;  %v10695_v27 = vld [vmem:[%s16947_s11 + $0xff8] sm:$0xf0]  ;;  %v10074_v52 = vor.u32 %v11207_v25, %v10071_v23 }
 0x5f6   : > { %7364 = vmatpush.bf16.msra.mxu1 %v9722_v40  ;;  %7378 = vmatpush.bf16.msra.mxu3 %v9850_v55  ;;  %v11363_v21 = vld [vmem:[%s16947_s11 + $0xfec] sm:$0xf]  ;;  %v10279_v40 = vld [vmem:[%s16947_s11 + $0xcb8] sm:$0xf0]  ;;  %v10570_v24 = vor.u32 %v11331_v10, %v10567_v44 }
 0x5f7   : > { %v11259_v33 = vld [vmem:[%s16947_s11 + $0xcac] sm:$0xf]  ;;  %v10407_v30 = vld [vmem:[%s16947_s11 + $0xdb8] sm:$0xf0]  ;;  %v10698_v11 = vor.u32 %v11363_v21, %v10695_v27 }
 0x5f8   : > { %7391 = vmatpush.bf16.msrb.mxu0 %v9994_v36  ;;  %7405 = vmatpush.bf16.msrb.mxu2 %v10122_v54  ;;  %v11291_v55 = vld [vmem:[%s16947_s11 + $0xdac] sm:$0xf]  ;;  %v16338_v54 = vpop.f32.mrf.mxu0  ;;  %v10551_v59 = vld [vmem:[%s16947_s11 + $0xed8] sm:$0xf0] }
 0x5f9   : > { %v11327_v36 = vld [vmem:[%s16947_s11 + $0xecc] sm:$0xf]  ;;  %v10410_v53 = vor.u32 %v11291_v55, %v10407_v30  ;;  %v10391_v28 = vld [vmem:[%s16947_s11 + $0xd98] sm:$0xf0] }
 0x5fa   : > { %7365 = vmatpush.bf16.msra.mxu1 %v9706_v0  ;;  %7379 = vmatpush.bf16.msra.mxu3 %v9834_v57  ;;  %v11359_v31 = vld [vmem:[%s16947_s11 + $0xfcc] sm:$0xf]  ;;  %v16352_v0 = vpop.f32.mrf.mxu1  ;;  %v10263_v57 = vld [vmem:[%s16947_s11 + $0xc98] sm:$0xf0]  ;;  %v10554_v37 = vor.u32 %v11327_v36, %v10551_v59 }
 0x5fb   : > { %v11255_v5 = vld [vmem:[%s16947_s11 + $0xc8c] sm:$0xf]  ;;  %v10535_v41 = vld [vmem:[%s16947_s11 + $0xeb8] sm:$0xf0] }
 0x5fc   : > { %7392 = vmatpush.bf16.msrb.mxu0 %v9978_v39  ;;  %7406 = vmatpush.bf16.msrb.mxu2 %v10106_v42  ;;  %v11287_v35 = vld [vmem:[%s16947_s11 + $0xd8c] sm:$0xf]  ;;  %v10663_v42 = vld [vmem:[%s16947_s11 + $0xfb8] sm:$0xf0]  ;;  %v10266_v47 = vor.u32 %v11255_v5, %v10263_v57 }
 0x5fd   : > { %v11323_v56 = vld [vmem:[%s16947_s11 + $0xeac] sm:$0xf]  ;;  %v10394_v4 = vor.u32 %v11287_v35, %v10391_v28  ;;  %v10247_v18 = vld [vmem:[%s16947_s11 + $0xc78] sm:$0xf0] }
 0x5fe   : > { %7366 = vmatpush.bf16.msra.mxu1 %v9690_v34  ;;  %7380 = vmatpush.bf16.msra.mxu3 %v9818_v61  ;;  %v11355_v39 = vld [vmem:[%s16947_s11 + $0xfac] sm:$0xf]  ;;  %v10375_v34 = vld [vmem:[%s16947_s11 + $0xd78] sm:$0xf0]  ;;  %v16391_v61 = vpop.f32.mrf.mxu3 }
 0x5ff   : > { %v11251_v48 = vld [vmem:[%s16947_s11 + $0xc6c] sm:$0xf]  ;;  %v10519_v46 = vld [vmem:[%s16947_s11 + $0xe98] sm:$0xf0] }
 0x600   : > { %7393 = vmatpush.bf16.msrb.mxu0 %v9962_v51  ;;  %7407 = vmatpush.bf16.msrb.mxu2 %v10090_v14  ;;  %v11283_v38 = vld [vmem:[%s16947_s11 + $0xd6c] sm:$0xf]  ;;  %v10647_v22 = vld [vmem:[%s16947_s11 + $0xf98] sm:$0xf0]  ;;  %v16410_v51 = vld [vmem:[%s16948_s12] sm:$0xf]  ;;  %v10250_v3 = vor.u32 %v11251_v48, %v10247_v18 }
 0x601   : > { %7367 = vmatmul.bf16.vlgmr.msra.gmra.mxu1 %v13815_v58  ;;  %7381 = vmatmul.bf16.vlgmr.msra.gmra.mxu3 %v13826_v9  ;;  %v10679_v58 = vld [vmem:[%s16947_s11 + $0xfd8] sm:$0xf0]  ;;  %v10282_v9 = vor.u32 %v11259_v33, %v10279_v40  ;;  %v11351_v12 = vld [vmem:[%s16947_s11 + $0xf8c] sm:$0xf]  ;;  %v3929_v14 = vperm.slane %v16410_v51, 2  ;;  %v10378_v50 = vor.u32 %v11283_v38, %v10375_v34 }
 0x602   : > { %7415 = vmatpush.bf16.msrb.mxu1 %v10314_v20  ;;  %7429 = vmatpush.bf16.msrb.mxu3 %v10442_v19  ;;  %v10682_v8 = vor.u32 %v11359_v31, %v10679_v58  ;;  %v10538_v20 = vor.u32 %v11323_v56, %v10535_v41  ;;  %v16396_v19 = vpop.f32.mrf.mxu0  ;;  %v11247_v1 = vld [vmem:[%s16947_s11 + $0xc4c] sm:$0xf]  ;;  %v10231_v25 = vld [vmem:[%s16947_s11 + $0xc58] sm:$0xf0]  ;;  %v10650_v21 = vor.u32 %v11351_v12, %v10647_v22 }
 0x603   : > { %v11279_v23 = vld [vmem:[%s16947_s11 + $0xd4c] sm:$0xf]  ;;  %v10359_v10 = vld [vmem:[%s16947_s11 + $0xd58] sm:$0xf0]  ;;  %v10234_v40 = vor.u32 %v11247_v1, %v10231_v25  ;;  %v7035_v18 = vadd.f32 %v16288_v63, %v3929_v14 }
 0x604   : > { %7394 = vmatpush.bf16.msrb.mxu0 %v9946_v15  ;;  %7408 = vmatpush.bf16.msrb.mxu2 %v10074_v52  ;;  %v11315_v27 = vld [vmem:[%s16947_s11 + $0xe6c] sm:$0xf]  ;;  %v10631_v15 = vld [vmem:[%s16947_s11 + $0xf78] sm:$0xf0]  ;;  %v7033_v52 = vadd.f32 %v16213_v45, %v3929_v14  ;;  %v10362_v55 = vor.u32 %v11279_v23, %v10359_v10 }
 0x605   : > { %v11347_v33 = vld [vmem:[%s16947_s11 + $0xf6c] sm:$0xf]  ;;  %v10343_v45 = vld [vmem:[%s16947_s11 + $0xd38] sm:$0xf0]  ;;  %v7049_v63 = vadd.f32 %v16331_v29, %v7035_v18 }
 0x606   : > { %7416 = vmatpush.bf16.msrb.mxu1 %v10298_v49  ;;  %7430 = vmatpush.bf16.msrb.mxu3 %v10426_v60  ;;  %v16428_v49 = vpop.f32.mrf.mxu1  ;;  %v10503_v60 = vld [vmem:[%s16947_s11 + $0xe78] sm:$0xf0]  ;;  %v11243_v30 = vld [vmem:[%s16947_s11 + $0xc2c] sm:$0xf]  ;;  %v7047_v59 = vadd.f32 %v16248_v16, %v7033_v52  ;;  %v10634_v58 = vor.u32 %v11347_v33, %v10631_v15  ;;  %v7104_v57 = vpop.f32.mrf.mxu3 }
 0x607   : > { %7395 = vmatmul.bf16.vlgmr.msrb.gmra.mxu0 %v13869_v26  ;;  %7409 = vmatmul.bf16.vlgmr.msrb.gmra.mxu2 %v13871_v13  ;;  %v10666_v26 = vor.u32 %v11355_v39, %v10663_v42  ;;  %v11319_v13 = vld [vmem:[%s16947_s11 + $0xe8c] sm:$0xf]  ;;  %v10506_v31 = vor.u32 %v11315_v27, %v10503_v60  ;;  %v10615_v16 = vld [vmem:[%s16947_s11 + $0xf58] sm:$0xf0]  ;;  %v7063_v10 = vadd.f32 %v16338_v54, %v7049_v63 }
 0x608   : > { %7443 = vmatpush.bf16.msra.mxu0 %v10570_v24  ;;  %7457 = vmatpush.bf16.msra.mxu2 %v10698_v11  ;;  %v10522_v44 = vor.u32 %v11319_v13, %v10519_v46  ;;  %v16443_v24 = vpop.f32.mrf.mxu2  ;;  %v10215_v11 = vld [vmem:[%s16947_s11 + $0xc38] sm:$0xf0]  ;;  %v11275_v36 = vld [vmem:[%s16947_s11 + $0xd2c] sm:$0xf]  ;;  %v7061_v42 = vadd.f32 %v16259_v32, %v7047_v59 }
 0x609   : > { %v11343_v5 = vld [vmem:[%s16947_s11 + $0xf4c] sm:$0xf]  ;;  %v10218_v35 = vor.u32 %v11243_v30, %v10215_v11  ;;  %v10346_v28 = vor.u32 %v11275_v36, %v10343_v45  ;;  %v10199_v56 = vld [vmem:[%s16947_s11 + $0xc18] sm:$0xf0]  ;;  %v7077_v27 = vadd.f32 %v16378_v17, %v7063_v10 }
 0x60a   : > { %7417 = vmatpush.bf16.msrb.mxu1 %v10282_v9  ;;  %7431 = vmatpush.bf16.msrb.mxu3 %v10410_v53  ;;  %v11311_v9 = vld [vmem:[%s16947_s11 + $0xe4c] sm:$0xf]  ;;  %v10487_v53 = vld [vmem:[%s16947_s11 + $0xe58] sm:$0xf0] }
 0x60b   : > { %v11271_v41 = vld [vmem:[%s16947_s11 + $0xd0c] sm:$0xf]  ;;  %v10327_v39 = vld [vmem:[%s16947_s11 + $0xd18] sm:$0xf0] }
 0x60c   : > { %7444 = vmatpush.bf16.msra.mxu0 %v10554_v37  ;;  %7458 = vmatpush.bf16.msra.mxu2 %v10682_v8  ;;  %v11239_v37 = vld [vmem:[%s16947_s11 + $0xc0c] sm:$0xf]  ;;  %v7118_v8 = vpop.f32.mrf.mxu0  ;;  %v10471_v34 = vld [vmem:[%s16947_s11 + $0xe38] sm:$0xf0]  ;;  %v10330_v46 = vor.u32 %v11271_v41, %v10327_v39 }
 0x60d   : > { %v11307_v48 = vld [vmem:[%s16947_s11 + $0xe2c] sm:$0xf]  ;;  %v10599_v32 = vld [vmem:[%s16947_s11 + $0xf38] sm:$0xf0]  ;;  %v10202_v13 = vor.u32 %v11239_v37, %v10199_v56 }
 0x60e   : > { %7418 = vmatpush.bf16.msrb.mxu1 %v10266_v47  ;;  %7432 = vmatpush.bf16.msrb.mxu3 %v10394_v4  ;;  %v10490_v47 = vor.u32 %v11311_v9, %v10487_v53  ;;  %v10618_v4 = vor.u32 %v11343_v5, %v10615_v16  ;;  %v7144_v38 = vpop.f32.mrf.mxu1  ;;  %v10474_v22 = vor.u32 %v11307_v48, %v10471_v34  ;;  %v11335_v1 = vld [vmem:[%s16947_s11 + $0xf0c] sm:$0xf]  ;;  %v10583_v29 = vld [vmem:[%s16947_s11 + $0xf18] sm:$0xf0]  ;;  %v7158_v25 = vpop.f32.mrf.mxu3  ;;  %v11432_v48 = vmov 7.0  }
 0x60f   : > { %11401 = vrcp.f32 %v11432_v48 }
 0x610   : > { %7445 = vmatpush.bf16.msra.mxu0 %v10538_v20  ;;  %7459 = vmatpush.bf16.msra.mxu2 %v10666_v26  ;;  %v11339_v20 = vld [vmem:[%s16947_s11 + $0xf2c] sm:$0xf]  ;;  %v7075_v26 = vadd.f32 %v16308_v43, %v7061_v42  ;;  %v10455_v43 = vld [vmem:[%s16947_s11 + $0xe18] sm:$0xf0] }
 0x611   : > { %v10602_v14 = vor.u32 %v11339_v20, %v10599_v32 }
 0x612   : > { %7419 = vmatpush.bf16.msrb.mxu1 %v10250_v3  ;;  %7433 = vmatpush.bf16.msrb.mxu3 %v10378_v50  ;;  %v7089_v12 = vadd.f32 %v16352_v0, %v7075_v26  ;;  %v11303_v3 = vld [vmem:[%s16947_s11 + $0xe0c] sm:$0xf]  ;;  %v7132_v50 = vpop.f32.mrf.mxu2 }
 0x614   : > { %7446 = vmatpush.bf16.msra.mxu0 %v10522_v44  ;;  %7460 = vmatpush.bf16.msra.mxu2 %v10650_v21  ;;  %v7103_v0 = vadd.f32 %v16391_v61, %v7089_v12  ;;  %v7172_v23 = vpop.f32.mrf.mxu0  ;;  %v10458_v44 = vor.u32 %v11303_v3, %v10455_v43  ;;  %v10586_v21 = vor.u32 %v11335_v1, %v10583_v29 }
 0x615   : > { %v7091_v61 = vadd.f32 %v16428_v49, %v7077_v27 }
 0x616   : > { %7420 = vmatpush.bf16.msrb.mxu1 %v10234_v40  ;;  %7434 = vmatpush.bf16.msrb.mxu3 %v10362_v55  ;;  %v7117_v60 = vadd.f32 %v16396_v19, %v7103_v0  ;;  %v7146_v33 = vpop.f32.mrf.mxu1 }
 0x617   : > { %v7105_v52 = vadd.f32 %v7104_v57, %v7091_v61 }
 0x618   : > { %7447 = vmatpush.bf16.msra.mxu0 %v10506_v31  ;;  %7461 = vmatpush.bf16.msra.mxu2 %v10634_v58  ;;  %v7131_v15 = vadd.f32 %v16443_v24, %v7117_v60 }
 0x619   : > { %v7119_v17 = vadd.f32 %v7118_v8, %v7105_v52 }
 0x61a   : > { %7421 = vmatpush.bf16.msrb.mxu1 %v10218_v35  ;;  %7435 = vmatpush.bf16.msrb.mxu3 %v10346_v28  ;;  %v7186_v54 = vpop.f32.mrf.mxu2  ;;  %v7145_v40 = vadd.f32 %v7144_v38, %v7131_v15 }
 0x61b   : > { %v7133_v19 = vadd.f32 %v7132_v50, %v7119_v17 }
 0x61c   : > { %7448 = vmatpush.bf16.msra.mxu0 %v10490_v47  ;;  %7462 = vmatpush.bf16.msra.mxu2 %v10618_v4  ;;  %v7174_v55 = vpop.f32.mrf.mxu0  ;;  %v7479_v47 = vld [vmem:[#allocation7 + $0x30] sm:$0x7f]  ;;  %v7480_v4 = vld [vmem:[#allocation7] sm:$0x7f] }
 0x61d   : > { %v7147_v36 = vadd.f32 %v7146_v33, %v7133_v19  ;;  %v7484_v18 = vsel %vm7483_vm6, %v7479_v47, 0.0  ;;  %v7491_v20 = vsel %vm7483_vm6, %v7480_v4, 0.0 }
 0x61e   : > { %7422 = vmatpush.bf16.msrb.mxu1 %v10202_v13  ;;  %7436 = vmatpush.bf16.msrb.mxu3 %v10330_v46  ;;  %v7200_v30 = vpop.f32.mrf.mxu1  ;;  %v7485_v26 = vrot.slane %v7484_v18, 4  ;;  %v7492_v13 = vrot.slane %v7491_v20, 4  ;;  %v11402_v46 = vpop.eup %11401 }
 0x61f   : > { %v7513_v50 = vmul.f32 7.0, %v11402_v46  ;;  %vm7517_vm7 = vweird.f32 %v11402_v46 }
 0x620   : > { %7449 = vmatpush.bf16.msra.mxu0 %v10474_v22  ;;  %7463 = vmatpush.bf16.msra.mxu2 %v10602_v14  ;;  %v7486_v14 = vadd.f32 %v7485_v26, %v7484_v18  ;;  %v7493_v3 = vadd.f32 %v7492_v13, %v7491_v20 }
 0x621   : > { %7423 = vmatmul.bf16.vlgmr.msrb.gmra.mxu1 %v14019_v6  ;;  %7437 = vmatmul.bf16.vlgmr.msrb.gmra.mxu3 %v14030_v7  ;;  %v7159_v6 = vadd.f32 %v7158_v25, %v7145_v40  ;;  %v7160_v7 = vpop.f32.mrf.mxu3  ;;  %v3930_v40 = vperm.slane %v16410_v51, 3 }
 0x622   : > { %v7188_v45 = vpop.f32.mrf.mxu2  ;;  %v7161_v24 = vadd.f32 %v7160_v7, %v7147_v36  ;;  %v7487_v0 = vrot.slane %v7486_v14, 2  ;;  %v7494_v25 = vrot.slane %v7493_v3, 2 }
 0x623   : > { %v7173_v11 = vadd.f32 %v7172_v23, %v7159_v6  ;;  %v7514_v23 = vsub.f32 1.0, %v7513_v50 }
 0x624   : > { %7450 = vmatpush.bf16.msra.mxu0 %v10458_v44  ;;  %7464 = vmatpush.bf16.msra.mxu2 %v10586_v21  ;;  %v7228_v58 = vpop.f32.mrf.mxu0  ;;  %v7175_v53 = vadd.f32 %v7174_v55, %v7161_v24  ;;  %v7488_v21 = vadd.f32 %v7487_v0, %v7486_v14  ;;  %v7495_v27 = vadd.f32 %v7494_v25, %v7493_v3 }
 0x625   : > { %v7187_v49 = vadd.f32 %v7186_v54, %v7173_v11  ;;  %v7515_v60 = vmul.f32 %v11402_v46, %v7514_v23 }
 0x626   : > { %v7202_v5 = vpop.f32.mrf.mxu1  ;;  %v7489_v52 = vrot.slane %v7488_v21, 1  ;;  %v7496_v6 = vrot.slane %v7495_v27, 1 }
 0x627   : > { %7451 = vmatmul.bf16.vlgmr.msra.gmra.mxu0 %v14073_v2  ;;  %7465 = vmatmul.bf16.vlgmr.msra.gmra.mxu2 %v14075_v62  ;;  %v7201_v59 = vadd.f32 %v7200_v30, %v7187_v49  ;;  %v7189_v2 = vadd.f32 %v7188_v45, %v7175_v53  ;;  %v7516_v7 = vadd.f32 %v11402_v46, %v7515_v60  ;;  %v16529_v53 = vld [vmem:[#allocation7 + $0x8] sm:$0x7f] }
 0x628   : > { %v7490_v30 = vadd.f32 %v7489_v52, %v7488_v21  ;;  %v7497_v11 = vadd.f32 %v7496_v6, %v7495_v27 }
 0x629   : > { %v7214_v31 = vpop.f32.mrf.mxu3  ;;  %v7203_v57 = vadd.f32 %v7202_v5, %v7189_v2  ;;  %v16525_v36 = vsel %vm7517_vm7, %v11402_v46, %v7516_v7  ;;  %v16531_v2 = vld [vmem:[#allocation7 + $0x20] sm:$0x7f] }
 0x62a   : > { %v7215_v9 = vadd.f32 %v7214_v31, %v7201_v59  ;;  %v7242_v62 = vpop.f32.mrf.mxu2  ;;  %v7519_v59 = vmul.f32 %v16525_v36, %v7490_v30  ;;  %v7520_v31 = vmul.f32 %v16525_v36, %v7497_v11 }
 0x62c   : > { %v7229_v16 = vadd.f32 %v7228_v58, %v7215_v9  ;;  %v7230_v8 = vpop.f32.mrf.mxu0 }
 0x62e   : > { %v7243_v35 = vadd.f32 %v7242_v62, %v7229_v16  ;;  %v16533_v62 = vsub.f32 %v7479_v47, %v7519_v59 }
 0x630   : > { %7473 = vst [vmem:[#allocation7 + $0x18] sm:$0xff] %v7243_v35  ;;  %v7527_v47 = vmul.f32 %v16533_v62, %v16533_v62 }
 0x631   : > { %v7216_v28 = vpop.f32.mrf.mxu3 }
 0x632   : > { %v7217_v37 = vadd.f32 %v7216_v28, %v7203_v57  ;;  %v7244_v41 = vpop.f32.mrf.mxu2  ;;  %v16535_v28 = vsub.f32 %v7480_v4, %v7520_v31 }
 0x634   : > { %v7231_v56 = vadd.f32 %v7230_v8, %v7217_v37  ;;  %v7736_v37 = vsel %vm7483_vm6, %v16529_v53, 0.0  ;;  %v7528_v4 = vmul.f32 %v16535_v28, %v16535_v28 }
 0x635   : > { %v7737_v18 = vrot.slane %v7736_v37, 4 }
 0x636   : > { %v7245_v39 = vadd.f32 %v7244_v41, %v7231_v56  ;;  %v7743_v41 = vsel %vm7483_vm6, %v16531_v2, 0.0 }
 0x637   : > { %v16520_v32 = vld [vmem:[#allocation7 + $0x18] sm:$0x7f] }
 0x638   : > { %7477 = vst [vmem:[#allocation7 + $0x28] sm:$0xff] %v7245_v39  ;;  %v7498_v12 = vsel %vm7483_vm6, %v16520_v32, 0.0 }
 0x639   : > { %v7499_v43 = vrot.slane %v7498_v12, 4 }
 0x63b   : > { %v7500_v44 = vadd.f32 %v7499_v43, %v7498_v12  ;;  %v7531_v12 = vsel %vm7483_vm6, %v7527_v47, 0.0  ;;  %v7538_v43 = vsel %vm7483_vm6, %v7528_v4, 0.0 }
 0x63c   : > { %v7532_v21 = vrot.slane %v7531_v12, 4 }
 0x63d   : > { %v7501_v61 = vrot.slane %v7500_v44, 2 }
 0x63e   : > { %v7256_v42 = vpop.f32.mrf.mxu1  ;;  %v7533_v6 = vadd.f32 %v7532_v21, %v7531_v12 }
 0x63f   : > { %v7502_v55 = vadd.f32 %v7501_v61, %v7500_v44  ;;  %v7257_v19 = vadd.f32 %v7256_v42, %v3930_v40  ;;  %v16540_v56 = vld [vmem:[#allocation7 + $0x28] sm:$0x7f] }
 0x640   : > { %v7750_v20 = vsel %vm7483_vm6, %v16540_v56, 0.0  ;;  %v7534_v59 = vrot.slane %v7533_v6, 2 }
 0x641   : > { %v7503_v45 = vrot.slane %v7502_v55, 1  ;;  %v7751_v14 = vrot.slane %v7750_v20, 4 }
 0x642   : > { %v7535_v47 = vadd.f32 %v7534_v59, %v7533_v6 }
 0x643   : > { %v7504_v51 = vadd.f32 %v7503_v45, %v7502_v55 }
 0x644   : > { %v7270_v38 = vpop.f32.mrf.mxu3  ;;  %v7284_v34 = vpop.f32.mrf.mxu0 }
 0x645   : > { %v7271_v24 = vadd.f32 %v7270_v38, %v7257_v19  ;;  %v7521_v8 = vmul.f32 %v16525_v36, %v7504_v51 }
 0x646   : > { %v7258_v63 = vpop.f32.mrf.mxu1 }
 0x647   : > { %v7285_v5 = vadd.f32 %v7284_v34, %v7271_v24  ;;  %v7259_v57 = vadd.f32 %v7258_v63, %v3930_v40  ;;  %v7744_v34 = vrot.slane %v7743_v41, 4  ;;  %v16551_v46 = vsub.f32 %v16520_v32, %v7521_v8 }
 0x648   : > { %v7539_v32 = vrot.slane %v7538_v43, 4 }
 0x649   : > { %v7529_v25 = vmul.f32 %v16551_v46, %v16551_v46 }
 0x64a   : > { %v7298_v22 = vpop.f32.mrf.mxu2  ;;  %v7540_v7 = vadd.f32 %v7539_v32, %v7538_v43 }
 0x64b   : > { %v7299_v35 = vadd.f32 %v7298_v22, %v7285_v5  ;;  %v7738_v22 = vadd.f32 %v7737_v18, %v7736_v37 }
 0x64c   : > { %v7272_v1 = vpop.f32.mrf.mxu3  ;;  %v7286_v29 = vpop.f32.mrf.mxu0  ;;  %v7541_v31 = vrot.slane %v7540_v7, 2 }
 0x64d   : > { %v7273_v39 = vadd.f32 %v7272_v1, %v7259_v57  ;;  %v7745_v1 = vadd.f32 %v7744_v34, %v7743_v41  ;;  %v7739_v27 = vrot.slane %v7738_v22, 2 }
 0x64f   : > { %v7287_v63 = vadd.f32 %v7286_v29, %v7273_v39  ;;  %v7752_v29 = vadd.f32 %v7751_v14, %v7750_v20  ;;  %v7740_v55 = vadd.f32 %v7739_v27, %v7738_v22 }
 0x651   : > { %v7753_v30 = vrot.slane %v7752_v29, 2 }
 0x652   : > { %v7300_v33 = vpop.f32.mrf.mxu2 }
 0x653   : > { %v7301_v3 = vadd.f32 %v7300_v33, %v7287_v63  ;;  %v7545_v33 = vsel %vm7483_vm6, %v7529_v25, 0.0  ;;  %v7754_v51 = vadd.f32 %v7753_v30, %v7752_v29 }
 0x65e   : > { %v7312_v10 = vpop.f32.mrf.mxu1 }
 0x65f   : > { %v7313_v42 = vadd.f32 %v7312_v10, %v7299_v35 }
 0x664   : > { %v7326_v15 = vpop.f32.mrf.mxu3  ;;  %v7340_v54 = vpop.f32.mrf.mxu0 }
 0x665   : > { %v7327_v38 = vadd.f32 %v7326_v15, %v7313_v42  ;;  %v7746_v15 = vrot.slane %v7745_v1, 2 }
 0x666   : > { %v7314_v17 = vpop.f32.mrf.mxu1 }
 0x667   : > { %v7341_v50 = vadd.f32 %v7340_v54, %v7327_v38  ;;  %v7315_v23 = vadd.f32 %v7314_v17, %v7301_v3  ;;  %v7546_v17 = vrot.slane %v7545_v33, 4  ;;  %v7747_v11 = vadd.f32 %v7746_v15, %v7745_v1 }
 0x668   : > { %v7755_v38 = vrot.slane %v7754_v51, 1 }
 0x669   : > { %v7547_v57 = vadd.f32 %v7546_v17, %v7545_v33  ;;  %v7748_v35 = vrot.slane %v7747_v11, 1 }
 0x66a   : > { %v7354_v49 = vpop.f32.mrf.mxu2  ;;  %v7756_v12 = vadd.f32 %v7755_v38, %v7754_v51 }
 0x66b   : > { %v7355_v10 = vadd.f32 %v7354_v49, %v7341_v50  ;;  %v7749_v34 = vadd.f32 %v7748_v35, %v7747_v11 }
 0x66c   : > { %v7328_v58 = vpop.f32.mrf.mxu3  ;;  %v7342_v9 = vpop.f32.mrf.mxu0 }
 0x66d   : > { %v7329_v60 = vadd.f32 %v7328_v58, %v7315_v23  ;;  %v7741_v58 = vrot.slane %v7740_v55, 1  ;;  %v7765_v43 = vmul.f32 %v7749_v34, %v16525_v36 }
 0x66f   : > { %v7343_v19 = vadd.f32 %v7342_v9, %v7329_v60  ;;  %v7542_v9 = vadd.f32 %v7541_v31, %v7540_v7  ;;  %v7742_v18 = vadd.f32 %v7741_v58, %v7740_v55  ;;  %v16565_v60 = vsub.f32 %v16531_v2, %v7765_v43 }
 0x671   : > { %v7543_v63 = vrot.slane %v7542_v9, 1  ;;  %v7764_v22 = vmul.f32 %v7742_v18, %v16525_v36  ;;  %v7773_v6 = vmul.f32 %v16565_v60, %v16565_v60 }
 0x672   : > { %v7356_v48 = vpop.f32.mrf.mxu2 }
 0x673   : > { %v7357_v45 = vadd.f32 %v7356_v48, %v7343_v19  ;;  %v7548_v48 = vrot.slane %v7547_v57, 2  ;;  %v16562_v21 = vsub.f32 %v16529_v53, %v7764_v22  ;;  %v7544_v27 = vadd.f32 %v7543_v63, %v7542_v9 }
 0x675   : > { %v7549_v50 = vadd.f32 %v7548_v48, %v7547_v57  ;;  %v7560_v53 = vmul.f32 %v7544_v27, %v16525_v36 }
 0x677   : > { %v7550_v29 = vrot.slane %v7549_v50, 1 }
 0x67e   : > { %v7368_v16 = vpop.f32.mrf.mxu1 }
 0x67f   : > { %v7369_v61 = vadd.f32 %v7368_v16, %v7355_v10 }
 0x684   : > { %v7382_v26 = vpop.f32.mrf.mxu3  ;;  %v7396_v13 = vpop.f32.mrf.mxu0 }
 0x685   : > { %v7383_v54 = vadd.f32 %v7382_v26, %v7369_v61 }
 0x686   : > { %v7370_v0 = vpop.f32.mrf.mxu1 }
 0x687   : > { %v7397_v24 = vadd.f32 %v7396_v13, %v7383_v54  ;;  %v7371_v5 = vadd.f32 %v7370_v0, %v7357_v45  ;;  %v7536_v13 = vrot.slane %v7535_v47, 1  ;;  %v7772_v54 = vmul.f32 %v16562_v21, %v16562_v21 }
 0x688   : > { %v7783_v45 = vsel %vm7483_vm6, %v7773_v6, 0.0 }
 0x689   : > { %v7537_v10 = vadd.f32 %v7536_v13, %v7535_v47  ;;  %v7784_v58 = vrot.slane %v7783_v45, 4 }
 0x68a   : > { %v7410_v44 = vpop.f32.mrf.mxu2 }
 0x68b   : > { %v7411_v16 = vadd.f32 %v7410_v44, %v7397_v24  ;;  %v7766_v44 = vmul.f32 %v7756_v12, %v16525_v36  ;;  %v7559_v15 = vmul.f32 %v7537_v10, %v16525_v36 }
 0x68c   : > { %v7384_v52 = vpop.f32.mrf.mxu3  ;;  %v7398_v40 = vpop.f32.mrf.mxu0 }
 0x68d   : > { %v7385_v8 = vadd.f32 %v7384_v52, %v7371_v5  ;;  %v16569_v33 = vsub.f32 %v16540_v56, %v7766_v44  ;;  %v16576_v30 = vadd.f32 1e-05, %v7559_v15  ;;  %v7776_v56 = vsel %vm7483_vm6, %v7772_v54, 0.0 }
 0x68e   : > { %v7777_v59 = vrot.slane %v7776_v56, 4 }
 0x68f   : > { %v7399_v20 = vadd.f32 %v7398_v40, %v7385_v8  ;;  %v7551_v40 = vadd.f32 %v7550_v29, %v7549_v50  ;;  %v7774_v19 = vmul.f32 %v16569_v33, %v16569_v33  ;;  %11403 = vrsqrt.f32 %v16576_v30 }
 0x690   : > { %v7778_v57 = vadd.f32 %v7777_v59, %v7776_v56  ;;  %v7785_v8 = vadd.f32 %v7784_v58, %v7783_v45  ;;  %vm7574_vm9 = vweird.f32 %v16576_v30 }
 0x691   : > { %v7561_v11 = vmul.f32 %v7551_v40, %v16525_v36  ;;  %v7790_v51 = vsel %vm7483_vm6, %v7774_v19, 0.0 }
 0x692   : > { %v7412_v37 = vpop.f32.mrf.mxu2  ;;  %v7791_v35 = vrot.slane %v7790_v51, 4  ;;  %v7779_v47 = vrot.slane %v7778_v57, 2  ;;  %v7786_v38 = vrot.slane %v7785_v8, 2 }
 0x693   : > { %v7413_v14 = vadd.f32 %v7412_v37, %v7399_v20  ;;  %v16588_v5 = vadd.f32 1e-05, %v7561_v11 }
 0x694   : > { %v7792_v9 = vadd.f32 %v7791_v35, %v7790_v51  ;;  %v7787_v12 = vadd.f32 %v7786_v38, %v7785_v8  ;;  %v16627_v51 = vld [vmem:[%s16949_s13] sm:$0xf] }
 0x695   : > { %vm7594_vm14 = vweird.f32 %v16588_v5 }
 0x696   : > { %v7793_v13 = vrot.slane %v7792_v9, 2 }
 0x69e   : > { %v7424_v49 = vpop.f32.mrf.mxu1 }
 0x69f   : > { %v7425_v41 = vadd.f32 %v7424_v49, %v7411_v16  ;;  %v16583_v49 = vadd.f32 1e-05, %v7560_v53 }
 0x6a1   : > { %11405 = vrsqrt.f32 %v16583_v49  ;;  %vm7584_vm12 = vweird.f32 %v16583_v49 }
 0x6a2   : > { %11407 = vrsqrt.f32 %v16588_v5 }
 0x6a4   : > { %v7438_v39 = vpop.f32.mrf.mxu3  ;;  %v7452_v42 = vpop.f32.mrf.mxu0 }
 0x6a5   : > { %v7439_v4 = vadd.f32 %v7438_v39, %v7425_v41  ;;  %v16592_v41 = vpop.eup %11403 }
 0x6a6   : > { %v7426_v26 = vpop.f32.mrf.mxu1  ;;  %vm7575_vm8 = vweird.f32 %v16592_v41 }
 0x6a7   : > { %v7453_v3 = vadd.f32 %v7452_v42, %v7439_v4  ;;  %v7427_v0 = vadd.f32 %v7426_v26, %v7413_v14  ;;  %v16594_v42 = vpop.eup %11405  ;;  %v7569_v4 = vmul.f32 %v16592_v41, %v16576_v30  ;;  %v7780_v26 = vadd.f32 %v7779_v47, %v7778_v57  ;;  %vm16629_vm11 = vmor %vm7574_vm9, %vm7575_vm8 }
 0x6a8   : > { %v7579_v34 = vmul.f32 %v16594_v42, %v16583_v49  ;;  %v16601_v20 = vpop.eup %11407  ;;  %vm7585_vm10 = vweird.f32 %v16594_v42  ;;  %v7613_v49 = vperm.slane %v16627_v51, 0 }
 0x6a9   : > { %v7570_v22 = vmul.f32 %v16592_v41, %v7569_v4  ;;  %v7589_v50 = vmul.f32 %v16601_v20, %v16588_v5  ;;  %v7781_v43 = vrot.slane %v7780_v26, 1  ;;  %vm7586_vm13 = vmor %vm7584_vm12, %vm7585_vm10  ;;  %vm7595_vm2 = vweird.f32 %v16601_v20 }
 0x6aa   : > { %v7466_v1 = vpop.f32.mrf.mxu2  ;;  %vm7596_vm15 = vmor %vm7594_vm14, %vm7595_vm2  ;;  %v7614_v4 = vperm.slane %v16627_v51, 1 }
 0x6ab   : > { %v7467_v25 = vadd.f32 %v7466_v1, %v7453_v3  ;;  %v7580_v3 = vmul.f32 %v16594_v42, %v7579_v34  ;;  %v7794_v1 = vadd.f32 %v7793_v13, %v7792_v9  ;;  %v7571_v10 = vmul.f32 0.5, %v7570_v22 }
 0x6ac   : > { %v7440_v23 = vpop.f32.mrf.mxu3  ;;  %v7454_v61 = vpop.f32.mrf.mxu0  ;;  %v7782_v29 = vadd.f32 %v7781_v43, %v7780_v26  ;;  %v7615_v22 = vperm.slane %v16627_v51, 2 }
 0x6ad   : > { %7474 = vst [vmem:[#allocation7 + $0x10] sm:$0xff] %v7467_v25  ;;  %v7441_v32 = vadd.f32 %v7440_v23, %v7427_v0  ;;  %v7788_v25 = vrot.slane %v7787_v12, 1  ;;  %v7581_v44 = vmul.f32 0.5, %v7580_v3 }
 0x6af   : > { %v7455_v52 = vadd.f32 %v7454_v61, %v7441_v32  ;;  %v7590_v32 = vmul.f32 %v16601_v20, %v7589_v50  ;;  %v7795_v61 = vrot.slane %v7794_v1, 1  ;;  %v7789_v15 = vadd.f32 %v7788_v25, %v7787_v12 }
 0x6b0   : > { %v7582_v40 = vsub.f32 1.5, %v7581_v44 }
 0x6b1   : > { %v7591_v53 = vmul.f32 0.5, %v7590_v32 }
 0x6b2   : > { %v7468_v7 = vpop.f32.mrf.mxu2 }
 0x6b3   : > { %v7469_v55 = vadd.f32 %v7468_v7, %v7455_v52  ;;  %v7572_v52 = vsub.f32 1.5, %v7571_v10  ;;  %v7796_v7 = vadd.f32 %v7795_v61, %v7794_v1  ;;  %v7592_v11 = vsub.f32 1.5, %v7591_v53 }
 0x6b4   : > { %v7482_v2 = vld [vmem:[#allocation7 + $0x10] sm:$0x7f] }
 0x6b5   : > { %7478 = vst [vmem:[#allocation7 + $0x38] sm:$0xff] %v7469_v55  ;;  %v7505_v17 = vsel %vm7483_vm6, %v7482_v2, 0.0  ;;  %v7804_v55 = vmul.f32 %v7782_v29, %v16525_v36  ;;  %v7573_v56 = vmul.f32 %v16592_v41, %v7572_v52 }
 0x6b6   : > { %v7506_v24 = vrot.slane %v7505_v17, 4 }
 0x6b7   : > { %v16622_v58 = vadd.f32 1e-05, %v7804_v55 }
 0x6b8   : > { %v7507_v31 = vadd.f32 %v7506_v24, %v7505_v17  ;;  %v7583_v17 = vmul.f32 %v16594_v42, %v7582_v40 }
 0x6b9   : > { %11409 = vrsqrt.f32 %v16622_v58  ;;  %vm7818_vm4 = vweird.f32 %v16622_v58 }
 0x6ba   : > { %v7508_v16 = vrot.slane %v7507_v31, 2  ;;  %v7587_v8 = vsel %vm7586_vm13, %v16594_v42, %v7583_v17  ;;  %v16708_v17 = vld [vmem:[%s16951_s15 + $0x48] sm:$0x7f] }
 0x6bb   : > { %v7609_v42 = vmul.f32 %v7587_v8, %v16535_v28 }
 0x6bc   : > { %v7509_v37 = vadd.f32 %v7508_v16, %v7507_v31  ;;  %v7735_v45 = vld [vmem:[#allocation7 + $0x38] sm:$0x7f]  ;;  %v7806_v31 = vmul.f32 %v7796_v7, %v16525_v36 }
 0x6bd   : > { %v7757_v59 = vsel %vm7483_vm6, %v7735_v45, 0.0 }
 0x6be   : > { %v7510_v39 = vrot.slane %v7509_v37, 1  ;;  %v7758_v16 = vrot.slane %v7757_v59, 4 }
 0x6bf   : > { %v16662_v12 = vpop.eup %11409 }
 0x6c0   : > { %v7511_v18 = vadd.f32 %v7510_v39, %v7509_v37  ;;  %v7577_v37 = vsel %vm16629_vm11, %v16592_v41, %v7573_v56  ;;  %v7593_v39 = vmul.f32 %v16601_v20, %v7592_v11  ;;  %v7759_v47 = vadd.f32 %v7758_v16, %v7757_v59  ;;  %v16713_v11 = vld [vmem:[%s16951_s15] sm:$0x7f]  ;;  %v16718_v59 = vld [vmem:[%s16951_s15 + $0x8] sm:$0x7f] }
 0x6c1   : > { %v7608_v38 = vmul.f32 %v7577_v37, %v16533_v62  ;;  %v7813_v25 = vmul.f32 %v16662_v12, %v16622_v58  ;;  %v7616_v16 = vperm.slane %v16627_v51, 3  ;;  %vm7819_vm5 = vweird.f32 %v16662_v12 }
 0x6c2   : > { %v7522_v48 = vmul.f32 %v16525_v36, %v7511_v18  ;;  %v16644_v18 = vadd.f32 1e-05, %v7806_v31  ;;  %v7760_v41 = vrot.slane %v7759_v47, 2  ;;  %v7597_v34 = vsel %vm7596_vm15, %v16601_v20, %v7593_v39  ;;  %vm16812_vm11 = vmor %vm7818_vm4, %vm7819_vm5 }
 0x6c3   : > { %v7621_v62 = vmul.f32 %v7613_v49, %v7608_v38  ;;  %v7610_v28 = vmul.f32 %v7597_v34, %v16551_v46  ;;  %v7814_v52 = vmul.f32 %v16662_v12, %v7813_v25  ;;  %v16736_v38 = vld [vmem:[%s16951_s15 + $0x10] sm:$0x7f]  ;;  %vm7728_vm4 = vcmask 52224  }
 0x6c4   : > { %v16603_v63 = vsub.f32 %v7482_v2, %v7522_v48  ;;  %v7805_v2 = vmul.f32 %v7789_v15, %v16525_v36  ;;  %v16655_v48 = vld [vmem:[%s16950_s14] sm:$0xf]  ;;  %v7761_v26 = vadd.f32 %v7760_v41, %v7759_v47  ;;  %v16729_v47 = vld [vmem:[%s16951_s15 + $0x50] sm:$0x7f]  ;;  %vm7838_vm12 = vweird.f32 %v16644_v18 }
 0x6c5   : > { %v7627_v5 = vperm.slane %v16655_v48, 0  ;;  %v7628_v20 = vperm.slane %v16655_v48, 1  ;;  %v7623_v46 = vmul.f32 %v7615_v22, %v7610_v28  ;;  %v7629_v10 = vperm.slane %v16655_v48, 2 }
 0x6c6   : > { %v7530_v14 = vmul.f32 %v16603_v63, %v16603_v63  ;;  %v16634_v57 = vadd.f32 1e-05, %v7805_v2  ;;  %v7762_v13 = vrot.slane %v7761_v26, 1  ;;  %v16701_v2 = vld [vmem:[%s16951_s15 + $0x40] sm:$0x7f]  ;;  %v7815_v31 = vmul.f32 0.5, %v7814_v52 }
 0x6c7   : > { %v7635_v44 = vadd.f32 %v7627_v5, %v7621_v62  ;;  %v7637_v53 = vadd.f32 %v7629_v10, %v7623_v46  ;;  %v16771_v52 = vld [vmem:[%s16951_s15 + $0x58] sm:$0x7f]  ;;  %vm7944_vm5 = vcmask 11264  }
 0x6c8   : > { %v7552_v0 = vsel %vm7483_vm6, %v7530_v14, 0.0  ;;  %11411 = vrsqrt.f32 %v16634_v57  ;;  %v7622_v14 = vmul.f32 %v7614_v4, %v7609_v42  ;;  %v7763_v50 = vadd.f32 %v7762_v13, %v7761_v26 }
 0x6c9   : > { %v7553_v23 = vrot.slane %v7552_v0, 4  ;;  %v7630_v26 = vperm.slane %v16655_v48, 3  ;;  %v7816_v28 = vsub.f32 1.5, %v7815_v31  ;;  %vm7828_vm7 = vweird.f32 %v16634_v57 }
 0x6ca   : > { %v7636_v32 = vadd.f32 %v7628_v20, %v7622_v14 }
 0x6cb   : > { %v7554_v27 = vadd.f32 %v7553_v23, %v7552_v0  ;;  %v7767_v0 = vmul.f32 %v7763_v50, %v16525_v36 }
 0x6cc   : > { %v16696_v7 = vmax.f32 %v7636_v32, 0.0 }
 0x6cd   : > { %v7555_v54 = vrot.slane %v7554_v27, 2  ;;  %v16683_v29 = vsub.f32 %v7735_v45, %v7767_v0 }
 0x6ce   : > { %v16669_v3 = vpop.eup %11411  ;;  %v7660_v62 = vmul.f32 %v16718_v59, %v16696_v7 }
 0x6cf   : > { %v7556_v6 = vadd.f32 %v7555_v54, %v7554_v27  ;;  %v7823_v61 = vmul.f32 %v16669_v3, %v16634_v57  ;;  %v7775_v54 = vmul.f32 %v16683_v29, %v16683_v29  ;;  %vm7829_vm8 = vweird.f32 %v16669_v3 }
 0x6d0   : > { %vm16802_vm10 = vmor %vm7828_vm7, %vm7829_vm8 }
 0x6d1   : > { %v7557_v19 = vrot.slane %v7556_v6, 1  ;;  %v7824_v56 = vmul.f32 %v16669_v3, %v7823_v61  ;;  %v7676_v61 = vsel %vm7483_vm6, %v7660_v62, 0.0 }
 0x6d3   : > { %v7558_v24 = vadd.f32 %v7557_v19, %v7556_v6  ;;  %v16694_v6 = vmax.f32 %v7635_v44, 0.0  ;;  %v7797_v19 = vsel %vm7483_vm6, %v7775_v54, 0.0  ;;  %v7825_v42 = vmul.f32 0.5, %v7824_v56  ;;  %v16766_v54 = vld [vmem:[%s16951_s15 + $0x28] sm:$0x7f] }
 0x6d4   : > { %v7798_v45 = vrot.slane %v7797_v19, 4 }
 0x6d5   : > { %v7562_v35 = vmul.f32 %v7558_v24, %v16525_v36  ;;  %v7667_v37 = vmul.f32 %v16701_v2, %v16694_v6  ;;  %v7659_v41 = vmul.f32 %v16713_v11, %v16694_v6  ;;  %v7826_v44 = vsub.f32 1.5, %v7825_v42 }
 0x6d6   : > { %v7799_v8 = vadd.f32 %v7798_v45, %v7797_v19 }
 0x6d7   : > { %v7567_v9 = vadd.f32 1e-05, %v7562_v35  ;;  %v16722_v35 = vmax.f32 %v7637_v53, 0.0  ;;  %v7693_v25 = vsel %vm7483_vm6, %v7667_v37, 0.0  ;;  %v7675_v46 = vsel %vm7483_vm6, %v7659_v41, 0.0 }
 0x6d8   : > { %v7800_v13 = vrot.slane %v7799_v8, 2  ;;  %v7817_v53 = vmul.f32 %v16662_v12, %v7816_v28  ;;  %v7677_v37 = vadd.f32 %v7676_v61, %v7675_v46 }
 0x6d9   : > { %11413 = vrsqrt.f32 %v7567_v9  ;;  %vm7604_vm0 = vweird.f32 %v7567_v9 }
 0x6da   : > { %11415 = vrsqrt.f32 %v16644_v18  ;;  %v7801_v0 = vadd.f32 %v7800_v13, %v7799_v8  ;;  %v7827_v8 = vmul.f32 %v16669_v3, %v7826_v44  ;;  %v16823_v44 = vld [vmem:[%s16951_s15 + $0x38] sm:$0x7f] }
 0x6dc   : > { %v7831_v57 = vsel %vm16802_vm10, %v16669_v3, %v7827_v8 }
 0x6dd   : > { %v7853_v61 = vmul.f32 %v7831_v57, %v16565_v60 }
 0x6df   : > { %v11414_v43 = vpop.eup %11413 }
 0x6e0   : > { %v7599_v1 = vmul.f32 %v11414_v43, %v7567_v9  ;;  %v16674_v23 = vpop.eup %11415  ;;  %vm7605_vm1 = vweird.f32 %v11414_v43  ;;  %v7668_v9 = vmul.f32 %v16708_v17, %v16696_v7 }
 0x6e1   : > { %v7833_v40 = vmul.f32 %v16674_v23, %v16644_v18  ;;  %vm7606_vm3 = vmor %vm7604_vm0, %vm7605_vm1  ;;  %vm7839_vm9 = vweird.f32 %v16674_v23  ;;  %v16834_v18 = vld [vmem:[%s16951_s15 + $0x68] sm:$0x7f]  ;;  %vm7721_vm1 = vcmask 1041409   ;;  %vm7723_vm0 = vcmask 1042434  }
 0x6e2   : > { %v7600_v27 = vmul.f32 %v11414_v43, %v7599_v1  ;;  %v7661_v1 = vmul.f32 %v16736_v38, %v16722_v35  ;;  %vm7840_vm13 = vmor %vm7838_vm12, %vm7839_vm9 }
 0x6e3   : > { %v7834_v30 = vmul.f32 %v16674_v23, %v7833_v40  ;;  %v16776_v40 = vld [vmem:[%s16951_s15 + $0x18] sm:$0x7f] }
 0x6e4   : > { %v7601_v15 = vmul.f32 0.5, %v7600_v27  ;;  %v7694_v27 = vsel %vm7483_vm6, %v7668_v9, 0.0 }
 0x6e5   : > { %v7835_v14 = vmul.f32 0.5, %v7834_v30  ;;  %v7695_v30 = vadd.f32 %v7694_v27, %v7693_v25 }
 0x6e6   : > { %v7602_v55 = vsub.f32 1.5, %v7601_v15  ;;  %v7802_v15 = vrot.slane %v7801_v0, 1 }
 0x6e8   : > { %v7603_v24 = vmul.f32 %v11414_v43, %v7602_v55  ;;  %v7836_v55 = vsub.f32 1.5, %v7835_v14  ;;  %v7803_v31 = vadd.f32 %v7802_v15, %v7801_v0 }
 0x6ea   : > { %v7607_v39 = vsel %vm7606_vm3, %v11414_v43, %v7603_v24  ;;  %v7669_v43 = vmul.f32 %v16729_v47, %v16722_v35  ;;  %v7678_v24 = vsel %vm7483_vm6, %v7661_v1, 0.0  ;;  %v7807_v42 = vmul.f32 %v7803_v31, %v16525_v36 }
 0x6eb   : > { %v7611_v34 = vmul.f32 %v7607_v39, %v16603_v63  ;;  %v16754_v63 = vld [vmem:[%s16951_s15 + $0x20] sm:$0x7f]  ;;  %v16789_v39 = vld [vmem:[%s16951_s15 + $0x30] sm:$0x7f]  ;;  %v7679_v13 = vadd.f32 %v7678_v24, %v7677_v37  ;;  %v7837_v28 = vmul.f32 %v16674_v23, %v7836_v55  ;;  %vm7725_vm3 = vcmask 1043459  }
 0x6ec   : > { %v7663_v19 = vmul.f32 %v16754_v63, %v16694_v6  ;;  %v7696_v45 = vsel %vm7483_vm6, %v7669_v43, 0.0  ;;  %v7811_v43 = vadd.f32 1e-05, %v7807_v42  ;;  %v7665_v36 = vmul.f32 %v16789_v39, %v16722_v35 }
 0x6ed   : > { %v7624_v50 = vmul.f32 %v7616_v16, %v7611_v34  ;;  %v7664_v34 = vmul.f32 %v16766_v54, %v16696_v7  ;;  %v7697_v62 = vadd.f32 %v7696_v45, %v7695_v30  ;;  %v7841_v3 = vsel %vm7840_vm13, %v16674_v23, %v7837_v28  ;;  %v16843_v45 = vld [vmem:[%s16951_s15 + $0x60] sm:$0x7f]  ;;  %v16848_v23 = vld [vmem:[%s16951_s15 + $0x70] sm:$0x7f] }
 0x6ee   : > { %11417 = vrsqrt.f32 %v7811_v43  ;;  %v7684_v15 = vsel %vm7483_vm6, %v7663_v19, 0.0  ;;  %v7854_v24 = vmul.f32 %v7841_v3, %v16569_v33  ;;  %v7672_v19 = vmul.f32 %v16834_v18, %v16696_v7  ;;  %v16865_v7 = vld [vmem:[%s16951_s15 + $0x78] sm:$0x7f] }
 0x6ef   : > { %v7638_v32 = vadd.f32 %v7630_v26, %v7624_v50  ;;  %v7685_v27 = vsel %vm7483_vm6, %v7664_v34, 0.0  ;;  %v7857_v30 = vmul.f32 %v7853_v61, %v7614_v4  ;;  %v7671_v37 = vmul.f32 %v16843_v45, %v16694_v6 }
 0x6f0   : > { %v7686_v55 = vadd.f32 %v7685_v27, %v7684_v15  ;;  %v7673_v8 = vmul.f32 %v16848_v23, %v16722_v35  ;;  %v7858_v42 = vmul.f32 %v7854_v24, %v7615_v22  ;;  %v7703_v6 = vsel %vm7483_vm6, %v7672_v19, 0.0 }
 0x6f1   : > { %v7642_v56 = vmax.f32 %v7638_v32, 0.0  ;;  %v7821_v32 = vsel %vm16812_vm11, %v16662_v12, %v7817_v53  ;;  %v7687_v12 = vsel %vm7483_vm6, %v7665_v36, 0.0  ;;  %v7861_v35 = vadd.f32 %v7857_v30, %v7628_v20 }
 0x6f2   : > { %v7852_v53 = vmul.f32 %v7821_v32, %v16562_v21  ;;  %v7688_v31 = vadd.f32 %v7687_v12, %v7686_v55  ;;  %v7862_v22 = vadd.f32 %v7858_v42, %v7629_v10  ;;  %vm7848_vm14 = vweird.f32 %v7811_v43 }
 0x6f3   : > { %v7670_v9 = vmul.f32 %v16771_v52, %v7642_v56  ;;  %v7662_v41 = vmul.f32 %v16776_v40, %v7642_v56  ;;  %v7666_v58 = vmul.f32 %v16823_v44, %v7642_v56  ;;  %v7674_v4 = vmul.f32 %v16865_v7, %v7642_v56 }
 0x6f4   : > { %v11418_v21 = vpop.eup %11417  ;;  %v7856_v33 = vmul.f32 %v7852_v53, %v7613_v49  ;;  %v7702_v49 = vsel %vm7483_vm6, %v7671_v37, 0.0  ;;  %v7865_v36 = vmax.f32 %v7861_v35, 0.0  ;;  %v7866_v46 = vmax.f32 %v7862_v22, 0.0 }
 0x6f5   : > { %v7698_v14 = vsel %vm7483_vm6, %v7670_v9, 0.0  ;;  %v7680_v50 = vsel %vm7483_vm6, %v7662_v41, 0.0  ;;  %v7689_v60 = vsel %vm7483_vm6, %v7666_v58, 0.0  ;;  %v7843_v9 = vmul.f32 %v11418_v21, %v7811_v43 }
 0x6f6   : > { %v7699_v0 = vadd.f32 %v7698_v14, %v7697_v62  ;;  %v7681_v25 = vadd.f32 %v7680_v50, %v7679_v13  ;;  %v7690_v41 = vadd.f32 %v7689_v60, %v7688_v31  ;;  %v7705_v62 = vsel %vm7483_vm6, %v7673_v8, 0.0 }
 0x6f7   : > { %v7844_v34 = vmul.f32 %v11418_v21, %v7843_v9  ;;  %v7860_v28 = vadd.f32 %v7856_v33, %v7627_v5  ;;  %v7704_v14 = vadd.f32 %v7703_v6, %v7702_v49  ;;  %v7707_v56 = vsel %vm7483_vm6, %v7674_v4, 0.0 }
 0x6f8   : > { %7700 = vadd.xlane.f32.xlu2 %v7699_v0  ;;  %7682 = vadd.xlane.f32.xlu0 %v7681_v25  ;;  %vm7849_vm2 = vweird.f32 %v11418_v21  ;;  %v7869_v32 = vmul.f32 %v7865_v36, %v16718_v59  ;;  %v7877_v10 = vmul.f32 %v7865_v36, %v16708_v17  ;;  %v7870_v3 = vmul.f32 %v7866_v46, %v16736_v38 }
 0x6f9   : > { %v7845_v13 = vmul.f32 0.5, %v7844_v34  ;;  %v7706_v1 = vadd.f32 %v7705_v62, %v7704_v14  ;;  %v7864_v20 = vmax.f32 %v7860_v28, 0.0  ;;  %vm7850_vm15 = vmor %vm7848_vm14, %vm7849_vm2  ;;  %v7878_v61 = vmul.f32 %v7866_v46, %v16729_v47 }
 0x6fa   : > { %v7903_v59 = vsel %vm7483_vm6, %v7877_v10, 0.0  ;;  %v7874_v31 = vmul.f32 %v7866_v46, %v16789_v39  ;;  %v7881_v33 = vmul.f32 %v7865_v36, %v16834_v18 }
 0x6fb   : > { %v7846_v50 = vsub.f32 1.5, %v7845_v13  ;;  %v7708_v25 = vadd.f32 %v7707_v56, %v7706_v1  ;;  %v7868_v58 = vmul.f32 %v7864_v20, %v16713_v11  ;;  %v7876_v43 = vmul.f32 %v7864_v20, %v16701_v2 }
 0x6fc   : > { %v7887_v11 = vsel %vm7483_vm6, %v7870_v3, 0.0  ;;  %v7872_v19 = vmul.f32 %v7864_v20, %v16754_v63  ;;  %v7880_v39 = vmul.f32 %v7864_v20, %v16843_v45  ;;  %v7912_v4 = vsel %vm7483_vm6, %v7881_v33, 0.0 }
 0x6fd   : > { %v7847_v0 = vmul.f32 %v11418_v21, %v7846_v50  ;;  %v7884_v17 = vsel %vm7483_vm6, %v7868_v58, 0.0  ;;  %v7902_v51 = vsel %vm7483_vm6, %v7876_v43, 0.0  ;;  %v7715_v45 = vlaneseq }
 0x6fe   : > { %v7904_v2 = vadd.f32 %v7903_v59, %v7902_v51  ;;  %v7911_v6 = vsel %vm7483_vm6, %v7880_v39, 0.0 }
 0x6ff   : > { %v7851_v57 = vsel %vm7850_vm15, %v11418_v21, %v7847_v0  ;;  %v7913_v35 = vadd.f32 %v7912_v4, %v7911_v6 }
 0x700   : > { %7691 = vadd.xlane.f32.xlu0 %v7690_v41  ;;  %v7855_v5 = vmul.f32 %v7851_v57, %v16683_v29  ;;  %v7885_v29 = vsel %vm7483_vm6, %v7869_v32, 0.0  ;;  %v7882_v41 = vmul.f32 %v7866_v46, %v16848_v23  ;;  %v7716_v23 = vand.u32 127, %v7715_v45 }
 0x701   : > { %v7886_v38 = vadd.f32 %v7885_v29, %v7884_v17 }
 0x702   : > { %v7859_v27 = vmul.f32 %v7855_v5, %v7616_v16  ;;  %v7905_v16 = vsel %vm7483_vm6, %v7878_v61, 0.0  ;;  %v7914_v34 = vsel %vm7483_vm6, %v7882_v41, 0.0 }
 0x703   : > { %v7888_v53 = vadd.f32 %v7887_v11, %v7886_v38  ;;  %v7906_v55 = vadd.f32 %v7905_v16, %v7904_v2  ;;  %v7915_v62 = vadd.f32 %v7914_v34, %v7913_v35 }
 0x704   : > { %v7863_v15 = vadd.f32 %v7859_v27, %v7630_v26  ;;  %v7873_v26 = vmul.f32 %v7865_v36, %v16766_v54  ;;  %v7893_v54 = vsel %vm7483_vm6, %v7872_v19, 0.0 }
 0x706   : > { %v7867_v12 = vmax.f32 %v7863_v15, 0.0 }
 0x708   : > { %7709 = vadd.xlane.f32.xlu0 %v7708_v25  ;;  %v7871_v47 = vmul.f32 %v7867_v12, %v16776_v40  ;;  %v7879_v48 = vmul.f32 %v7867_v12, %v16771_v52  ;;  %v7875_v37 = vmul.f32 %v7867_v12, %v16823_v44  ;;  %v7894_v40 = vsel %vm7483_vm6, %v7873_v26, 0.0  ;;  %v7937_v25 = vld [vmem:[%s16952_s16] sm:$0xf] }
 0x709   : > { %v7896_v52 = vsel %vm7483_vm6, %v7874_v31, 0.0  ;;  %v7895_v8 = vadd.f32 %v7894_v40, %v7893_v54  ;;  %v7883_v44 = vmul.f32 %v7867_v12, %v16865_v7 }
 0x70a   : > { %v7889_v24 = vsel %vm7483_vm6, %v7871_v47, 0.0  ;;  %v7907_v60 = vsel %vm7483_vm6, %v7879_v48, 0.0  ;;  %v7898_v9 = vsel %vm7483_vm6, %v7875_v37, 0.0 }
 0x70b   : > { %v7890_v21 = vadd.f32 %v7889_v24, %v7888_v53  ;;  %v7908_v30 = vadd.f32 %v7907_v60, %v7906_v55  ;;  %v7897_v63 = vadd.f32 %v7896_v52, %v7895_v8  ;;  %v7916_v49 = vsel %vm7483_vm6, %v7883_v44, 0.0 }
 0x70c   : > { %v7917_v18 = vadd.f32 %v7916_v49, %v7915_v62  ;;  %vm7935_vm6 = vcmask 7168  }
 0x70d   : > { %7891 = vadd.xlane.f32.xlu1 %v7890_v21  ;;  %7909 = vadd.xlane.f32.xlu2 %v7908_v30  ;;  %v7899_v42 = vadd.f32 %v7898_v9, %v7897_v63 }
 0x715   : > { %7900 = vadd.xlane.f32.xlu1 %v7899_v42 }
 0x71d   : > { %7918 = vadd.xlane.f32.xlu1 %v7917_v18 }
 0x736   : > { %7940 = vperm.xlu1 %11378, %v7937_v25  }
 0x76b   : > { %v7683_v13 = vpop.xlane.xlu0 %7682  ;;  %v7701_v7 = vpop.xlane.xlu2 %7700 }
 0x76c   : > { %v7717_v22 = vperm.slane %v7683_v13, %v7716_v23  ;;  %v7719_v50 = vperm.slane %v7701_v7, %v7716_v23 }
 0x773   : > { %v7692_v28 = vpop.xlane.xlu0 %7691 }
 0x774   : > { %v7718_v14 = vperm.slane %v7692_v28, %v7716_v23 }
 0x776   : > { %v7722_v56 = vsel %vm7721_vm1, %v7718_v14, %v7717_v22 }
 0x777   : > { %v7724_v0 = vsel %vm7723_vm0, %v7719_v50, %v7722_v56 }
 0x77b   : > { %v7710_v1 = vpop.xlane.xlu0 %7709 }
 0x77c   : > { %v7720_v36 = vperm.slane %v7710_v1, %v7716_v23 }
 0x77e   : > { %v7726_v20 = vsel %vm7725_vm3, %v7720_v36, %v7724_v0 }
 0x77f   : > { %v7729_v46 = vsel %vm7728_vm4, %v7726_v20, 0.0 }
 0x780   : > { %7730 = vadd.xlane.f32.xlu2 %v7729_v46  ;;  %v7892_v57 = vpop.xlane.xlu1 %7891  ;;  %v7910_v58 = vpop.xlane.xlu2 %7909 }
 0x781   : > { %v7924_v10 = vperm.slane %v7892_v57, %v7716_v23  ;;  %v7926_v3 = vperm.slane %v7910_v58, %v7716_v23 }
 0x788   : > { %v7901_v5 = vpop.xlane.xlu1 %7900 }
 0x789   : > { %v7925_v32 = vperm.slane %v7901_v5, %v7716_v23 }
 0x78b   : > { %v7928_v27 = vsel %vm7721_vm1, %v7925_v32, %v7924_v10 }
 0x78c   : > { %v7929_v15 = vsel %vm7723_vm0, %v7926_v3, %v7928_v27 }
 0x790   : > { %v7919_v43 = vpop.xlane.xlu1 %7918 }
 0x791   : > { %v7927_v61 = vperm.slane %v7919_v43, %v7716_v23 }
 0x793   : > { %v7930_v29 = vsel %vm7725_vm3, %v7927_v61, %v7929_v15 }
 0x794   : > { %v7932_v59 = vsel %vm7728_vm4, %v7930_v29, 0.0 }
 0x795   : > { %7933 = vadd.xlane.f32.xlu0 %v7932_v59 }
 0x7a8   : > { %v7941_v17 = vpop.permute.xlu1 %7940 }
 0x7f3   : > { %v7731_v12 = vpop.xlane.xlu2 %7730 }
 0x808   : > { %v7934_v11 = vpop.xlane.xlu0 %7933 }
 0x809   : > { %v7936_v51 = vsel %vm7935_vm6, %v7731_v12, %v7934_v11 }
 0x80a   : > { %v7943_v16 = vadd.f32 %v7941_v17, %v7936_v51 }
 0x80c   : > { %7945 = vst.msk [vmem:[%s551_s26] sm:$0xf] %vm7944_vm5, %v7943_v16 }
 0x80d PF: > { %s16986_s24 = sld [smem:[#allocation8_spill]] }
 0x813   : > { %s27_s24 = sadd.s32 1, %s16986_s24  }
 0x814   : > { %p24_p5 = scmp.ge.s32.totalorder %s27_s24, 4  }
 0x816   :  { %26 = sbr.rel (!%p24_p5) target bundleno = 4 (0x4), region = 118 }

</bundles_post_ra>
